<compile_context>
chip_gen: v7x
topology: tpu7x:2x2x1
jax: 0.10.0
libtpu: 0.0.40
codegen_flags: <defaults>
</compile_context>

<pallas_src>
import jax
import jax.numpy as jnp
import numpy as np
from jax import lax
from jax.experimental import pallas as pl
from jax.experimental.pallas import tpu as pltpu


# ----------------------------------------------------------------------------
# Padded-flat geometry
# ----------------------------------------------------------------------------
# An HxW activation is stored as a ((H+2)*(W+2) + 2*M, C) f32 block: the
# zero-padded image flattened row-major, plus an all-zero margin of M = W+3
# rows on both ends, so for every output position the 3x3 tap (dy, dx) is the
# row-slice at constant offset d = (dy-1)*(W+2) + (dx-1).

def _geom(h):
    w2 = h + 2            # padded width
    p = w2 * w2           # rows of the padded-flat image
    m = h + 3             # zero margin (= max |tap offset|)
    return w2, p, m, p + 2 * m


G16 = _geom(16)           # (18, 324, 19, 362)
G8 = _geom(8)             # (10, 100, 11, 122)
G4 = _geom(4)             # ( 6,  36,  7,  50)
G2 = _geom(2)             # ( 4,  16,  5,  26)
W2_16, P16, M16, PE16 = G16
W2_8, P8, M8, PE8 = G8
W2_4, P4, M4, PE4 = G4
W2_2, P2, M2, PE2 = G2


# ----------------------------------------------------------------------------
# In-kernel building blocks
# ----------------------------------------------------------------------------

def _conv3x3(buf, geom, cin, w_ref, scale_ref, bias_ref, mask_ref):
    """3x3 conv over a padded-flat VMEM block + folded BN scale/bias + ReLU.

    buf:      (PE, Cmax) f32 scratch, padded-flat activation with zero margins
    w_ref:    (9, cin, cout) bf16
    scale/bias: (1, cout) f32, mask_ref: (P, 1) f32 (1 on interior rows)
    returns:  (P, cout) f32, padding rows zeroed.
    """
    w2, p, m, _ = geom
    acc = None
    t = 0
    for dy in range(3):
        for dx in range(3):
            d = (dy - 1) * w2 + (dx - 1)
            tap = buf[pl.ds(m + d, p), :cin].astype(jnp.bfloat16)
            part = jnp.dot(tap, w_ref[t], preferred_element_type=jnp.float32)
            acc = part if acc is None else acc + part
            t += 1
    y = jnp.maximum(acc * scale_ref[...] + bias_ref[...], 0.0)
    return y * mask_ref[...]


def _maxpool2x2(buf_in, geom_in, cin, buf_out, geom_out, sel_ref):
    """Fused 2x2/stride-2 max pool between two padded-flat VMEM blocks.

    m2[p] = max of the 2x2 window whose top-left is padded-flat position p,
    then a 0/1 selection matmul picks the stride-2 window starts and drops them
    at the interior positions of the coarser padded-flat layout.
    """
    w2i, pi, mi, _ = geom_in
    _, po, mo, _ = geom_out
    a = jnp.maximum(buf_in[pl.ds(mi, pi), :cin], buf_in[pl.ds(mi + 1, pi), :cin])
    b = jnp.maximum(buf_in[pl.ds(mi + w2i, pi), :cin],
                    buf_in[pl.ds(mi + w2i + 1, pi), :cin])
    m2 = jnp.maximum(a, b).astype(jnp.bfloat16)                       # (pi, cin)
    pooled = jnp.dot(sel_ref[...], m2, preferred_element_type=jnp.float32)
    buf_out[pl.ds(mo, po), :cin] = pooled                             # (po, cin)


# ----------------------------------------------------------------------------
# Fused whole-network kernel (one grid step = one image)
# ----------------------------------------------------------------------------

def _tinycnn_kernel(patches_ref,
                    cw1, s1, b1, cw2, s2, b2, cw3, s3, b3, cw4, s4, b4,
                    cw5, s5, b5, cw6, s6, b6, cw7, s7, b7,
                    wl_ref, bl_ref,
                    msk16, msk8, msk4, msk2,
                    sel16, sel8, sel4,
                    o_ref,
                    buf16, buf8, buf4, buf2):
    # Zero the padded-flat activation buffers (margins / padding rows must be 0).
    buf16[...] = jnp.zeros(buf16.shape, jnp.float32)
    buf8[...] = jnp.zeros(buf8.shape, jnp.float32)
    buf4[...] = jnp.zeros(buf4.shape, jnp.float32)
    buf2[...] = jnp.zeros(buf2.shape, jnp.float32)

    # ---- stage 1 @ 16x16 ----------------------------------------------------
    # conv1: 3->32 as a single K=27 patch matmul (patches built in the wrapper).
    y = jnp.dot(patches_ref[0], cw1[...], preferred_element_type=jnp.float32)
    y = jnp.maximum(y * s1[...] + b1[...], 0.0) * msk16[...]
    buf16[pl.ds(M16, P16), :32] = y
    # conv2: 32->32, taps formed in-kernel from the VMEM-resident padded block.
    y = _conv3x3(buf16, G16, 32, cw2, s2, b2, msk16)
    buf16[pl.ds(M16, P16), :32] = y
    _maxpool2x2(buf16, G16, 32, buf8, G8, sel16)

    # ---- stage 2 @ 8x8 --------------------------------------------------------
    y = _conv3x3(buf8, G8, 32, cw3, s3, b3, msk8)
    buf8[pl.ds(M8, P8), :64] = y
    y = _conv3x3(buf8, G8, 64, cw4, s4, b4, msk8)
    buf8[pl.ds(M8, P8), :64] = y
    _maxpool2x2(buf8, G8, 64, buf4, G4, sel8)

    # ---- stage 3 @ 4x4 --------------------------------------------------------
    y = _conv3x3(buf4, G4, 64, cw5, s5, b5, msk4)
    buf4[pl.ds(M4, P4), :128] = y
    y = _conv3x3(buf4, G4, 128, cw6, s6, b6, msk4)
    buf4[pl.ds(M4, P4), :128] = y
    _maxpool2x2(buf4, G4, 128, buf2, G2, sel4)

    # ---- head: conv 128->256 + ReLU @ 2x2, then GAP(2x2) -> Linear ------------
    y = _conv3x3(buf2, G2, 128, cw7, s7, b7, msk2)          # (16, 256), masked
    pooled = jnp.sum(y, axis=0, keepdims=True) * 0.25       # AdaptiveAvgPool2d(1)+Flatten
    # TODO(synk): Dropout(p=0.3) is identity in eval mode; training-mode RNG masking not implemented.
    o_ref[0] = jnp.dot(pooled, wl_ref[...],
                       preferred_element_type=jnp.float32) + bl_ref[...]


# ----------------------------------------------------------------------------
# Wrapper: constants, layer-1 patches, one pallas_call
# ----------------------------------------------------------------------------

def _full_spec(shape):
    nd = len(shape)
    return pl.BlockSpec(tuple(shape), lambda *_: (0,) * nd)


def _interior_mask(h):
    """(P, 1) f32 mask: 1 on interior rows of the padded-flat layout, 0 on padding."""
    w2 = h + 2
    m = np.zeros((w2, w2), np.float32)
    m[1:h + 1, 1:h + 1] = 1.0
    return jnp.asarray(m.reshape(w2 * w2, 1))


def _pool_select(h_in, h_out):
    """(P_out, P_in) 0/1 matrix: picks 2x2-window top-lefts (stride 2) of the fine
    padded-flat layout and places them at interior rows of the coarse layout."""
    w2i = h_in + 2
    w2o = h_out + 2
    s = np.zeros((w2o * w2o, w2i * w2i), np.float32)
    for yo in range(h_out):
        for xo in range(h_out):
            q = (yo + 1) * w2o + (xo + 1)
            p = (2 * yo + 1) * w2i + (2 * xo + 1)
            s[q, p] = 1.0
    return jnp.asarray(s).astype(jnp.bfloat16)


def tiny_cnn_forward(x_nchw, conv_layers, wl, bl):
    n = x_nchw.shape[0]
    nc = wl.shape[1]
    x = jnp.transpose(x_nchw, (0, 2, 3, 1)).astype(jnp.float32)      # NCHW -> NHWC

    # Layer-1 K=27 patch matrix in padded-flat layout: (N, 324, 27), bf16.
    xp = jnp.pad(x, ((0, 0), (2, 2), (2, 2), (0, 0)))                # (N, 20, 20, 3)
    cols = [xp[:, dy:dy + 18, dx:dx + 18, :] for dy in range(3) for dx in range(3)]
    patches = jnp.concatenate(cols, axis=-1).reshape(n, P16, 27).astype(jnp.bfloat16)

    masks = [_interior_mask(16), _interior_mask(8), _interior_mask(4), _interior_mask(2)]
    sels = [_pool_select(16, 8), _pool_select(8, 4), _pool_select(4, 2)]

    w9s = [w for (w, _, _) in conv_layers]
    scales = [s for (_, s, _) in conv_layers]
    biases = [b for (_, _, b) in conv_layers]
    ws = [w9s[0].reshape(27, w9s[0].shape[-1]).astype(jnp.bfloat16)]  # conv1: (27, 32)
    ws += [w.astype(jnp.bfloat16) for w in w9s[1:]]                   # (9, cin, cout)

    inputs = [patches]
    in_specs = [pl.BlockSpec((1, P16, 27), lambda i: (i, 0, 0))]
    for w, s, b in zip(ws, scales, biases):
        inputs += [w, s, b]
        in_specs += [_full_spec(w.shape), _full_spec(s.shape), _full_spec(b.shape)]
    inputs += [wl, bl] + masks + sels
    in_specs += [_full_spec(wl.shape), _full_spec(bl.shape)]
    in_specs += [_full_spec(m.shape) for m in masks]
    in_specs += [_full_spec(s.shape) for s in sels]

    out = pl.pallas_call(
        _tinycnn_kernel,
        out_shape=jax.ShapeDtypeStruct((n, 1, nc), jnp.float32),
        grid=(n,),
        in_specs=in_specs,
        out_specs=pl.BlockSpec((1, 1, nc), lambda i: (i, 0, 0)),
        scratch_shapes=[
            pltpu.VMEM((PE16, 32), jnp.float32),
            pltpu.VMEM((PE8, 64), jnp.float32),
            pltpu.VMEM((PE4, 128), jnp.float32),
            pltpu.VMEM((PE2, 128), jnp.float32),
        ],
        compiler_params=pltpu.CompilerParams(dimension_semantics=("parallel",)),
    )(*inputs)
    return out.reshape(n, nc)


# ----------------------------------------------------------------------------
# Deterministic parameter init (eval-mode BatchNorm folded into scale/bias)
# ----------------------------------------------------------------------------

def init_params(key, num_classes):
    cfg = [(3, 32, True), (32, 32, True), (32, 64, True), (64, 64, True),
           (64, 128, True), (128, 128, True), (128, 256, False)]
    layers = []
    eps = 1e-5
    for cin, cout, has_bn in cfg:
        key, kw, kb, kg, kbt, km, kv = jax.random.split(key, 7)
        w = jax.random.normal(kw, (3, 3, cin, cout), jnp.float32) / jnp.sqrt(9.0 * cin)
        b = 0.01 * jax.random.normal(kb, (cout,), jnp.float32)
        if has_bn:
            gamma = 1.0 + 0.1 * jax.random.normal(kg, (cout,), jnp.float32)
            beta = 0.1 * jax.random.normal(kbt, (cout,), jnp.float32)
            rmean = 0.1 * jax.random.normal(km, (cout,), jnp.float32)
            rvar = 1.0 + 0.5 * jax.random.uniform(kv, (cout,), jnp.float32)
            scale = gamma / jnp.sqrt(rvar + eps)
            bias = scale * (b - rmean) + beta
        else:
            scale = jnp.ones((cout,), jnp.float32)
            bias = b
        layers.append((w.reshape(9, cin, cout), scale.reshape(1, cout),
                       bias.reshape(1, cout)))
    key, kl, klb = jax.random.split(key, 3)
    wl = jax.random.normal(kl, (256, num_classes), jnp.float32) / jnp.sqrt(256.0)
    bl = 0.01 * jax.random.normal(klb, (1, num_classes), jnp.float32)
    return layers, wl, bl


# ----------------------------------------------------------------------------
# Pure-JAX reference (same folded params) for a sanity check
# ----------------------------------------------------------------------------

def _ref_conv_block(x, w9, scale, bias):
    cin, cout = w9.shape[1], w9.shape[2]
    w = w9.reshape(3, 3, cin, cout)
    y = lax.conv_general_dilated(x, w, (1, 1), "SAME",
                                 dimension_numbers=("NHWC", "HWIO", "NHWC"),
                                 precision=lax.Precision.HIGHEST)
    return jnp.maximum(y * scale.reshape(1, 1, 1, cout) + bias.reshape(1, 1, 1, cout), 0.0)


def reference_forward(x_nchw, conv_layers, wl, bl):
    x = jnp.transpose(x_nchw, (0, 2, 3, 1)).astype(jnp.float32)
    li = 0
    for _stage in range(3):
        x = _ref_conv_block(x, *conv_layers[li]); li += 1
        x = _ref_conv_block(x, *conv_layers[li]); li += 1
        n, h, w, c = x.shape
        x = x.reshape(n, h // 2, 2, w // 2, 2, c).max(axis=(2, 4))
    x = _ref_conv_block(x, *conv_layers[li]); li += 1
    pooled = x.mean(axis=(1, 2))
    return jnp.dot(pooled, wl, precision=lax.Precision.HIGHEST) + bl


# ----------------------------------------------------------------------------

if __name__ == "__main__":
    num_classes = 10
    batch, cin, spatial = 2, 3, 16  # PyTorch NCHW input: (2, 3, 16, 16)

    key = jax.random.PRNGKey(0)
    key, kx = jax.random.split(key)
    x = jax.random.normal(kx, (batch, cin, spatial, spatial), jnp.float32)

    conv_layers, wl, bl = init_params(key, num_classes)

    fwd = jax.jit(lambda xin: tiny_cnn_forward(xin, conv_layers, wl, bl))
    out = jax.block_until_ready(fwd(x))

    assert out.shape == (batch, num_classes), out.shape

    ref = jax.block_until_ready(reference_forward(x, conv_layers, wl, bl))
    np.testing.assert_allclose(np.asarray(out), np.asarray(ref), atol=2e-2, rtol=2e-2)

    print("KERNEL_OK")
</pallas_src>

<mosaic_0001>
module attributes {stable_mosaic.version = 11 : i64} {
  func.func @_tinycnn_kernel(%arg0: i32, %arg1: memref<1x324x27xbf16, #tpu.memory_space<vmem>>, %arg2: memref<27x32xbf16, #tpu.memory_space<vmem>>, %arg3: memref<1x32xf32, #tpu.memory_space<vmem>>, %arg4: memref<1x32xf32, #tpu.memory_space<vmem>>, %arg5: memref<9x32x32xbf16, #tpu.memory_space<vmem>>, %arg6: memref<1x32xf32, #tpu.memory_space<vmem>>, %arg7: memref<1x32xf32, #tpu.memory_space<vmem>>, %arg8: memref<9x32x64xbf16, #tpu.memory_space<vmem>>, %arg9: memref<1x64xf32, #tpu.memory_space<vmem>>, %arg10: memref<1x64xf32, #tpu.memory_space<vmem>>, %arg11: memref<9x64x64xbf16, #tpu.memory_space<vmem>>, %arg12: memref<1x64xf32, #tpu.memory_space<vmem>>, %arg13: memref<1x64xf32, #tpu.memory_space<vmem>>, %arg14: memref<9x64x128xbf16, #tpu.memory_space<vmem>>, %arg15: memref<1x128xf32, #tpu.memory_space<vmem>>, %arg16: memref<1x128xf32, #tpu.memory_space<vmem>>, %arg17: memref<9x128x128xbf16, #tpu.memory_space<vmem>>, %arg18: memref<1x128xf32, #tpu.memory_space<vmem>>, %arg19: memref<1x128xf32, #tpu.memory_space<vmem>>, %arg20: memref<9x128x256xbf16, #tpu.memory_space<vmem>>, %arg21: memref<1x256xf32, #tpu.memory_space<vmem>>, %arg22: memref<1x256xf32, #tpu.memory_space<vmem>>, %arg23: memref<256x10xf32, #tpu.memory_space<vmem>>, %arg24: memref<1x10xf32, #tpu.memory_space<vmem>>, %arg25: memref<324x1xf32, #tpu.memory_space<vmem>>, %arg26: memref<100x1xf32, #tpu.memory_space<vmem>>, %arg27: memref<36x1xf32, #tpu.memory_space<vmem>>, %arg28: memref<16x1xf32, #tpu.memory_space<vmem>>, %arg29: memref<100x324xbf16, #tpu.memory_space<vmem>>, %arg30: memref<36x100xbf16, #tpu.memory_space<vmem>>, %arg31: memref<16x36xbf16, #tpu.memory_space<vmem>>, %arg32: memref<1x1x10xf32, #tpu.memory_space<vmem>>, %arg33: memref<362x32xf32, #tpu.memory_space<vmem>>, %arg34: memref<122x64xf32, #tpu.memory_space<vmem>>, %arg35: memref<50x128xf32, #tpu.memory_space<vmem>>, %arg36: memref<26x128xf32, #tpu.memory_space<vmem>>) attributes {dimension_semantics = [#tpu.dimension_semantics<parallel>], iteration_bounds = array<i64: 2>, scalar_prefetch = 0 : i64, scratch_operands = 4 : i64, tpu.core_type = #tpu.core_type<tc>, window_params = [{transform_indices = @transform_0, window_bounds = array<i64: 1, 324, 27>}, {pipeline_mode = #tpu.pipeline_mode<synchronous>, transform_indices = @transform_1, window_bounds = array<i64: 27, 32>}, {pipeline_mode = #tpu.pipeline_mode<synchronous>, transform_indices = @transform_2, window_bounds = array<i64: 1, 32>}, {pipeline_mode = #tpu.pipeline_mode<synchronous>, transform_indices = @transform_3, window_bounds = array<i64: 1, 32>}, {pipeline_mode = #tpu.pipeline_mode<synchronous>, transform_indices = @transform_4, window_bounds = array<i64: 9, 32, 32>}, {pipeline_mode = #tpu.pipeline_mode<synchronous>, transform_indices = @transform_5, window_bounds = array<i64: 1, 32>}, {pipeline_mode = #tpu.pipeline_mode<synchronous>, transform_indices = @transform_6, window_bounds = array<i64: 1, 32>}, {pipeline_mode = #tpu.pipeline_mode<synchronous>, transform_indices = @transform_7, window_bounds = array<i64: 9, 32, 64>}, {pipeline_mode = #tpu.pipeline_mode<synchronous>, transform_indices = @transform_8, window_bounds = array<i64: 1, 64>}, {pipeline_mode = #tpu.pipeline_mode<synchronous>, transform_indices = @transform_9, window_bounds = array<i64: 1, 64>}, {pipeline_mode = #tpu.pipeline_mode<synchronous>, transform_indices = @transform_10, window_bounds = array<i64: 9, 64, 64>}, {pipeline_mode = #tpu.pipeline_mode<synchronous>, transform_indices = @transform_11, window_bounds = array<i64: 1, 64>}, {pipeline_mode = #tpu.pipeline_mode<synchronous>, transform_indices = @transform_12, window_bounds = array<i64: 1, 64>}, {pipeline_mode = #tpu.pipeline_mode<synchronous>, transform_indices = @transform_13, window_bounds = array<i64: 9, 64, 128>}, {pipeline_mode = #tpu.pipeline_mode<synchronous>, transform_indices = @transform_14, window_bounds = array<i64: 1, 128>}, {pipeline_mode = #tpu.pipeline_mode<synchronous>, transform_indices = @transform_15, window_bounds = array<i64: 1, 128>}, {pipeline_mode = #tpu.pipeline_mode<synchronous>, transform_indices = @transform_16, window_bounds = array<i64: 9, 128, 128>}, {pipeline_mode = #tpu.pipeline_mode<synchronous>, transform_indices = @transform_17, window_bounds = array<i64: 1, 128>}, {pipeline_mode = #tpu.pipeline_mode<synchronous>, transform_indices = @transform_18, window_bounds = array<i64: 1, 128>}, {pipeline_mode = #tpu.pipeline_mode<synchronous>, transform_indices = @transform_19, window_bounds = array<i64: 9, 128, 256>}, {pipeline_mode = #tpu.pipeline_mode<synchronous>, transform_indices = @transform_20, window_bounds = array<i64: 1, 256>}, {pipeline_mode = #tpu.pipeline_mode<synchronous>, transform_indices = @transform_21, window_bounds = array<i64: 1, 256>}, {pipeline_mode = #tpu.pipeline_mode<synchronous>, transform_indices = @transform_22, window_bounds = array<i64: 256, 10>}, {pipeline_mode = #tpu.pipeline_mode<synchronous>, transform_indices = @transform_23, window_bounds = array<i64: 1, 10>}, {pipeline_mode = #tpu.pipeline_mode<synchronous>, transform_indices = @transform_24, window_bounds = array<i64: 324, 1>}, {pipeline_mode = #tpu.pipeline_mode<synchronous>, transform_indices = @transform_25, window_bounds = array<i64: 100, 1>}, {pipeline_mode = #tpu.pipeline_mode<synchronous>, transform_indices = @transform_26, window_bounds = array<i64: 36, 1>}, {pipeline_mode = #tpu.pipeline_mode<synchronous>, transform_indices = @transform_27, window_bounds = array<i64: 16, 1>}, {pipeline_mode = #tpu.pipeline_mode<synchronous>, transform_indices = @transform_28, window_bounds = array<i64: 100, 324>}, {pipeline_mode = #tpu.pipeline_mode<synchronous>, transform_indices = @transform_29, window_bounds = array<i64: 36, 100>}, {pipeline_mode = #tpu.pipeline_mode<synchronous>, transform_indices = @transform_30, window_bounds = array<i64: 16, 36>}, {transform_indices = @transform_31, window_bounds = array<i64: 1, 1, 10>}]} {
    %cst = arith.constant 0.000000e+00 : f32
    %0 = vector.broadcast %cst : f32 to vector<362x32xf32>
    %c0 = arith.constant 0 : index
    %c0_0 = arith.constant 0 : index
    %1 = vector.load %arg33[%c0, %c0_0] : memref<362x32xf32, #tpu.memory_space<vmem>>, vector<362x32xf32>
    tpu.vector_store %arg33[%c0, %c0_0], %0 {strides = array<i32>} : memref<362x32xf32, #tpu.memory_space<vmem>>, vector<362x32xf32>,
    %cst_1 = arith.constant 0.000000e+00 : f32
    %2 = vector.broadcast %cst_1 : f32 to vector<122x64xf32>
    %c0_2 = arith.constant 0 : index
    %c0_3 = arith.constant 0 : index
    %3 = vector.load %arg34[%c0_2, %c0_3] : memref<122x64xf32, #tpu.memory_space<vmem>>, vector<122x64xf32>
    tpu.vector_store %arg34[%c0_2, %c0_3], %2 {strides = array<i32>} : memref<122x64xf32, #tpu.memory_space<vmem>>, vector<122x64xf32>,
    %cst_4 = arith.constant 0.000000e+00 : f32
    %4 = vector.broadcast %cst_4 : f32 to vector<50x128xf32>
    %c0_5 = arith.constant 0 : index
    %c0_6 = arith.constant 0 : index
    %5 = vector.load %arg35[%c0_5, %c0_6] : memref<50x128xf32, #tpu.memory_space<vmem>>, vector<50x128xf32>
    tpu.vector_store %arg35[%c0_5, %c0_6], %4 {strides = array<i32>} : memref<50x128xf32, #tpu.memory_space<vmem>>, vector<50x128xf32>,
    %cst_7 = arith.constant 0.000000e+00 : f32
    %6 = vector.broadcast %cst_7 : f32 to vector<26x128xf32>
    %c0_8 = arith.constant 0 : index
    %c0_9 = arith.constant 0 : index
    %7 = vector.load %arg36[%c0_8, %c0_9] : memref<26x128xf32, #tpu.memory_space<vmem>>, vector<26x128xf32>
    tpu.vector_store %arg36[%c0_8, %c0_9], %6 {strides = array<i32>} : memref<26x128xf32, #tpu.memory_space<vmem>>, vector<26x128xf32>,
    %c0_10 = arith.constant 0 : index
    %c0_11 = arith.constant 0 : index
    %c0_12 = arith.constant 0 : index
    %8 = vector.load %arg1[%c0_10, %c0_11, %c0_12] : memref<1x324x27xbf16, #tpu.memory_space<vmem>>, vector<1x324x27xbf16>
    %9 = vector.shape_cast %8 : vector<1x324x27xbf16> to vector<324x27xbf16>
    %c0_13 = arith.constant 0 : index
    %c0_14 = arith.constant 0 : index
    %10 = vector.load %arg2[%c0_13, %c0_14] : memref<27x32xbf16, #tpu.memory_space<vmem>>, vector<27x32xbf16>
    %cst_15 = arith.constant dense<0.000000e+00> : vector<324x32xf32>
    %11 = tpu.matmul %9, %10, %cst_15 {dimension_numbers = #tpu.dot_dimension_numbers<[1], [0], [0], [1], [0, 0, 1, 1], [], []>} : vector<324x27xbf16>, vector<27x32xbf16>, vector<324x32xf32> -> vector<324x32xf32>
    %c0_16 = arith.constant 0 : index
    %c0_17 = arith.constant 0 : index
    %12 = vector.load %arg3[%c0_16, %c0_17] : memref<1x32xf32, #tpu.memory_space<vmem>>, vector<1x32xf32>
    %13 = vector.broadcast %12 : vector<1x32xf32> to vector<324x32xf32>
    %14 = arith.mulf %11, %13 : vector<324x32xf32>
    %c0_18 = arith.constant 0 : index
    %c0_19 = arith.constant 0 : index
    %15 = vector.load %arg4[%c0_18, %c0_19] : memref<1x32xf32, #tpu.memory_space<vmem>>, vector<1x32xf32>
    %16 = vector.broadcast %15 : vector<1x32xf32> to vector<324x32xf32>
    %17 = arith.addf %14, %16 : vector<324x32xf32>
    %cst_20 = arith.constant 0.000000e+00 : f32
    %18 = vector.broadcast %cst_20 : f32 to vector<324x32xf32>
    %19 = arith.maximumf %17, %18 : vector<324x32xf32>
    %c0_21 = arith.constant 0 : index
    %c0_22 = arith.constant 0 : index
    %20 = vector.load %arg25[%c0_21, %c0_22] : memref<324x1xf32, #tpu.memory_space<vmem>>, vector<324x1xf32>
    %21 = vector.broadcast %20 : vector<324x1xf32> to vector<324x32xf32>
    %22 = arith.mulf %19, %21 : vector<324x32xf32>
    %c19 = arith.constant 19 : index
    %c0_23 = arith.constant 0 : index
    %23 = vector.load %arg33[%c19, %c0_23] : memref<362x32xf32, #tpu.memory_space<vmem>>, vector<324x32xf32>
    tpu.vector_store %arg33[%c19, %c0_23], %22 {strides = array<i32>} : memref<362x32xf32, #tpu.memory_space<vmem>>, vector<324x32xf32>,
    %c0_24 = arith.constant 0 : index
    %c0_25 = arith.constant 0 : index
    %24 = vector.load %arg33[%c0_24, %c0_25] : memref<362x32xf32, #tpu.memory_space<vmem>>, vector<324x32xf32>
    %25 = arith.truncf %24 : vector<324x32xf32> to vector<324x32xbf16>
    %c0_26 = arith.constant 0 : index
    %c0_27 = arith.constant 0 : index
    %c0_28 = arith.constant 0 : index
    %26 = vector.load %arg5[%c0_26, %c0_27, %c0_28] : memref<9x32x32xbf16, #tpu.memory_space<vmem>>, vector<1x32x32xbf16>
    %27 = vector.shape_cast %26 : vector<1x32x32xbf16> to vector<32x32xbf16>
    %cst_29 = arith.constant dense<0.000000e+00> : vector<324x32xf32>
    %28 = tpu.matmul %25, %27, %cst_29 {dimension_numbers = #tpu.dot_dimension_numbers<[1], [0], [0], [1], [0, 0, 1, 1], [], []>} : vector<324x32xbf16>, vector<32x32xbf16>, vector<324x32xf32> -> vector<324x32xf32>
    %c1 = arith.constant 1 : index
    %c0_30 = arith.constant 0 : index
    %29 = vector.load %arg33[%c1, %c0_30] : memref<362x32xf32, #tpu.memory_space<vmem>>, vector<324x32xf32>
    %30 = arith.truncf %29 : vector<324x32xf32> to vector<324x32xbf16>
    %c1_31 = arith.constant 1 : index
    %c0_32 = arith.constant 0 : index
    %c0_33 = arith.constant 0 : index
    %31 = vector.load %arg5[%c1_31, %c0_32, %c0_33] : memref<9x32x32xbf16, #tpu.memory_space<vmem>>, vector<1x32x32xbf16>
    %32 = vector.shape_cast %31 : vector<1x32x32xbf16> to vector<32x32xbf16>
    %cst_34 = arith.constant dense<0.000000e+00> : vector<324x32xf32>
    %33 = tpu.matmul %30, %32, %cst_34 {dimension_numbers = #tpu.dot_dimension_numbers<[1], [0], [0], [1], [0, 0, 1, 1], [], []>} : vector<324x32xbf16>, vector<32x32xbf16>, vector<324x32xf32> -> vector<324x32xf32>
    %34 = arith.addf %28, %33 : vector<324x32xf32>
    %c2 = arith.constant 2 : index
    %c0_35 = arith.constant 0 : index
    %35 = vector.load %arg33[%c2, %c0_35] : memref<362x32xf32, #tpu.memory_space<vmem>>, vector<324x32xf32>
    %36 = arith.truncf %35 : vector<324x32xf32> to vector<324x32xbf16>
    %c2_36 = arith.constant 2 : index
    %c0_37 = arith.constant 0 : index
    %c0_38 = arith.constant 0 : index
    %37 = vector.load %arg5[%c2_36, %c0_37, %c0_38] : memref<9x32x32xbf16, #tpu.memory_space<vmem>>, vector<1x32x32xbf16>
    %38 = vector.shape_cast %37 : vector<1x32x32xbf16> to vector<32x32xbf16>
    %cst_39 = arith.constant dense<0.000000e+00> : vector<324x32xf32>
    %39 = tpu.matmul %36, %38, %cst_39 {dimension_numbers = #tpu.dot_dimension_numbers<[1], [0], [0], [1], [0, 0, 1, 1], [], []>} : vector<324x32xbf16>, vector<32x32xbf16>, vector<324x32xf32> -> vector<324x32xf32>
    %40 = arith.addf %34, %39 : vector<324x32xf32>
    %c18 = arith.constant 18 : index
    %c0_40 = arith.constant 0 : index
    %41 = vector.load %arg33[%c18, %c0_40] : memref<362x32xf32, #tpu.memory_space<vmem>>, vector<324x32xf32>
    %42 = arith.truncf %41 : vector<324x32xf32> to vector<324x32xbf16>
    %c3 = arith.constant 3 : index
    %c0_41 = arith.constant 0 : index
    %c0_42 = arith.constant 0 : index
    %43 = vector.load %arg5[%c3, %c0_41, %c0_42] : memref<9x32x32xbf16, #tpu.memory_space<vmem>>, vector<1x32x32xbf16>
    %44 = vector.shape_cast %43 : vector<1x32x32xbf16> to vector<32x32xbf16>
    %cst_43 = arith.constant dense<0.000000e+00> : vector<324x32xf32>
    %45 = tpu.matmul %42, %44, %cst_43 {dimension_numbers = #tpu.dot_dimension_numbers<[1], [0], [0], [1], [0, 0, 1, 1], [], []>} : vector<324x32xbf16>, vector<32x32xbf16>, vector<324x32xf32> -> vector<324x32xf32>
    %46 = arith.addf %40, %45 : vector<324x32xf32>
    %c19_44 = arith.constant 19 : index
    %c0_45 = arith.constant 0 : index
    %47 = vector.load %arg33[%c19_44, %c0_45] : memref<362x32xf32, #tpu.memory_space<vmem>>, vector<324x32xf32>
    %48 = arith.truncf %47 : vector<324x32xf32> to vector<324x32xbf16>
    %c4 = arith.constant 4 : index
    %c0_46 = arith.constant 0 : index
    %c0_47 = arith.constant 0 : index
    %49 = vector.load %arg5[%c4, %c0_46, %c0_47] : memref<9x32x32xbf16, #tpu.memory_space<vmem>>, vector<1x32x32xbf16>
    %50 = vector.shape_cast %49 : vector<1x32x32xbf16> to vector<32x32xbf16>
    %cst_48 = arith.constant dense<0.000000e+00> : vector<324x32xf32>
    %51 = tpu.matmul %48, %50, %cst_48 {dimension_numbers = #tpu.dot_dimension_numbers<[1], [0], [0], [1], [0, 0, 1, 1], [], []>} : vector<324x32xbf16>, vector<32x32xbf16>, vector<324x32xf32> -> vector<324x32xf32>
    %52 = arith.addf %46, %51 : vector<324x32xf32>
    %c20 = arith.constant 20 : index
    %c0_49 = arith.constant 0 : index
    %53 = vector.load %arg33[%c20, %c0_49] : memref<362x32xf32, #tpu.memory_space<vmem>>, vector<324x32xf32>
    %54 = arith.truncf %53 : vector<324x32xf32> to vector<324x32xbf16>
    %c5 = arith.constant 5 : index
    %c0_50 = arith.constant 0 : index
    %c0_51 = arith.constant 0 : index
    %55 = vector.load %arg5[%c5, %c0_50, %c0_51] : memref<9x32x32xbf16, #tpu.memory_space<vmem>>, vector<1x32x32xbf16>
    %56 = vector.shape_cast %55 : vector<1x32x32xbf16> to vector<32x32xbf16>
    %cst_52 = arith.constant dense<0.000000e+00> : vector<324x32xf32>
    %57 = tpu.matmul %54, %56, %cst_52 {dimension_numbers = #tpu.dot_dimension_numbers<[1], [0], [0], [1], [0, 0, 1, 1], [], []>} : vector<324x32xbf16>, vector<32x32xbf16>, vector<324x32xf32> -> vector<324x32xf32>
    %58 = arith.addf %52, %57 : vector<324x32xf32>
    %c36 = arith.constant 36 : index
    %c0_53 = arith.constant 0 : index
    %59 = vector.load %arg33[%c36, %c0_53] : memref<362x32xf32, #tpu.memory_space<vmem>>, vector<324x32xf32>
    %60 = arith.truncf %59 : vector<324x32xf32> to vector<324x32xbf16>
    %c6 = arith.constant 6 : index
    %c0_54 = arith.constant 0 : index
    %c0_55 = arith.constant 0 : index
    %61 = vector.load %arg5[%c6, %c0_54, %c0_55] : memref<9x32x32xbf16, #tpu.memory_space<vmem>>, vector<1x32x32xbf16>
    %62 = vector.shape_cast %61 : vector<1x32x32xbf16> to vector<32x32xbf16>
    %cst_56 = arith.constant dense<0.000000e+00> : vector<324x32xf32>
    %63 = tpu.matmul %60, %62, %cst_56 {dimension_numbers = #tpu.dot_dimension_numbers<[1], [0], [0], [1], [0, 0, 1, 1], [], []>} : vector<324x32xbf16>, vector<32x32xbf16>, vector<324x32xf32> -> vector<324x32xf32>
    %64 = arith.addf %58, %63 : vector<324x32xf32>
    %c37 = arith.constant 37 : index
    %c0_57 = arith.constant 0 : index
    %65 = vector.load %arg33[%c37, %c0_57] : memref<362x32xf32, #tpu.memory_space<vmem>>, vector<324x32xf32>
    %66 = arith.truncf %65 : vector<324x32xf32> to vector<324x32xbf16>
    %c7 = arith.constant 7 : index
    %c0_58 = arith.constant 0 : index
    %c0_59 = arith.constant 0 : index
    %67 = vector.load %arg5[%c7, %c0_58, %c0_59] : memref<9x32x32xbf16, #tpu.memory_space<vmem>>, vector<1x32x32xbf16>
    %68 = vector.shape_cast %67 : vector<1x32x32xbf16> to vector<32x32xbf16>
    %cst_60 = arith.constant dense<0.000000e+00> : vector<324x32xf32>
    %69 = tpu.matmul %66, %68, %cst_60 {dimension_numbers = #tpu.dot_dimension_numbers<[1], [0], [0], [1], [0, 0, 1, 1], [], []>} : vector<324x32xbf16>, vector<32x32xbf16>, vector<324x32xf32> -> vector<324x32xf32>
    %70 = arith.addf %64, %69 : vector<324x32xf32>
    %c38 = arith.constant 38 : index
    %c0_61 = arith.constant 0 : index
    %71 = vector.load %arg33[%c38, %c0_61] : memref<362x32xf32, #tpu.memory_space<vmem>>, vector<324x32xf32>
    %72 = arith.truncf %71 : vector<324x32xf32> to vector<324x32xbf16>
    %c8 = arith.constant 8 : index
    %c0_62 = arith.constant 0 : index
    %c0_63 = arith.constant 0 : index
    %73 = vector.load %arg5[%c8, %c0_62, %c0_63] : memref<9x32x32xbf16, #tpu.memory_space<vmem>>, vector<1x32x32xbf16>
    %74 = vector.shape_cast %73 : vector<1x32x32xbf16> to vector<32x32xbf16>
    %cst_64 = arith.constant dense<0.000000e+00> : vector<324x32xf32>
    %75 = tpu.matmul %72, %74, %cst_64 {dimension_numbers = #tpu.dot_dimension_numbers<[1], [0], [0], [1], [0, 0, 1, 1], [], []>} : vector<324x32xbf16>, vector<32x32xbf16>, vector<324x32xf32> -> vector<324x32xf32>
    %76 = arith.addf %70, %75 : vector<324x32xf32>
    %c0_65 = arith.constant 0 : index
    %c0_66 = arith.constant 0 : index
    %77 = vector.load %arg6[%c0_65, %c0_66] : memref<1x32xf32, #tpu.memory_space<vmem>>, vector<1x32xf32>
    %78 = vector.broadcast %77 : vector<1x32xf32> to vector<324x32xf32>
    %79 = arith.mulf %76, %78 : vector<324x32xf32>
    %c0_67 = arith.constant 0 : index
    %c0_68 = arith.constant 0 : index
    %80 = vector.load %arg7[%c0_67, %c0_68] : memref<1x32xf32, #tpu.memory_space<vmem>>, vector<1x32xf32>
    %81 = vector.broadcast %80 : vector<1x32xf32> to vector<324x32xf32>
    %82 = arith.addf %79, %81 : vector<324x32xf32>
    %cst_69 = arith.constant 0.000000e+00 : f32
    %83 = vector.broadcast %cst_69 : f32 to vector<324x32xf32>
    %84 = arith.maximumf %82, %83 : vector<324x32xf32>
    %c0_70 = arith.constant 0 : index
    %c0_71 = arith.constant 0 : index
    %85 = vector.load %arg25[%c0_70, %c0_71] : memref<324x1xf32, #tpu.memory_space<vmem>>, vector<324x1xf32>
    %86 = vector.broadcast %85 : vector<324x1xf32> to vector<324x32xf32>
    %87 = arith.mulf %84, %86 : vector<324x32xf32>
    %c19_72 = arith.constant 19 : index
    %c0_73 = arith.constant 0 : index
    %88 = vector.load %arg33[%c19_72, %c0_73] : memref<362x32xf32, #tpu.memory_space<vmem>>, vector<324x32xf32>
    tpu.vector_store %arg33[%c19_72, %c0_73], %87 {strides = array<i32>} : memref<362x32xf32, #tpu.memory_space<vmem>>, vector<324x32xf32>,
    %c19_74 = arith.constant 19 : index
    %c0_75 = arith.constant 0 : index
    %89 = vector.load %arg33[%c19_74, %c0_75] : memref<362x32xf32, #tpu.memory_space<vmem>>, vector<324x32xf32>
    %c20_76 = arith.constant 20 : index
    %c0_77 = arith.constant 0 : index
    %90 = vector.load %arg33[%c20_76, %c0_77] : memref<362x32xf32, #tpu.memory_space<vmem>>, vector<324x32xf32>
    %91 = arith.maximumf %89, %90 : vector<324x32xf32>
    %c37_78 = arith.constant 37 : index
    %c0_79 = arith.constant 0 : index
    %92 = vector.load %arg33[%c37_78, %c0_79] : memref<362x32xf32, #tpu.memory_space<vmem>>, vector<324x32xf32>
    %c38_80 = arith.constant 38 : index
    %c0_81 = arith.constant 0 : index
    %93 = vector.load %arg33[%c38_80, %c0_81] : memref<362x32xf32, #tpu.memory_space<vmem>>, vector<324x32xf32>
    %94 = arith.maximumf %92, %93 : vector<324x32xf32>
    %95 = arith.maximumf %91, %94 : vector<324x32xf32>
    %96 = arith.truncf %95 : vector<324x32xf32> to vector<324x32xbf16>
    %c0_82 = arith.constant 0 : index
    %c0_83 = arith.constant 0 : index
    %97 = vector.load %arg29[%c0_82, %c0_83] : memref<100x324xbf16, #tpu.memory_space<vmem>>, vector<100x324xbf16>
    %cst_84 = arith.constant dense<0.000000e+00> : vector<100x32xf32>
    %98 = tpu.matmul %97, %96, %cst_84 {dimension_numbers = #tpu.dot_dimension_numbers<[1], [0], [0], [1], [0, 0, 1, 1], [], []>} : vector<100x324xbf16>, vector<324x32xbf16>, vector<100x32xf32> -> vector<100x32xf32>
    %c11 = arith.constant 11 : index
    %c0_85 = arith.constant 0 : index
    %99 = vector.load %arg34[%c11, %c0_85] : memref<122x64xf32, #tpu.memory_space<vmem>>, vector<100x32xf32>
    tpu.vector_store %arg34[%c11, %c0_85], %98 {strides = array<i32>} : memref<122x64xf32, #tpu.memory_space<vmem>>, vector<100x32xf32>,
    %c0_86 = arith.constant 0 : index
    %c0_87 = arith.constant 0 : index
    %100 = vector.load %arg34[%c0_86, %c0_87] : memref<122x64xf32, #tpu.memory_space<vmem>>, vector<100x32xf32>
    %101 = arith.truncf %100 : vector<100x32xf32> to vector<100x32xbf16>
    %c0_88 = arith.constant 0 : index
    %c0_89 = arith.constant 0 : index
    %c0_90 = arith.constant 0 : index
    %102 = vector.load %arg8[%c0_88, %c0_89, %c0_90] : memref<9x32x64xbf16, #tpu.memory_space<vmem>>, vector<1x32x64xbf16>
    %103 = vector.shape_cast %102 : vector<1x32x64xbf16> to vector<32x64xbf16>
    %cst_91 = arith.constant dense<0.000000e+00> : vector<100x64xf32>
    %104 = tpu.matmul %101, %103, %cst_91 {dimension_numbers = #tpu.dot_dimension_numbers<[1], [0], [0], [1], [0, 0, 1, 1], [], []>} : vector<100x32xbf16>, vector<32x64xbf16>, vector<100x64xf32> -> vector<100x64xf32>
    %c1_92 = arith.constant 1 : index
    %c0_93 = arith.constant 0 : index
    %105 = vector.load %arg34[%c1_92, %c0_93] : memref<122x64xf32, #tpu.memory_space<vmem>>, vector<100x32xf32>
    %106 = arith.truncf %105 : vector<100x32xf32> to vector<100x32xbf16>
    %c1_94 = arith.constant 1 : index
    %c0_95 = arith.constant 0 : index
    %c0_96 = arith.constant 0 : index
    %107 = vector.load %arg8[%c1_94, %c0_95, %c0_96] : memref<9x32x64xbf16, #tpu.memory_space<vmem>>, vector<1x32x64xbf16>
    %108 = vector.shape_cast %107 : vector<1x32x64xbf16> to vector<32x64xbf16>
    %cst_97 = arith.constant dense<0.000000e+00> : vector<100x64xf32>
    %109 = tpu.matmul %106, %108, %cst_97 {dimension_numbers = #tpu.dot_dimension_numbers<[1], [0], [0], [1], [0, 0, 1, 1], [], []>} : vector<100x32xbf16>, vector<32x64xbf16>, vector<100x64xf32> -> vector<100x64xf32>
    %110 = arith.addf %104, %109 : vector<100x64xf32>
    %c2_98 = arith.constant 2 : index
    %c0_99 = arith.constant 0 : index
    %111 = vector.load %arg34[%c2_98, %c0_99] : memref<122x64xf32, #tpu.memory_space<vmem>>, vector<100x32xf32>
    %112 = arith.truncf %111 : vector<100x32xf32> to vector<100x32xbf16>
    %c2_100 = arith.constant 2 : index
    %c0_101 = arith.constant 0 : index
    %c0_102 = arith.constant 0 : index
    %113 = vector.load %arg8[%c2_100, %c0_101, %c0_102] : memref<9x32x64xbf16, #tpu.memory_space<vmem>>, vector<1x32x64xbf16>
    %114 = vector.shape_cast %113 : vector<1x32x64xbf16> to vector<32x64xbf16>
    %cst_103 = arith.constant dense<0.000000e+00> : vector<100x64xf32>
    %115 = tpu.matmul %112, %114, %cst_103 {dimension_numbers = #tpu.dot_dimension_numbers<[1], [0], [0], [1], [0, 0, 1, 1], [], []>} : vector<100x32xbf16>, vector<32x64xbf16>, vector<100x64xf32> -> vector<100x64xf32>
    %116 = arith.addf %110, %115 : vector<100x64xf32>
    %c10 = arith.constant 10 : index
    %c0_104 = arith.constant 0 : index
    %117 = vector.load %arg34[%c10, %c0_104] : memref<122x64xf32, #tpu.memory_space<vmem>>, vector<100x32xf32>
    %118 = arith.truncf %117 : vector<100x32xf32> to vector<100x32xbf16>
    %c3_105 = arith.constant 3 : index
    %c0_106 = arith.constant 0 : index
    %c0_107 = arith.constant 0 : index
    %119 = vector.load %arg8[%c3_105, %c0_106, %c0_107] : memref<9x32x64xbf16, #tpu.memory_space<vmem>>, vector<1x32x64xbf16>
    %120 = vector.shape_cast %119 : vector<1x32x64xbf16> to vector<32x64xbf16>
    %cst_108 = arith.constant dense<0.000000e+00> : vector<100x64xf32>
    %121 = tpu.matmul %118, %120, %cst_108 {dimension_numbers = #tpu.dot_dimension_numbers<[1], [0], [0], [1], [0, 0, 1, 1], [], []>} : vector<100x32xbf16>, vector<32x64xbf16>, vector<100x64xf32> -> vector<100x64xf32>
    %122 = arith.addf %116, %121 : vector<100x64xf32>
    %c11_109 = arith.constant 11 : index
    %c0_110 = arith.constant 0 : index
    %123 = vector.load %arg34[%c11_109, %c0_110] : memref<122x64xf32, #tpu.memory_space<vmem>>, vector<100x32xf32>
    %124 = arith.truncf %123 : vector<100x32xf32> to vector<100x32xbf16>
    %c4_111 = arith.constant 4 : index
    %c0_112 = arith.constant 0 : index
    %c0_113 = arith.constant 0 : index
    %125 = vector.load %arg8[%c4_111, %c0_112, %c0_113] : memref<9x32x64xbf16, #tpu.memory_space<vmem>>, vector<1x32x64xbf16>
    %126 = vector.shape_cast %125 : vector<1x32x64xbf16> to vector<32x64xbf16>
    %cst_114 = arith.constant dense<0.000000e+00> : vector<100x64xf32>
    %127 = tpu.matmul %124, %126, %cst_114 {dimension_numbers = #tpu.dot_dimension_numbers<[1], [0], [0], [1], [0, 0, 1, 1], [], []>} : vector<100x32xbf16>, vector<32x64xbf16>, vector<100x64xf32> -> vector<100x64xf32>
    %128 = arith.addf %122, %127 : vector<100x64xf32>
    %c12 = arith.constant 12 : index
    %c0_115 = arith.constant 0 : index
    %129 = vector.load %arg34[%c12, %c0_115] : memref<122x64xf32, #tpu.memory_space<vmem>>, vector<100x32xf32>
    %130 = arith.truncf %129 : vector<100x32xf32> to vector<100x32xbf16>
    %c5_116 = arith.constant 5 : index
    %c0_117 = arith.constant 0 : index
    %c0_118 = arith.constant 0 : index
    %131 = vector.load %arg8[%c5_116, %c0_117, %c0_118] : memref<9x32x64xbf16, #tpu.memory_space<vmem>>, vector<1x32x64xbf16>
    %132 = vector.shape_cast %131 : vector<1x32x64xbf16> to vector<32x64xbf16>
    %cst_119 = arith.constant dense<0.000000e+00> : vector<100x64xf32>
    %133 = tpu.matmul %130, %132, %cst_119 {dimension_numbers = #tpu.dot_dimension_numbers<[1], [0], [0], [1], [0, 0, 1, 1], [], []>} : vector<100x32xbf16>, vector<32x64xbf16>, vector<100x64xf32> -> vector<100x64xf32>
    %134 = arith.addf %128, %133 : vector<100x64xf32>
    %c20_120 = arith.constant 20 : index
    %c0_121 = arith.constant 0 : index
    %135 = vector.load %arg34[%c20_120, %c0_121] : memref<122x64xf32, #tpu.memory_space<vmem>>, vector<100x32xf32>
    %136 = arith.truncf %135 : vector<100x32xf32> to vector<100x32xbf16>
    %c6_122 = arith.constant 6 : index
    %c0_123 = arith.constant 0 : index
    %c0_124 = arith.constant 0 : index
    %137 = vector.load %arg8[%c6_122, %c0_123, %c0_124] : memref<9x32x64xbf16, #tpu.memory_space<vmem>>, vector<1x32x64xbf16>
    %138 = vector.shape_cast %137 : vector<1x32x64xbf16> to vector<32x64xbf16>
    %cst_125 = arith.constant dense<0.000000e+00> : vector<100x64xf32>
    %139 = tpu.matmul %136, %138, %cst_125 {dimension_numbers = #tpu.dot_dimension_numbers<[1], [0], [0], [1], [0, 0, 1, 1], [], []>} : vector<100x32xbf16>, vector<32x64xbf16>, vector<100x64xf32> -> vector<100x64xf32>
    %140 = arith.addf %134, %139 : vector<100x64xf32>
    %c21 = arith.constant 21 : index
    %c0_126 = arith.constant 0 : index
    %141 = vector.load %arg34[%c21, %c0_126] : memref<122x64xf32, #tpu.memory_space<vmem>>, vector<100x32xf32>
    %142 = arith.truncf %141 : vector<100x32xf32> to vector<100x32xbf16>
    %c7_127 = arith.constant 7 : index
    %c0_128 = arith.constant 0 : index
    %c0_129 = arith.constant 0 : index
    %143 = vector.load %arg8[%c7_127, %c0_128, %c0_129] : memref<9x32x64xbf16, #tpu.memory_space<vmem>>, vector<1x32x64xbf16>
    %144 = vector.shape_cast %143 : vector<1x32x64xbf16> to vector<32x64xbf16>
    %cst_130 = arith.constant dense<0.000000e+00> : vector<100x64xf32>
    %145 = tpu.matmul %142, %144, %cst_130 {dimension_numbers = #tpu.dot_dimension_numbers<[1], [0], [0], [1], [0, 0, 1, 1], [], []>} : vector<100x32xbf16>, vector<32x64xbf16>, vector<100x64xf32> -> vector<100x64xf32>
    %146 = arith.addf %140, %145 : vector<100x64xf32>
    %c22 = arith.constant 22 : index
    %c0_131 = arith.constant 0 : index
    %147 = vector.load %arg34[%c22, %c0_131] : memref<122x64xf32, #tpu.memory_space<vmem>>, vector<100x32xf32>
    %148 = arith.truncf %147 : vector<100x32xf32> to vector<100x32xbf16>
    %c8_132 = arith.constant 8 : index
    %c0_133 = arith.constant 0 : index
    %c0_134 = arith.constant 0 : index
    %149 = vector.load %arg8[%c8_132, %c0_133, %c0_134] : memref<9x32x64xbf16, #tpu.memory_space<vmem>>, vector<1x32x64xbf16>
    %150 = vector.shape_cast %149 : vector<1x32x64xbf16> to vector<32x64xbf16>
    %cst_135 = arith.constant dense<0.000000e+00> : vector<100x64xf32>
    %151 = tpu.matmul %148, %150, %cst_135 {dimension_numbers = #tpu.dot_dimension_numbers<[1], [0], [0], [1], [0, 0, 1, 1], [], []>} : vector<100x32xbf16>, vector<32x64xbf16>, vector<100x64xf32> -> vector<100x64xf32>
    %152 = arith.addf %146, %151 : vector<100x64xf32>
    %c0_136 = arith.constant 0 : index
    %c0_137 = arith.constant 0 : index
    %153 = vector.load %arg9[%c0_136, %c0_137] : memref<1x64xf32, #tpu.memory_space<vmem>>, vector<1x64xf32>
    %154 = vector.broadcast %153 : vector<1x64xf32> to vector<100x64xf32>
    %155 = arith.mulf %152, %154 : vector<100x64xf32>
    %c0_138 = arith.constant 0 : index
    %c0_139 = arith.constant 0 : index
    %156 = vector.load %arg10[%c0_138, %c0_139] : memref<1x64xf32, #tpu.memory_space<vmem>>, vector<1x64xf32>
    %157 = vector.broadcast %156 : vector<1x64xf32> to vector<100x64xf32>
    %158 = arith.addf %155, %157 : vector<100x64xf32>
    %cst_140 = arith.constant 0.000000e+00 : f32
    %159 = vector.broadcast %cst_140 : f32 to vector<100x64xf32>
    %160 = arith.maximumf %158, %159 : vector<100x64xf32>
    %c0_141 = arith.constant 0 : index
    %c0_142 = arith.constant 0 : index
    %161 = vector.load %arg26[%c0_141, %c0_142] : memref<100x1xf32, #tpu.memory_space<vmem>>, vector<100x1xf32>
    %162 = vector.broadcast %161 : vector<100x1xf32> to vector<100x64xf32>
    %163 = arith.mulf %160, %162 : vector<100x64xf32>
    %c11_143 = arith.constant 11 : index
    %c0_144 = arith.constant 0 : index
    %164 = vector.load %arg34[%c11_143, %c0_144] : memref<122x64xf32, #tpu.memory_space<vmem>>, vector<100x64xf32>
    tpu.vector_store %arg34[%c11_143, %c0_144], %163 {strides = array<i32>} : memref<122x64xf32, #tpu.memory_space<vmem>>, vector<100x64xf32>,
    %c0_145 = arith.constant 0 : index
    %c0_146 = arith.constant 0 : index
    %165 = vector.load %arg34[%c0_145, %c0_146] : memref<122x64xf32, #tpu.memory_space<vmem>>, vector<100x64xf32>
    %166 = arith.truncf %165 : vector<100x64xf32> to vector<100x64xbf16>
    %c0_147 = arith.constant 0 : index
    %c0_148 = arith.constant 0 : index
    %c0_149 = arith.constant 0 : index
    %167 = vector.load %arg11[%c0_147, %c0_148, %c0_149] : memref<9x64x64xbf16, #tpu.memory_space<vmem>>, vector<1x64x64xbf16>
    %168 = vector.shape_cast %167 : vector<1x64x64xbf16> to vector<64x64xbf16>
    %cst_150 = arith.constant dense<0.000000e+00> : vector<100x64xf32>
    %169 = tpu.matmul %166, %168, %cst_150 {dimension_numbers = #tpu.dot_dimension_numbers<[1], [0], [0], [1], [0, 0, 1, 1], [], []>} : vector<100x64xbf16>, vector<64x64xbf16>, vector<100x64xf32> -> vector<100x64xf32>
    %c1_151 = arith.constant 1 : index
    %c0_152 = arith.constant 0 : index
    %170 = vector.load %arg34[%c1_151, %c0_152] : memref<122x64xf32, #tpu.memory_space<vmem>>, vector<100x64xf32>
    %171 = arith.truncf %170 : vector<100x64xf32> to vector<100x64xbf16>
    %c1_153 = arith.constant 1 : index
    %c0_154 = arith.constant 0 : index
    %c0_155 = arith.constant 0 : index
    %172 = vector.load %arg11[%c1_153, %c0_154, %c0_155] : memref<9x64x64xbf16, #tpu.memory_space<vmem>>, vector<1x64x64xbf16>
    %173 = vector.shape_cast %172 : vector<1x64x64xbf16> to vector<64x64xbf16>
    %cst_156 = arith.constant dense<0.000000e+00> : vector<100x64xf32>
    %174 = tpu.matmul %171, %173, %cst_156 {dimension_numbers = #tpu.dot_dimension_numbers<[1], [0], [0], [1], [0, 0, 1, 1], [], []>} : vector<100x64xbf16>, vector<64x64xbf16>, vector<100x64xf32> -> vector<100x64xf32>
    %175 = arith.addf %169, %174 : vector<100x64xf32>
    %c2_157 = arith.constant 2 : index
    %c0_158 = arith.constant 0 : index
    %176 = vector.load %arg34[%c2_157, %c0_158] : memref<122x64xf32, #tpu.memory_space<vmem>>, vector<100x64xf32>
    %177 = arith.truncf %176 : vector<100x64xf32> to vector<100x64xbf16>
    %c2_159 = arith.constant 2 : index
    %c0_160 = arith.constant 0 : index
    %c0_161 = arith.constant 0 : index
    %178 = vector.load %arg11[%c2_159, %c0_160, %c0_161] : memref<9x64x64xbf16, #tpu.memory_space<vmem>>, vector<1x64x64xbf16>
    %179 = vector.shape_cast %178 : vector<1x64x64xbf16> to vector<64x64xbf16>
    %cst_162 = arith.constant dense<0.000000e+00> : vector<100x64xf32>
    %180 = tpu.matmul %177, %179, %cst_162 {dimension_numbers = #tpu.dot_dimension_numbers<[1], [0], [0], [1], [0, 0, 1, 1], [], []>} : vector<100x64xbf16>, vector<64x64xbf16>, vector<100x64xf32> -> vector<100x64xf32>
    %181 = arith.addf %175, %180 : vector<100x64xf32>
    %c10_163 = arith.constant 10 : index
    %c0_164 = arith.constant 0 : index
    %182 = vector.load %arg34[%c10_163, %c0_164] : memref<122x64xf32, #tpu.memory_space<vmem>>, vector<100x64xf32>
    %183 = arith.truncf %182 : vector<100x64xf32> to vector<100x64xbf16>
    %c3_165 = arith.constant 3 : index
    %c0_166 = arith.constant 0 : index
    %c0_167 = arith.constant 0 : index
    %184 = vector.load %arg11[%c3_165, %c0_166, %c0_167] : memref<9x64x64xbf16, #tpu.memory_space<vmem>>, vector<1x64x64xbf16>
    %185 = vector.shape_cast %184 : vector<1x64x64xbf16> to vector<64x64xbf16>
    %cst_168 = arith.constant dense<0.000000e+00> : vector<100x64xf32>
    %186 = tpu.matmul %183, %185, %cst_168 {dimension_numbers = #tpu.dot_dimension_numbers<[1], [0], [0], [1], [0, 0, 1, 1], [], []>} : vector<100x64xbf16>, vector<64x64xbf16>, vector<100x64xf32> -> vector<100x64xf32>
    %187 = arith.addf %181, %186 : vector<100x64xf32>
    %c11_169 = arith.constant 11 : index
    %c0_170 = arith.constant 0 : index
    %188 = vector.load %arg34[%c11_169, %c0_170] : memref<122x64xf32, #tpu.memory_space<vmem>>, vector<100x64xf32>
    %189 = arith.truncf %188 : vector<100x64xf32> to vector<100x64xbf16>
    %c4_171 = arith.constant 4 : index
    %c0_172 = arith.constant 0 : index
    %c0_173 = arith.constant 0 : index
    %190 = vector.load %arg11[%c4_171, %c0_172, %c0_173] : memref<9x64x64xbf16, #tpu.memory_space<vmem>>, vector<1x64x64xbf16>
    %191 = vector.shape_cast %190 : vector<1x64x64xbf16> to vector<64x64xbf16>
    %cst_174 = arith.constant dense<0.000000e+00> : vector<100x64xf32>
    %192 = tpu.matmul %189, %191, %cst_174 {dimension_numbers = #tpu.dot_dimension_numbers<[1], [0], [0], [1], [0, 0, 1, 1], [], []>} : vector<100x64xbf16>, vector<64x64xbf16>, vector<100x64xf32> -> vector<100x64xf32>
    %193 = arith.addf %187, %192 : vector<100x64xf32>
    %c12_175 = arith.constant 12 : index
    %c0_176 = arith.constant 0 : index
    %194 = vector.load %arg34[%c12_175, %c0_176] : memref<122x64xf32, #tpu.memory_space<vmem>>, vector<100x64xf32>
    %195 = arith.truncf %194 : vector<100x64xf32> to vector<100x64xbf16>
    %c5_177 = arith.constant 5 : index
    %c0_178 = arith.constant 0 : index
    %c0_179 = arith.constant 0 : index
    %196 = vector.load %arg11[%c5_177, %c0_178, %c0_179] : memref<9x64x64xbf16, #tpu.memory_space<vmem>>, vector<1x64x64xbf16>
    %197 = vector.shape_cast %196 : vector<1x64x64xbf16> to vector<64x64xbf16>
    %cst_180 = arith.constant dense<0.000000e+00> : vector<100x64xf32>
    %198 = tpu.matmul %195, %197, %cst_180 {dimension_numbers = #tpu.dot_dimension_numbers<[1], [0], [0], [1], [0, 0, 1, 1], [], []>} : vector<100x64xbf16>, vector<64x64xbf16>, vector<100x64xf32> -> vector<100x64xf32>
    %199 = arith.addf %193, %198 : vector<100x64xf32>
    %c20_181 = arith.constant 20 : index
    %c0_182 = arith.constant 0 : index
    %200 = vector.load %arg34[%c20_181, %c0_182] : memref<122x64xf32, #tpu.memory_space<vmem>>, vector<100x64xf32>
    %201 = arith.truncf %200 : vector<100x64xf32> to vector<100x64xbf16>
    %c6_183 = arith.constant 6 : index
    %c0_184 = arith.constant 0 : index
    %c0_185 = arith.constant 0 : index
    %202 = vector.load %arg11[%c6_183, %c0_184, %c0_185] : memref<9x64x64xbf16, #tpu.memory_space<vmem>>, vector<1x64x64xbf16>
    %203 = vector.shape_cast %202 : vector<1x64x64xbf16> to vector<64x64xbf16>
    %cst_186 = arith.constant dense<0.000000e+00> : vector<100x64xf32>
    %204 = tpu.matmul %201, %203, %cst_186 {dimension_numbers = #tpu.dot_dimension_numbers<[1], [0], [0], [1], [0, 0, 1, 1], [], []>} : vector<100x64xbf16>, vector<64x64xbf16>, vector<100x64xf32> -> vector<100x64xf32>
    %205 = arith.addf %199, %204 : vector<100x64xf32>
    %c21_187 = arith.constant 21 : index
    %c0_188 = arith.constant 0 : index
    %206 = vector.load %arg34[%c21_187, %c0_188] : memref<122x64xf32, #tpu.memory_space<vmem>>, vector<100x64xf32>
    %207 = arith.truncf %206 : vector<100x64xf32> to vector<100x64xbf16>
    %c7_189 = arith.constant 7 : index
    %c0_190 = arith.constant 0 : index
    %c0_191 = arith.constant 0 : index
    %208 = vector.load %arg11[%c7_189, %c0_190, %c0_191] : memref<9x64x64xbf16, #tpu.memory_space<vmem>>, vector<1x64x64xbf16>
    %209 = vector.shape_cast %208 : vector<1x64x64xbf16> to vector<64x64xbf16>
    %cst_192 = arith.constant dense<0.000000e+00> : vector<100x64xf32>
    %210 = tpu.matmul %207, %209, %cst_192 {dimension_numbers = #tpu.dot_dimension_numbers<[1], [0], [0], [1], [0, 0, 1, 1], [], []>} : vector<100x64xbf16>, vector<64x64xbf16>, vector<100x64xf32> -> vector<100x64xf32>
    %211 = arith.addf %205, %210 : vector<100x64xf32>
    %c22_193 = arith.constant 22 : index
    %c0_194 = arith.constant 0 : index
    %212 = vector.load %arg34[%c22_193, %c0_194] : memref<122x64xf32, #tpu.memory_space<vmem>>, vector<100x64xf32>
    %213 = arith.truncf %212 : vector<100x64xf32> to vector<100x64xbf16>
    %c8_195 = arith.constant 8 : index
    %c0_196 = arith.constant 0 : index
    %c0_197 = arith.constant 0 : index
    %214 = vector.load %arg11[%c8_195, %c0_196, %c0_197] : memref<9x64x64xbf16, #tpu.memory_space<vmem>>, vector<1x64x64xbf16>
    %215 = vector.shape_cast %214 : vector<1x64x64xbf16> to vector<64x64xbf16>
    %cst_198 = arith.constant dense<0.000000e+00> : vector<100x64xf32>
    %216 = tpu.matmul %213, %215, %cst_198 {dimension_numbers = #tpu.dot_dimension_numbers<[1], [0], [0], [1], [0, 0, 1, 1], [], []>} : vector<100x64xbf16>, vector<64x64xbf16>, vector<100x64xf32> -> vector<100x64xf32>
    %217 = arith.addf %211, %216 : vector<100x64xf32>
    %c0_199 = arith.constant 0 : index
    %c0_200 = arith.constant 0 : index
    %218 = vector.load %arg12[%c0_199, %c0_200] : memref<1x64xf32, #tpu.memory_space<vmem>>, vector<1x64xf32>
    %219 = vector.broadcast %218 : vector<1x64xf32> to vector<100x64xf32>
    %220 = arith.mulf %217, %219 : vector<100x64xf32>
    %c0_201 = arith.constant 0 : index
    %c0_202 = arith.constant 0 : index
    %221 = vector.load %arg13[%c0_201, %c0_202] : memref<1x64xf32, #tpu.memory_space<vmem>>, vector<1x64xf32>
    %222 = vector.broadcast %221 : vector<1x64xf32> to vector<100x64xf32>
    %223 = arith.addf %220, %222 : vector<100x64xf32>
    %cst_203 = arith.constant 0.000000e+00 : f32
    %224 = vector.broadcast %cst_203 : f32 to vector<100x64xf32>
    %225 = arith.maximumf %223, %224 : vector<100x64xf32>
    %c0_204 = arith.constant 0 : index
    %c0_205 = arith.constant 0 : index
    %226 = vector.load %arg26[%c0_204, %c0_205] : memref<100x1xf32, #tpu.memory_space<vmem>>, vector<100x1xf32>
    %227 = vector.broadcast %226 : vector<100x1xf32> to vector<100x64xf32>
    %228 = arith.mulf %225, %227 : vector<100x64xf32>
    %c11_206 = arith.constant 11 : index
    %c0_207 = arith.constant 0 : index
    %229 = vector.load %arg34[%c11_206, %c0_207] : memref<122x64xf32, #tpu.memory_space<vmem>>, vector<100x64xf32>
    tpu.vector_store %arg34[%c11_206, %c0_207], %228 {strides = array<i32>} : memref<122x64xf32, #tpu.memory_space<vmem>>, vector<100x64xf32>,
    %c11_208 = arith.constant 11 : index
    %c0_209 = arith.constant 0 : index
    %230 = vector.load %arg34[%c11_208, %c0_209] : memref<122x64xf32, #tpu.memory_space<vmem>>, vector<100x64xf32>
    %c12_210 = arith.constant 12 : index
    %c0_211 = arith.constant 0 : index
    %231 = vector.load %arg34[%c12_210, %c0_211] : memref<122x64xf32, #tpu.memory_space<vmem>>, vector<100x64xf32>
    %232 = arith.maximumf %230, %231 : vector<100x64xf32>
    %c21_212 = arith.constant 21 : index
    %c0_213 = arith.constant 0 : index
    %233 = vector.load %arg34[%c21_212, %c0_213] : memref<122x64xf32, #tpu.memory_space<vmem>>, vector<100x64xf32>
    %c22_214 = arith.constant 22 : index
    %c0_215 = arith.constant 0 : index
    %234 = vector.load %arg34[%c22_214, %c0_215] : memref<122x64xf32, #tpu.memory_space<vmem>>, vector<100x64xf32>
    %235 = arith.maximumf %233, %234 : vector<100x64xf32>
    %236 = arith.maximumf %232, %235 : vector<100x64xf32>
    %237 = arith.truncf %236 : vector<100x64xf32> to vector<100x64xbf16>
    %c0_216 = arith.constant 0 : index
    %c0_217 = arith.constant 0 : index
    %238 = vector.load %arg30[%c0_216, %c0_217] : memref<36x100xbf16, #tpu.memory_space<vmem>>, vector<36x100xbf16>
    %cst_218 = arith.constant dense<0.000000e+00> : vector<36x64xf32>
    %239 = tpu.matmul %238, %237, %cst_218 {dimension_numbers = #tpu.dot_dimension_numbers<[1], [0], [0], [1], [0, 0, 1, 1], [], []>} : vector<36x100xbf16>, vector<100x64xbf16>, vector<36x64xf32> -> vector<36x64xf32>
    %c7_219 = arith.constant 7 : index
    %c0_220 = arith.constant 0 : index
    %240 = vector.load %arg35[%c7_219, %c0_220] : memref<50x128xf32, #tpu.memory_space<vmem>>, vector<36x64xf32>
    tpu.vector_store %arg35[%c7_219, %c0_220], %239 {strides = array<i32>} : memref<50x128xf32, #tpu.memory_space<vmem>>, vector<36x64xf32>,
    %c0_221 = arith.constant 0 : index
    %c0_222 = arith.constant 0 : index
    %241 = vector.load %arg35[%c0_221, %c0_222] : memref<50x128xf32, #tpu.memory_space<vmem>>, vector<36x64xf32>
    %242 = arith.truncf %241 : vector<36x64xf32> to vector<36x64xbf16>
    %c0_223 = arith.constant 0 : index
    %c0_224 = arith.constant 0 : index
    %c0_225 = arith.constant 0 : index
    %243 = vector.load %arg14[%c0_223, %c0_224, %c0_225] : memref<9x64x128xbf16, #tpu.memory_space<vmem>>, vector<1x64x128xbf16>
    %244 = vector.shape_cast %243 : vector<1x64x128xbf16> to vector<64x128xbf16>
    %cst_226 = arith.constant dense<0.000000e+00> : vector<36x128xf32>
    %245 = tpu.matmul %242, %244, %cst_226 {dimension_numbers = #tpu.dot_dimension_numbers<[1], [0], [0], [1], [0, 0, 1, 1], [], []>} : vector<36x64xbf16>, vector<64x128xbf16>, vector<36x128xf32> -> vector<36x128xf32>
    %c1_227 = arith.constant 1 : index
    %c0_228 = arith.constant 0 : index
    %246 = vector.load %arg35[%c1_227, %c0_228] : memref<50x128xf32, #tpu.memory_space<vmem>>, vector<36x64xf32>
    %247 = arith.truncf %246 : vector<36x64xf32> to vector<36x64xbf16>
    %c1_229 = arith.constant 1 : index
    %c0_230 = arith.constant 0 : index
    %c0_231 = arith.constant 0 : index
    %248 = vector.load %arg14[%c1_229, %c0_230, %c0_231] : memref<9x64x128xbf16, #tpu.memory_space<vmem>>, vector<1x64x128xbf16>
    %249 = vector.shape_cast %248 : vector<1x64x128xbf16> to vector<64x128xbf16>
    %cst_232 = arith.constant dense<0.000000e+00> : vector<36x128xf32>
    %250 = tpu.matmul %247, %249, %cst_232 {dimension_numbers = #tpu.dot_dimension_numbers<[1], [0], [0], [1], [0, 0, 1, 1], [], []>} : vector<36x64xbf16>, vector<64x128xbf16>, vector<36x128xf32> -> vector<36x128xf32>
    %251 = arith.addf %245, %250 : vector<36x128xf32>
    %c2_233 = arith.constant 2 : index
    %c0_234 = arith.constant 0 : index
    %252 = vector.load %arg35[%c2_233, %c0_234] : memref<50x128xf32, #tpu.memory_space<vmem>>, vector<36x64xf32>
    %253 = arith.truncf %252 : vector<36x64xf32> to vector<36x64xbf16>
    %c2_235 = arith.constant 2 : index
    %c0_236 = arith.constant 0 : index
    %c0_237 = arith.constant 0 : index
    %254 = vector.load %arg14[%c2_235, %c0_236, %c0_237] : memref<9x64x128xbf16, #tpu.memory_space<vmem>>, vector<1x64x128xbf16>
    %255 = vector.shape_cast %254 : vector<1x64x128xbf16> to vector<64x128xbf16>
    %cst_238 = arith.constant dense<0.000000e+00> : vector<36x128xf32>
    %256 = tpu.matmul %253, %255, %cst_238 {dimension_numbers = #tpu.dot_dimension_numbers<[1], [0], [0], [1], [0, 0, 1, 1], [], []>} : vector<36x64xbf16>, vector<64x128xbf16>, vector<36x128xf32> -> vector<36x128xf32>
    %257 = arith.addf %251, %256 : vector<36x128xf32>
    %c6_239 = arith.constant 6 : index
    %c0_240 = arith.constant 0 : index
    %258 = vector.load %arg35[%c6_239, %c0_240] : memref<50x128xf32, #tpu.memory_space<vmem>>, vector<36x64xf32>
    %259 = arith.truncf %258 : vector<36x64xf32> to vector<36x64xbf16>
    %c3_241 = arith.constant 3 : index
    %c0_242 = arith.constant 0 : index
    %c0_243 = arith.constant 0 : index
    %260 = vector.load %arg14[%c3_241, %c0_242, %c0_243] : memref<9x64x128xbf16, #tpu.memory_space<vmem>>, vector<1x64x128xbf16>
    %261 = vector.shape_cast %260 : vector<1x64x128xbf16> to vector<64x128xbf16>
    %cst_244 = arith.constant dense<0.000000e+00> : vector<36x128xf32>
    %262 = tpu.matmul %259, %261, %cst_244 {dimension_numbers = #tpu.dot_dimension_numbers<[1], [0], [0], [1], [0, 0, 1, 1], [], []>} : vector<36x64xbf16>, vector<64x128xbf16>, vector<36x128xf32> -> vector<36x128xf32>
    %263 = arith.addf %257, %262 : vector<36x128xf32>
    %c7_245 = arith.constant 7 : index
    %c0_246 = arith.constant 0 : index
    %264 = vector.load %arg35[%c7_245, %c0_246] : memref<50x128xf32, #tpu.memory_space<vmem>>, vector<36x64xf32>
    %265 = arith.truncf %264 : vector<36x64xf32> to vector<36x64xbf16>
    %c4_247 = arith.constant 4 : index
    %c0_248 = arith.constant 0 : index
    %c0_249 = arith.constant 0 : index
    %266 = vector.load %arg14[%c4_247, %c0_248, %c0_249] : memref<9x64x128xbf16, #tpu.memory_space<vmem>>, vector<1x64x128xbf16>
    %267 = vector.shape_cast %266 : vector<1x64x128xbf16> to vector<64x128xbf16>
    %cst_250 = arith.constant dense<0.000000e+00> : vector<36x128xf32>
    %268 = tpu.matmul %265, %267, %cst_250 {dimension_numbers = #tpu.dot_dimension_numbers<[1], [0], [0], [1], [0, 0, 1, 1], [], []>} : vector<36x64xbf16>, vector<64x128xbf16>, vector<36x128xf32> -> vector<36x128xf32>
    %269 = arith.addf %263, %268 : vector<36x128xf32>
    %c8_251 = arith.constant 8 : index
    %c0_252 = arith.constant 0 : index
    %270 = vector.load %arg35[%c8_251, %c0_252] : memref<50x128xf32, #tpu.memory_space<vmem>>, vector<36x64xf32>
    %271 = arith.truncf %270 : vector<36x64xf32> to vector<36x64xbf16>
    %c5_253 = arith.constant 5 : index
    %c0_254 = arith.constant 0 : index
    %c0_255 = arith.constant 0 : index
    %272 = vector.load %arg14[%c5_253, %c0_254, %c0_255] : memref<9x64x128xbf16, #tpu.memory_space<vmem>>, vector<1x64x128xbf16>
    %273 = vector.shape_cast %272 : vector<1x64x128xbf16> to vector<64x128xbf16>
    %cst_256 = arith.constant dense<0.000000e+00> : vector<36x128xf32>
    %274 = tpu.matmul %271, %273, %cst_256 {dimension_numbers = #tpu.dot_dimension_numbers<[1], [0], [0], [1], [0, 0, 1, 1], [], []>} : vector<36x64xbf16>, vector<64x128xbf16>, vector<36x128xf32> -> vector<36x128xf32>
    %275 = arith.addf %269, %274 : vector<36x128xf32>
    %c12_257 = arith.constant 12 : index
    %c0_258 = arith.constant 0 : index
    %276 = vector.load %arg35[%c12_257, %c0_258] : memref<50x128xf32, #tpu.memory_space<vmem>>, vector<36x64xf32>
    %277 = arith.truncf %276 : vector<36x64xf32> to vector<36x64xbf16>
    %c6_259 = arith.constant 6 : index
    %c0_260 = arith.constant 0 : index
    %c0_261 = arith.constant 0 : index
    %278 = vector.load %arg14[%c6_259, %c0_260, %c0_261] : memref<9x64x128xbf16, #tpu.memory_space<vmem>>, vector<1x64x128xbf16>
    %279 = vector.shape_cast %278 : vector<1x64x128xbf16> to vector<64x128xbf16>
    %cst_262 = arith.constant dense<0.000000e+00> : vector<36x128xf32>
    %280 = tpu.matmul %277, %279, %cst_262 {dimension_numbers = #tpu.dot_dimension_numbers<[1], [0], [0], [1], [0, 0, 1, 1], [], []>} : vector<36x64xbf16>, vector<64x128xbf16>, vector<36x128xf32> -> vector<36x128xf32>
    %281 = arith.addf %275, %280 : vector<36x128xf32>
    %c13 = arith.constant 13 : index
    %c0_263 = arith.constant 0 : index
    %282 = vector.load %arg35[%c13, %c0_263] : memref<50x128xf32, #tpu.memory_space<vmem>>, vector<36x64xf32>
    %283 = arith.truncf %282 : vector<36x64xf32> to vector<36x64xbf16>
    %c7_264 = arith.constant 7 : index
    %c0_265 = arith.constant 0 : index
    %c0_266 = arith.constant 0 : index
    %284 = vector.load %arg14[%c7_264, %c0_265, %c0_266] : memref<9x64x128xbf16, #tpu.memory_space<vmem>>, vector<1x64x128xbf16>
    %285 = vector.shape_cast %284 : vector<1x64x128xbf16> to vector<64x128xbf16>
    %cst_267 = arith.constant dense<0.000000e+00> : vector<36x128xf32>
    %286 = tpu.matmul %283, %285, %cst_267 {dimension_numbers = #tpu.dot_dimension_numbers<[1], [0], [0], [1], [0, 0, 1, 1], [], []>} : vector<36x64xbf16>, vector<64x128xbf16>, vector<36x128xf32> -> vector<36x128xf32>
    %287 = arith.addf %281, %286 : vector<36x128xf32>
    %c14 = arith.constant 14 : index
    %c0_268 = arith.constant 0 : index
    %288 = vector.load %arg35[%c14, %c0_268] : memref<50x128xf32, #tpu.memory_space<vmem>>, vector<36x64xf32>
    %289 = arith.truncf %288 : vector<36x64xf32> to vector<36x64xbf16>
    %c8_269 = arith.constant 8 : index
    %c0_270 = arith.constant 0 : index
    %c0_271 = arith.constant 0 : index
    %290 = vector.load %arg14[%c8_269, %c0_270, %c0_271] : memref<9x64x128xbf16, #tpu.memory_space<vmem>>, vector<1x64x128xbf16>
    %291 = vector.shape_cast %290 : vector<1x64x128xbf16> to vector<64x128xbf16>
    %cst_272 = arith.constant dense<0.000000e+00> : vector<36x128xf32>
    %292 = tpu.matmul %289, %291, %cst_272 {dimension_numbers = #tpu.dot_dimension_numbers<[1], [0], [0], [1], [0, 0, 1, 1], [], []>} : vector<36x64xbf16>, vector<64x128xbf16>, vector<36x128xf32> -> vector<36x128xf32>
    %293 = arith.addf %287, %292 : vector<36x128xf32>
    %c0_273 = arith.constant 0 : index
    %c0_274 = arith.constant 0 : index
    %294 = vector.load %arg15[%c0_273, %c0_274] : memref<1x128xf32, #tpu.memory_space<vmem>>, vector<1x128xf32>
    %295 = vector.broadcast %294 : vector<1x128xf32> to vector<36x128xf32>
    %296 = arith.mulf %293, %295 : vector<36x128xf32>
    %c0_275 = arith.constant 0 : index
    %c0_276 = arith.constant 0 : index
    %297 = vector.load %arg16[%c0_275, %c0_276] : memref<1x128xf32, #tpu.memory_space<vmem>>, vector<1x128xf32>
    %298 = vector.broadcast %297 : vector<1x128xf32> to vector<36x128xf32>
    %299 = arith.addf %296, %298 : vector<36x128xf32>
    %cst_277 = arith.constant 0.000000e+00 : f32
    %300 = vector.broadcast %cst_277 : f32 to vector<36x128xf32>
    %301 = arith.maximumf %299, %300 : vector<36x128xf32>
    %c0_278 = arith.constant 0 : index
    %c0_279 = arith.constant 0 : index
    %302 = vector.load %arg27[%c0_278, %c0_279] : memref<36x1xf32, #tpu.memory_space<vmem>>, vector<36x1xf32>
    %303 = vector.broadcast %302 : vector<36x1xf32> to vector<36x128xf32>
    %304 = arith.mulf %301, %303 : vector<36x128xf32>
    %c7_280 = arith.constant 7 : index
    %c0_281 = arith.constant 0 : index
    %305 = vector.load %arg35[%c7_280, %c0_281] : memref<50x128xf32, #tpu.memory_space<vmem>>, vector<36x128xf32>
    tpu.vector_store %arg35[%c7_280, %c0_281], %304 {strides = array<i32>} : memref<50x128xf32, #tpu.memory_space<vmem>>, vector<36x128xf32>,
    %c0_282 = arith.constant 0 : index
    %c0_283 = arith.constant 0 : index
    %306 = vector.load %arg35[%c0_282, %c0_283] : memref<50x128xf32, #tpu.memory_space<vmem>>, vector<36x128xf32>
    %307 = arith.truncf %306 : vector<36x128xf32> to vector<36x128xbf16>
    %c0_284 = arith.constant 0 : index
    %c0_285 = arith.constant 0 : index
    %c0_286 = arith.constant 0 : index
    %308 = vector.load %arg17[%c0_284, %c0_285, %c0_286] : memref<9x128x128xbf16, #tpu.memory_space<vmem>>, vector<1x128x128xbf16>
    %309 = vector.shape_cast %308 : vector<1x128x128xbf16> to vector<128x128xbf16>
    %cst_287 = arith.constant dense<0.000000e+00> : vector<36x128xf32>
    %310 = tpu.matmul %307, %309, %cst_287 {dimension_numbers = #tpu.dot_dimension_numbers<[1], [0], [0], [1], [0, 0, 1, 1], [], []>} : vector<36x128xbf16>, vector<128x128xbf16>, vector<36x128xf32> -> vector<36x128xf32>
    %c1_288 = arith.constant 1 : index
    %c0_289 = arith.constant 0 : index
    %311 = vector.load %arg35[%c1_288, %c0_289] : memref<50x128xf32, #tpu.memory_space<vmem>>, vector<36x128xf32>
    %312 = arith.truncf %311 : vector<36x128xf32> to vector<36x128xbf16>
    %c1_290 = arith.constant 1 : index
    %c0_291 = arith.constant 0 : index
    %c0_292 = arith.constant 0 : index
    %313 = vector.load %arg17[%c1_290, %c0_291, %c0_292] : memref<9x128x128xbf16, #tpu.memory_space<vmem>>, vector<1x128x128xbf16>
    %314 = vector.shape_cast %313 : vector<1x128x128xbf16> to vector<128x128xbf16>
    %cst_293 = arith.constant dense<0.000000e+00> : vector<36x128xf32>
    %315 = tpu.matmul %312, %314, %cst_293 {dimension_numbers = #tpu.dot_dimension_numbers<[1], [0], [0], [1], [0, 0, 1, 1], [], []>} : vector<36x128xbf16>, vector<128x128xbf16>, vector<36x128xf32> -> vector<36x128xf32>
    %316 = arith.addf %310, %315 : vector<36x128xf32>
    %c2_294 = arith.constant 2 : index
    %c0_295 = arith.constant 0 : index
    %317 = vector.load %arg35[%c2_294, %c0_295] : memref<50x128xf32, #tpu.memory_space<vmem>>, vector<36x128xf32>
    %318 = arith.truncf %317 : vector<36x128xf32> to vector<36x128xbf16>
    %c2_296 = arith.constant 2 : index
    %c0_297 = arith.constant 0 : index
    %c0_298 = arith.constant 0 : index
    %319 = vector.load %arg17[%c2_296, %c0_297, %c0_298] : memref<9x128x128xbf16, #tpu.memory_space<vmem>>, vector<1x128x128xbf16>
    %320 = vector.shape_cast %319 : vector<1x128x128xbf16> to vector<128x128xbf16>
    %cst_299 = arith.constant dense<0.000000e+00> : vector<36x128xf32>
    %321 = tpu.matmul %318, %320, %cst_299 {dimension_numbers = #tpu.dot_dimension_numbers<[1], [0], [0], [1], [0, 0, 1, 1], [], []>} : vector<36x128xbf16>, vector<128x128xbf16>, vector<36x128xf32> -> vector<36x128xf32>
    %322 = arith.addf %316, %321 : vector<36x128xf32>
    %c6_300 = arith.constant 6 : index
    %c0_301 = arith.constant 0 : index
    %323 = vector.load %arg35[%c6_300, %c0_301] : memref<50x128xf32, #tpu.memory_space<vmem>>, vector<36x128xf32>
    %324 = arith.truncf %323 : vector<36x128xf32> to vector<36x128xbf16>
    %c3_302 = arith.constant 3 : index
    %c0_303 = arith.constant 0 : index
    %c0_304 = arith.constant 0 : index
    %325 = vector.load %arg17[%c3_302, %c0_303, %c0_304] : memref<9x128x128xbf16, #tpu.memory_space<vmem>>, vector<1x128x128xbf16>
    %326 = vector.shape_cast %325 : vector<1x128x128xbf16> to vector<128x128xbf16>
    %cst_305 = arith.constant dense<0.000000e+00> : vector<36x128xf32>
    %327 = tpu.matmul %324, %326, %cst_305 {dimension_numbers = #tpu.dot_dimension_numbers<[1], [0], [0], [1], [0, 0, 1, 1], [], []>} : vector<36x128xbf16>, vector<128x128xbf16>, vector<36x128xf32> -> vector<36x128xf32>
    %328 = arith.addf %322, %327 : vector<36x128xf32>
    %c7_306 = arith.constant 7 : index
    %c0_307 = arith.constant 0 : index
    %329 = vector.load %arg35[%c7_306, %c0_307] : memref<50x128xf32, #tpu.memory_space<vmem>>, vector<36x128xf32>
    %330 = arith.truncf %329 : vector<36x128xf32> to vector<36x128xbf16>
    %c4_308 = arith.constant 4 : index
    %c0_309 = arith.constant 0 : index
    %c0_310 = arith.constant 0 : index
    %331 = vector.load %arg17[%c4_308, %c0_309, %c0_310] : memref<9x128x128xbf16, #tpu.memory_space<vmem>>, vector<1x128x128xbf16>
    %332 = vector.shape_cast %331 : vector<1x128x128xbf16> to vector<128x128xbf16>
    %cst_311 = arith.constant dense<0.000000e+00> : vector<36x128xf32>
    %333 = tpu.matmul %330, %332, %cst_311 {dimension_numbers = #tpu.dot_dimension_numbers<[1], [0], [0], [1], [0, 0, 1, 1], [], []>} : vector<36x128xbf16>, vector<128x128xbf16>, vector<36x128xf32> -> vector<36x128xf32>
    %334 = arith.addf %328, %333 : vector<36x128xf32>
    %c8_312 = arith.constant 8 : index
    %c0_313 = arith.constant 0 : index
    %335 = vector.load %arg35[%c8_312, %c0_313] : memref<50x128xf32, #tpu.memory_space<vmem>>, vector<36x128xf32>
    %336 = arith.truncf %335 : vector<36x128xf32> to vector<36x128xbf16>
    %c5_314 = arith.constant 5 : index
    %c0_315 = arith.constant 0 : index
    %c0_316 = arith.constant 0 : index
    %337 = vector.load %arg17[%c5_314, %c0_315, %c0_316] : memref<9x128x128xbf16, #tpu.memory_space<vmem>>, vector<1x128x128xbf16>
    %338 = vector.shape_cast %337 : vector<1x128x128xbf16> to vector<128x128xbf16>
    %cst_317 = arith.constant dense<0.000000e+00> : vector<36x128xf32>
    %339 = tpu.matmul %336, %338, %cst_317 {dimension_numbers = #tpu.dot_dimension_numbers<[1], [0], [0], [1], [0, 0, 1, 1], [], []>} : vector<36x128xbf16>, vector<128x128xbf16>, vector<36x128xf32> -> vector<36x128xf32>
    %340 = arith.addf %334, %339 : vector<36x128xf32>
    %c12_318 = arith.constant 12 : index
    %c0_319 = arith.constant 0 : index
    %341 = vector.load %arg35[%c12_318, %c0_319] : memref<50x128xf32, #tpu.memory_space<vmem>>, vector<36x128xf32>
    %342 = arith.truncf %341 : vector<36x128xf32> to vector<36x128xbf16>
    %c6_320 = arith.constant 6 : index
    %c0_321 = arith.constant 0 : index
    %c0_322 = arith.constant 0 : index
    %343 = vector.load %arg17[%c6_320, %c0_321, %c0_322] : memref<9x128x128xbf16, #tpu.memory_space<vmem>>, vector<1x128x128xbf16>
    %344 = vector.shape_cast %343 : vector<1x128x128xbf16> to vector<128x128xbf16>
    %cst_323 = arith.constant dense<0.000000e+00> : vector<36x128xf32>
    %345 = tpu.matmul %342, %344, %cst_323 {dimension_numbers = #tpu.dot_dimension_numbers<[1], [0], [0], [1], [0, 0, 1, 1], [], []>} : vector<36x128xbf16>, vector<128x128xbf16>, vector<36x128xf32> -> vector<36x128xf32>
    %346 = arith.addf %340, %345 : vector<36x128xf32>
    %c13_324 = arith.constant 13 : index
    %c0_325 = arith.constant 0 : index
    %347 = vector.load %arg35[%c13_324, %c0_325] : memref<50x128xf32, #tpu.memory_space<vmem>>, vector<36x128xf32>
    %348 = arith.truncf %347 : vector<36x128xf32> to vector<36x128xbf16>
    %c7_326 = arith.constant 7 : index
    %c0_327 = arith.constant 0 : index
    %c0_328 = arith.constant 0 : index
    %349 = vector.load %arg17[%c7_326, %c0_327, %c0_328] : memref<9x128x128xbf16, #tpu.memory_space<vmem>>, vector<1x128x128xbf16>
    %350 = vector.shape_cast %349 : vector<1x128x128xbf16> to vector<128x128xbf16>
    %cst_329 = arith.constant dense<0.000000e+00> : vector<36x128xf32>
    %351 = tpu.matmul %348, %350, %cst_329 {dimension_numbers = #tpu.dot_dimension_numbers<[1], [0], [0], [1], [0, 0, 1, 1], [], []>} : vector<36x128xbf16>, vector<128x128xbf16>, vector<36x128xf32> -> vector<36x128xf32>
    %352 = arith.addf %346, %351 : vector<36x128xf32>
    %c14_330 = arith.constant 14 : index
    %c0_331 = arith.constant 0 : index
    %353 = vector.load %arg35[%c14_330, %c0_331] : memref<50x128xf32, #tpu.memory_space<vmem>>, vector<36x128xf32>
    %354 = arith.truncf %353 : vector<36x128xf32> to vector<36x128xbf16>
    %c8_332 = arith.constant 8 : index
    %c0_333 = arith.constant 0 : index
    %c0_334 = arith.constant 0 : index
    %355 = vector.load %arg17[%c8_332, %c0_333, %c0_334] : memref<9x128x128xbf16, #tpu.memory_space<vmem>>, vector<1x128x128xbf16>
    %356 = vector.shape_cast %355 : vector<1x128x128xbf16> to vector<128x128xbf16>
    %cst_335 = arith.constant dense<0.000000e+00> : vector<36x128xf32>
    %357 = tpu.matmul %354, %356, %cst_335 {dimension_numbers = #tpu.dot_dimension_numbers<[1], [0], [0], [1], [0, 0, 1, 1], [], []>} : vector<36x128xbf16>, vector<128x128xbf16>, vector<36x128xf32> -> vector<36x128xf32>
    %358 = arith.addf %352, %357 : vector<36x128xf32>
    %c0_336 = arith.constant 0 : index
    %c0_337 = arith.constant 0 : index
    %359 = vector.load %arg18[%c0_336, %c0_337] : memref<1x128xf32, #tpu.memory_space<vmem>>, vector<1x128xf32>
    %360 = vector.broadcast %359 : vector<1x128xf32> to vector<36x128xf32>
    %361 = arith.mulf %358, %360 : vector<36x128xf32>
    %c0_338 = arith.constant 0 : index
    %c0_339 = arith.constant 0 : index
    %362 = vector.load %arg19[%c0_338, %c0_339] : memref<1x128xf32, #tpu.memory_space<vmem>>, vector<1x128xf32>
    %363 = vector.broadcast %362 : vector<1x128xf32> to vector<36x128xf32>
    %364 = arith.addf %361, %363 : vector<36x128xf32>
    %cst_340 = arith.constant 0.000000e+00 : f32
    %365 = vector.broadcast %cst_340 : f32 to vector<36x128xf32>
    %366 = arith.maximumf %364, %365 : vector<36x128xf32>
    %c0_341 = arith.constant 0 : index
    %c0_342 = arith.constant 0 : index
    %367 = vector.load %arg27[%c0_341, %c0_342] : memref<36x1xf32, #tpu.memory_space<vmem>>, vector<36x1xf32>
    %368 = vector.broadcast %367 : vector<36x1xf32> to vector<36x128xf32>
    %369 = arith.mulf %366, %368 : vector<36x128xf32>
    %c7_343 = arith.constant 7 : index
    %c0_344 = arith.constant 0 : index
    %370 = vector.load %arg35[%c7_343, %c0_344] : memref<50x128xf32, #tpu.memory_space<vmem>>, vector<36x128xf32>
    tpu.vector_store %arg35[%c7_343, %c0_344], %369 {strides = array<i32>} : memref<50x128xf32, #tpu.memory_space<vmem>>, vector<36x128xf32>,
    %c7_345 = arith.constant 7 : index
    %c0_346 = arith.constant 0 : index
    %371 = vector.load %arg35[%c7_345, %c0_346] : memref<50x128xf32, #tpu.memory_space<vmem>>, vector<36x128xf32>
    %c8_347 = arith.constant 8 : index
    %c0_348 = arith.constant 0 : index
    %372 = vector.load %arg35[%c8_347, %c0_348] : memref<50x128xf32, #tpu.memory_space<vmem>>, vector<36x128xf32>
    %373 = arith.maximumf %371, %372 : vector<36x128xf32>
    %c13_349 = arith.constant 13 : index
    %c0_350 = arith.constant 0 : index
    %374 = vector.load %arg35[%c13_349, %c0_350] : memref<50x128xf32, #tpu.memory_space<vmem>>, vector<36x128xf32>
    %c14_351 = arith.constant 14 : index
    %c0_352 = arith.constant 0 : index
    %375 = vector.load %arg35[%c14_351, %c0_352] : memref<50x128xf32, #tpu.memory_space<vmem>>, vector<36x128xf32>
    %376 = arith.maximumf %374, %375 : vector<36x128xf32>
    %377 = arith.maximumf %373, %376 : vector<36x128xf32>
    %378 = arith.truncf %377 : vector<36x128xf32> to vector<36x128xbf16>
    %c0_353 = arith.constant 0 : index
    %c0_354 = arith.constant 0 : index
    %379 = vector.load %arg31[%c0_353, %c0_354] : memref<16x36xbf16, #tpu.memory_space<vmem>>, vector<16x36xbf16>
    %cst_355 = arith.constant dense<0.000000e+00> : vector<16x128xf32>
    %380 = tpu.matmul %379, %378, %cst_355 {dimension_numbers = #tpu.dot_dimension_numbers<[1], [0], [0], [1], [0, 0, 1, 1], [], []>} : vector<16x36xbf16>, vector<36x128xbf16>, vector<16x128xf32> -> vector<16x128xf32>
    %c5_356 = arith.constant 5 : index
    %c0_357 = arith.constant 0 : index
    %381 = vector.load %arg36[%c5_356, %c0_357] : memref<26x128xf32, #tpu.memory_space<vmem>>, vector<16x128xf32>
    tpu.vector_store %arg36[%c5_356, %c0_357], %380 {strides = array<i32>} : memref<26x128xf32, #tpu.memory_space<vmem>>, vector<16x128xf32>,
    %c0_358 = arith.constant 0 : index
    %c0_359 = arith.constant 0 : index
    %382 = vector.load %arg36[%c0_358, %c0_359] : memref<26x128xf32, #tpu.memory_space<vmem>>, vector<16x128xf32>
    %383 = arith.truncf %382 : vector<16x128xf32> to vector<16x128xbf16>
    %c0_360 = arith.constant 0 : index
    %c0_361 = arith.constant 0 : index
    %c0_362 = arith.constant 0 : index
    %384 = vector.load %arg20[%c0_360, %c0_361, %c0_362] : memref<9x128x256xbf16, #tpu.memory_space<vmem>>, vector<1x128x256xbf16>
    %385 = vector.shape_cast %384 : vector<1x128x256xbf16> to vector<128x256xbf16>
    %cst_363 = arith.constant dense<0.000000e+00> : vector<16x256xf32>
    %386 = tpu.matmul %383, %385, %cst_363 {dimension_numbers = #tpu.dot_dimension_numbers<[1], [0], [0], [1], [0, 0, 1, 1], [], []>} : vector<16x128xbf16>, vector<128x256xbf16>, vector<16x256xf32> -> vector<16x256xf32>
    %c1_364 = arith.constant 1 : index
    %c0_365 = arith.constant 0 : index
    %387 = vector.load %arg36[%c1_364, %c0_365] : memref<26x128xf32, #tpu.memory_space<vmem>>, vector<16x128xf32>
    %388 = arith.truncf %387 : vector<16x128xf32> to vector<16x128xbf16>
    %c1_366 = arith.constant 1 : index
    %c0_367 = arith.constant 0 : index
    %c0_368 = arith.constant 0 : index
    %389 = vector.load %arg20[%c1_366, %c0_367, %c0_368] : memref<9x128x256xbf16, #tpu.memory_space<vmem>>, vector<1x128x256xbf16>
    %390 = vector.shape_cast %389 : vector<1x128x256xbf16> to vector<128x256xbf16>
    %cst_369 = arith.constant dense<0.000000e+00> : vector<16x256xf32>
    %391 = tpu.matmul %388, %390, %cst_369 {dimension_numbers = #tpu.dot_dimension_numbers<[1], [0], [0], [1], [0, 0, 1, 1], [], []>} : vector<16x128xbf16>, vector<128x256xbf16>, vector<16x256xf32> -> vector<16x256xf32>
    %392 = arith.addf %386, %391 : vector<16x256xf32>
    %c2_370 = arith.constant 2 : index
    %c0_371 = arith.constant 0 : index
    %393 = vector.load %arg36[%c2_370, %c0_371] : memref<26x128xf32, #tpu.memory_space<vmem>>, vector<16x128xf32>
    %394 = arith.truncf %393 : vector<16x128xf32> to vector<16x128xbf16>
    %c2_372 = arith.constant 2 : index
    %c0_373 = arith.constant 0 : index
    %c0_374 = arith.constant 0 : index
    %395 = vector.load %arg20[%c2_372, %c0_373, %c0_374] : memref<9x128x256xbf16, #tpu.memory_space<vmem>>, vector<1x128x256xbf16>
    %396 = vector.shape_cast %395 : vector<1x128x256xbf16> to vector<128x256xbf16>
    %cst_375 = arith.constant dense<0.000000e+00> : vector<16x256xf32>
    %397 = tpu.matmul %394, %396, %cst_375 {dimension_numbers = #tpu.dot_dimension_numbers<[1], [0], [0], [1], [0, 0, 1, 1], [], []>} : vector<16x128xbf16>, vector<128x256xbf16>, vector<16x256xf32> -> vector<16x256xf32>
    %398 = arith.addf %392, %397 : vector<16x256xf32>
    %c4_376 = arith.constant 4 : index
    %c0_377 = arith.constant 0 : index
    %399 = vector.load %arg36[%c4_376, %c0_377] : memref<26x128xf32, #tpu.memory_space<vmem>>, vector<16x128xf32>
    %400 = arith.truncf %399 : vector<16x128xf32> to vector<16x128xbf16>
    %c3_378 = arith.constant 3 : index
    %c0_379 = arith.constant 0 : index
    %c0_380 = arith.constant 0 : index
    %401 = vector.load %arg20[%c3_378, %c0_379, %c0_380] : memref<9x128x256xbf16, #tpu.memory_space<vmem>>, vector<1x128x256xbf16>
    %402 = vector.shape_cast %401 : vector<1x128x256xbf16> to vector<128x256xbf16>
    %cst_381 = arith.constant dense<0.000000e+00> : vector<16x256xf32>
    %403 = tpu.matmul %400, %402, %cst_381 {dimension_numbers = #tpu.dot_dimension_numbers<[1], [0], [0], [1], [0, 0, 1, 1], [], []>} : vector<16x128xbf16>, vector<128x256xbf16>, vector<16x256xf32> -> vector<16x256xf32>
    %404 = arith.addf %398, %403 : vector<16x256xf32>
    %c5_382 = arith.constant 5 : index
    %c0_383 = arith.constant 0 : index
    %405 = vector.load %arg36[%c5_382, %c0_383] : memref<26x128xf32, #tpu.memory_space<vmem>>, vector<16x128xf32>
    %406 = arith.truncf %405 : vector<16x128xf32> to vector<16x128xbf16>
    %c4_384 = arith.constant 4 : index
    %c0_385 = arith.constant 0 : index
    %c0_386 = arith.constant 0 : index
    %407 = vector.load %arg20[%c4_384, %c0_385, %c0_386] : memref<9x128x256xbf16, #tpu.memory_space<vmem>>, vector<1x128x256xbf16>
    %408 = vector.shape_cast %407 : vector<1x128x256xbf16> to vector<128x256xbf16>
    %cst_387 = arith.constant dense<0.000000e+00> : vector<16x256xf32>
    %409 = tpu.matmul %406, %408, %cst_387 {dimension_numbers = #tpu.dot_dimension_numbers<[1], [0], [0], [1], [0, 0, 1, 1], [], []>} : vector<16x128xbf16>, vector<128x256xbf16>, vector<16x256xf32> -> vector<16x256xf32>
    %410 = arith.addf %404, %409 : vector<16x256xf32>
    %c6_388 = arith.constant 6 : index
    %c0_389 = arith.constant 0 : index
    %411 = vector.load %arg36[%c6_388, %c0_389] : memref<26x128xf32, #tpu.memory_space<vmem>>, vector<16x128xf32>
    %412 = arith.truncf %411 : vector<16x128xf32> to vector<16x128xbf16>
    %c5_390 = arith.constant 5 : index
    %c0_391 = arith.constant 0 : index
    %c0_392 = arith.constant 0 : index
    %413 = vector.load %arg20[%c5_390, %c0_391, %c0_392] : memref<9x128x256xbf16, #tpu.memory_space<vmem>>, vector<1x128x256xbf16>
    %414 = vector.shape_cast %413 : vector<1x128x256xbf16> to vector<128x256xbf16>
    %cst_393 = arith.constant dense<0.000000e+00> : vector<16x256xf32>
    %415 = tpu.matmul %412, %414, %cst_393 {dimension_numbers = #tpu.dot_dimension_numbers<[1], [0], [0], [1], [0, 0, 1, 1], [], []>} : vector<16x128xbf16>, vector<128x256xbf16>, vector<16x256xf32> -> vector<16x256xf32>
    %416 = arith.addf %410, %415 : vector<16x256xf32>
    %c8_394 = arith.constant 8 : index
    %c0_395 = arith.constant 0 : index
    %417 = vector.load %arg36[%c8_394, %c0_395] : memref<26x128xf32, #tpu.memory_space<vmem>>, vector<16x128xf32>
    %418 = arith.truncf %417 : vector<16x128xf32> to vector<16x128xbf16>
    %c6_396 = arith.constant 6 : index
    %c0_397 = arith.constant 0 : index
    %c0_398 = arith.constant 0 : index
    %419 = vector.load %arg20[%c6_396, %c0_397, %c0_398] : memref<9x128x256xbf16, #tpu.memory_space<vmem>>, vector<1x128x256xbf16>
    %420 = vector.shape_cast %419 : vector<1x128x256xbf16> to vector<128x256xbf16>
    %cst_399 = arith.constant dense<0.000000e+00> : vector<16x256xf32>
    %421 = tpu.matmul %418, %420, %cst_399 {dimension_numbers = #tpu.dot_dimension_numbers<[1], [0], [0], [1], [0, 0, 1, 1], [], []>} : vector<16x128xbf16>, vector<128x256xbf16>, vector<16x256xf32> -> vector<16x256xf32>
    %422 = arith.addf %416, %421 : vector<16x256xf32>
    %c9 = arith.constant 9 : index
    %c0_400 = arith.constant 0 : index
    %423 = vector.load %arg36[%c9, %c0_400] : memref<26x128xf32, #tpu.memory_space<vmem>>, vector<16x128xf32>
    %424 = arith.truncf %423 : vector<16x128xf32> to vector<16x128xbf16>
    %c7_401 = arith.constant 7 : index
    %c0_402 = arith.constant 0 : index
    %c0_403 = arith.constant 0 : index
    %425 = vector.load %arg20[%c7_401, %c0_402, %c0_403] : memref<9x128x256xbf16, #tpu.memory_space<vmem>>, vector<1x128x256xbf16>
    %426 = vector.shape_cast %425 : vector<1x128x256xbf16> to vector<128x256xbf16>
    %cst_404 = arith.constant dense<0.000000e+00> : vector<16x256xf32>
    %427 = tpu.matmul %424, %426, %cst_404 {dimension_numbers = #tpu.dot_dimension_numbers<[1], [0], [0], [1], [0, 0, 1, 1], [], []>} : vector<16x128xbf16>, vector<128x256xbf16>, vector<16x256xf32> -> vector<16x256xf32>
    %428 = arith.addf %422, %427 : vector<16x256xf32>
    %c10_405 = arith.constant 10 : index
    %c0_406 = arith.constant 0 : index
    %429 = vector.load %arg36[%c10_405, %c0_406] : memref<26x128xf32, #tpu.memory_space<vmem>>, vector<16x128xf32>
    %430 = arith.truncf %429 : vector<16x128xf32> to vector<16x128xbf16>
    %c8_407 = arith.constant 8 : index
    %c0_408 = arith.constant 0 : index
    %c0_409 = arith.constant 0 : index
    %431 = vector.load %arg20[%c8_407, %c0_408, %c0_409] : memref<9x128x256xbf16, #tpu.memory_space<vmem>>, vector<1x128x256xbf16>
    %432 = vector.shape_cast %431 : vector<1x128x256xbf16> to vector<128x256xbf16>
    %cst_410 = arith.constant dense<0.000000e+00> : vector<16x256xf32>
    %433 = tpu.matmul %430, %432, %cst_410 {dimension_numbers = #tpu.dot_dimension_numbers<[1], [0], [0], [1], [0, 0, 1, 1], [], []>} : vector<16x128xbf16>, vector<128x256xbf16>, vector<16x256xf32> -> vector<16x256xf32>
    %434 = arith.addf %428, %433 : vector<16x256xf32>
    %c0_411 = arith.constant 0 : index
    %c0_412 = arith.constant 0 : index
    %435 = vector.load %arg21[%c0_411, %c0_412] : memref<1x256xf32, #tpu.memory_space<vmem>>, vector<1x256xf32>
    %436 = vector.broadcast %435 : vector<1x256xf32> to vector<16x256xf32>
    %437 = arith.mulf %434, %436 : vector<16x256xf32>
    %c0_413 = arith.constant 0 : index
    %c0_414 = arith.constant 0 : index
    %438 = vector.load %arg22[%c0_413, %c0_414] : memref<1x256xf32, #tpu.memory_space<vmem>>, vector<1x256xf32>
    %439 = vector.broadcast %438 : vector<1x256xf32> to vector<16x256xf32>
    %440 = arith.addf %437, %439 : vector<16x256xf32>
    %cst_415 = arith.constant 0.000000e+00 : f32
    %441 = vector.broadcast %cst_415 : f32 to vector<16x256xf32>
    %442 = arith.maximumf %440, %441 : vector<16x256xf32>
    %c0_416 = arith.constant 0 : index
    %c0_417 = arith.constant 0 : index
    %443 = vector.load %arg28[%c0_416, %c0_417] : memref<16x1xf32, #tpu.memory_space<vmem>>, vector<16x1xf32>
    %444 = vector.broadcast %443 : vector<16x1xf32> to vector<16x256xf32>
    %445 = arith.mulf %442, %444 : vector<16x256xf32>
    %cst_418 = arith.constant dense<0.000000e+00> : vector<256xf32>
    %446 = vector.multi_reduction <add>, %445, %cst_418 [0] : vector<16x256xf32> to vector<256xf32>
    %447 = vector.shape_cast %446 : vector<256xf32> to vector<1x256xf32>
    %cst_419 = arith.constant 2.500000e-01 : f32
    %448 = vector.broadcast %cst_419 : f32 to vector<1x256xf32>
    %449 = arith.mulf %447, %448 : vector<1x256xf32>
    %c0_420 = arith.constant 0 : index
    %c0_421 = arith.constant 0 : index
    %450 = vector.load %arg23[%c0_420, %c0_421] : memref<256x10xf32, #tpu.memory_space<vmem>>, vector<256x10xf32>
    %cst_422 = arith.constant dense<0.000000e+00> : vector<1x10xf32>
    %451 = tpu.matmul %449, %450, %cst_422 {dimension_numbers = #tpu.dot_dimension_numbers<[1], [0], [0], [1], [0, 0, 1, 1], [], []>} : vector<1x256xf32>, vector<256x10xf32>, vector<1x10xf32> -> vector<1x10xf32>
    %c0_423 = arith.constant 0 : index
    %c0_424 = arith.constant 0 : index
    %452 = vector.load %arg24[%c0_423, %c0_424] : memref<1x10xf32, #tpu.memory_space<vmem>>, vector<1x10xf32>
    %453 = arith.addf %451, %452 : vector<1x10xf32>
    %c0_425 = arith.constant 0 : index
    %c0_426 = arith.constant 0 : index
    %c0_427 = arith.constant 0 : index
    %454 = vector.load %arg32[%c0_425, %c0_426, %c0_427] : memref<1x1x10xf32, #tpu.memory_space<vmem>>, vector<1x1x10xf32>
    %455 = vector.shape_cast %454 : vector<1x1x10xf32> to vector<1x10xf32>
    %456 = vector.shape_cast %453 : vector<1x10xf32> to vector<1x1x10xf32>
    tpu.vector_store %arg32[%c0_425, %c0_426, %c0_427], %456 {strides = array<i32>} : memref<1x1x10xf32, #tpu.memory_space<vmem>>, vector<1x1x10xf32>,
    return
  }
  func.func @transform_0(%arg0: i32) -> (i32, i32, i32) {
    %c0_i32 = arith.constant 0 : i32
    %c0_i32_0 = arith.constant 0 : i32
    %c0_i32_1 = arith.constant 0 : i32
    return %arg0, %c0_i32, %c0_i32_0 : i32, i32, i32
  }
  func.func @transform_1(%arg0: i32) -> (i32, i32) {
    %c0_i32 = arith.constant 0 : i32
    %c0_i32_0 = arith.constant 0 : i32
    %c0_i32_1 = arith.constant 0 : i32
    return %c0_i32, %c0_i32_0 : i32, i32
  }
  func.func @transform_2(%arg0: i32) -> (i32, i32) {
    %c0_i32 = arith.constant 0 : i32
    %c0_i32_0 = arith.constant 0 : i32
    %c0_i32_1 = arith.constant 0 : i32
    return %c0_i32, %c0_i32_0 : i32, i32
  }
  func.func @transform_3(%arg0: i32) -> (i32, i32) {
    %c0_i32 = arith.constant 0 : i32
    %c0_i32_0 = arith.constant 0 : i32
    %c0_i32_1 = arith.constant 0 : i32
    return %c0_i32, %c0_i32_0 : i32, i32
  }
  func.func @transform_4(%arg0: i32) -> (i32, i32, i32) {
    %c0_i32 = arith.constant 0 : i32
    %c0_i32_0 = arith.constant 0 : i32
    %c0_i32_1 = arith.constant 0 : i32
    %c0_i32_2 = arith.constant 0 : i32
    return %c0_i32, %c0_i32_0, %c0_i32_1 : i32, i32, i32
  }
  func.func @transform_5(%arg0: i32) -> (i32, i32) {
    %c0_i32 = arith.constant 0 : i32
    %c0_i32_0 = arith.constant 0 : i32
    %c0_i32_1 = arith.constant 0 : i32
    return %c0_i32, %c0_i32_0 : i32, i32
  }
  func.func @transform_6(%arg0: i32) -> (i32, i32) {
    %c0_i32 = arith.constant 0 : i32
    %c0_i32_0 = arith.constant 0 : i32
    %c0_i32_1 = arith.constant 0 : i32
    return %c0_i32, %c0_i32_0 : i32, i32
  }
  func.func @transform_7(%arg0: i32) -> (i32, i32, i32) {
    %c0_i32 = arith.constant 0 : i32
    %c0_i32_0 = arith.constant 0 : i32
    %c0_i32_1 = arith.constant 0 : i32
    %c0_i32_2 = arith.constant 0 : i32
    return %c0_i32, %c0_i32_0, %c0_i32_1 : i32, i32, i32
  }
  func.func @transform_8(%arg0: i32) -> (i32, i32) {
    %c0_i32 = arith.constant 0 : i32
    %c0_i32_0 = arith.constant 0 : i32
    %c0_i32_1 = arith.constant 0 : i32
    return %c0_i32, %c0_i32_0 : i32, i32
  }
  func.func @transform_9(%arg0: i32) -> (i32, i32) {
    %c0_i32 = arith.constant 0 : i32
    %c0_i32_0 = arith.constant 0 : i32
    %c0_i32_1 = arith.constant 0 : i32
    return %c0_i32, %c0_i32_0 : i32, i32
  }
  func.func @transform_10(%arg0: i32) -> (i32, i32, i32) {
    %c0_i32 = arith.constant 0 : i32
    %c0_i32_0 = arith.constant 0 : i32
    %c0_i32_1 = arith.constant 0 : i32
    %c0_i32_2 = arith.constant 0 : i32
    return %c0_i32, %c0_i32_0, %c0_i32_1 : i32, i32, i32
  }
  func.func @transform_11(%arg0: i32) -> (i32, i32) {
    %c0_i32 = arith.constant 0 : i32
    %c0_i32_0 = arith.constant 0 : i32
    %c0_i32_1 = arith.constant 0 : i32
    return %c0_i32, %c0_i32_0 : i32, i32
  }
  func.func @transform_12(%arg0: i32) -> (i32, i32) {
    %c0_i32 = arith.constant 0 : i32
    %c0_i32_0 = arith.constant 0 : i32
    %c0_i32_1 = arith.constant 0 : i32
    return %c0_i32, %c0_i32_0 : i32, i32
  }
  func.func @transform_13(%arg0: i32) -> (i32, i32, i32) {
    %c0_i32 = arith.constant 0 : i32
    %c0_i32_0 = arith.constant 0 : i32
    %c0_i32_1 = arith.constant 0 : i32
    %c0_i32_2 = arith.constant 0 : i32
    return %c0_i32, %c0_i32_0, %c0_i32_1 : i32, i32, i32
  }
  func.func @transform_14(%arg0: i32) -> (i32, i32) {
    %c0_i32 = arith.constant 0 : i32
    %c0_i32_0 = arith.constant 0 : i32
    %c0_i32_1 = arith.constant 0 : i32
    return %c0_i32, %c0_i32_0 : i32, i32
  }
  func.func @transform_15(%arg0: i32) -> (i32, i32) {
    %c0_i32 = arith.constant 0 : i32
    %c0_i32_0 = arith.constant 0 : i32
    %c0_i32_1 = arith.constant 0 : i32
    return %c0_i32, %c0_i32_0 : i32, i32
  }
  func.func @transform_16(%arg0: i32) -> (i32, i32, i32) {
    %c0_i32 = arith.constant 0 : i32
    %c0_i32_0 = arith.constant 0 : i32
    %c0_i32_1 = arith.constant 0 : i32
    %c0_i32_2 = arith.constant 0 : i32
    return %c0_i32, %c0_i32_0, %c0_i32_1 : i32, i32, i32
  }
  func.func @transform_17(%arg0: i32) -> (i32, i32) {
    %c0_i32 = arith.constant 0 : i32
    %c0_i32_0 = arith.constant 0 : i32
    %c0_i32_1 = arith.constant 0 : i32
    return %c0_i32, %c0_i32_0 : i32, i32
  }
  func.func @transform_18(%arg0: i32) -> (i32, i32) {
    %c0_i32 = arith.constant 0 : i32
    %c0_i32_0 = arith.constant 0 : i32
    %c0_i32_1 = arith.constant 0 : i32
    return %c0_i32, %c0_i32_0 : i32, i32
  }
  func.func @transform_19(%arg0: i32) -> (i32, i32, i32) {
    %c0_i32 = arith.constant 0 : i32
    %c0_i32_0 = arith.constant 0 : i32
    %c0_i32_1 = arith.constant 0 : i32
    %c0_i32_2 = arith.constant 0 : i32
    return %c0_i32, %c0_i32_0, %c0_i32_1 : i32, i32, i32
  }
  func.func @transform_20(%arg0: i32) -> (i32, i32) {
    %c0_i32 = arith.constant 0 : i32
    %c0_i32_0 = arith.constant 0 : i32
    %c0_i32_1 = arith.constant 0 : i32
    return %c0_i32, %c0_i32_0 : i32, i32
  }
  func.func @transform_21(%arg0: i32) -> (i32, i32) {
    %c0_i32 = arith.constant 0 : i32
    %c0_i32_0 = arith.constant 0 : i32
    %c0_i32_1 = arith.constant 0 : i32
    return %c0_i32, %c0_i32_0 : i32, i32
  }
  func.func @transform_22(%arg0: i32) -> (i32, i32) {
    %c0_i32 = arith.constant 0 : i32
    %c0_i32_0 = arith.constant 0 : i32
    %c0_i32_1 = arith.constant 0 : i32
    return %c0_i32, %c0_i32_0 : i32, i32
  }
  func.func @transform_23(%arg0: i32) -> (i32, i32) {
    %c0_i32 = arith.constant 0 : i32
    %c0_i32_0 = arith.constant 0 : i32
    %c0_i32_1 = arith.constant 0 : i32
    return %c0_i32, %c0_i32_0 : i32, i32
  }
  func.func @transform_24(%arg0: i32) -> (i32, i32) {
    %c0_i32 = arith.constant 0 : i32
    %c0_i32_0 = arith.constant 0 : i32
    %c0_i32_1 = arith.constant 0 : i32
    return %c0_i32, %c0_i32_0 : i32, i32
  }
  func.func @transform_25(%arg0: i32) -> (i32, i32) {
    %c0_i32 = arith.constant 0 : i32
    %c0_i32_0 = arith.constant 0 : i32
    %c0_i32_1 = arith.constant 0 : i32
    return %c0_i32, %c0_i32_0 : i32, i32
  }
  func.func @transform_26(%arg0: i32) -> (i32, i32) {
    %c0_i32 = arith.constant 0 : i32
    %c0_i32_0 = arith.constant 0 : i32
    %c0_i32_1 = arith.constant 0 : i32
    return %c0_i32, %c0_i32_0 : i32, i32
  }
  func.func @transform_27(%arg0: i32) -> (i32, i32) {
    %c0_i32 = arith.constant 0 : i32
    %c0_i32_0 = arith.constant 0 : i32
    %c0_i32_1 = arith.constant 0 : i32
    return %c0_i32, %c0_i32_0 : i32, i32
  }
  func.func @transform_28(%arg0: i32) -> (i32, i32) {
    %c0_i32 = arith.constant 0 : i32
    %c0_i32_0 = arith.constant 0 : i32
    %c0_i32_1 = arith.constant 0 : i32
    return %c0_i32, %c0_i32_0 : i32, i32
  }
  func.func @transform_29(%arg0: i32) -> (i32, i32) {
    %c0_i32 = arith.constant 0 : i32
    %c0_i32_0 = arith.constant 0 : i32
    %c0_i32_1 = arith.constant 0 : i32
    return %c0_i32, %c0_i32_0 : i32, i32
  }
  func.func @transform_30(%arg0: i32) -> (i32, i32) {
    %c0_i32 = arith.constant 0 : i32
    %c0_i32_0 = arith.constant 0 : i32
    %c0_i32_1 = arith.constant 0 : i32
    return %c0_i32, %c0_i32_0 : i32, i32
  }
  func.func @transform_31(%arg0: i32) -> (i32, i32, i32) {
    %c0_i32 = arith.constant 0 : i32
    %c0_i32_0 = arith.constant 0 : i32
    %c0_i32_1 = arith.constant 0 : i32
    return %arg0, %c0_i32, %c0_i32_0 : i32, i32, i32
  }
}

</mosaic_0001>

<bundles_post_ra>
// kernel: _lambda_.1
= control target key start
LH: loop header
LB: loop body
LE: loop exit
PB: predicated region body
PF: predicated region fallthrough
CT: control target
= control target key end

     0   :  { %s19751_s6 = smov 1   ;;  %s19752_s10 = smov 2   ;;  %s22936_s0 = inlined_call_operand.smem [shape: u32[32], index: -1, kind: input, shape index: {}] }
   0x1   :  { %s19795_s5 = sld [smem:[%s22936_s0]]   ;;  %s19753_s14 = smov 3  }
   0x2   :  { %s19800_s9 = sld [smem:[%s22936_s0 + %s19751_s6]]   ;;  %s19754_s18 = smov 4  }
   0x3   :  { %s19805_s13 = sld [smem:[%s22936_s0 + %s19752_s10]]   ;;  %s19755_s22 = smov 5  }
   0x4   :  { %s19810_s17 = sld [smem:[%s22936_s0 + %s19753_s14]]   ;;  %s19756_s26 = smov 6  }
   0x5   :  { %s19815_s21 = sld [smem:[%s22936_s0 + %s19754_s18]]   ;;  %s19757_s30 = smov 7  }
   0x6   :  { %s19820_s25 = sld [smem:[%s22936_s0 + %s19755_s22]]   ;;  %s19758_s4 = smov 8  }
   0x7   :  { %22948 = sst [smem:[#allocation9_spill]] %s19795_s5  ;;  %s19759_s10 = smov 9  }
   0x8   :  { %22949 = sst [smem:[#allocation10_spill]] %s19800_s9  ;;  %s19760_s15 = smov 10  }
   0x9   :  { %s19825_s29 = sld [smem:[%s22936_s0 + %s19756_s26]]   ;;  %s19761_s20 = smov 11  }
   0xa   :  { %s19830_s3 = sld [smem:[%s22936_s0 + %s19757_s30]]   ;;  %s19762_s26 = smov 12  }
   0xb   :  { %s19835_s8 = sld [smem:[%s22936_s0 + %s19758_s4]]   ;;  %s19763_s1 = smov 13  }
   0xc   :  { %s19840_s14 = sld [smem:[%s22936_s0 + %s19759_s10]]   ;;  %s19764_s7 = smov 14  }
   0xd   :  { %s19845_s19 = sld [smem:[%s22936_s0 + %s19760_s15]]   ;;  %s19765_s15 = smov 15  }
   0xe   :  { %s19850_s24 = sld [smem:[%s22936_s0 + %s19761_s20]]   ;;  %s19766_s22 = smov 16  }
   0xf   :  { %s19855_s30 = sld [smem:[%s22936_s0 + %s19762_s26]]   ;;  %s19767_s28 = smov 17  }
  0x10   :  { %22950 = sst [smem:[#allocation11_spill]] %s19830_s3 }
  0x11   :  { %22951 = sst [smem:[#allocation12_spill]] %s19835_s8 }
  0x12   :  { %22952 = sst [smem:[#allocation13_spill]] %s19840_s14 }
  0x13   :  { %s19860_s6 = sld [smem:[%s22936_s0 + %s19763_s1]]  }
  0x14   :  { %22953 = sst [smem:[#allocation14_spill]] %s19850_s24 }
  0x15   :  { %22954 = sst [smem:[#allocation15_spill]] %s19855_s30 }
  0x16   :  { %s19865_s12 = sld [smem:[%s22936_s0 + %s19764_s7]]   ;;  %s19768_s7 = smov 18  }
  0x17   :  { %s19870_s20 = sld [smem:[%s22936_s0 + %s19765_s15]]   ;;  %s19769_s15 = smov 19  }
  0x18   :  { %s19875_s27 = sld [smem:[%s22936_s0 + %s19766_s22]]   ;;  %s19770_s22 = smov 20  }
  0x19   :  { %22955 = sst [smem:[#allocation16_spill]] %s19860_s6 }
  0x1a   :  { %s19880_s4 = sld [smem:[%s22936_s0 + %s19767_s28]]   ;;  %s19771_s28 = smov 21  }
  0x1c   :  { %22956 = sst [smem:[#allocation17_spill]] %s19865_s12 }
  0x1d   :  { %22957 = sst [smem:[#allocation18_spill]] %s19870_s20 }
  0x1e   :  { %22958 = sst [smem:[#allocation19_spill]] %s19875_s27 }
  0x1f   :  { %s19885_s12 = sld [smem:[%s22936_s0 + %s19768_s7]]   ;;  %s19772_s7 = smov 22  }
  0x20   :  { %22959 = sst [smem:[#allocation20_spill]] %s19880_s4 }
  0x21   :  { %s19890_s20 = sld [smem:[%s22936_s0 + %s19769_s15]]   ;;  %s19773_s15 = smov 23  }
  0x22   :  { %s19895_s27 = sld [smem:[%s22936_s0 + %s19770_s22]]   ;;  %s19774_s22 = smov 24  }
  0x23   :  { %s19900_s4 = sld [smem:[%s22936_s0 + %s19771_s28]]   ;;  %s19775_s28 = smov 25  }
  0x25   :  { %22960 = sst [smem:[#allocation21_spill]] %s19885_s12 }
  0x26   :  { %s19905_s12 = sld [smem:[%s22936_s0 + %s19772_s7]]   ;;  %s19776_s7 = smov 26  }
  0x27   :  { %22961 = sst [smem:[#allocation22_spill]] %s19890_s20 }
  0x28   :  { %22962 = sst [smem:[#allocation23_spill]] %s19895_s27 }
  0x29   :  { %22963 = sst [smem:[#allocation24_spill]] %s19900_s4 }
  0x2a   :  { %s19910_s20 = sld [smem:[%s22936_s0 + %s19773_s15]]   ;;  %s19777_s15 = smov 27  }
  0x2b   :  { %s19915_s27 = sld [smem:[%s22936_s0 + %s19774_s22]]   ;;  %s19778_s22 = smov 28  }
  0x2c   :  { %22964 = sst [smem:[#allocation25_spill]] %s19905_s12 }
  0x2d   :  { %s19920_s4 = sld [smem:[%s22936_s0 + %s19775_s28]]   ;;  %s19779_s28 = smov 29  }
  0x2e   :  { %s19925_s12 = sld [smem:[%s22936_s0 + %s19776_s7]]   ;;  %s19780_s7 = smov 30  }
  0x2f   :  { %s19935_s6 = sld [smem:[%s22936_s0 + %s19778_s22]]  }
  0x30   :  { %22965 = sst [smem:[#allocation26_spill]] %s19910_s20 }
  0x31   :  { %s19930_s20 = sld [smem:[%s22936_s0 + %s19777_s15]]   ;;  %s19781_s15 = smov 31  }
  0x32   :  { %s19940_s30 = sld [smem:[%s22936_s0 + %s19779_s28]]  }
  0x33   :  { %22966 = sst [smem:[#allocation27_spill]] %s19920_s4 }
  0x34   :  { %s19945_s24 = sld [smem:[%s22936_s0 + %s19780_s7]]  }
  0x35   :  { %22967 = sst [smem:[#allocation28_spill]] %s19935_s6 }
  0x36   :  { %s19950_s14 = sld [smem:[%s22936_s0 + %s19781_s15]]  }
  0x37   :  { %68 = vsyncpa [#allocation7], 0 }
  0x38   :  { %70 = vsyncpa [#allocation7 + $0x1], 0  ;;  %s19952_s22 = smov 0   ;;  %s19954_s23 = smov 0  }
  0x39   :  { %s19956_s26 = smov 0   ;;  %s19958_s28 = smov 0  }
  0x3a LB: > { %s22968_s9 = sld [smem:[#allocation10_spill]]  ;;  %s22969_s6 = sld [smem:[#allocation28_spill]]  ;;  %s19749_s28 = sphi %s19958_s28, %s22993_s28   ;;  %s19745_s26 = sphi %s19956_s26, %s22992_s26   ;;  %s19741_s23 = sphi %s19954_s23, %s22991_s23   ;;  %s19737_s22 = sphi %s19952_s22, %s22990_s22  }
  0x3b   : > { %s22970_s4 = sld [smem:[#allocation27_spill]]  ;;  %s19973_s0 = sadd.s32 4294967295, %s19749_s28  }
  0x3c   : > { %s22971_s3 = sld [smem:[#allocation11_spill]]  ;;  %s13867_s1 = sadd.s32 4294967294, %s19749_s28  }
  0x3d   : > { %s19977_s2 = sadd.s32 1, %s19749_s28   ;;  %s739_s7 = sadd.s32 1, %s19745_s26 }
  0x3e   : > { %s736_s10 = ssub.s32 %s19749_s28, %s19977_s2  ;;  %p749_p0 = scmp.ne.s32.totalorder %s19745_s26, %s19741_s23 }
  0x3f   : > { %p737_p1 = scmp.eq.s32.totalorder %s736_s10, 0  ;;  %p750_p2 = scmp.eq.s32.totalorder %s19973_s0, 1 }
  0x40   : > { %p755_p3 = scmp.ne.s32.totalorder %s19741_s23, %s19737_s22  ;;  %p756_p4 = scmp.eq.s32.totalorder %s13867_s1, 1 }
  0x41   : > { %s19988_s11 = scalar_select %p737_p1, %s19745_s26, %s739_s7  }
  0x42   : > { %p19990_p5 = por %p750_p2, %p749_p0  ;;  %p19994_p6 = por %p756_p4, %p755_p3 }
  0x43   : > { %p13870_p7 = scmp.ge.s32.totalorder %s19749_s28, 1  ;;  %p872_p8 = scmp.lt.s32.totalorder %s19749_s28, 3 }
  0x45   : > { %p873_p9 = pnand %p13870_p7, %p872_p8 }
  0x46   : > { %v20001_v0 = vld [vmem:[%s19915_s27 + $0x10] sm:$0xff] (!%p873_p9)  ;;  %v20004_v1 = vld [vmem:[%s19915_s27] sm:$0xff] (!%p873_p9)  ;;  %v19782_v2 = vmov (!%p873_p9), 0   ;;  %v19783_v3 = vmov (!%p873_p9), 0.0   ;;  %vm1257_vm0 = vcmask (!%p873_p9), 1044480   ;;  %vm1258_vm1 = vcmask (!%p873_p9), 1045504  }
  0x47   : > { %876 = sbr.rel (%p873_p9) target bundleno = 5838 (0x16ce), region = 144  ;;  %19226 = vset.pattern.permute.xlu1 (!%p873_p9), %v19782_v2  ;;  %19225 = vset.pattern.permute.xlu0 (!%p873_p9), %v19782_v2  ;;  %1023 = vst [vmem:[#allocation4] sm:$0xff] (!%p873_p9), %v19783_v3  ;;  %1024 = vst [vmem:[#allocation4 + $0x8] sm:$0xff] (!%p873_p9), %v19783_v3  ;;  %v19227_v4 = vld [vmem:[%s22968_s9] sm:$0xff] (!%p873_p9)   ;;  %v20025_v5 = vld [vmem:[%s19915_s27 + $0x18] sm:$0xff] (!%p873_p9)  ;;  %v19784_v8 = vmov (!%p873_p9), 65535  }
  0x48   : > { %1025 = vst [vmem:[#allocation4 + $0x10] sm:$0xff] (!%p873_p9), %v19783_v3  ;;  %1026 = vst [vmem:[#allocation4 + $0x18] sm:$0xff] (!%p873_p9), %v19783_v3  ;;  %1654 = vperm.xlu1 (!%p873_p9), %19226, %v20001_v0   ;;  %1644 = vperm.xlu0 (!%p873_p9), %19225, %v20004_v1   ;;  %v20028_v6 = vld [vmem:[%s19915_s27 + $0x8] sm:$0xff] (!%p873_p9)  ;;  %v1259_v9 = vsel (!%p873_p9), %vm1257_vm0, 4294967295, %v19784_v8  ;;  %p951_p10 = scmp.lt.s32.totalorder (!%p873_p9), %s19973_s0, 1  ;;  %s22974_s5 = sld [smem:[#allocation9_spill]] (!%p873_p9) }
  0x49   : > { %1027 = vst [vmem:[#allocation4 + $0x20] sm:$0xff] (!%p873_p9), %v19783_v3  ;;  %1028 = vst [vmem:[#allocation4 + $0x28] sm:$0xff] (!%p873_p9), %v19783_v3  ;;  %15772 = vmatprep.subr.bf16.mxu0 (!%p873_p9), %v19783_v3  ;;  %17802 = vmatprep.subr.bf16.mxu1 (!%p873_p9), %v19783_v3  ;;  %v19228_v7 = vld [vmem:[%s22968_s9 + $0x8] sm:$0x3f] (!%p873_p9)   ;;  %v1260_v10 = vsel (!%p873_p9), %vm1258_vm1, %v1259_v9, 0  ;;  %vm19785_vm2 = vmmov (!%p873_p9), 0  }
  0x4a   : > { %1029 = vst [vmem:[#allocation4 + $0x30] sm:$0x3] (!%p873_p9), %v19783_v3  ;;  %1030 = vst [vmem:[#allocation5] sm:$0xff] (!%p873_p9), %v19783_v3  ;;  %15773 = vmatpush3.bf16.msra.mxu0 (!%p873_p9), %v19227_v4  ;;  %17804 = vmatpush3.bf16.msra.mxu1 (!%p873_p9), %v19227_v4  ;;  %v1262_v11 = vand.u32 (!%p873_p9), %v19228_v7, %v1260_v10  ;;  %v20042_v12 = vld [vmem:[%s19915_s27 + $0x28] sm:$0xff] (!%p873_p9)  ;;  %v20045_v13 = vld [vmem:[%s19915_s27 + $0x20] sm:$0xff] (!%p873_p9)  ;;  %vm1193_vm3 = vcmask (!%p873_p9), 220160  }
  0x4b   : > { %1031 = vst [vmem:[#allocation5 + $0x8] sm:$0xff] (!%p873_p9), %v19783_v3  ;;  %1032 = vst [vmem:[#allocation5 + $0x10] sm:$0xff] (!%p873_p9), %v19783_v3  ;;  %15774 = vmatprep.subr.bf16.mxu0 (!%p873_p9), %v19783_v3  ;;  %17803 = vmatprep.subr.bf16.mxu1 (!%p873_p9), %v19783_v3  ;;  %v20054_v14 = vld [vmem:[%s19915_s27 + $0x38] sm:$0xff] (!%p873_p9)  ;;  %v20059_v17 = vld [vmem:[%s19915_s27 + $0x30] sm:$0xff] (!%p873_p9)  ;;  %vm957_vm4 = vcmask (!%p873_p9), 261120   ;;  %vm1928_vm5 = vcmask (!%p873_p9), 257024  }
  0x4c   : > { %1033 = vst [vmem:[#allocation5 + $0x18] sm:$0x3] (!%p873_p9), %v19783_v3  ;;  %1659 = vperm.xlu1 (!%p873_p9), %19226, %v20025_v5   ;;  %1649 = vperm.xlu0 (!%p873_p9), %19225, %v20028_v6   ;;  %v20068_v18 = vld [vmem:[%s19915_s27 + $0x48] sm:$0xff] (!%p873_p9)  ;;  %v20071_v19 = vld [vmem:[%s19915_s27 + $0x40] sm:$0xff] (!%p873_p9)  ;;  %v20079_v21 = vld [vmem:[%s19915_s27 + $0x58] sm:$0xff] (!%p873_p9)  ;;  %vm1003_vm6 = vcmask (!%p873_p9), 254976  }
  0x4d   : > { %15776 = vmatprep.mubr.msk.bf16.mxu0 (!%p873_p9), %vm19785_vm2, %v19783_v3  ;;  %15856 = vmatprep.mubr.msk.bf16.mxu1 (!%p873_p9), %vm19785_vm2, %v19783_v3  ;;  %v20082_v22 = vld [vmem:[%s19915_s27 + $0x50] sm:$0xff] (!%p873_p9)  ;;  %v20090_v23 = vld [vmem:[%s19915_s27 + $0x68] sm:$0xff] (!%p873_p9)  ;;  %v20093_v24 = vld [vmem:[%s19915_s27 + $0x60] sm:$0xff] (!%p873_p9)  ;;  %960 = vst.msk [vmem:[#allocation2 + $0x10] sm:$0xff] (!%p873_p9), %vm957_vm4, %v19783_v3  ;;  %vm6215_vm7 = vcmask (!%p873_p9), 1041408   ;;  %vm6193_vm8 = vcmask (!%p873_p9), 556032  }
  0x4e   : > { %s952_s18 = scalar_select %p951_p10, %s19973_s0, 1  ;;  %15775 = vmatpush3.bf16.msra.mxu0 %v1262_v11  ;;  %17805 = vmatpush3.bf16.msra.mxu1 %v1262_v11  ;;  %v20099_v26 = vld [vmem:[%s19915_s27 + $0x78] sm:$0xff]  ;;  %v20102_v27 = vld [vmem:[%s19915_s27 + $0x70] sm:$0xff]  ;;  %v20110_v28 = vld [vmem:[%s19915_s27 + $0x88] sm:$0xff]  ;;  %961 = vst.msk [vmem:[#allocation2 + $0x18] sm:$0xff] %vm957_vm4, %v19783_v3  ;;  %vm1005_vm9 = vcmask 523264  }
  0x4f   : > { %15860 = vmatprep.subr.bf16.mxu1 %v19783_v3  ;;  %v20113_v29 = vld [vmem:[%s19915_s27 + $0x80] sm:$0xff]  ;;  %v20119_v31 = vld [vmem:[%s19915_s27 + $0x98] sm:$0xff]  ;;  %v20122_v32 = vld [vmem:[%s19915_s27 + $0x90] sm:$0xff]  ;;  %958 = vst.msk [vmem:[#allocation2] sm:$0xff] %vm957_vm4, %v19783_v3  ;;  %vm1021_vm10 = vcmask 517120   ;;  %s22975_s8 = sld [smem:[#allocation12_spill]] }
  0x50   : > { %s19150_s1 = smul.u32 164, %s952_s18  ;;  %1669 = vperm.xlu1 %19226, %v20042_v12   ;;  %1664 = vperm.xlu0 %19225, %v20045_v13   ;;  %v20129_v33 = vld [vmem:[%s19915_s27 + $0xa8] sm:$0xff]  ;;  %v20132_v34 = vld [vmem:[%s19915_s27 + $0xa0] sm:$0xff]  ;;  %v20138_v36 = vld [vmem:[%s19915_s27 + $0xb8] sm:$0xff]  ;;  %959 = vst.msk [vmem:[#allocation2 + $0x8] sm:$0xff] %vm957_vm4, %v19783_v3  ;;  %s22976_s10 = sld [smem:[#allocation13_spill]] }
  0x51   : > { %v20141_v37 = vld [vmem:[%s19915_s27 + $0xb0] sm:$0xff]  ;;  %v20149_v38 = vld [vmem:[%s19915_s27 + $0xc8] sm:$0xff]  ;;  %v20152_v39 = vld [vmem:[%s19915_s27 + $0xc0] sm:$0xff]  ;;  %962 = vst.msk [vmem:[#allocation2 + $0x20] sm:$0xff] %vm957_vm4, %v19783_v3  ;;  %vm7968_vm11 = vcmask 519168   ;;  %s22977_s18 = sld [smem:[#allocation14_spill]] }
  0x52   : > { %s20051_s7 = scalar_lea.vmem %s22974_s5, %s19150_s1  ;;  %v20158_v41 = vld [vmem:[%s19915_s27 + $0xd8] sm:$0xff]  ;;  %v20161_v42 = vld [vmem:[%s19915_s27 + $0xd0] sm:$0xff]  ;;  %v20169_v43 = vld [vmem:[%s19915_s27 + $0xe8] sm:$0xff]  ;;  %963 = vst.msk [vmem:[#allocation2 + $0x28] sm:$0xff] %vm957_vm4, %v19783_v3  ;;  %s22978_s1 = sld [smem:[#allocation15_spill]]  ;;  %vm9791_vm12 = vcmask 818176  }
  0x53   : > { %v19229_v15 = vld [vmem:[%s20051_s7] sm:$0xff]   ;;  %v19231_v20 = vld [vmem:[%s20051_s7 + $0x8] sm:$0xff]   ;;  %v19232_v25 = vld [vmem:[%s20051_s7 + $0x10] sm:$0xff]   ;;  %964 = vst.msk [vmem:[#allocation2 + $0x30] sm:$0xff] %vm957_vm4, %v19783_v3  ;;  %vm12231_vm13 = vcmask 293888   ;;  %vm13766_vm14 = vcmask 73728  }
  0x54   : > { %v19230_v16 = vld [vmem:[%s20051_s7 + $0xa0] ss:$0 sps:$4 sm:$0x33]   ;;  %15777 = vmatmul.mubr.msk.bf16.vlgmr.msra.gmra.mrb[0].mxu0 %vm1193_vm3, %v19229_v15  ;;  %1679 = vperm.xlu1 %19226, %v20054_v14   ;;  %v19233_v30 = vld [vmem:[%s20051_s7 + $0x18] sm:$0xff]   ;;  %v19235_v40 = vld [vmem:[%s20051_s7 + $0x28] sm:$0xff]   ;;  %965 = vst.msk [vmem:[#allocation2 + $0x38] sm:$0xff] %vm957_vm4, %v19783_v3 }
  0x55   : > { %15857 = vmatmul.mubr.msk.bf16.vlgmr.msra.gmra.mrb[0].mxu1 %vm1193_vm3, %v19230_v16  ;;  %1674 = vperm.xlu0 %19225, %v20059_v17   ;;  %v19234_v35 = vld [vmem:[%s20051_s7 + $0x20] sm:$0xff]   ;;  %v19236_v45 = vld [vmem:[%s20051_s7 + $0x30] sm:$0xff]   ;;  %v20178_v46 = vld [vmem:[%s19915_s27 + $0xf8] sm:$0xff]  ;;  %966 = vst.msk [vmem:[#allocation2 + $0x40] sm:$0xff] %vm957_vm4, %v19783_v3 }
  0x56   : > { %15780 = vmatprep.mubr.msk.bf16.mxu0 %vm19785_vm2, %v19783_v3  ;;  %15864 = vmatprep.mubr.msk.bf16.mxu1 %vm19785_vm2, %v19783_v3  ;;  %v20172_v44 = vld [vmem:[%s19915_s27 + $0xe0] sm:$0xff]  ;;  %v20181_v47 = vld [vmem:[%s19915_s27 + $0xf0] sm:$0xff]  ;;  %v20186_v48 = vld [vmem:[%s19915_s27 + $0x108] sm:$0xff]  ;;  %967 = vst.msk [vmem:[#allocation2 + $0x48] sm:$0xff] %vm957_vm4, %v19783_v3 }
  0x57   : > { %v20192_v49 = vld [vmem:[%s19915_s27 + $0x100] sm:$0xff]  ;;  %v19237_v50 = vld [vmem:[%s20051_s7 + $0x38] sm:$0xff]   ;;  %v20201_v52 = vld [vmem:[%s19915_s27 + $0x110] sm:$0xff]  ;;  %968 = vst.msk [vmem:[#allocation2 + $0x50] sm:$0xff] %vm957_vm4, %v19783_v3 }
  0x58   : > { %1689 = vperm.xlu1 %19226, %v20068_v18   ;;  %v20197_v51 = vld [vmem:[%s19915_s27 + $0x118] sm:$0xff]  ;;  %v20206_v53 = vld [vmem:[%s19915_s27 + $0x128] sm:$0xff]  ;;  %v20212_v54 = vld [vmem:[%s19915_s27 + $0x120] sm:$0xff]  ;;  %969 = vst.msk [vmem:[#allocation2 + $0x58] sm:$0xff] %vm957_vm4, %v19783_v3 }
  0x59   : > { %1684 = vperm.xlu0 %19225, %v20071_v19   ;;  %v19238_v55 = vld [vmem:[%s20051_s7 + $0x40] sm:$0xff]   ;;  %v20217_v56 = vld [vmem:[%s19915_s27 + $0x138] sm:$0xff]  ;;  %v20221_v57 = vld [vmem:[%s19915_s27 + $0x130] sm:$0xff]  ;;  %970 = vst.msk [vmem:[#allocation2 + $0x60] sm:$0xff] %vm957_vm4, %v19783_v3 }
  0x5a   : > { %v1641_v58 = vld [vmem:[%s19915_s27 + $0x140] sm:$0xf]  ;;  %v19239_v59 = vld [vmem:[%s20051_s7 + $0x48] sm:$0xff]   ;;  %v19240_v60 = vld [vmem:[%s20051_s7 + $0x50] sm:$0xff]   ;;  %971 = vst.msk [vmem:[#allocation2 + $0x68] sm:$0xff] %vm957_vm4, %v19783_v3 }
  0x5b   : > { %972 = vst.msk [vmem:[#allocation2 + $0x70] sm:$0xff] %vm957_vm4, %v19783_v3  ;;  %973 = vst.msk [vmem:[#allocation2 + $0x78] sm:$0xff] %vm957_vm4, %v19783_v3  ;;  %v19241_v61 = vld [vmem:[%s20051_s7 + $0x58] sm:$0xff]   ;;  %v19250_v62 = vld [vmem:[%s19815_s21 + $0x10] sm:$0xff]  }
  0x5c   : > { %15781 = vmatmul.mubr.msk.bf16.gmra.mrb[4].mxu0 %vm1193_vm3, %v19231_v20  ;;  %1699 = vperm.xlu1 %19226, %v20079_v21   ;;  %974 = vst.msk [vmem:[#allocation2 + $0x80] sm:$0xff] %vm957_vm4, %v19783_v3  ;;  %975 = vst.msk [vmem:[#allocation2 + $0x88] sm:$0xff] %vm957_vm4, %v19783_v3  ;;  %v19242_v63 = vld [vmem:[%s20051_s7 + $0x60] sm:$0xff]   ;;  %v1997_v4 = vld [vmem:[#allocation2 + $0x9] sm:$0xff] }
  0x5d   : > { %15784 = vmatprep.mubr.msk.bf16.mxu0 %vm19785_vm2, %v19783_v3  ;;  %1694 = vperm.xlu0 %19225, %v20082_v22   ;;  %976 = vst.msk [vmem:[#allocation2 + $0x90] sm:$0xff] %vm957_vm4, %v19783_v3  ;;  %977 = vst.msk [vmem:[#allocation2 + $0x98] sm:$0xff] %vm957_vm4, %v19783_v3  ;;  %v19244_v7 = vld [vmem:[%s20051_s7 + $0x70] sm:$0xff]   ;;  %v19246_v11 = vld [vmem:[%s20051_s7 + $0x80] sm:$0xff]  }
  0x5e   : > { %978 = vst.msk [vmem:[#allocation2 + $0xa0] sm:$0xff] %vm957_vm4, %v19783_v3  ;;  %979 = vst.msk [vmem:[#allocation2 + $0xa8] sm:$0xff] %vm957_vm4, %v19783_v3  ;;  %15861 = vmatpush3.bf16.msra.mxu1 %v19250_v62  ;;  %v20371_v8 = vld [vmem:[#allocation4] sm:$0xff]  ;;  %v10886_v62 = vld [vmem:[%s19925_s12 + $0x20] sm:$0xf] }
  0x5f   : > { %980 = vst.msk [vmem:[#allocation2 + $0xb0] sm:$0xff] %vm957_vm4, %v19783_v3  ;;  %981 = vst.msk [vmem:[#allocation2 + $0xb8] sm:$0xff] %vm957_vm4, %v19783_v3  ;;  %15862 = vmatprep.subr.bf16.mxu1 %v19783_v3 }
  0x60   : > { %1709 = vperm.xlu1 %19226, %v20090_v23   ;;  %982 = vst.msk [vmem:[#allocation2 + $0xc0] sm:$0xff] %vm957_vm4, %v19783_v3  ;;  %983 = vst.msk [vmem:[#allocation2 + $0xc8] sm:$0xff] %vm957_vm4, %v19783_v3 }
  0x61   : > { %1704 = vperm.xlu0 %19225, %v20093_v24   ;;  %984 = vst.msk [vmem:[#allocation2 + $0xd0] sm:$0xff] %vm957_vm4, %v19783_v3  ;;  %985 = vst.msk [vmem:[#allocation2 + $0xd8] sm:$0xff] %vm957_vm4, %v19783_v3 }
  0x62   : > { %986 = vst.msk [vmem:[#allocation2 + $0xe0] sm:$0xff] %vm957_vm4, %v19783_v3  ;;  %987 = vst.msk [vmem:[#allocation2 + $0xe8] sm:$0xff] %vm957_vm4, %v19783_v3 }
  0x63   : > { %988 = vst.msk [vmem:[#allocation2 + $0xf0] sm:$0xff] %vm957_vm4, %v19783_v3  ;;  %989 = vst.msk [vmem:[#allocation2 + $0xf8] sm:$0xff] %vm957_vm4, %v19783_v3 }
  0x64   : > { %15785 = vmatmul.mubr.msk.bf16.gmra.mrb[8].mxu0 %vm1193_vm3, %v19232_v25  ;;  %1719 = vperm.xlu1 %19226, %v20099_v26   ;;  %990 = vst.msk [vmem:[#allocation2 + $0x100] sm:$0xff] %vm957_vm4, %v19783_v3  ;;  %991 = vst.msk [vmem:[#allocation2 + $0x108] sm:$0xff] %vm957_vm4, %v19783_v3  ;;  %v7868_v25 = vld [vmem:[%s22970_s4 + $0x18] sm:$0xff] }
  0x65   : > { %15788 = vmatprep.mubr.msk.bf16.mxu0 %vm19785_vm2, %v19783_v3  ;;  %1714 = vperm.xlu0 %19225, %v20102_v27   ;;  %992 = vst.msk [vmem:[#allocation2 + $0x110] sm:$0xff] %vm957_vm4, %v19783_v3  ;;  %993 = vst.msk [vmem:[#allocation2 + $0x118] sm:$0xff] %vm957_vm4, %v19783_v3 }
  0x66   : > { %994 = vst.msk [vmem:[#allocation2 + $0x120] sm:$0xff] %vm957_vm4, %v19783_v3  ;;  %995 = vst.msk [vmem:[#allocation2 + $0x128] sm:$0xff] %vm957_vm4, %v19783_v3 }
  0x67   : > { %996 = vst.msk [vmem:[#allocation2 + $0x130] sm:$0xff] %vm957_vm4, %v19783_v3  ;;  %997 = vst.msk [vmem:[#allocation2 + $0x138] sm:$0xff] %vm957_vm4, %v19783_v3 }
  0x68   : > { %1729 = vperm.xlu1 %19226, %v20110_v28   ;;  %998 = vst.msk [vmem:[#allocation2 + $0x140] sm:$0xff] %vm957_vm4, %v19783_v3  ;;  %999 = vst.msk [vmem:[#allocation2 + $0x148] sm:$0xff] %vm957_vm4, %v19783_v3 }
  0x69   : > { %1724 = vperm.xlu0 %19225, %v20113_v29   ;;  %1000 = vst.msk [vmem:[#allocation2 + $0x150] sm:$0xff] %vm957_vm4, %v19783_v3  ;;  %1001 = vst.msk [vmem:[#allocation2 + $0x158] sm:$0xff] %vm957_vm4, %v19783_v3 }
  0x6a   : > { %1002 = vst.msk [vmem:[#allocation2 + $0x160] sm:$0xff] %vm957_vm4, %v19783_v3 }
  0x6c   : > { %15789 = vmatmul.mubr.msk.bf16.gmra.mrb[12].mxu0 %vm1193_vm3, %v19233_v30  ;;  %1739 = vperm.xlu1 %19226, %v20119_v31   ;;  %v7869_v30 = vld [vmem:[%s22970_s4 + $0x20] sm:$0xff] }
  0x6d   : > { %15792 = vmatprep.mubr.msk.bf16.mxu0 %vm19785_vm2, %v19783_v3  ;;  %1734 = vperm.xlu0 %19225, %v20122_v32  }
  0x70   : > { %1749 = vperm.xlu1 %19226, %v20129_v33  }
  0x71   : > { %1744 = vperm.xlu0 %19225, %v20132_v34  }
  0x74   : > { %15793 = vmatmul.mubr.msk.bf16.gmra.mrb[16].mxu0 %vm1193_vm3, %v19234_v35  ;;  %1759 = vperm.xlu1 %19226, %v20138_v36  }
  0x75   : > { %15796 = vmatprep.mubr.msk.bf16.mxu0 %vm19785_vm2, %v19783_v3  ;;  %1754 = vperm.xlu0 %19225, %v20141_v37  }
  0x78   : > { %1769 = vperm.xlu1 %19226, %v20149_v38  }
  0x79   : > { %1764 = vperm.xlu0 %19225, %v20152_v39  }
  0x7c   : > { %15797 = vmatmul.mubr.msk.bf16.gmra.mrb[20].mxu0 %vm1193_vm3, %v19235_v40  ;;  %1779 = vperm.xlu1 %19226, %v20158_v41  }
  0x7d   : > { %15800 = vmatprep.mubr.msk.bf16.mxu0 %vm19785_vm2, %v19783_v3  ;;  %1774 = vperm.xlu0 %19225, %v20161_v42  }
  0x80   : > { %1789 = vperm.xlu1 %19226, %v20169_v43  }
  0x81   : > { %1784 = vperm.xlu0 %19225, %v20172_v44  }
  0x84   : > { %15801 = vmatmul.mubr.msk.bf16.gmra.mrb[24].mxu0 %vm1193_vm3, %v19236_v45  ;;  %1799 = vperm.xlu1 %19226, %v20178_v46  }
  0x85   : > { %15804 = vmatprep.mubr.msk.bf16.mxu0 %vm19785_vm2, %v19783_v3  ;;  %1794 = vperm.xlu0 %19225, %v20181_v47  }
  0x88   : > { %1809 = vperm.xlu1 %19226, %v20186_v48  }
  0x89   : > { %1804 = vperm.xlu0 %19225, %v20192_v49  }
  0x8c   : > { %15805 = vmatmul.mubr.msk.bf16.gmra.mrb[28].mxu0 %vm1193_vm3, %v19237_v50  ;;  %1819 = vperm.xlu1 %19226, %v20197_v51   ;;  %v9583_v50 = vld [vmem:[%s22970_s4 + $0x60] sm:$0xf] }
  0x8d   : > { %15808 = vmatprep.mubr.msk.bf16.mxu0 %vm19785_vm2, %v19783_v3  ;;  %1814 = vperm.xlu0 %19225, %v20201_v52  }
  0x90   : > { %1829 = vperm.xlu1 %19226, %v20206_v53  }
  0x91   : > { %1824 = vperm.xlu0 %19225, %v20212_v54  }
  0x94   : > { %15809 = vmatmul.mubr.msk.bf16.gmra.mrb[32].mxu0 %vm1193_vm3, %v19238_v55  ;;  %1839 = vperm.xlu1 %19226, %v20217_v56   ;;  %v10885_v55 = vld [vmem:[%s19925_s12 + $0x18] sm:$0xff] }
  0x95   : > { %15812 = vmatprep.mubr.msk.bf16.mxu0 %vm19785_vm2, %v19783_v3  ;;  %1834 = vperm.xlu0 %19225, %v20221_v57  }
  0x98   : > { %5554 = vperm.xlu1 %19226, %v20113_v29  }
  0x99   : > { %1844 = vperm.xlu0 %19225, %v1641_v58   ;;  %v19252_v58 = vld [vmem:[%s19815_s21] sm:$0xff]  }
  0x9c   : > { %15813 = vmatmul.mubr.msk.bf16.gmra.mrb[36].mxu0 %vm1193_vm3, %v19239_v59  ;;  %5564 = vperm.xlu1 %19226, %v20122_v32   ;;  %v7871_v32 = vld [vmem:[%s22970_s4 + $0x30] sm:$0xff] }
  0x9d   : > { %15816 = vmatprep.mubr.msk.bf16.mxu0 %vm19785_vm2, %v19783_v3  ;;  %5559 = vperm.xlu0 %19225, %v20110_v28   ;;  %v7870_v28 = vld [vmem:[%s22970_s4 + $0x28] sm:$0xff] }
  0xa0   : > { %5574 = vperm.xlu1 %19226, %v20132_v34   ;;  %v7874_v34 = vld [vmem:[%s22970_s4 + $0x48] sm:$0xff] }
  0xa1   : > { %5569 = vperm.xlu0 %19225, %v20119_v31   ;;  %v7872_v31 = vld [vmem:[%s22970_s4 + $0x38] sm:$0xff] }
  0xa4   : > { %15817 = vmatmul.mubr.msk.bf16.gmra.mrb[40].mxu0 %vm1193_vm3, %v19240_v60  ;;  %5479 = vperm.xlu1 %19226, %v20028_v6   ;;  %v19243_v6 = vld [vmem:[%s20051_s7 + $0x68] sm:$0xff]   ;;  %v20486_v60 = vld [vmem:[%s19805_s13] ss:$0 sm:$0xff] }
  0xa5   : > { %15820 = vmatprep.mubr.msk.bf16.mxu0 %vm19785_vm2, %v19783_v3  ;;  %5474 = vperm.xlu0 %19225, %v20004_v1   ;;  %v19251_v1 = vld [vmem:[%s19815_s21 + $0x18] sm:$0xff]  }
  0xa6   : > { %15863 = vmatpush3.bf16.msra.mxu1 %v19251_v1 }
  0xa7   : > { %15948 = vmatprep.subr.bf16.mxu1 %v19783_v3 }
  0xa8   : > { %5489 = vperm.xlu1 %19226, %v20025_v5  }
  0xa9   : > { %5484 = vperm.xlu0 %19225, %v20001_v0   ;;  %v1996_v0 = vld [vmem:[#allocation2 + $0x1] sm:$0xff] }
  0xaa   : > { %v2037_v5 = vpack.c.bf16 %v1997_v4, %v1996_v0 }
  0xac   : > { %15821 = vmatmul.mubr.msk.bf16.gmra.mrb[44].mxu0 %vm1193_vm3, %v19241_v61  ;;  %5579 = vperm.xlu1 %19226, %v20129_v33   ;;  %v20489_v61 = vld [vmem:[%s19810_s17] ss:$0 sm:$0xff] }
  0xad   : > { %15824 = vmatprep.mubr.msk.bf16.mxu0 %vm19785_vm2, %v19783_v3  ;;  %5494 = vperm.xlu0 %19225, %v20045_v13  }
  0xae   : > { %15865 = vmatmul.mubr.msk.bf16.vlgmr.msra.gmra.mrb[4].mxu1 %vm957_vm4, %v2037_v5 }
  0xaf   : > { %15868 = vmatprep.mubr.msk.bf16.mxu1 %vm19785_vm2, %v19783_v3  ;;  %15949 = vmatpush3.bf16.msra.mxu1 %v19252_v58 }
  0xb0   : > { %5499 = vperm.xlu1 %19226, %v20042_v12   ;;  %15950 = vmatprep.subr.bf16.mxu1 %v20371_v8 }
  0xb1   : > { %5584 = vperm.xlu0 %19225, %v20141_v37   ;;  %v7876_v37 = vld [vmem:[%s22970_s4 + $0x58] sm:$0xff] }
  0xb4   : > { %15825 = vmatmul.mubr.msk.bf16.gmra.mrb[48].mxu0 %vm1193_vm3, %v19242_v63  ;;  %5589 = vperm.xlu1 %19226, %v20138_v36   ;;  %v7873_v36 = vld [vmem:[%s22970_s4 + $0x40] sm:$0xff] }
  0xb5   : > { %15828 = vmatprep.mubr.msk.bf16.mxu0 %vm19785_vm2, %v19783_v3  ;;  %5504 = vperm.xlu0 %19225, %v20059_v17   ;;  %v19248_v17 = vld [vmem:[%s20051_s7 + $0x90] sm:$0xff]  }
  0xb8   : > { %5509 = vperm.xlu1 %19226, %v20054_v14   ;;  %v19247_v14 = vld [vmem:[%s20051_s7 + $0x88] sm:$0xff]  }
  0xb9   : > { %5594 = vperm.xlu0 %19225, %v20152_v39   ;;  %v7875_v39 = vld [vmem:[%s22970_s4 + $0x50] sm:$0xff] }
  0xbc   : > { %15829 = vmatmul.mubr.msk.bf16.gmra.mrb[52].mxu0 %vm1193_vm3, %v19243_v6  ;;  %5599 = vperm.xlu1 %19226, %v20149_v38  }
  0xbd   : > { %15832 = vmatprep.mubr.msk.bf16.mxu0 %vm19785_vm2, %v19783_v3  ;;  %5514 = vperm.xlu0 %19225, %v20071_v19   ;;  %v19245_v3 = vld [vmem:[%s20051_s7 + $0x78] sm:$0xff]   ;;  %v5471_v19 = vld [vmem:[%s19915_s27 + $0x140] sm:$0xf] }
  0xc0   : > { %5519 = vperm.xlu1 %19226, %v20068_v18  }
  0xc1   : > { %5604 = vperm.xlu0 %19225, %v20161_v42  }
  0xc4   : > { %15833 = vmatmul.mubr.msk.bf16.gmra.mrb[56].mxu0 %vm1193_vm3, %v19244_v7  ;;  %5609 = vperm.xlu1 %19226, %v20158_v41   ;;  %v7877_v41 = vld [vmem:[%s22970_s4 + $0x60] sm:$0xf] }
  0xc5   : > { %15836 = vmatprep.mubr.msk.bf16.mxu0 %vm19785_vm2, %v20371_v8  ;;  %5524 = vperm.xlu0 %19225, %v20082_v22   ;;  %v7866_v22 = vld [vmem:[%s22970_s4 + $0x8] sm:$0xff] }
  0xc7   : > { %v20377_v9 = vpop.permute.xlu0 %1644  ;;  %v20445_v35 = vpop.permute.xlu1 %1654 }
  0xc8   : > { %5529 = vperm.xlu1 %19226, %v20079_v21   ;;  %v19249_v21 = vld [vmem:[%s20051_s7 + $0x98] sm:$0xff]   ;;  %s22979_s7 = sld [smem:[#allocation16_spill]] }
  0xc9   : > { %5614 = vperm.xlu0 %19225, %v20172_v44  }
  0xcb   : > { %v20382_v10 = vpop.permute.xlu0 %1649  ;;  %v20452_v40 = vpop.permute.xlu1 %1659 }
  0xcc   : > { %15837 = vmatmul.mubr.msk.bf16.gmra.mrb[60].mxu0 %vm1193_vm3, %v19245_v3  ;;  %5619 = vperm.xlu1 %19226, %v20169_v43  }
  0xcd   : > { %15840 = vmatprep.mubr.msk.bf16.mxu0 %vm19785_vm2, %v20371_v8  ;;  %5534 = vperm.xlu0 %19225, %v20093_v24   ;;  %v7865_v24 = vld [vmem:[%s22970_s4] sm:$0xff] }
  0xcf   : > { %v20389_v12 = vpop.permute.xlu0 %1664  ;;  %v20457_v43 = vpop.permute.xlu1 %1669 }
  0xd0   : > { %5539 = vperm.xlu1 %19226, %v20090_v23  }
  0xd1   : > { %5624 = vperm.xlu0 %19225, %v20181_v47  }
  0xd3   : > { %v20461_v45 = vpop.permute.xlu1 %1679 }
  0xd4   : > { %15841 = vmatmul.mubr.msk.bf16.gmra.mrb[64].mxu0 %vm1193_vm3, %v19246_v11  ;;  %v20394_v13 = vpop.permute.xlu0 %1674  ;;  %5629 = vperm.xlu1 %19226, %v20178_v46  }
  0xd5   : > { %15844 = vmatprep.mubr.msk.bf16.mxu0 %vm19785_vm2, %v20371_v8  ;;  %5544 = vperm.xlu0 %19225, %v20102_v27   ;;  %v7867_v27 = vld [vmem:[%s22970_s4 + $0x10] sm:$0xff]  ;;  %s22988_s4 = sld [smem:[#allocation24_spill]] }
  0xd7   : > { %v20465_v47 = vpop.permute.xlu1 %1689 }
  0xd8   : > { %v20401_v15 = vpop.permute.xlu0 %1684  ;;  %5549 = vperm.xlu1 %19226, %v20099_v26  }
  0xd9   : > { %5634 = vperm.xlu0 %19225, %v20192_v49  }
  0xdb   : > { %v20469_v49 = vpop.permute.xlu1 %1699 }
  0xdc   : > { %15845 = vmatmul.mubr.msk.bf16.gmra.mrb[68].mxu0 %vm1193_vm3, %v19247_v14  ;;  %v20406_v16 = vpop.permute.xlu0 %1694  ;;  %5644 = vperm.xlu1 %19226, %v20201_v52   ;;  %v10883_v52 = vld [vmem:[%s19925_s12 + $0x8] sm:$0xff] }
  0xdd   : > { %15848 = vmatprep.mubr.msk.bf16.mxu0 %vm19785_vm2, %v20371_v8  ;;  %5639 = vperm.xlu0 %19225, %v20186_v48  }
  0xe0   : > { %v20413_v18 = vpop.permute.xlu0 %1704  ;;  %5654 = vperm.xlu1 %19226, %v20212_v54   ;;  %v10882_v54 = vld [vmem:[%s19925_s12] sm:$0xff] }
  0xe1   : > { %5649 = vperm.xlu0 %19225, %v20197_v51  }
  0xe4   : > { %15849 = vmatmul.mubr.msk.bf16.gmra.mrb[72].mxu0 %vm1193_vm3, %v19248_v17  ;;  %v20419_v20 = vpop.permute.xlu0 %1714  ;;  %5664 = vperm.xlu1 %19226, %v20221_v57   ;;  %v10884_v57 = vld [vmem:[%s19925_s12 + $0x10] sm:$0xff] }
  0xe5   : > { %15852 = vmatprep.mubr.msk.bf16.mxu0 %vm19785_vm2, %v20371_v8  ;;  %5659 = vperm.xlu0 %19225, %v20206_v53   ;;  %v20475_v53 = vpop.permute.xlu1 %1709 }
  0xe8   : > { %v20427_v23 = vpop.permute.xlu0 %1724  ;;  %5674 = vperm.xlu1 %19226, %v5471_v19  }
  0xe9   : > { %5669 = vperm.xlu0 %19225, %v20217_v56   ;;  %v20483_v59 = vpop.permute.xlu1 %1719 }
  0xec   : > { %15853 = vmatmul.mubr.msk.bf16.gmra.mrb[76].mxu0 %vm1193_vm3, %v19249_v21  ;;  %v20433_v26 = vpop.permute.xlu0 %1734  ;;  %7885 = vperm.xlu1 %19226, %v7866_v22  }
  0xed   : > { %7880 = vperm.xlu0 %19225, %v7865_v24   ;;  %v20496_v6 = vpop.permute.xlu1 %1729 }
  0xf0   : > { %v20437_v29 = vpop.permute.xlu0 %1744  ;;  %7895 = vperm.xlu1 %19226, %v7868_v25  }
  0xf1   : > { %7890 = vperm.xlu0 %19225, %v7867_v27  }
  0xf4   : > { %7905 = vperm.xlu1 %19226, %v7870_v28   ;;  %v20442_v33 = vpop.permute.xlu0 %1754 }
  0xf5   : > { %7900 = vperm.xlu0 %19225, %v7869_v30  }
  0xf8   : > { %7915 = vperm.xlu1 %19226, %v7872_v31   ;;  %v20449_v38 = vpop.permute.xlu0 %1764 }
  0xf9   : > { %7910 = vperm.xlu0 %19225, %v7871_v32  }
  0xfc   : > { %7925 = vperm.xlu1 %19226, %v7874_v34   ;;  %v20455_v42 = vpop.permute.xlu0 %1774 }
  0xfd   : > { %7920 = vperm.xlu0 %19225, %v7873_v36  }
 0x100   : > { %7935 = vperm.xlu1 %19226, %v7876_v37   ;;  %v20459_v44 = vpop.permute.xlu0 %1784 }
 0x101   : > { %7930 = vperm.xlu0 %19225, %v7875_v39  }
 0x104   : > { %9586 = vperm.xlu1 %19226, %v7865_v24   ;;  %v20463_v46 = vpop.permute.xlu0 %1794 }
 0x105   : > { %7940 = vperm.xlu0 %19225, %v7877_v41  }
 0x108   : > { %9596 = vperm.xlu1 %19226, %v7867_v27   ;;  %v20467_v48 = vpop.permute.xlu0 %1804 }
 0x109   : > { %9591 = vperm.xlu0 %19225, %v7866_v22  }
 0x10c   : > { %9606 = vperm.xlu1 %19226, %v7869_v30   ;;  %v20472_v51 = vpop.permute.xlu0 %1814 }
 0x10d   : > { %9601 = vperm.xlu0 %19225, %v7868_v25  }
 0x110   : > { %9616 = vperm.xlu1 %19226, %v7871_v32   ;;  %v20479_v56 = vpop.permute.xlu0 %1824 }
 0x111   : > { %9611 = vperm.xlu0 %19225, %v7870_v28  }
 0x114   : > { %9626 = vperm.xlu1 %19226, %v7873_v36   ;;  %v20493_v63 = vpop.permute.xlu0 %1834  ;;  %v20505_v36 = vpop.permute.xlu1 %1739 }
 0x115   : > { %9621 = vperm.xlu0 %19225, %v7872_v31  }
 0x118   : > { %9636 = vperm.xlu1 %19226, %v7875_v39   ;;  %v1845_v30 = vpop.permute.xlu0 %1844 }
 0x119   : > { %9631 = vperm.xlu0 %19225, %v7874_v34   ;;  %v12150_v34 = vld [vmem:[%s19925_s12 + $0x20] sm:$0xf] }
 0x11c   : > { %9646 = vperm.xlu1 %19226, %v9583_v50  }
 0x11d   : > { %9641 = vperm.xlu0 %19225, %v7876_v37  }
 0x120   : > { %10894 = vperm.xlu1 %19226, %v10883_v52  }
 0x121   : > { %10889 = vperm.xlu0 %19225, %v10882_v54  }
 0x124   : > { %10904 = vperm.xlu1 %19226, %v10885_v55  }
 0x125   : > { %10899 = vperm.xlu0 %19225, %v10884_v57  }
 0x127   : > { %v1298_v1 = vpop.f32.mrb[0].mxu0 }
 0x128   : > { %v1471_v0 = vmul.f32 %v20486_v60, %v1298_v1  ;;  %v1458_v4 = vpop.f32.mrb[0].mxu1  ;;  %v15778_v5 = vpop.f32.mrb[1].mxu0  ;;  %12153 = vperm.xlu1 %19226, %v10882_v54   ;;  %v13631_v1 = vld [vmem:[%s19930_s20] sm:$0xff] }
 0x129   : > { %v1511_v7 = vmul.f32 %v20486_v60, %v1458_v4  ;;  %v1301_v3 = vpop.f32.mrb[2].mxu0  ;;  %10909 = vperm.xlu0 %19225, %v10886_v62   ;;  %v15858_v21 = vpop.f32.mrb[1].mxu1  ;;  %v13632_v62 = vld [vmem:[%s19930_s20 + $0x8] sm:$0xff] }
 0x12a   : > { %v1519_v11 = vadd.f32 %v20489_v61, %v1471_v0  ;;  %v1472_v14 = vmul.f32 %v20486_v60, %v1301_v3  ;;  %v15779_v17 = vpop.f32.mrb[3].mxu0  ;;  %v1461_v25 = vpop.f32.mrb[2].mxu1 }
 0x12b   : > { %v1559_v19 = vadd.f32 %v20489_v61, %v1511_v7  ;;  %v15859_v28 = vpop.f32.mrb[3].mxu1  ;;  %v20517_v4 = vpop.permute.xlu1 %1749 }
 0x12c   : > { %v1560_v22 = vmax.f32 %v1519_v11, 0.0  ;;  %v1520_v24 = vadd.f32 %v20489_v61, %v1472_v14  ;;  %12163 = vperm.xlu1 %19226, %v10884_v57  }
 0x12d   : > { %v1600_v27 = vmax.f32 %v1559_v19, 0.0  ;;  %12158 = vperm.xlu0 %19225, %v10883_v52  }
 0x12e   : > { %v1847_v31 = vmul.f32 %v20377_v9, %v1560_v22  ;;  %v1561_v32 = vmax.f32 %v1520_v24, 0.0 }
 0x12f   : > { %v1887_v37 = vmul.f32 %v1845_v30, %v1600_v27  ;;  %v1306_v39 = vpop.f32.mrb[4].mxu0 }
 0x130   : > { %1888 = vst.msk [vmem:[#allocation2 + $0x13] sm:$0xff] %vm957_vm4, %v1847_v31  ;;  %v1848_v41 = vmul.f32 %v20382_v10, %v1561_v32  ;;  %v1473_v50 = vmul.f32 %v20486_v60, %v1306_v39  ;;  %v15782_v54 = vpop.f32.mrb[5].mxu0  ;;  %12173 = vperm.xlu1 %19226, %v12150_v34  }
 0x131   : > { %1929 = vst.msk [vmem:[#allocation2 + $0x153] sm:$0xf] %vm1928_vm5, %v1887_v37  ;;  %v1309_v9 = vpop.f32.mrb[6].mxu0  ;;  %12168 = vperm.xlu0 %19225, %v10885_v55  }
 0x132   : > { %1889 = vst.msk [vmem:[#allocation2 + $0x1b] sm:$0xff] %vm957_vm4, %v1848_v41  ;;  %v1521_v52 = vadd.f32 %v20489_v61, %v1473_v50  ;;  %v1474_v57 = vmul.f32 %v20486_v60, %v1309_v9  ;;  %v15783_v58 = vpop.f32.mrb[7].mxu0 }
 0x134   : > { %v1562_v0 = vmax.f32 %v1521_v52, 0.0  ;;  %v1522_v10 = vadd.f32 %v20489_v61, %v1474_v57  ;;  %13640 = vperm.xlu1 %19226, %v13632_v62  }
 0x135   : > { %13635 = vperm.xlu0 %19225, %v13631_v1  }
 0x136   : > { %v1849_v5 = vmul.f32 %v20445_v35, %v1562_v0  ;;  %v1563_v7 = vmax.f32 %v1522_v10, 0.0 }
 0x137   : > { %v1314_v3 = vpop.f32.mrb[8].mxu0  ;;  %v1998_v19 = vld [vmem:[#allocation2 + $0x11] sm:$0xff] }
 0x138   : > { %1890 = vst.msk [vmem:[#allocation2 + $0x23] sm:$0xff] %vm957_vm4, %v1849_v5  ;;  %v1850_v11 = vmul.f32 %v20452_v40, %v1563_v7  ;;  %v1475_v14 = vmul.f32 %v20486_v60, %v1314_v3  ;;  %v15786_v55 = vpop.f32.mrb[9].mxu0 }
 0x139   : > { %v1317_v17 = vpop.f32.mrb[10].mxu0  ;;  %v1999_v21 = vld [vmem:[#allocation2 + $0x19] sm:$0xff] }
 0x13a   : > { %1891 = vst.msk [vmem:[#allocation2 + $0x2b] sm:$0xff] %vm957_vm4, %v1850_v11  ;;  %v1523_v22 = vadd.f32 %v20489_v61, %v1475_v14  ;;  %v1476_v24 = vmul.f32 %v20486_v60, %v1317_v17  ;;  %v15787_v35 = vpop.f32.mrb[11].mxu0  ;;  %v2038_v25 = vpack.c.bf16 %v1999_v21, %v1998_v19 }
 0x13c   : > { %v1564_v27 = vmax.f32 %v1523_v22, 0.0  ;;  %v1524_v28 = vadd.f32 %v20489_v61, %v1476_v24  ;;  %15869 = vmatmul.mubr.msk.bf16.gmra.mrb[8].mxu1 %vm957_vm4, %v2038_v25 }
 0x13d   : > { %15872 = vmatprep.mubr.msk.bf16.mxu1 %vm19785_vm2, %v20371_v8 }
 0x13e   : > { %v1851_v40 = vmul.f32 %v20389_v12, %v1564_v27  ;;  %v1565_v30 = vmax.f32 %v1524_v28, 0.0 }
 0x13f   : > { %v1322_v31 = vpop.f32.mrb[12].mxu0  ;;  %v2000_v41 = vld [vmem:[#allocation2 + $0x21] sm:$0xff] }
 0x140   : > { %1892 = vst.msk [vmem:[#allocation2 + $0x33] sm:$0xff] %vm957_vm4, %v1851_v40  ;;  %v1852_v32 = vmul.f32 %v20457_v43, %v1565_v30  ;;  %v1477_v34 = vmul.f32 %v20486_v60, %v1322_v31  ;;  %v15790_v37 = vpop.f32.mrb[13].mxu0 }
 0x141   : > { %v1325_v39 = vpop.f32.mrb[14].mxu0  ;;  %v2001_v50 = vld [vmem:[#allocation2 + $0x29] sm:$0xff] }
 0x142   : > { %1893 = vst.msk [vmem:[#allocation2 + $0x3b] sm:$0xff] %vm957_vm4, %v1852_v32  ;;  %v1525_v54 = vadd.f32 %v20489_v61, %v1477_v34  ;;  %v1478_v9 = vmul.f32 %v20486_v60, %v1325_v39  ;;  %v15791_v52 = vpop.f32.mrb[15].mxu0  ;;  %v2039_v12 = vpack.c.bf16 %v2001_v50, %v2000_v41 }
 0x144   : > { %v1566_v57 = vmax.f32 %v1525_v54, 0.0  ;;  %v1526_v58 = vadd.f32 %v20489_v61, %v1478_v9  ;;  %15873 = vmatmul.mubr.msk.bf16.gmra.mrb[12].mxu1 %vm957_vm4, %v2039_v12 }
 0x145   : > { %15876 = vmatprep.mubr.msk.bf16.mxu1 %vm19785_vm2, %v20371_v8 }
 0x146   : > { %v1853_v43 = vmul.f32 %v20394_v13, %v1566_v57  ;;  %v1567_v62 = vmax.f32 %v1526_v58, 0.0 }
 0x147   : > { %v1330_v1 = vpop.f32.mrb[16].mxu0  ;;  %v2002_v3 = vld [vmem:[#allocation2 + $0x31] sm:$0xff] }
 0x148   : > { %1894 = vst.msk [vmem:[#allocation2 + $0x43] sm:$0xff] %vm957_vm4, %v1853_v43  ;;  %v1854_v0 = vmul.f32 %v20461_v45, %v1567_v62  ;;  %v1479_v10 = vmul.f32 %v20486_v60, %v1330_v1  ;;  %v15794_v5 = vpop.f32.mrb[17].mxu0  ;;  %v20550_v45 = vld [vmem:[#allocation4] sm:$0xff] }
 0x149   : > { %v1333_v7 = vpop.f32.mrb[18].mxu0  ;;  %v2003_v11 = vld [vmem:[#allocation2 + $0x39] sm:$0xff] }
 0x14a   : > { %1895 = vst.msk [vmem:[#allocation2 + $0x4b] sm:$0xff] %vm957_vm4, %v1854_v0  ;;  %v1527_v14 = vadd.f32 %v20489_v61, %v1479_v10  ;;  %v1480_v8 = vmul.f32 %v20486_v60, %v1333_v7  ;;  %v15795_v55 = vpop.f32.mrb[19].mxu0  ;;  %v2040_v13 = vpack.c.bf16 %v2003_v11, %v2002_v3 }
 0x14c   : > { %v1568_v17 = vmax.f32 %v1527_v14, 0.0  ;;  %v1528_v19 = vadd.f32 %v20489_v61, %v1480_v8  ;;  %15877 = vmatmul.mubr.msk.bf16.gmra.mrb[16].mxu1 %vm957_vm4, %v2040_v13 }
 0x14d   : > { %15880 = vmatprep.mubr.msk.bf16.mxu1 %vm19785_vm2, %v20550_v45 }
 0x14e   : > { %v1855_v21 = vmul.f32 %v20401_v15, %v1568_v17  ;;  %v1569_v22 = vmax.f32 %v1528_v19, 0.0 }
 0x14f   : > { %v1338_v24 = vpop.f32.mrb[20].mxu0  ;;  %v2004_v40 = vld [vmem:[#allocation2 + $0x41] sm:$0xff] }
 0x150   : > { %1896 = vst.msk [vmem:[#allocation2 + $0x53] sm:$0xff] %vm957_vm4, %v1855_v21  ;;  %v1856_v35 = vmul.f32 %v20465_v47, %v1569_v22  ;;  %v1481_v25 = vmul.f32 %v20486_v60, %v1338_v24  ;;  %v15798_v27 = vpop.f32.mrb[21].mxu0  ;;  %v19253_v47 = vld [vmem:[%s19815_s21 + $0x8] sm:$0xff]  }
 0x151   : > { %v1341_v28 = vpop.f32.mrb[22].mxu0  ;;  %v2005_v30 = vld [vmem:[#allocation2 + $0x49] sm:$0xff]  ;;  %15951 = vmatpush3.bf16.msra.mxu1 %v19253_v47 }
 0x152   : > { %1897 = vst.msk [vmem:[#allocation2 + $0x5b] sm:$0xff] %vm957_vm4, %v1856_v35  ;;  %v1529_v31 = vadd.f32 %v20489_v61, %v1481_v25  ;;  %v1482_v32 = vmul.f32 %v20486_v60, %v1341_v28  ;;  %v15799_v15 = vpop.f32.mrb[23].mxu0  ;;  %v2041_v34 = vpack.c.bf16 %v2005_v30, %v2004_v40  ;;  %16036 = vmatprep.subr.bf16.mxu1 %v20550_v45 }
 0x154   : > { %v1570_v37 = vmax.f32 %v1529_v31, 0.0  ;;  %v1530_v39 = vadd.f32 %v20489_v61, %v1482_v32  ;;  %15881 = vmatmul.mubr.msk.bf16.gmra.mrb[20].mxu1 %vm957_vm4, %v2041_v34 }
 0x155   : > { %15884 = vmatprep.mubr.msk.bf16.mxu1 %vm19785_vm2, %v20550_v45 }
 0x156   : > { %v1857_v41 = vmul.f32 %v20406_v16, %v1570_v37  ;;  %v1571_v50 = vmax.f32 %v1530_v39, 0.0 }
 0x157   : > { %v1346_v54 = vpop.f32.mrb[24].mxu0  ;;  %v2006_v58 = vld [vmem:[#allocation2 + $0x51] sm:$0xff] }
 0x158   : > { %1898 = vst.msk [vmem:[#allocation2 + $0x63] sm:$0xff] %vm957_vm4, %v1857_v41  ;;  %v1858_v9 = vmul.f32 %v20469_v49, %v1571_v50  ;;  %v1483_v52 = vmul.f32 %v20486_v60, %v1346_v54  ;;  %v15802_v12 = vpop.f32.mrb[25].mxu0 }
 0x159   : > { %v1349_v57 = vpop.f32.mrb[26].mxu0  ;;  %v2007_v43 = vld [vmem:[#allocation2 + $0x59] sm:$0xff] }
 0x15a   : > { %1899 = vst.msk [vmem:[#allocation2 + $0x6b] sm:$0xff] %vm957_vm4, %v1858_v9  ;;  %v1531_v62 = vadd.f32 %v20489_v61, %v1483_v52  ;;  %v1484_v16 = vmul.f32 %v20486_v60, %v1349_v57  ;;  %v15803_v1 = vpop.f32.mrb[27].mxu0  ;;  %v2042_v0 = vpack.c.bf16 %v2007_v43, %v2006_v58 }
 0x15c   : > { %v1572_v10 = vmax.f32 %v1531_v62, 0.0  ;;  %v1532_v5 = vadd.f32 %v20489_v61, %v1484_v16  ;;  %15885 = vmatmul.mubr.msk.bf16.gmra.mrb[24].mxu1 %vm957_vm4, %v2042_v0 }
 0x15d   : > { %15888 = vmatprep.mubr.msk.bf16.mxu1 %vm19785_vm2, %v20550_v45 }
 0x15e   : > { %v1859_v49 = vmul.f32 %v20413_v18, %v1572_v10  ;;  %v1573_v7 = vmax.f32 %v1532_v5, 0.0 }
 0x15f   : > { %v1354_v3 = vpop.f32.mrb[28].mxu0  ;;  %v2008_v13 = vld [vmem:[#allocation2 + $0x61] sm:$0xff] }
 0x160   : > { %1900 = vst.msk [vmem:[#allocation2 + $0x73] sm:$0xff] %vm957_vm4, %v1859_v49  ;;  %v1860_v11 = vmul.f32 %v20475_v53, %v1573_v7  ;;  %v1485_v14 = vmul.f32 %v20486_v60, %v1354_v3  ;;  %v15806_v8 = vpop.f32.mrb[29].mxu0 }
 0x161   : > { %v1357_v55 = vpop.f32.mrb[30].mxu0  ;;  %v2009_v17 = vld [vmem:[#allocation2 + $0x69] sm:$0xff] }
 0x162   : > { %1901 = vst.msk [vmem:[#allocation2 + $0x7b] sm:$0xff] %vm957_vm4, %v1860_v11  ;;  %v1533_v19 = vadd.f32 %v20489_v61, %v1485_v14  ;;  %v1486_v21 = vmul.f32 %v20486_v60, %v1357_v55  ;;  %v15807_v22 = vpop.f32.mrb[31].mxu0  ;;  %v2043_v18 = vpack.c.bf16 %v2009_v17, %v2008_v13 }
 0x164   : > { %v1574_v24 = vmax.f32 %v1533_v19, 0.0  ;;  %v1534_v35 = vadd.f32 %v20489_v61, %v1486_v21  ;;  %15889 = vmatmul.mubr.msk.bf16.gmra.mrb[28].mxu1 %vm957_vm4, %v2043_v18 }
 0x165   : > { %15892 = vmatprep.mubr.msk.bf16.mxu1 %vm19785_vm2, %v20550_v45 }
 0x166   : > { %v1861_v53 = vmul.f32 %v20419_v20, %v1574_v24  ;;  %v1575_v25 = vmax.f32 %v1534_v35, 0.0 }
 0x167   : > { %v1362_v27 = vpop.f32.mrb[32].mxu0  ;;  %v2010_v32 = vld [vmem:[#allocation2 + $0x71] sm:$0xff] }
 0x168   : > { %1902 = vst.msk [vmem:[#allocation2 + $0x83] sm:$0xff] %vm957_vm4, %v1861_v53  ;;  %v1862_v28 = vmul.f32 %v20483_v59, %v1575_v25  ;;  %v1487_v40 = vmul.f32 %v20486_v60, %v1362_v27  ;;  %v15810_v30 = vpop.f32.mrb[33].mxu0 }
 0x169   : > { %v1365_v31 = vpop.f32.mrb[34].mxu0  ;;  %v2011_v15 = vld [vmem:[#allocation2 + $0x79] sm:$0xff] }
 0x16a   : > { %1903 = vst.msk [vmem:[#allocation2 + $0x8b] sm:$0xff] %vm957_vm4, %v1862_v28  ;;  %v1535_v34 = vadd.f32 %v20489_v61, %v1487_v40  ;;  %v1488_v37 = vmul.f32 %v20486_v60, %v1365_v31  ;;  %v15811_v39 = vpop.f32.mrb[35].mxu0  ;;  %v2044_v20 = vpack.c.bf16 %v2011_v15, %v2010_v32 }
 0x16b   : > { %v1760_v39 = vpop.permute.xlu1 %1759 }
 0x16c   : > { %v1576_v47 = vmax.f32 %v1535_v34, 0.0  ;;  %v1536_v41 = vadd.f32 %v20489_v61, %v1488_v37  ;;  %15893 = vmatmul.mubr.msk.bf16.gmra.mrb[32].mxu1 %vm957_vm4, %v2044_v20 }
 0x16d   : > { %15896 = vmatprep.mubr.msk.bf16.mxu1 %vm19785_vm2, %v20550_v45 }
 0x16e   : > { %v1863_v59 = vmul.f32 %v20427_v23, %v1576_v47  ;;  %v1577_v50 = vmax.f32 %v1536_v41, 0.0 }
 0x16f   : > { %v1370_v54 = vpop.f32.mrb[36].mxu0  ;;  %v2012_v58 = vld [vmem:[#allocation2 + $0x81] sm:$0xff] }
 0x170   : > { %1904 = vst.msk [vmem:[#allocation2 + $0x93] sm:$0xff] %vm957_vm4, %v1863_v59  ;;  %v1864_v9 = vmul.f32 %v20496_v6, %v1577_v50  ;;  %v1489_v52 = vmul.f32 %v20486_v60, %v1370_v54  ;;  %v15814_v12 = vpop.f32.mrb[37].mxu0 }
 0x171   : > { %v1373_v57 = vpop.f32.mrb[38].mxu0  ;;  %v2013_v43 = vld [vmem:[#allocation2 + $0x89] sm:$0xff] }
 0x172   : > { %1905 = vst.msk [vmem:[#allocation2 + $0x9b] sm:$0xff] %vm957_vm4, %v1864_v9  ;;  %v1537_v62 = vadd.f32 %v20489_v61, %v1489_v52  ;;  %v1490_v16 = vmul.f32 %v20486_v60, %v1373_v57  ;;  %v15815_v1 = vpop.f32.mrb[39].mxu0  ;;  %v2045_v23 = vpack.c.bf16 %v2013_v43, %v2012_v58 }
 0x173   : > { %v1770_v1 = vpop.permute.xlu1 %1769 }
 0x174   : > { %v1578_v0 = vmax.f32 %v1537_v62, 0.0  ;;  %v1538_v10 = vadd.f32 %v20489_v61, %v1490_v16  ;;  %15897 = vmatmul.mubr.msk.bf16.gmra.mrb[36].mxu1 %vm957_vm4, %v2045_v23 }
 0x175   : > { %15900 = vmatprep.mubr.msk.bf16.mxu1 %vm19785_vm2, %v20550_v45 }
 0x176   : > { %v1865_v6 = vmul.f32 %v20433_v26, %v1578_v0  ;;  %v1579_v5 = vmax.f32 %v1538_v10, 0.0 }
 0x177   : > { %v1378_v49 = vpop.f32.mrb[40].mxu0  ;;  %v2014_v8 = vld [vmem:[#allocation2 + $0x91] sm:$0xff] }
 0x178   : > { %1906 = vst.msk [vmem:[#allocation2 + $0xa3] sm:$0xff] %vm957_vm4, %v1865_v6  ;;  %v1866_v7 = vmul.f32 %v20505_v36, %v1579_v5  ;;  %v1491_v3 = vmul.f32 %v20486_v60, %v1378_v49  ;;  %v15818_v11 = vpop.f32.mrb[41].mxu0 }
 0x179   : > { %v1381_v14 = vpop.f32.mrb[42].mxu0  ;;  %v2015_v55 = vld [vmem:[#allocation2 + $0x99] sm:$0xff] }
 0x17a   : > { %1907 = vst.msk [vmem:[#allocation2 + $0xab] sm:$0xff] %vm957_vm4, %v1866_v7  ;;  %v1539_v13 = vadd.f32 %v20489_v61, %v1491_v3  ;;  %v1492_v17 = vmul.f32 %v20486_v60, %v1381_v14  ;;  %v15819_v19 = vpop.f32.mrb[43].mxu0  ;;  %v2046_v26 = vpack.c.bf16 %v2015_v55, %v2014_v8 }
 0x17b   : > { %v1780_v19 = vpop.permute.xlu1 %1779 }
 0x17c   : > { %v1580_v21 = vmax.f32 %v1539_v13, 0.0  ;;  %v1540_v22 = vadd.f32 %v20489_v61, %v1492_v17  ;;  %15901 = vmatmul.mubr.msk.bf16.gmra.mrb[40].mxu1 %vm957_vm4, %v2046_v26 }
 0x17d   : > { %15904 = vmatprep.mubr.msk.bf16.mxu1 %vm19785_vm2, %v20550_v45 }
 0x17e   : > { %v1867_v36 = vmul.f32 %v20437_v29, %v1580_v21  ;;  %v1581_v18 = vmax.f32 %v1540_v22, 0.0 }
 0x17f   : > { %v1386_v24 = vpop.f32.mrb[44].mxu0  ;;  %v2016_v28 = vld [vmem:[#allocation2 + $0xa1] sm:$0xff] }
 0x180   : > { %1908 = vst.msk [vmem:[#allocation2 + $0xb3] sm:$0xff] %vm957_vm4, %v1867_v36  ;;  %v1868_v35 = vmul.f32 %v20517_v4, %v1581_v18  ;;  %v1493_v53 = vmul.f32 %v20486_v60, %v1386_v24  ;;  %v15822_v25 = vpop.f32.mrb[45].mxu0 }
 0x181   : > { %v1389_v27 = vpop.f32.mrb[46].mxu0  ;;  %v2017_v40 = vld [vmem:[#allocation2 + $0xa9] sm:$0xff] }
 0x182   : > { %1909 = vst.msk [vmem:[#allocation2 + $0xbb] sm:$0xff] %vm957_vm4, %v1868_v35  ;;  %v1541_v30 = vadd.f32 %v20489_v61, %v1493_v53  ;;  %v1494_v31 = vmul.f32 %v20486_v60, %v1389_v27  ;;  %v15823_v32 = vpop.f32.mrb[47].mxu0  ;;  %v2047_v29 = vpack.c.bf16 %v2017_v40, %v2016_v28 }
 0x183   : > { %v1790_v32 = vpop.permute.xlu1 %1789 }
 0x184   : > { %v1582_v15 = vmax.f32 %v1541_v30, 0.0  ;;  %v1542_v34 = vadd.f32 %v20489_v61, %v1494_v31  ;;  %15905 = vmatmul.mubr.msk.bf16.gmra.mrb[44].mxu1 %vm957_vm4, %v2047_v29 }
 0x185   : > { %15908 = vmatprep.mubr.msk.bf16.mxu1 %vm19785_vm2, %v20550_v45 }
 0x186   : > { %v1869_v4 = vmul.f32 %v20442_v33, %v1582_v15  ;;  %v1583_v37 = vmax.f32 %v1542_v34, 0.0 }
 0x187   : > { %v1394_v20 = vpop.f32.mrb[48].mxu0  ;;  %v2018_v54 = vld [vmem:[#allocation2 + $0xb1] sm:$0xff] }
 0x188   : > { %1910 = vst.msk [vmem:[#allocation2 + $0xc3] sm:$0xff] %vm957_vm4, %v1869_v4  ;;  %v1870_v47 = vmul.f32 %v1760_v39, %v1583_v37  ;;  %v1495_v41 = vmul.f32 %v20486_v60, %v1394_v20  ;;  %v15826_v59 = vpop.f32.mrb[49].mxu0 }
 0x189   : > { %v1397_v50 = vpop.f32.mrb[50].mxu0  ;;  %v2019_v9 = vld [vmem:[#allocation2 + $0xb9] sm:$0xff] }
 0x18a   : > { %1911 = vst.msk [vmem:[#allocation2 + $0xcb] sm:$0xff] %vm957_vm4, %v1870_v47  ;;  %v1543_v52 = vadd.f32 %v20489_v61, %v1495_v41  ;;  %v1496_v12 = vmul.f32 %v20486_v60, %v1397_v50  ;;  %v15827_v57 = vpop.f32.mrb[51].mxu0  ;;  %v2048_v33 = vpack.c.bf16 %v2019_v9, %v2018_v54 }
 0x18c   : > { %v1584_v58 = vmax.f32 %v1543_v52, 0.0  ;;  %v1544_v43 = vadd.f32 %v20489_v61, %v1496_v12  ;;  %15909 = vmatmul.mubr.msk.bf16.gmra.mrb[48].mxu1 %vm957_vm4, %v2048_v33  ;;  %v1800_v12 = vpop.permute.xlu1 %1799 }
 0x18d   : > { %15912 = vmatprep.mubr.msk.bf16.mxu1 %vm19785_vm2, %v20550_v45 }
 0x18e   : > { %v1871_v62 = vmul.f32 %v20449_v38, %v1584_v58  ;;  %v1585_v16 = vmax.f32 %v1544_v43, 0.0 }
 0x18f   : > { %v1402_v23 = vpop.f32.mrb[52].mxu0  ;;  %v2020_v49 = vld [vmem:[#allocation2 + $0xc1] sm:$0xff] }
 0x190   : > { %1912 = vst.msk [vmem:[#allocation2 + $0xd3] sm:$0xff] %vm957_vm4, %v1871_v62  ;;  %v1872_v0 = vmul.f32 %v1770_v1, %v1585_v16  ;;  %v1497_v10 = vmul.f32 %v20486_v60, %v1402_v23  ;;  %v15830_v6 = vpop.f32.mrb[53].mxu0 }
 0x191   : > { %v1405_v5 = vpop.f32.mrb[54].mxu0  ;;  %v2021_v7 = vld [vmem:[#allocation2 + $0xc9] sm:$0xff] }
 0x192   : > { %1913 = vst.msk [vmem:[#allocation2 + $0xdb] sm:$0xff] %vm957_vm4, %v1872_v0  ;;  %v1545_v3 = vadd.f32 %v20489_v61, %v1497_v10  ;;  %v1498_v11 = vmul.f32 %v20486_v60, %v1405_v5  ;;  %v15831_v14 = vpop.f32.mrb[55].mxu0  ;;  %v2049_v38 = vpack.c.bf16 %v2021_v7, %v2020_v49 }
 0x194   : > { %v1586_v8 = vmax.f32 %v1545_v3, 0.0  ;;  %v1546_v55 = vadd.f32 %v20489_v61, %v1498_v11  ;;  %15913 = vmatmul.mubr.msk.bf16.gmra.mrb[52].mxu1 %vm957_vm4, %v2049_v38  ;;  %v1810_v3 = vpop.permute.xlu1 %1809 }
 0x195   : > { %15916 = vmatprep.mubr.msk.bf16.mxu1 %vm19785_vm2, %v20550_v45 }
 0x196   : > { %v1873_v13 = vmul.f32 %v20455_v42, %v1586_v8  ;;  %v1587_v17 = vmax.f32 %v1546_v55, 0.0 }
 0x197   : > { %v1410_v26 = vpop.f32.mrb[56].mxu0  ;;  %v2022_v24 = vld [vmem:[#allocation2 + $0xd1] sm:$0xff] }
 0x198   : > { %1914 = vst.msk [vmem:[#allocation2 + $0xe3] sm:$0xff] %vm957_vm4, %v1873_v13  ;;  %v1874_v21 = vmul.f32 %v1780_v19, %v1587_v17  ;;  %v1499_v22 = vmul.f32 %v20486_v60, %v1410_v26  ;;  %v15834_v36 = vpop.f32.mrb[57].mxu0 }
 0x199   : > { %v1413_v18 = vpop.f32.mrb[58].mxu0  ;;  %v2023_v35 = vld [vmem:[#allocation2 + $0xd9] sm:$0xff] }
 0x19a   : > { %1915 = vst.msk [vmem:[#allocation2 + $0xeb] sm:$0xff] %vm957_vm4, %v1874_v21  ;;  %v1547_v53 = vadd.f32 %v20489_v61, %v1499_v22  ;;  %v1500_v25 = vmul.f32 %v20486_v60, %v1413_v18  ;;  %v15835_v27 = vpop.f32.mrb[59].mxu0  ;;  %v2050_v42 = vpack.c.bf16 %v2023_v35, %v2022_v24  ;;  %v1820_v35 = vpop.permute.xlu1 %1819 }
 0x19c   : > { %v1588_v28 = vmax.f32 %v1547_v53, 0.0  ;;  %v1548_v40 = vadd.f32 %v20489_v61, %v1500_v25  ;;  %15917 = vmatmul.mubr.msk.bf16.gmra.mrb[56].mxu1 %vm957_vm4, %v2050_v42 }
 0x19d   : > { %15920 = vmatprep.mubr.msk.bf16.mxu1 %vm19785_vm2, %v20550_v45 }
 0x19e   : > { %v1875_v30 = vmul.f32 %v20459_v44, %v1588_v28  ;;  %v1589_v31 = vmax.f32 %v1548_v40, 0.0 }
 0x19f   : > { %v1418_v29 = vpop.f32.mrb[60].mxu0  ;;  %v2024_v39 = vld [vmem:[#allocation2 + $0xe1] sm:$0xff] }
 0x1a0   : > { %1916 = vst.msk [vmem:[#allocation2 + $0xf3] sm:$0xff] %vm957_vm4, %v1875_v30  ;;  %v1876_v15 = vmul.f32 %v1790_v32, %v1589_v31  ;;  %v1501_v34 = vmul.f32 %v20486_v60, %v1418_v29  ;;  %v15838_v4 = vpop.f32.mrb[61].mxu0 }
 0x1a1   : > { %v1421_v37 = vpop.f32.mrb[62].mxu0  ;;  %v2025_v20 = vld [vmem:[#allocation2 + $0xe9] sm:$0xff] }
 0x1a2   : > { %1917 = vst.msk [vmem:[#allocation2 + $0xfb] sm:$0xff] %vm957_vm4, %v1876_v15  ;;  %v1549_v47 = vadd.f32 %v20489_v61, %v1501_v34  ;;  %v1502_v41 = vmul.f32 %v20486_v60, %v1421_v37  ;;  %v15839_v59 = vpop.f32.mrb[63].mxu0  ;;  %v2051_v44 = vpack.c.bf16 %v2025_v20, %v2024_v39  ;;  %v1830_v39 = vpop.permute.xlu1 %1829 }
 0x1a4   : > { %v1590_v50 = vmax.f32 %v1549_v47, 0.0  ;;  %v1550_v54 = vadd.f32 %v20489_v61, %v1502_v41  ;;  %15921 = vmatmul.mubr.msk.bf16.gmra.mrb[60].mxu1 %vm957_vm4, %v2051_v44 }
 0x1a5   : > { %15924 = vmatprep.mubr.msk.bf16.mxu1 %vm19785_vm2, %v20550_v45 }
 0x1a6   : > { %v1877_v9 = vmul.f32 %v20463_v46, %v1590_v50  ;;  %v1591_v52 = vmax.f32 %v1550_v54, 0.0 }
 0x1a7   : > { %v1426_v57 = vpop.f32.mrb[64].mxu0  ;;  %v2026_v16 = vld [vmem:[#allocation2 + $0xf1] sm:$0xff] }
 0x1a8   : > { %1918 = vst.msk [vmem:[#allocation2 + $0x103] sm:$0xff] %vm957_vm4, %v1877_v9  ;;  %v1878_v33 = vmul.f32 %v1800_v12, %v1591_v52  ;;  %v1503_v58 = vmul.f32 %v20486_v60, %v1426_v57  ;;  %v15842_v43 = vpop.f32.mrb[65].mxu0 }
 0x1a9   : > { %v1429_v62 = vpop.f32.mrb[66].mxu0  ;;  %v2027_v1 = vld [vmem:[#allocation2 + $0xf9] sm:$0xff] }
 0x1aa   : > { %1919 = vst.msk [vmem:[#allocation2 + $0x10b] sm:$0xff] %vm957_vm4, %v1878_v33  ;;  %v1551_v23 = vadd.f32 %v20489_v61, %v1503_v58  ;;  %v1504_v0 = vmul.f32 %v20486_v60, %v1429_v62  ;;  %v15843_v10 = vpop.f32.mrb[67].mxu0  ;;  %v2052_v46 = vpack.c.bf16 %v2027_v1, %v2026_v16  ;;  %v1840_v62 = vpop.permute.xlu1 %1839 }
 0x1ab   : > { %v1931_v10 = vld [vmem:[#allocation2 + $0x8] sm:$0xff] }
 0x1ac   : > { %v1592_v6 = vmax.f32 %v1551_v23, 0.0  ;;  %v1552_v5 = vadd.f32 %v20489_v61, %v1504_v0  ;;  %15925 = vmatmul.mubr.msk.bf16.gmra.mrb[64].mxu1 %vm957_vm4, %v2052_v46 }
 0x1ad   : > { %15928 = vmatprep.mubr.msk.bf16.mxu1 %vm19785_vm2, %v20550_v45 }
 0x1ae   : > { %v1879_v49 = vmul.f32 %v20467_v48, %v1592_v6  ;;  %v1593_v7 = vmax.f32 %v1552_v5, 0.0  ;;  %v19254_v6 = vld [vmem:[%s19815_s21 + $0x20] sm:$0xff]   ;;  %v1933_v5 = vld [vmem:[#allocation2 + $0x18] sm:$0xff] }
 0x1af   : > { %v1434_v11 = vpop.f32.mrb[68].mxu0  ;;  %v2028_v13 = vld [vmem:[#allocation2 + $0x101] sm:$0xff] }
 0x1b0   : > { %1920 = vst.msk [vmem:[#allocation2 + $0x113] sm:$0xff] %vm957_vm4, %v1879_v49  ;;  %v1880_v14 = vmul.f32 %v1810_v3, %v1593_v7  ;;  %v1505_v38 = vmul.f32 %v20486_v60, %v1434_v11  ;;  %v15846_v8 = vpop.f32.mrb[69].mxu0  ;;  %v1932_v49 = vld [vmem:[#allocation2 + $0x10] sm:$0xff]  ;;  %v1935_v3 = vld [vmem:[#allocation2 + $0x28] sm:$0xff]  ;;  %v1934_v11 = vld [vmem:[#allocation2 + $0x20] sm:$0xff] }
 0x1b1   : > { %v1437_v55 = vpop.f32.mrb[70].mxu0  ;;  %v2029_v17 = vld [vmem:[#allocation2 + $0x109] sm:$0xff]  ;;  %v1972_v7 = vpack.c.bf16 %v1933_v5, %v1932_v49 }
 0x1b2   : > { %1921 = vst.msk [vmem:[#allocation2 + $0x11b] sm:$0xff] %vm957_vm4, %v1880_v14  ;;  %v1553_v19 = vadd.f32 %v20489_v61, %v1505_v38  ;;  %v1506_v26 = vmul.f32 %v20486_v60, %v1437_v55  ;;  %v15847_v21 = vpop.f32.mrb[71].mxu0  ;;  %v2053_v48 = vpack.c.bf16 %v2029_v17, %v2028_v13  ;;  %v1973_v14 = vpack.c.bf16 %v1935_v3, %v1934_v11  ;;  %v1937_v38 = vld [vmem:[#allocation2 + $0x38] sm:$0xff]  ;;  %v1936_v8 = vld [vmem:[#allocation2 + $0x30] sm:$0xff]  ;;  %v1939_v13 = vld [vmem:[#allocation2 + $0x48] sm:$0xff] }
 0x1b3   : > { %v1974_v55 = vpack.c.bf16 %v1937_v38, %v1936_v8  ;;  %v1938_v17 = vld [vmem:[#allocation2 + $0x40] sm:$0xff]  ;;  %v1941_v21 = vld [vmem:[#allocation2 + $0x58] sm:$0xff]  ;;  %v19256_v49 = vld [vmem:[%s19815_s21 + $0x30] sm:$0xff]  }
 0x1b4   : > { %v1594_v22 = vmax.f32 %v1553_v19, 0.0  ;;  %v1554_v36 = vadd.f32 %v20489_v61, %v1506_v26  ;;  %15929 = vmatmul.mubr.msk.bf16.gmra.mrb[68].mxu1 %vm957_vm4, %v2053_v48  ;;  %v1975_v19 = vpack.c.bf16 %v1939_v13, %v1938_v17  ;;  %v19255_v26 = vld [vmem:[%s19815_s21 + $0x28] sm:$0xff]   ;;  %v1940_v48 = vld [vmem:[#allocation2 + $0x50] sm:$0xff] }
 0x1b5   : > { %15932 = vmatprep.mubr.msk.bf16.mxu1 %vm19785_vm2, %v20550_v45  ;;  %v2615_v3 = vld [vmem:[#allocation2 + $0x12] sm:$0xff]  ;;  %v2617_v38 = vld [vmem:[#allocation2 + $0x22] sm:$0xff] }
 0x1b6   : > { %v1881_v18 = vmul.f32 %v20472_v51, %v1594_v22  ;;  %v1595_v24 = vmax.f32 %v1554_v36, 0.0  ;;  %v1976_v22 = vpack.c.bf16 %v1941_v21, %v1940_v48  ;;  %v1943_v36 = vld [vmem:[#allocation2 + $0x68] sm:$0xff]  ;;  %v2619_v13 = vld [vmem:[#allocation2 + $0x32] sm:$0xff] }
 0x1b7   : > { %v1442_v53 = vpop.f32.mrb[72].mxu0  ;;  %v2030_v40 = vld [vmem:[#allocation2 + $0x111] sm:$0xff] }
 0x1b8   : > { %1922 = vst.msk [vmem:[#allocation2 + $0x123] sm:$0xff] %vm957_vm4, %v1881_v18  ;;  %v1882_v25 = vmul.f32 %v1820_v35, %v1595_v24  ;;  %v1507_v27 = vmul.f32 %v20486_v60, %v1442_v53  ;;  %v15850_v42 = vpop.f32.mrb[73].mxu0  ;;  %v1942_v18 = vld [vmem:[#allocation2 + $0x60] sm:$0xff]  ;;  %v1945_v35 = vld [vmem:[#allocation2 + $0x78] sm:$0xff]  ;;  %v1944_v53 = vld [vmem:[#allocation2 + $0x70] sm:$0xff] }
 0x1b9   : > { %v1445_v28 = vpop.f32.mrb[74].mxu0  ;;  %v2031_v30 = vld [vmem:[#allocation2 + $0x119] sm:$0xff]  ;;  %v1977_v24 = vpack.c.bf16 %v1943_v36, %v1942_v18 }
 0x1ba   : > { %1923 = vst.msk [vmem:[#allocation2 + $0x12b] sm:$0xff] %vm957_vm4, %v1882_v25  ;;  %v1555_v31 = vadd.f32 %v20489_v61, %v1507_v27  ;;  %v1508_v32 = vmul.f32 %v20486_v60, %v1445_v28  ;;  %v15851_v29 = vpop.f32.mrb[75].mxu0  ;;  %v2054_v51 = vpack.c.bf16 %v2031_v30, %v2030_v40  ;;  %v1978_v25 = vpack.c.bf16 %v1945_v35, %v1944_v53  ;;  %v1947_v27 = vld [vmem:[#allocation2 + $0x88] sm:$0xff]  ;;  %v1946_v42 = vld [vmem:[#allocation2 + $0x80] sm:$0xff]  ;;  %v1949_v40 = vld [vmem:[#allocation2 + $0x98] sm:$0xff] }
 0x1bb   : > { %v1979_v28 = vpack.c.bf16 %v1947_v27, %v1946_v42  ;;  %v1948_v30 = vld [vmem:[#allocation2 + $0x90] sm:$0xff]  ;;  %v1950_v29 = vld [vmem:[#allocation2 + $0xa0] sm:$0xff]  ;;  %v19257_v48 = vld [vmem:[%s19815_s21 + $0x38] sm:$0xff]  }
 0x1bc   : > { %v1596_v15 = vmax.f32 %v1555_v31, 0.0  ;;  %v1556_v34 = vadd.f32 %v20489_v61, %v1508_v32  ;;  %15933 = vmatmul.mubr.msk.bf16.gmra.mrb[72].mxu1 %vm957_vm4, %v2054_v51  ;;  %v1980_v31 = vpack.c.bf16 %v1949_v40, %v1948_v30  ;;  %v1951_v32 = vld [vmem:[#allocation2 + $0xa8] sm:$0xff]  ;;  %v2623_v36 = vld [vmem:[#allocation2 + $0x52] sm:$0xff] }
 0x1bd   : > { %15936 = vmatprep.mubr.msk.bf16.mxu1 %vm19785_vm2, %v20550_v45  ;;  %v1981_v51 = vpack.c.bf16 %v1951_v32, %v1950_v29  ;;  %v2625_v35 = vld [vmem:[#allocation2 + $0x62] sm:$0xff]  ;;  %v2627_v27 = vld [vmem:[#allocation2 + $0x72] sm:$0xff] }
 0x1be   : > { %v1883_v4 = vmul.f32 %v20479_v56, %v1596_v15  ;;  %v1597_v37 = vmax.f32 %v1556_v34, 0.0  ;;  %v1953_v15 = vld [vmem:[#allocation2 + $0xb8] sm:$0xff]  ;;  %v1952_v34 = vld [vmem:[#allocation2 + $0xb0] sm:$0xff]  ;;  %v2629_v40 = vld [vmem:[#allocation2 + $0x82] sm:$0xff] }
 0x1bf   : > { %v1450_v20 = vpop.f32.mrb[76].mxu0  ;;  %v2032_v50 = vld [vmem:[#allocation2 + $0x121] sm:$0xff]  ;;  %v2631_v32 = vld [vmem:[#allocation2 + $0x92] sm:$0xff] }
 0x1c0   : > { %1924 = vst.msk [vmem:[#allocation2 + $0x133] sm:$0xff] %vm957_vm4, %v1883_v4  ;;  %v1884_v47 = vmul.f32 %v1830_v39, %v1597_v37  ;;  %v1509_v41 = vmul.f32 %v20486_v60, %v1450_v20  ;;  %v15854_v59 = vpop.f32.mrb[77].mxu0  ;;  %v1982_v4 = vpack.c.bf16 %v1953_v15, %v1952_v34  ;;  %v1955_v37 = vld [vmem:[#allocation2 + $0xc8] sm:$0xff]  ;;  %v1954_v39 = vld [vmem:[#allocation2 + $0xc0] sm:$0xff] }
 0x1c1   : > { %v1453_v44 = vpop.f32.mrb[78].mxu0  ;;  %v2033_v54 = vld [vmem:[#allocation2 + $0x129] sm:$0xff]  ;;  %v1983_v20 = vpack.c.bf16 %v1955_v37, %v1954_v39  ;;  %v2635_v37 = vld [vmem:[#allocation2 + $0xb2] sm:$0xff] }
 0x1c2   : > { %1925 = vst.msk [vmem:[#allocation2 + $0x13b] sm:$0xff] %vm957_vm4, %v1884_v47  ;;  %v1557_v9 = vadd.f32 %v20489_v61, %v1509_v41  ;;  %v1510_v52 = vmul.f32 %v20486_v60, %v1453_v44  ;;  %v15855_v12 = vpop.f32.mrb[79].mxu0  ;;  %v2055_v56 = vpack.c.bf16 %v2033_v54, %v2032_v50  ;;  %v1957_v47 = vld [vmem:[#allocation2 + $0xd8] sm:$0xff]  ;;  %v1956_v41 = vld [vmem:[#allocation2 + $0xd0] sm:$0xff]  ;;  %v1959_v44 = vld [vmem:[#allocation2 + $0xe8] sm:$0xff] }
 0x1c3   : > { %v1984_v59 = vpack.c.bf16 %v1957_v47, %v1956_v41  ;;  %v1958_v50 = vld [vmem:[#allocation2 + $0xe0] sm:$0xff] }
 0x1c4   : > { %v1598_v57 = vmax.f32 %v1557_v9, 0.0  ;;  %v1558_v33 = vadd.f32 %v20489_v61, %v1510_v52  ;;  %15937 = vmatmul.mubr.msk.bf16.gmra.mrb[76].mxu1 %vm957_vm4, %v2055_v56  ;;  %v1985_v54 = vpack.c.bf16 %v1959_v44, %v1958_v50  ;;  %v1961_v9 = vld [vmem:[#allocation2 + $0xf8] sm:$0xff]  ;;  %v1960_v52 = vld [vmem:[#allocation2 + $0xf0] sm:$0xff]  ;;  %v1963_v56 = vld [vmem:[#allocation2 + $0x108] sm:$0xff] }
 0x1c5   : > { %15940 = vmatprep.mubr.msk.bf16.mxu1 %vm19785_vm2, %v20550_v45  ;;  %v1986_v12 = vpack.c.bf16 %v1961_v9, %v1960_v52  ;;  %v2633_v15 = vld [vmem:[#allocation2 + $0xa2] sm:$0xff]  ;;  %v2639_v44 = vld [vmem:[#allocation2 + $0xd2] sm:$0xff] }
 0x1c6   : > { %v1885_v58 = vmul.f32 %v20493_v63, %v1598_v57  ;;  %v1599_v43 = vmax.f32 %v1558_v33, 0.0  ;;  %v1930_v63 = vld [vmem:[#allocation2] sm:$0xff] }
 0x1c7   : > { %v2034_v1 = vld [vmem:[#allocation2 + $0x131] sm:$0xff]  ;;  %v1971_v46 = vpack.c.bf16 %v1931_v10, %v1930_v63  ;;  %v1962_v57 = vld [vmem:[#allocation2 + $0x100] sm:$0xff] }
 0x1c8   : > { %1926 = vst.msk [vmem:[#allocation2 + $0x143] sm:$0xff] %vm957_vm4, %v1885_v58  ;;  %v1886_v16 = vmul.f32 %v1840_v62, %v1599_v43  ;;  %v1987_v33 = vpack.c.bf16 %v1963_v56, %v1962_v57  ;;  %v1965_v58 = vld [vmem:[#allocation2 + $0x118] sm:$0xff]  ;;  %v1964_v43 = vld [vmem:[#allocation2 + $0x110] sm:$0xff]  ;;  %v2637_v47 = vld [vmem:[#allocation2 + $0xc2] sm:$0xff] }
 0x1c9   : > { %v2035_v60 = vld [vmem:[#allocation2 + $0x139] sm:$0xff]  ;;  %v1988_v62 = vpack.c.bf16 %v1965_v58, %v1964_v43  ;;  %v2641_v9 = vld [vmem:[#allocation2 + $0xe2] sm:$0xff] }
 0x1ca   : > { %1927 = vst.msk [vmem:[#allocation2 + $0x14b] sm:$0xff] %vm957_vm4, %v1886_v16  ;;  %v2056_v23 = vpack.c.bf16 %v2035_v60, %v2034_v1  ;;  %v1967_v16 = vld [vmem:[#allocation2 + $0x128] sm:$0xff]  ;;  %v1966_v1 = vld [vmem:[#allocation2 + $0x120] sm:$0xff]  ;;  %v2643_v56 = vld [vmem:[#allocation2 + $0xf2] sm:$0xff] }
 0x1cb   : > { %v1989_v60 = vpack.c.bf16 %v1967_v16, %v1966_v1  ;;  %v2645_v58 = vld [vmem:[#allocation2 + $0x102] sm:$0xff]  ;;  %v2648_v16 = vld [vmem:[#allocation2 + $0x11a] sm:$0xff]  ;;  %v2647_v1 = vld [vmem:[#allocation2 + $0x112] sm:$0xff] }
 0x1cc   : > { %15941 = vmatmul.mubr.msk.bf16.gmra.mrb[80].mxu1 %vm957_vm4, %v2056_v23  ;;  %v1969_v23 = vld [vmem:[#allocation2 + $0x138] sm:$0xff] }
 0x1cd   : > { %15944 = vmatprep.mubr.msk.bf16.mxu1 %vm19785_vm2, %v20550_v45 }
 0x1cf   : > { %v2036_v61 = vld [vmem:[#allocation2 + $0x141] sm:$0xf] }
 0x1d0   : > { %v2057_v0 = vpack.c.bf16 %v2036_v61, %v2036_v61  ;;  %v1968_v61 = vld [vmem:[#allocation2 + $0x130] sm:$0xff]  ;;  %v1970_v63 = vld [vmem:[#allocation2 + $0x140] sm:$0xf] }
 0x1d1   : > { %v1991_v10 = vpack.c.bf16 %v1970_v63, %v1970_v63  ;;  %v2651_v63 = vld [vmem:[#allocation2 + $0x132] sm:$0xff] }
 0x1d4   : > { %15945 = vmatmul.mubr.msk.bf16.gmra.mrb[84].mxu1 %vm957_vm4, %v2057_v0  ;;  %v1990_v0 = vpack.c.bf16 %v1969_v23, %v1968_v61  ;;  %v2649_v23 = vld [vmem:[#allocation2 + $0x122] sm:$0xff] }
 0x1d5   : > { %15952 = vmatprep.mubr.msk.bf16.mxu1 %vm19785_vm2, %v20550_v45 }
 0x1dc   : > { %15953 = vmatmul.mubr.msk.bf16.vlgmr.msra.gmra.mrb[4].mxu1 %vm957_vm4, %v1971_v46  ;;  %v2613_v46 = vld [vmem:[#allocation2 + $0x2] sm:$0xff] }
 0x1dd   : > { %15956 = vmatprep.mubr.msk.bf16.mxu1 %vm19785_vm2, %v20550_v45  ;;  %16037 = vmatpush3.bf16.msra.mxu1 %v19254_v6  ;;  %v2614_v6 = vld [vmem:[#allocation2 + $0xa] sm:$0xff] }
 0x1de   : > { %16038 = vmatprep.subr.bf16.mxu1 %v20550_v45  ;;  %v2654_v5 = vpack.c.bf16 %v2614_v6, %v2613_v46  ;;  %v2653_v46 = vld [vmem:[#allocation2 + $0x142] sm:$0xf] }
 0x1df   : > { %v2674_v6 = vpack.c.bf16 %v2653_v46, %v2653_v46  ;;  %v3414_v46 = vld [vmem:[#allocation2 + $0x12b] sm:$0xff] }
 0x1e1   : > { %16039 = vmatpush3.bf16.msra.mxu1 %v19255_v26  ;;  %v2621_v26 = vld [vmem:[#allocation2 + $0x42] sm:$0xff] }
 0x1e2   : > { %16124 = vmatprep.subr.bf16.mxu1 %v20550_v45 }
 0x1e4   : > { %15957 = vmatmul.mubr.msk.bf16.gmra.mrb[8].mxu1 %vm957_vm4, %v1972_v7  ;;  %v2616_v7 = vld [vmem:[#allocation2 + $0x1a] sm:$0xff] }
 0x1e5   : > { %15960 = vmatprep.mubr.msk.bf16.mxu1 %vm19785_vm2, %v20550_v45  ;;  %v20794_v11 = vpack.c.bf16 %v2616_v7, %v2615_v3  ;;  %v3035_v7 = vld [vmem:[#allocation2 + $0x14a] sm:$0xff]  ;;  %v3034_v3 = vld [vmem:[#allocation2 + $0x142] sm:$0xff] }
 0x1ec   : > { %15961 = vmatmul.mubr.msk.bf16.gmra.mrb[12].mxu1 %vm957_vm4, %v1973_v14  ;;  %v2618_v14 = vld [vmem:[#allocation2 + $0x2a] sm:$0xff] }
 0x1ed   : > { %15964 = vmatprep.mubr.msk.bf16.mxu1 %vm19785_vm2, %v20550_v45  ;;  %v20800_v8 = vpack.c.bf16 %v2618_v14, %v2617_v38  ;;  %v3036_v14 = vld [vmem:[#allocation2 + $0x152] sm:$0xf] }
 0x1ee   : > { %v3057_v38 = vpack.c.bf16 %v3036_v14, %v3036_v14  ;;  %v3417_v14 = vld [vmem:[#allocation2 + $0x143] sm:$0xff] }
 0x1f4   : > { %15965 = vmatmul.mubr.msk.bf16.gmra.mrb[16].mxu1 %vm957_vm4, %v1974_v55  ;;  %v2620_v55 = vld [vmem:[#allocation2 + $0x3a] sm:$0xff] }
 0x1f5   : > { %15968 = vmatprep.mubr.msk.bf16.mxu1 %vm19785_vm2, %v20550_v45  ;;  %v20806_v17 = vpack.c.bf16 %v2620_v55, %v2619_v13  ;;  %v3379_v55 = vld [vmem:[#allocation2 + $0x13] sm:$0xff] }
 0x1f6   : > { %v19260_v13 = vld [vmem:[%s19815_s21 + $0x50] sm:$0xff]  }
 0x1fc   : > { %15969 = vmatmul.mubr.msk.bf16.gmra.mrb[20].mxu1 %vm957_vm4, %v1975_v19  ;;  %v2622_v19 = vld [vmem:[#allocation2 + $0x4a] sm:$0xff] }
 0x1fd   : > { %15972 = vmatprep.mubr.msk.bf16.mxu1 %vm19785_vm2, %v20550_v45  ;;  %v20812_v21 = vpack.c.bf16 %v2622_v19, %v2621_v26  ;;  %v3382_v19 = vld [vmem:[#allocation2 + $0x2b] sm:$0xff]  ;;  %v3381_v26 = vld [vmem:[#allocation2 + $0x23] sm:$0xff] }
 0x204   : > { %15973 = vmatmul.mubr.msk.bf16.gmra.mrb[24].mxu1 %vm957_vm4, %v1976_v22  ;;  %v2624_v22 = vld [vmem:[#allocation2 + $0x5a] sm:$0xff] }
 0x205   : > { %15976 = vmatprep.mubr.msk.bf16.mxu1 %vm19785_vm2, %v20550_v45  ;;  %v20820_v18 = vpack.c.bf16 %v2624_v22, %v2623_v36  ;;  %v3383_v22 = vld [vmem:[#allocation2 + $0x33] sm:$0xff] }
 0x20c   : > { %15977 = vmatmul.mubr.msk.bf16.gmra.mrb[28].mxu1 %vm957_vm4, %v1977_v24  ;;  %v2626_v24 = vld [vmem:[#allocation2 + $0x6a] sm:$0xff] }
 0x20d   : > { %15980 = vmatprep.mubr.msk.bf16.mxu1 %vm19785_vm2, %v20550_v45  ;;  %v20826_v53 = vpack.c.bf16 %v2626_v24, %v2625_v35  ;;  %v3385_v24 = vld [vmem:[#allocation2 + $0x43] sm:$0xff] }
 0x214   : > { %15981 = vmatmul.mubr.msk.bf16.gmra.mrb[32].mxu1 %vm957_vm4, %v1978_v25  ;;  %v2628_v25 = vld [vmem:[#allocation2 + $0x7a] sm:$0xff] }
 0x215   : > { %15984 = vmatprep.mubr.msk.bf16.mxu1 %vm19785_vm2, %v20550_v45  ;;  %v20832_v42 = vpack.c.bf16 %v2628_v25, %v2627_v27  ;;  %v3387_v25 = vld [vmem:[#allocation2 + $0x53] sm:$0xff] }
 0x21c   : > { %15985 = vmatmul.mubr.msk.bf16.gmra.mrb[36].mxu1 %vm957_vm4, %v1979_v28  ;;  %v2630_v28 = vld [vmem:[#allocation2 + $0x8a] sm:$0xff] }
 0x21d   : > { %15988 = vmatprep.mubr.msk.bf16.mxu1 %vm19785_vm2, %v20550_v45  ;;  %v20838_v30 = vpack.c.bf16 %v2630_v28, %v2629_v40  ;;  %v3390_v28 = vld [vmem:[#allocation2 + $0x6b] sm:$0xff]  ;;  %v3389_v40 = vld [vmem:[#allocation2 + $0x63] sm:$0xff] }
 0x224   : > { %15989 = vmatmul.mubr.msk.bf16.gmra.mrb[40].mxu1 %vm957_vm4, %v1980_v31  ;;  %v2632_v31 = vld [vmem:[#allocation2 + $0x9a] sm:$0xff] }
 0x225   : > { %15992 = vmatprep.mubr.msk.bf16.mxu1 %vm19785_vm2, %v20550_v45  ;;  %v20844_v29 = vpack.c.bf16 %v2632_v31, %v2631_v32  ;;  %v3392_v31 = vld [vmem:[#allocation2 + $0x7b] sm:$0xff]  ;;  %v3391_v32 = vld [vmem:[#allocation2 + $0x73] sm:$0xff] }
 0x22c   : > { %15993 = vmatmul.mubr.msk.bf16.gmra.mrb[44].mxu1 %vm957_vm4, %v1981_v51  ;;  %v2634_v51 = vld [vmem:[#allocation2 + $0xaa] sm:$0xff] }
 0x22d   : > { %15996 = vmatprep.mubr.msk.bf16.mxu1 %vm19785_vm2, %v20550_v45  ;;  %v20850_v34 = vpack.c.bf16 %v2634_v51, %v2633_v15  ;;  %v3394_v51 = vld [vmem:[#allocation2 + $0x8b] sm:$0xff]  ;;  %v3393_v15 = vld [vmem:[#allocation2 + $0x83] sm:$0xff] }
 0x234   : > { %15997 = vmatmul.mubr.msk.bf16.gmra.mrb[48].mxu1 %vm957_vm4, %v1982_v4  ;;  %v2636_v4 = vld [vmem:[#allocation2 + $0xba] sm:$0xff] }
 0x235   : > { %16000 = vmatprep.mubr.msk.bf16.mxu1 %vm19785_vm2, %v20550_v45  ;;  %v20856_v39 = vpack.c.bf16 %v2636_v4, %v2635_v37  ;;  %v3396_v4 = vld [vmem:[#allocation2 + $0x9b] sm:$0xff]  ;;  %v3395_v37 = vld [vmem:[#allocation2 + $0x93] sm:$0xff] }
 0x23c   : > { %16001 = vmatmul.mubr.msk.bf16.gmra.mrb[52].mxu1 %vm957_vm4, %v1983_v20  ;;  %v2638_v20 = vld [vmem:[#allocation2 + $0xca] sm:$0xff] }
 0x23d   : > { %16004 = vmatprep.mubr.msk.bf16.mxu1 %vm19785_vm2, %v20550_v45  ;;  %v20862_v41 = vpack.c.bf16 %v2638_v20, %v2637_v47  ;;  %v3398_v20 = vld [vmem:[#allocation2 + $0xab] sm:$0xff]  ;;  %v3397_v47 = vld [vmem:[#allocation2 + $0xa3] sm:$0xff] }
 0x244   : > { %16005 = vmatmul.mubr.msk.bf16.gmra.mrb[56].mxu1 %vm957_vm4, %v1984_v59  ;;  %v2640_v59 = vld [vmem:[#allocation2 + $0xda] sm:$0xff] }
 0x245   : > { %16008 = vmatprep.mubr.msk.bf16.mxu1 %vm19785_vm2, %v20550_v45  ;;  %v20868_v50 = vpack.c.bf16 %v2640_v59, %v2639_v44  ;;  %v3400_v59 = vld [vmem:[#allocation2 + $0xbb] sm:$0xff]  ;;  %v3399_v44 = vld [vmem:[#allocation2 + $0xb3] sm:$0xff] }
 0x24c   : > { %16009 = vmatmul.mubr.msk.bf16.gmra.mrb[60].mxu1 %vm957_vm4, %v1985_v54  ;;  %v2642_v54 = vld [vmem:[#allocation2 + $0xea] sm:$0xff] }
 0x24d   : > { %16012 = vmatprep.mubr.msk.bf16.mxu1 %vm19785_vm2, %v20550_v45  ;;  %v20874_v52 = vpack.c.bf16 %v2642_v54, %v2641_v9  ;;  %v3402_v54 = vld [vmem:[#allocation2 + $0xcb] sm:$0xff]  ;;  %v3401_v9 = vld [vmem:[#allocation2 + $0xc3] sm:$0xff] }
 0x254   : > { %16013 = vmatmul.mubr.msk.bf16.gmra.mrb[64].mxu1 %vm957_vm4, %v1986_v12  ;;  %v2644_v12 = vld [vmem:[#allocation2 + $0xfa] sm:$0xff] }
 0x255   : > { %16016 = vmatprep.mubr.msk.bf16.mxu1 %vm19785_vm2, %v20550_v45  ;;  %v2669_v57 = vpack.c.bf16 %v2644_v12, %v2643_v56  ;;  %v3404_v12 = vld [vmem:[#allocation2 + $0xdb] sm:$0xff]  ;;  %v3403_v56 = vld [vmem:[#allocation2 + $0xd3] sm:$0xff] }
 0x25c   : > { %16017 = vmatmul.mubr.msk.bf16.gmra.mrb[68].mxu1 %vm957_vm4, %v1987_v33  ;;  %v2646_v33 = vld [vmem:[#allocation2 + $0x10a] sm:$0xff] }
 0x25d   : > { %16020 = vmatprep.mubr.msk.bf16.mxu1 %vm19785_vm2, %v20550_v45  ;;  %v2670_v43 = vpack.c.bf16 %v2646_v33, %v2645_v58  ;;  %v3406_v33 = vld [vmem:[#allocation2 + $0xeb] sm:$0xff]  ;;  %v3405_v58 = vld [vmem:[#allocation2 + $0xe3] sm:$0xff] }
 0x264   : > { %16021 = vmatmul.mubr.msk.bf16.gmra.mrb[72].mxu1 %vm957_vm4, %v1988_v62  ;;  %v20884_v62 = vld [vmem:[#allocation4] sm:$0xff] }
 0x265   : > { %16024 = vmatprep.mubr.msk.bf16.mxu1 %vm19785_vm2, %v20550_v45  ;;  %1004 = vst.msk [vmem:[#allocation2 + $0x168] sm:$0x3] %vm1003_vm6, %v20884_v62 }
 0x26c   : > { %16025 = vmatmul.mubr.msk.bf16.gmra.mrb[76].mxu1 %vm957_vm4, %v1989_v60  ;;  %v2671_v60 = vpack.c.bf16 %v2648_v16, %v2647_v1  ;;  %v3408_v16 = vld [vmem:[#allocation2 + $0xfb] sm:$0xff]  ;;  %v3407_v1 = vld [vmem:[#allocation2 + $0xf3] sm:$0xff] }
 0x26d   : > { %16028 = vmatprep.mubr.msk.bf16.mxu1 %vm19785_vm2, %v20550_v45 }
 0x274   : > { %16029 = vmatmul.mubr.msk.bf16.gmra.mrb[80].mxu1 %vm957_vm4, %v1990_v0  ;;  %v2652_v0 = vld [vmem:[#allocation2 + $0x13a] sm:$0xff] }
 0x275   : > { %16032 = vmatprep.mubr.msk.bf16.mxu1 %vm19785_vm2, %v20550_v45 }
 0x27c   : > { %16033 = vmatmul.mubr.msk.bf16.gmra.mrb[84].mxu1 %vm957_vm4, %v1991_v10  ;;  %v2673_v10 = vpack.c.bf16 %v2652_v0, %v2651_v63  ;;  %v3412_v0 = vld [vmem:[#allocation2 + $0x11b] sm:$0xff]  ;;  %v3411_v63 = vld [vmem:[#allocation2 + $0x113] sm:$0xff] }
 0x27d   : > { %16040 = vmatprep.mubr.msk.bf16.mxu1 %vm19785_vm2, %v20550_v45 }
 0x284   : > { %16041 = vmatmul.mubr.msk.bf16.vlgmr.msra.gmra.mrb[4].mxu1 %vm957_vm4, %v2654_v5  ;;  %v19258_v5 = vld [vmem:[%s19815_s21 + $0x40] sm:$0xff]  }
 0x285   : > { %16044 = vmatprep.mubr.msk.bf16.mxu1 %vm19785_vm2, %v20550_v45  ;;  %16125 = vmatpush3.bf16.msra.mxu1 %v19256_v49  ;;  %v19259_v49 = vld [vmem:[%s19815_s21 + $0x48] sm:$0xff]  }
 0x286   : > { %16126 = vmatprep.subr.bf16.mxu1 %v20550_v45 }
 0x289   : > { %16127 = vmatpush3.bf16.msra.mxu1 %v19257_v48  ;;  %v3384_v48 = vld [vmem:[#allocation2 + $0x3b] sm:$0xff] }
 0x28a   : > { %16212 = vmatprep.subr.bf16.mxu1 %v20550_v45  ;;  %v3422_v36 = vpack.c.bf16 %v3384_v48, %v3383_v22  ;;  %v3764_v48 = vld [vmem:[#allocation2 + $0x24] sm:$0xff] }
 0x28c   : > { %16045 = vmatmul.mubr.msk.bf16.gmra.mrb[8].mxu1 %vm957_vm4, %v20794_v11 }
 0x28d   : > { %16048 = vmatprep.mubr.msk.bf16.mxu1 %vm19785_vm2, %v20550_v45 }
 0x294   : > { %16049 = vmatmul.mubr.msk.bf16.gmra.mrb[12].mxu1 %vm957_vm4, %v20800_v8 }
 0x295   : > { %16052 = vmatprep.mubr.msk.bf16.mxu1 %vm19785_vm2, %v20550_v45 }
 0x29c   : > { %16053 = vmatmul.mubr.msk.bf16.gmra.mrb[16].mxu1 %vm957_vm4, %v20806_v17 }
 0x29d   : > { %16056 = vmatprep.mubr.msk.bf16.mxu1 %vm19785_vm2, %v20550_v45 }
 0x2a4   : > { %16057 = vmatmul.mubr.msk.bf16.gmra.mrb[20].mxu1 %vm957_vm4, %v20812_v21 }
 0x2a5   : > { %16060 = vmatprep.mubr.msk.bf16.mxu1 %vm19785_vm2, %v20550_v45 }
 0x2ac   : > { %16061 = vmatmul.mubr.msk.bf16.gmra.mrb[24].mxu1 %vm957_vm4, %v20820_v18 }
 0x2ad   : > { %16064 = vmatprep.mubr.msk.bf16.mxu1 %vm19785_vm2, %v20550_v45 }
 0x2b4   : > { %16065 = vmatmul.mubr.msk.bf16.gmra.mrb[28].mxu1 %vm957_vm4, %v20826_v53 }
 0x2b5   : > { %16068 = vmatprep.mubr.msk.bf16.mxu1 %vm19785_vm2, %v20550_v45 }
 0x2bc   : > { %16069 = vmatmul.mubr.msk.bf16.gmra.mrb[32].mxu1 %vm957_vm4, %v20832_v42 }
 0x2bd   : > { %16072 = vmatprep.mubr.msk.bf16.mxu1 %vm19785_vm2, %v20550_v45 }
 0x2c4   : > { %16073 = vmatmul.mubr.msk.bf16.gmra.mrb[36].mxu1 %vm957_vm4, %v20838_v30 }
 0x2c5   : > { %16076 = vmatprep.mubr.msk.bf16.mxu1 %vm19785_vm2, %v20550_v45 }
 0x2cc   : > { %16077 = vmatmul.mubr.msk.bf16.gmra.mrb[40].mxu1 %vm957_vm4, %v20844_v29 }
 0x2cd   : > { %16080 = vmatprep.mubr.msk.bf16.mxu1 %vm19785_vm2, %v20550_v45 }
 0x2d4   : > { %16081 = vmatmul.mubr.msk.bf16.gmra.mrb[44].mxu1 %vm957_vm4, %v20850_v34 }
 0x2d5   : > { %16084 = vmatprep.mubr.msk.bf16.mxu1 %vm19785_vm2, %v20550_v45 }
 0x2dc   : > { %16085 = vmatmul.mubr.msk.bf16.gmra.mrb[48].mxu1 %vm957_vm4, %v20856_v39 }
 0x2dd   : > { %16088 = vmatprep.mubr.msk.bf16.mxu1 %vm19785_vm2, %v20550_v45 }
 0x2e4   : > { %16089 = vmatmul.mubr.msk.bf16.gmra.mrb[52].mxu1 %vm957_vm4, %v20862_v41 }
 0x2e5   : > { %16092 = vmatprep.mubr.msk.bf16.mxu1 %vm19785_vm2, %v20550_v45 }
 0x2ec   : > { %16093 = vmatmul.mubr.msk.bf16.gmra.mrb[56].mxu1 %vm957_vm4, %v20868_v50 }
 0x2ed   : > { %16096 = vmatprep.mubr.msk.bf16.mxu1 %vm19785_vm2, %v20550_v45 }
 0x2f4   : > { %16097 = vmatmul.mubr.msk.bf16.gmra.mrb[60].mxu1 %vm957_vm4, %v20874_v52 }
 0x2f5   : > { %16100 = vmatprep.mubr.msk.bf16.mxu1 %vm19785_vm2, %v20550_v45 }
 0x2fc   : > { %16101 = vmatmul.mubr.msk.bf16.gmra.mrb[64].mxu1 %vm957_vm4, %v2669_v57 }
 0x2fd   : > { %16104 = vmatprep.mubr.msk.bf16.mxu1 %vm19785_vm2, %v20550_v45  ;;  %v2650_v45 = vld [vmem:[#allocation2 + $0x12a] sm:$0xff] }
 0x2fe   : > { %v2672_v61 = vpack.c.bf16 %v2650_v45, %v2649_v23  ;;  %v3410_v45 = vld [vmem:[#allocation2 + $0x10b] sm:$0xff]  ;;  %v3409_v23 = vld [vmem:[#allocation2 + $0x103] sm:$0xff] }
 0x304   : > { %16105 = vmatmul.mubr.msk.bf16.gmra.mrb[68].mxu1 %vm957_vm4, %v2670_v43 }
 0x305   : > { %16108 = vmatprep.mubr.msk.bf16.mxu1 %vm19785_vm2, %v20884_v62 }
 0x30c   : > { %16109 = vmatmul.mubr.msk.bf16.gmra.mrb[72].mxu1 %vm957_vm4, %v2671_v60 }
 0x30d   : > { %16112 = vmatprep.mubr.msk.bf16.mxu1 %vm19785_vm2, %v20884_v62 }
 0x314   : > { %16113 = vmatmul.mubr.msk.bf16.gmra.mrb[76].mxu1 %vm957_vm4, %v2672_v61 }
 0x315   : > { %16116 = vmatprep.mubr.msk.bf16.mxu1 %vm19785_vm2, %v20884_v62 }
 0x31c   : > { %16117 = vmatmul.mubr.msk.bf16.gmra.mrb[80].mxu1 %vm957_vm4, %v2673_v10 }
 0x31d   : > { %16120 = vmatprep.mubr.msk.bf16.mxu1 %vm19785_vm2, %v20884_v62 }
 0x324   : > { %16121 = vmatmul.mubr.msk.bf16.gmra.mrb[84].mxu1 %vm957_vm4, %v2674_v6  ;;  %v3413_v6 = vld [vmem:[#allocation2 + $0x123] sm:$0xff] }
 0x325   : > { %16128 = vmatprep.mubr.msk.bf16.mxu1 %vm19785_vm2, %v20884_v62 }
 0x32c   : > { %16129 = vmatmul.mubr.msk.bf16.vlgmr.msra.gmra.mrb[4].mxu1 %vm957_vm4, %v20794_v11  ;;  %v3056_v11 = vpack.c.bf16 %v3035_v7, %v3034_v3  ;;  %v3415_v7 = vld [vmem:[#allocation2 + $0x133] sm:$0xff] }
 0x32d   : > { %16132 = vmatprep.mubr.msk.bf16.mxu1 %vm19785_vm2, %v20884_v62  ;;  %16213 = vmatpush3.bf16.msra.mxu1 %v19258_v5  ;;  %v3437_v5 = vpack.c.bf16 %v3414_v46, %v3413_v6  ;;  %v3794_v46 = vld [vmem:[#allocation2 + $0x114] sm:$0xff] }
 0x32e   : > { %16214 = vmatprep.subr.bf16.mxu1 %v20884_v62 }
 0x331   : > { %16215 = vmatpush3.bf16.msra.mxu1 %v19259_v49  ;;  %v3416_v49 = vld [vmem:[#allocation2 + $0x13b] sm:$0xff] }
 0x332   : > { %16300 = vmatprep.subr.bf16.mxu1 %v20884_v62  ;;  %v3438_v3 = vpack.c.bf16 %v3416_v49, %v3415_v7  ;;  %v3796_v49 = vld [vmem:[#allocation2 + $0x124] sm:$0xff] }
 0x334   : > { %16133 = vmatmul.mubr.msk.bf16.gmra.mrb[8].mxu1 %vm957_vm4, %v20800_v8  ;;  %v3380_v8 = vld [vmem:[#allocation2 + $0x1b] sm:$0xff] }
 0x335   : > { %16136 = vmatprep.mubr.msk.bf16.mxu1 %vm19785_vm2, %v20884_v62 }
 0x33c   : > { %16137 = vmatmul.mubr.msk.bf16.gmra.mrb[12].mxu1 %vm957_vm4, %v20806_v17  ;;  %v3420_v17 = vpack.c.bf16 %v3380_v8, %v3379_v55  ;;  %v3419_v8 = vld [vmem:[#allocation2 + $0x153] sm:$0xf] }
 0x33d   : > { %16140 = vmatprep.mubr.msk.bf16.mxu1 %vm19785_vm2, %v20884_v62  ;;  %v3440_v55 = vpack.c.bf16 %v3419_v8, %v3419_v8  ;;  %v3801_v8 = vld [vmem:[#allocation2 + $0x14c] sm:$0xff] }
 0x344   : > { %16141 = vmatmul.mubr.msk.bf16.gmra.mrb[16].mxu1 %vm957_vm4, %v20812_v21  ;;  %v3421_v21 = vpack.c.bf16 %v3382_v19, %v3381_v26  ;;  %v19262_v19 = vld [vmem:[%s19815_s21 + $0x60] sm:$0xff]  }
 0x345   : > { %16144 = vmatprep.mubr.msk.bf16.mxu1 %vm19785_vm2, %v20884_v62 }
 0x34c   : > { %16145 = vmatmul.mubr.msk.bf16.gmra.mrb[20].mxu1 %vm957_vm4, %v20820_v18  ;;  %v3386_v18 = vld [vmem:[#allocation2 + $0x4b] sm:$0xff] }
 0x34d   : > { %16148 = vmatprep.mubr.msk.bf16.mxu1 %vm19785_vm2, %v20884_v62  ;;  %v3423_v35 = vpack.c.bf16 %v3386_v18, %v3385_v24  ;;  %v3766_v18 = vld [vmem:[#allocation2 + $0x34] sm:$0xff] }
 0x354   : > { %16149 = vmatmul.mubr.msk.bf16.gmra.mrb[24].mxu1 %vm957_vm4, %v20826_v53  ;;  %v3388_v53 = vld [vmem:[#allocation2 + $0x5b] sm:$0xff] }
 0x355   : > { %16152 = vmatprep.mubr.msk.bf16.mxu1 %vm19785_vm2, %v20884_v62  ;;  %v3424_v27 = vpack.c.bf16 %v3388_v53, %v3387_v25  ;;  %v3768_v53 = vld [vmem:[#allocation2 + $0x44] sm:$0xff] }
 0x35c   : > { %16153 = vmatmul.mubr.msk.bf16.gmra.mrb[28].mxu1 %vm957_vm4, %v20832_v42  ;;  %v19261_v42 = vld [vmem:[%s19815_s21 + $0x58] sm:$0xff]  }
 0x35d   : > { %16156 = vmatprep.mubr.msk.bf16.mxu1 %vm19785_vm2, %v20884_v62 }
 0x364   : > { %16157 = vmatmul.mubr.msk.bf16.gmra.mrb[32].mxu1 %vm957_vm4, %v20838_v30  ;;  %v3425_v30 = vpack.c.bf16 %v3390_v28, %v3389_v40  ;;  %v19263_v40 = vld [vmem:[%s19815_s21 + $0x68] sm:$0xff]  }
 0x365   : > { %16160 = vmatprep.mubr.msk.bf16.mxu1 %vm19785_vm2, %v20884_v62 }
 0x36c   : > { %16161 = vmatmul.mubr.msk.bf16.gmra.mrb[36].mxu1 %vm957_vm4, %v20844_v29  ;;  %v3426_v29 = vpack.c.bf16 %v3392_v31, %v3391_v32  ;;  %v3772_v31 = vld [vmem:[#allocation2 + $0x64] sm:$0xff] }
 0x36d   : > { %16164 = vmatprep.mubr.msk.bf16.mxu1 %vm19785_vm2, %v20884_v62 }
 0x374   : > { %16165 = vmatmul.mubr.msk.bf16.gmra.mrb[40].mxu1 %vm957_vm4, %v20850_v34  ;;  %v3427_v34 = vpack.c.bf16 %v3394_v51, %v3393_v15  ;;  %v3774_v51 = vld [vmem:[#allocation2 + $0x74] sm:$0xff] }
 0x375   : > { %16168 = vmatprep.mubr.msk.bf16.mxu1 %vm19785_vm2, %v20884_v62 }
 0x37c   : > { %16169 = vmatmul.mubr.msk.bf16.gmra.mrb[44].mxu1 %vm957_vm4, %v20856_v39  ;;  %v3428_v39 = vpack.c.bf16 %v3396_v4, %v3395_v37  ;;  %v3776_v4 = vld [vmem:[#allocation2 + $0x84] sm:$0xff] }
 0x37d   : > { %16172 = vmatprep.mubr.msk.bf16.mxu1 %vm19785_vm2, %v20884_v62 }
 0x384   : > { %16173 = vmatmul.mubr.msk.bf16.gmra.mrb[48].mxu1 %vm957_vm4, %v20862_v41  ;;  %v3429_v41 = vpack.c.bf16 %v3398_v20, %v3397_v47  ;;  %v3778_v20 = vld [vmem:[#allocation2 + $0x94] sm:$0xff] }
 0x385   : > { %16176 = vmatprep.mubr.msk.bf16.mxu1 %vm19785_vm2, %v20884_v62 }
 0x38c   : > { %16177 = vmatmul.mubr.msk.bf16.gmra.mrb[52].mxu1 %vm957_vm4, %v20868_v50  ;;  %v3430_v50 = vpack.c.bf16 %v3400_v59, %v3399_v44  ;;  %v3780_v59 = vld [vmem:[#allocation2 + $0xa4] sm:$0xff] }
 0x38d   : > { %16180 = vmatprep.mubr.msk.bf16.mxu1 %vm19785_vm2, %v20884_v62 }
 0x394   : > { %16181 = vmatmul.mubr.msk.bf16.gmra.mrb[56].mxu1 %vm957_vm4, %v20874_v52  ;;  %v3431_v52 = vpack.c.bf16 %v3402_v54, %v3401_v9  ;;  %v3782_v54 = vld [vmem:[#allocation2 + $0xb4] sm:$0xff] }
 0x395   : > { %16184 = vmatprep.mubr.msk.bf16.mxu1 %vm19785_vm2, %v20884_v62 }
 0x39c   : > { %16185 = vmatmul.mubr.msk.bf16.gmra.mrb[60].mxu1 %vm957_vm4, %v2669_v57  ;;  %v3432_v57 = vpack.c.bf16 %v3404_v12, %v3403_v56  ;;  %v3784_v12 = vld [vmem:[#allocation2 + $0xc4] sm:$0xff] }
 0x39d   : > { %16188 = vmatprep.mubr.msk.bf16.mxu1 %vm19785_vm2, %v20884_v62 }
 0x3a4   : > { %16189 = vmatmul.mubr.msk.bf16.gmra.mrb[64].mxu1 %vm957_vm4, %v2670_v43  ;;  %v3433_v43 = vpack.c.bf16 %v3406_v33, %v3405_v58  ;;  %v3786_v33 = vld [vmem:[#allocation2 + $0xd4] sm:$0xff] }
 0x3a5   : > { %16192 = vmatprep.mubr.msk.bf16.mxu1 %vm19785_vm2, %v20884_v62 }
 0x3ac   : > { %16193 = vmatmul.mubr.msk.bf16.gmra.mrb[68].mxu1 %vm957_vm4, %v2671_v60  ;;  %v3434_v60 = vpack.c.bf16 %v3408_v16, %v3407_v1  ;;  %v3788_v16 = vld [vmem:[#allocation2 + $0xe4] sm:$0xff] }
 0x3ad   : > { %16196 = vmatprep.mubr.msk.bf16.mxu1 %vm19785_vm2, %v20884_v62 }
 0x3b4   : > { %16197 = vmatmul.mubr.msk.bf16.gmra.mrb[72].mxu1 %vm957_vm4, %v2672_v61  ;;  %v3435_v61 = vpack.c.bf16 %v3410_v45, %v3409_v23  ;;  %v3790_v45 = vld [vmem:[#allocation2 + $0xf4] sm:$0xff] }
 0x3b5   : > { %16200 = vmatprep.mubr.msk.bf16.mxu1 %vm19785_vm2, %v20884_v62 }
 0x3bc   : > { %16201 = vmatmul.mubr.msk.bf16.gmra.mrb[76].mxu1 %vm957_vm4, %v2673_v10  ;;  %v3436_v10 = vpack.c.bf16 %v3412_v0, %v3411_v63  ;;  %v3792_v0 = vld [vmem:[#allocation2 + $0x104] sm:$0xff] }
 0x3bd   : > { %16204 = vmatprep.mubr.msk.bf16.mxu1 %vm19785_vm2, %v20884_v62 }
 0x3c4   : > { %16205 = vmatmul.mubr.msk.bf16.gmra.mrb[80].mxu1 %vm957_vm4, %v3056_v11  ;;  %v3418_v11 = vld [vmem:[#allocation2 + $0x14b] sm:$0xff] }
 0x3c5   : > { %16208 = vmatprep.mubr.msk.bf16.mxu1 %vm19785_vm2, %v20884_v62 }
 0x3cc   : > { %16209 = vmatmul.mubr.msk.bf16.gmra.mrb[84].mxu1 %vm957_vm4, %v3057_v38  ;;  %v3439_v38 = vpack.c.bf16 %v3418_v11, %v3417_v14  ;;  %v3798_v11 = vld [vmem:[#allocation2 + $0x134] sm:$0xff] }
 0x3cd   : > { %16216 = vmatprep.mubr.msk.bf16.mxu1 %vm19785_vm2, %v20884_v62 }
 0x3d4   : > { %16217 = vmatmul.mubr.msk.bf16.vlgmr.msra.gmra.mrb[4].mxu1 %vm957_vm4, %v3420_v17  ;;  %v3762_v17 = vld [vmem:[#allocation2 + $0x14] sm:$0xff] }
 0x3d5   : > { %16220 = vmatprep.mubr.msk.bf16.mxu1 %vm19785_vm2, %v20884_v62  ;;  %16301 = vmatpush3.bf16.msra.mxu1 %v19260_v13  ;;  %v3763_v13 = vld [vmem:[#allocation2 + $0x1c] sm:$0xff] }
 0x3d6   : > { %16302 = vmatprep.subr.bf16.mxu1 %v20884_v62  ;;  %v3803_v26 = vpack.c.bf16 %v3763_v13, %v3762_v17  ;;  %v3802_v13 = vld [vmem:[#allocation2 + $0x154] sm:$0xf] }
 0x3d7   : > { %v3823_v17 = vpack.c.bf16 %v3802_v13, %v3802_v13  ;;  %v4563_v13 = vld [vmem:[#allocation2 + $0x13d] sm:$0xff] }
 0x3d9   : > { %16303 = vmatpush3.bf16.msra.mxu1 %v19261_v42  ;;  %v3770_v42 = vld [vmem:[#allocation2 + $0x54] sm:$0xff] }
 0x3da   : > { %16388 = vmatprep.subr.bf16.mxu1 %v20884_v62 }
 0x3dc   : > { %16221 = vmatmul.mubr.msk.bf16.gmra.mrb[8].mxu1 %vm957_vm4, %v3421_v21  ;;  %v3765_v21 = vld [vmem:[#allocation2 + $0x2c] sm:$0xff] }
 0x3dd   : > { %16224 = vmatprep.mubr.msk.bf16.mxu1 %vm19785_vm2, %v20884_v62  ;;  %v21053_v22 = vpack.c.bf16 %v3765_v21, %v3764_v48  ;;  %v4183_v21 = vld [vmem:[#allocation2 + $0x154] sm:$0xff]  ;;  %v4184_v48 = vld [vmem:[#allocation2 + $0x15c] sm:$0xff] }
 0x3e4   : > { %16225 = vmatmul.mubr.msk.bf16.gmra.mrb[12].mxu1 %vm957_vm4, %v3422_v36  ;;  %v3767_v36 = vld [vmem:[#allocation2 + $0x3c] sm:$0xff] }
 0x3e5   : > { %16228 = vmatprep.mubr.msk.bf16.mxu1 %vm19785_vm2, %v20884_v62  ;;  %v21059_v24 = vpack.c.bf16 %v3767_v36, %v3766_v18  ;;  %v4185_v36 = vld [vmem:[#allocation2 + $0x164] sm:$0xf] }
 0x3e6   : > { %v4206_v18 = vpack.c.bf16 %v4185_v36, %v4185_v36  ;;  %v4567_v36 = vld [vmem:[#allocation2 + $0x15d] sm:$0xff] }
 0x3ec   : > { %16229 = vmatmul.mubr.msk.bf16.gmra.mrb[16].mxu1 %vm957_vm4, %v3423_v35  ;;  %v3769_v35 = vld [vmem:[#allocation2 + $0x4c] sm:$0xff] }
 0x3ed   : > { %16232 = vmatprep.mubr.msk.bf16.mxu1 %vm19785_vm2, %v20884_v62  ;;  %v21065_v25 = vpack.c.bf16 %v3769_v35, %v3768_v53  ;;  %v4528_v35 = vld [vmem:[#allocation2 + $0x25] sm:$0xff] }
 0x3ee   : > { %v19266_v53 = vld [vmem:[%s19815_s21 + $0x80] sm:$0xff]  }
 0x3f4   : > { %16233 = vmatmul.mubr.msk.bf16.gmra.mrb[20].mxu1 %vm957_vm4, %v3424_v27  ;;  %v3771_v27 = vld [vmem:[#allocation2 + $0x5c] sm:$0xff] }
 0x3f5   : > { %16236 = vmatprep.mubr.msk.bf16.mxu1 %vm19785_vm2, %v20884_v62  ;;  %v21071_v28 = vpack.c.bf16 %v3771_v27, %v3770_v42  ;;  %v4531_v27 = vld [vmem:[#allocation2 + $0x3d] sm:$0xff]  ;;  %v4530_v42 = vld [vmem:[#allocation2 + $0x35] sm:$0xff] }
 0x3fc   : > { %16237 = vmatmul.mubr.msk.bf16.gmra.mrb[24].mxu1 %vm957_vm4, %v3425_v30  ;;  %v3773_v30 = vld [vmem:[#allocation2 + $0x6c] sm:$0xff] }
 0x3fd   : > { %16240 = vmatprep.mubr.msk.bf16.mxu1 %vm19785_vm2, %v20884_v62  ;;  %v21079_v32 = vpack.c.bf16 %v3773_v30, %v3772_v31  ;;  %v4532_v30 = vld [vmem:[#allocation2 + $0x45] sm:$0xff] }
 0x404   : > { %16241 = vmatmul.mubr.msk.bf16.gmra.mrb[28].mxu1 %vm957_vm4, %v3426_v29  ;;  %v3775_v29 = vld [vmem:[#allocation2 + $0x7c] sm:$0xff] }
 0x405   : > { %16244 = vmatprep.mubr.msk.bf16.mxu1 %vm19785_vm2, %v20884_v62  ;;  %v21085_v15 = vpack.c.bf16 %v3775_v29, %v3774_v51  ;;  %v4534_v29 = vld [vmem:[#allocation2 + $0x55] sm:$0xff] }
 0x40c   : > { %16245 = vmatmul.mubr.msk.bf16.gmra.mrb[32].mxu1 %vm957_vm4, %v3427_v34  ;;  %v3777_v34 = vld [vmem:[#allocation2 + $0x8c] sm:$0xff] }
 0x40d   : > { %16248 = vmatprep.mubr.msk.bf16.mxu1 %vm19785_vm2, %v20884_v62  ;;  %v21091_v37 = vpack.c.bf16 %v3777_v34, %v3776_v4  ;;  %v4536_v34 = vld [vmem:[#allocation2 + $0x65] sm:$0xff] }
 0x414   : > { %16249 = vmatmul.mubr.msk.bf16.gmra.mrb[36].mxu1 %vm957_vm4, %v3428_v39  ;;  %v3779_v39 = vld [vmem:[#allocation2 + $0x9c] sm:$0xff] }
 0x415   : > { %16252 = vmatprep.mubr.msk.bf16.mxu1 %vm19785_vm2, %v20884_v62  ;;  %v21097_v47 = vpack.c.bf16 %v3779_v39, %v3778_v20  ;;  %v4539_v39 = vld [vmem:[#allocation2 + $0x7d] sm:$0xff]  ;;  %v4538_v20 = vld [vmem:[#allocation2 + $0x75] sm:$0xff] }
 0x41c   : > { %16253 = vmatmul.mubr.msk.bf16.gmra.mrb[40].mxu1 %vm957_vm4, %v3429_v41  ;;  %v3781_v41 = vld [vmem:[#allocation2 + $0xac] sm:$0xff] }
 0x41d   : > { %16256 = vmatprep.mubr.msk.bf16.mxu1 %vm19785_vm2, %v20884_v62  ;;  %v21103_v44 = vpack.c.bf16 %v3781_v41, %v3780_v59  ;;  %v4541_v41 = vld [vmem:[#allocation2 + $0x8d] sm:$0xff]  ;;  %v4540_v59 = vld [vmem:[#allocation2 + $0x85] sm:$0xff] }
 0x424   : > { %16257 = vmatmul.mubr.msk.bf16.gmra.mrb[44].mxu1 %vm957_vm4, %v3430_v50  ;;  %v3783_v50 = vld [vmem:[#allocation2 + $0xbc] sm:$0xff] }
 0x425   : > { %16260 = vmatprep.mubr.msk.bf16.mxu1 %vm19785_vm2, %v20884_v62  ;;  %v21109_v9 = vpack.c.bf16 %v3783_v50, %v3782_v54  ;;  %v4543_v50 = vld [vmem:[#allocation2 + $0x9d] sm:$0xff]  ;;  %v4542_v54 = vld [vmem:[#allocation2 + $0x95] sm:$0xff] }
 0x42c   : > { %16261 = vmatmul.mubr.msk.bf16.gmra.mrb[48].mxu1 %vm957_vm4, %v3431_v52  ;;  %v3785_v52 = vld [vmem:[#allocation2 + $0xcc] sm:$0xff] }
 0x42d   : > { %16264 = vmatprep.mubr.msk.bf16.mxu1 %vm19785_vm2, %v20884_v62  ;;  %v21115_v56 = vpack.c.bf16 %v3785_v52, %v3784_v12  ;;  %v4545_v52 = vld [vmem:[#allocation2 + $0xad] sm:$0xff]  ;;  %v4544_v12 = vld [vmem:[#allocation2 + $0xa5] sm:$0xff] }
 0x434   : > { %16265 = vmatmul.mubr.msk.bf16.gmra.mrb[52].mxu1 %vm957_vm4, %v3432_v57  ;;  %v3787_v57 = vld [vmem:[#allocation2 + $0xdc] sm:$0xff] }
 0x435   : > { %16268 = vmatprep.mubr.msk.bf16.mxu1 %vm19785_vm2, %v20884_v62  ;;  %v21121_v58 = vpack.c.bf16 %v3787_v57, %v3786_v33  ;;  %v4547_v57 = vld [vmem:[#allocation2 + $0xbd] sm:$0xff]  ;;  %v4546_v33 = vld [vmem:[#allocation2 + $0xb5] sm:$0xff] }
 0x43c   : > { %16269 = vmatmul.mubr.msk.bf16.gmra.mrb[56].mxu1 %vm957_vm4, %v3433_v43  ;;  %v3789_v43 = vld [vmem:[#allocation2 + $0xec] sm:$0xff] }
 0x43d   : > { %16272 = vmatprep.mubr.msk.bf16.mxu1 %vm19785_vm2, %v20884_v62  ;;  %v21127_v1 = vpack.c.bf16 %v3789_v43, %v3788_v16  ;;  %v4549_v43 = vld [vmem:[#allocation2 + $0xcd] sm:$0xff]  ;;  %v4548_v16 = vld [vmem:[#allocation2 + $0xc5] sm:$0xff] }
 0x444   : > { %16273 = vmatmul.mubr.msk.bf16.gmra.mrb[60].mxu1 %vm957_vm4, %v3434_v60  ;;  %v3791_v60 = vld [vmem:[#allocation2 + $0xfc] sm:$0xff] }
 0x445   : > { %16276 = vmatprep.mubr.msk.bf16.mxu1 %vm19785_vm2, %v20884_v62  ;;  %v21133_v23 = vpack.c.bf16 %v3791_v60, %v3790_v45  ;;  %v4551_v60 = vld [vmem:[#allocation2 + $0xdd] sm:$0xff]  ;;  %v4550_v45 = vld [vmem:[#allocation2 + $0xd5] sm:$0xff] }
 0x44c   : > { %16277 = vmatmul.mubr.msk.bf16.gmra.mrb[64].mxu1 %vm957_vm4, %v3435_v61  ;;  %v3793_v61 = vld [vmem:[#allocation2 + $0x10c] sm:$0xff] }
 0x44d   : > { %16280 = vmatprep.mubr.msk.bf16.mxu1 %vm19785_vm2, %v20884_v62  ;;  %v3818_v63 = vpack.c.bf16 %v3793_v61, %v3792_v0  ;;  %v4553_v61 = vld [vmem:[#allocation2 + $0xed] sm:$0xff]  ;;  %v4552_v0 = vld [vmem:[#allocation2 + $0xe5] sm:$0xff] }
 0x454   : > { %16281 = vmatmul.mubr.msk.bf16.gmra.mrb[68].mxu1 %vm957_vm4, %v3436_v10  ;;  %v3795_v10 = vld [vmem:[#allocation2 + $0x11c] sm:$0xff] }
 0x455   : > { %16284 = vmatprep.mubr.msk.bf16.mxu1 %vm19785_vm2, %v20884_v62  ;;  %v3819_v6 = vpack.c.bf16 %v3795_v10, %v3794_v46  ;;  %v4555_v10 = vld [vmem:[#allocation2 + $0xfd] sm:$0xff]  ;;  %v4554_v46 = vld [vmem:[#allocation2 + $0xf5] sm:$0xff] }
 0x45c   : > { %16285 = vmatmul.mubr.msk.bf16.gmra.mrb[72].mxu1 %vm957_vm4, %v3437_v5  ;;  %v3797_v5 = vld [vmem:[#allocation2 + $0x12c] sm:$0xff] }
 0x45d   : > { %16288 = vmatprep.mubr.msk.bf16.mxu1 %vm19785_vm2, %v20884_v62  ;;  %v3820_v7 = vpack.c.bf16 %v3797_v5, %v3796_v49  ;;  %v4557_v5 = vld [vmem:[#allocation2 + $0x10d] sm:$0xff]  ;;  %v4556_v49 = vld [vmem:[#allocation2 + $0x105] sm:$0xff] }
 0x464   : > { %16289 = vmatmul.mubr.msk.bf16.gmra.mrb[76].mxu1 %vm957_vm4, %v3438_v3  ;;  %v3799_v3 = vld [vmem:[#allocation2 + $0x13c] sm:$0xff] }
 0x465   : > { %16292 = vmatprep.mubr.msk.bf16.mxu1 %vm19785_vm2, %v20884_v62  ;;  %v3821_v14 = vpack.c.bf16 %v3799_v3, %v3798_v11  ;;  %v4559_v3 = vld [vmem:[#allocation2 + $0x11d] sm:$0xff]  ;;  %v4558_v11 = vld [vmem:[#allocation2 + $0x115] sm:$0xff] }
 0x46c   : > { %16293 = vmatmul.mubr.msk.bf16.gmra.mrb[80].mxu1 %vm957_vm4, %v3439_v38  ;;  %v3800_v38 = vld [vmem:[#allocation2 + $0x144] sm:$0xff] }
 0x46d   : > { %16296 = vmatprep.mubr.msk.bf16.mxu1 %vm19785_vm2, %v20884_v62 }
 0x474   : > { %16297 = vmatmul.mubr.msk.bf16.gmra.mrb[84].mxu1 %vm957_vm4, %v3440_v55  ;;  %v3822_v55 = vpack.c.bf16 %v3801_v8, %v3800_v38  ;;  %v4561_v38 = vld [vmem:[#allocation2 + $0x12d] sm:$0xff]  ;;  %v4560_v8 = vld [vmem:[#allocation2 + $0x125] sm:$0xff] }
 0x475   : > { %16304 = vmatprep.mubr.msk.bf16.mxu1 %vm19785_vm2, %v20884_v62 }
 0x47c   : > { %16305 = vmatmul.mubr.msk.bf16.vlgmr.msra.gmra.mrb[4].mxu1 %vm957_vm4, %v3803_v26  ;;  %v19265_v26 = vld [vmem:[%s19815_s21 + $0x78] sm:$0xff]  }
 0x47d   : > { %16308 = vmatprep.mubr.msk.bf16.mxu1 %vm19785_vm2, %v20884_v62  ;;  %16389 = vmatpush3.bf16.msra.mxu1 %v19262_v19  ;;  %v19264_v19 = vld [vmem:[%s19815_s21 + $0x70] sm:$0xff]  }
 0x47e   : > { %16390 = vmatprep.subr.bf16.mxu1 %v20884_v62 }
 0x481   : > { %16391 = vmatpush3.bf16.msra.mxu1 %v19263_v40  ;;  %v4533_v40 = vld [vmem:[#allocation2 + $0x4d] sm:$0xff] }
 0x482   : > { %16476 = vmatprep.subr.bf16.mxu1 %v20884_v62  ;;  %v4571_v31 = vpack.c.bf16 %v4533_v40, %v4532_v30  ;;  %v4916_v30 = vld [vmem:[#allocation2 + $0x4e] sm:$0xff] }
 0x484   : > { %16309 = vmatmul.mubr.msk.bf16.gmra.mrb[8].mxu1 %vm957_vm4, %v21053_v22 }
 0x485   : > { %16312 = vmatprep.mubr.msk.bf16.mxu1 %vm19785_vm2, %v20884_v62 }
 0x48c   : > { %16313 = vmatmul.mubr.msk.bf16.gmra.mrb[12].mxu1 %vm957_vm4, %v21059_v24 }
 0x48d   : > { %16316 = vmatprep.mubr.msk.bf16.mxu1 %vm19785_vm2, %v20884_v62 }
 0x494   : > { %16317 = vmatmul.mubr.msk.bf16.gmra.mrb[16].mxu1 %vm957_vm4, %v21065_v25 }
 0x495   : > { %16320 = vmatprep.mubr.msk.bf16.mxu1 %vm19785_vm2, %v20884_v62 }
 0x49c   : > { %16321 = vmatmul.mubr.msk.bf16.gmra.mrb[20].mxu1 %vm957_vm4, %v21071_v28 }
 0x49d   : > { %16324 = vmatprep.mubr.msk.bf16.mxu1 %vm19785_vm2, %v20884_v62 }
 0x4a4   : > { %16325 = vmatmul.mubr.msk.bf16.gmra.mrb[24].mxu1 %vm957_vm4, %v21079_v32 }
 0x4a5   : > { %16328 = vmatprep.mubr.msk.bf16.mxu1 %vm19785_vm2, %v20884_v62 }
 0x4ac   : > { %16329 = vmatmul.mubr.msk.bf16.gmra.mrb[28].mxu1 %vm957_vm4, %v21085_v15 }
 0x4ad   : > { %16332 = vmatprep.mubr.msk.bf16.mxu1 %vm19785_vm2, %v20884_v62 }
 0x4b4   : > { %16333 = vmatmul.mubr.msk.bf16.gmra.mrb[32].mxu1 %vm957_vm4, %v21091_v37 }
 0x4b5   : > { %16336 = vmatprep.mubr.msk.bf16.mxu1 %vm19785_vm2, %v20884_v62 }
 0x4bc   : > { %16337 = vmatmul.mubr.msk.bf16.gmra.mrb[36].mxu1 %vm957_vm4, %v21097_v47 }
 0x4bd   : > { %16340 = vmatprep.mubr.msk.bf16.mxu1 %vm19785_vm2, %v20884_v62 }
 0x4c4   : > { %16341 = vmatmul.mubr.msk.bf16.gmra.mrb[40].mxu1 %vm957_vm4, %v21103_v44 }
 0x4c5   : > { %16344 = vmatprep.mubr.msk.bf16.mxu1 %vm19785_vm2, %v20884_v62 }
 0x4cc   : > { %16345 = vmatmul.mubr.msk.bf16.gmra.mrb[44].mxu1 %vm957_vm4, %v21109_v9 }
 0x4cd   : > { %16348 = vmatprep.mubr.msk.bf16.mxu1 %vm19785_vm2, %v20884_v62 }
 0x4d4   : > { %16349 = vmatmul.mubr.msk.bf16.gmra.mrb[48].mxu1 %vm957_vm4, %v21115_v56 }
 0x4d5   : > { %16352 = vmatprep.mubr.msk.bf16.mxu1 %vm19785_vm2, %v20884_v62 }
 0x4dc   : > { %16353 = vmatmul.mubr.msk.bf16.gmra.mrb[52].mxu1 %vm957_vm4, %v21121_v58 }
 0x4dd   : > { %16356 = vmatprep.mubr.msk.bf16.mxu1 %vm19785_vm2, %v20884_v62 }
 0x4e4   : > { %16357 = vmatmul.mubr.msk.bf16.gmra.mrb[56].mxu1 %vm957_vm4, %v21127_v1 }
 0x4e5   : > { %16360 = vmatprep.mubr.msk.bf16.mxu1 %vm19785_vm2, %v20884_v62 }
 0x4ec   : > { %16361 = vmatmul.mubr.msk.bf16.gmra.mrb[60].mxu1 %vm957_vm4, %v21133_v23 }
 0x4ed   : > { %16364 = vmatprep.mubr.msk.bf16.mxu1 %vm19785_vm2, %v20884_v62 }
 0x4f4   : > { %16365 = vmatmul.mubr.msk.bf16.gmra.mrb[64].mxu1 %vm957_vm4, %v3818_v63 }
 0x4f5   : > { %16368 = vmatprep.mubr.msk.bf16.mxu1 %vm19785_vm2, %v20884_v62 }
 0x4fc   : > { %16369 = vmatmul.mubr.msk.bf16.gmra.mrb[68].mxu1 %vm957_vm4, %v3819_v6 }
 0x4fd   : > { %16372 = vmatprep.mubr.msk.bf16.mxu1 %vm19785_vm2, %v20884_v62 }
 0x504   : > { %16373 = vmatmul.mubr.msk.bf16.gmra.mrb[72].mxu1 %vm957_vm4, %v3820_v7 }
 0x505   : > { %16376 = vmatprep.mubr.msk.bf16.mxu1 %vm19785_vm2, %v20884_v62 }
 0x50c   : > { %16377 = vmatmul.mubr.msk.bf16.gmra.mrb[76].mxu1 %vm957_vm4, %v3821_v14 }
 0x50d   : > { %16380 = vmatprep.mubr.msk.bf16.mxu1 %vm19785_vm2, %v20884_v62 }
 0x514   : > { %16381 = vmatmul.mubr.msk.bf16.gmra.mrb[80].mxu1 %vm957_vm4, %v3822_v55 }
 0x515   : > { %16384 = vmatprep.mubr.msk.bf16.mxu1 %vm19785_vm2, %v20884_v62 }
 0x51c   : > { %16385 = vmatmul.mubr.msk.bf16.gmra.mrb[84].mxu1 %vm957_vm4, %v3823_v17  ;;  %v4562_v17 = vld [vmem:[#allocation2 + $0x135] sm:$0xff] }
 0x51d   : > { %16392 = vmatprep.mubr.msk.bf16.mxu1 %vm19785_vm2, %v20884_v62 }
 0x524   : > { %16393 = vmatmul.mubr.msk.bf16.vlgmr.msra.gmra.mrb[4].mxu1 %vm957_vm4, %v21053_v22  ;;  %v4205_v22 = vpack.c.bf16 %v4184_v48, %v4183_v21  ;;  %v4565_v21 = vld [vmem:[#allocation2 + $0x14d] sm:$0xff] }
 0x525   : > { %16396 = vmatprep.mubr.msk.bf16.mxu1 %vm19785_vm2, %v20884_v62  ;;  %16477 = vmatpush3.bf16.msra.mxu1 %v19264_v19  ;;  %v4586_v19 = vpack.c.bf16 %v4563_v13, %v4562_v17  ;;  %v4946_v13 = vld [vmem:[#allocation2 + $0x13e] sm:$0xff]  ;;  %v4945_v17 = vld [vmem:[#allocation2 + $0x136] sm:$0xff] }
 0x526   : > { %16478 = vmatprep.subr.bf16.mxu1 %v20884_v62 }
 0x529   : > { %16479 = vmatpush3.bf16.msra.mxu1 %v19265_v26  ;;  %v4564_v26 = vld [vmem:[#allocation2 + $0x145] sm:$0xff] }
 0x52a   : > { %16564 = vmatprep.subr.bf16.mxu1 %v20884_v62  ;;  %v4587_v48 = vpack.c.bf16 %v4565_v21, %v4564_v26  ;;  %v4947_v26 = vld [vmem:[#allocation2 + $0x146] sm:$0xff]  ;;  %v4948_v21 = vld [vmem:[#allocation2 + $0x14e] sm:$0xff] }
 0x52c   : > { %16397 = vmatmul.mubr.msk.bf16.gmra.mrb[8].mxu1 %vm957_vm4, %v21059_v24  ;;  %v4529_v24 = vld [vmem:[#allocation2 + $0x2d] sm:$0xff] }
 0x52d   : > { %16400 = vmatprep.mubr.msk.bf16.mxu1 %vm19785_vm2, %v20884_v62 }
 0x534   : > { %16401 = vmatmul.mubr.msk.bf16.gmra.mrb[12].mxu1 %vm957_vm4, %v21065_v25  ;;  %v4569_v25 = vpack.c.bf16 %v4529_v24, %v4528_v35  ;;  %v4568_v24 = vld [vmem:[#allocation2 + $0x165] sm:$0xf] }
 0x535   : > { %16404 = vmatprep.mubr.msk.bf16.mxu1 %vm19785_vm2, %v20884_v62  ;;  %v4589_v35 = vpack.c.bf16 %v4568_v24, %v4568_v24  ;;  %v4951_v24 = vld [vmem:[#allocation2 + $0x166] sm:$0xf] }
 0x53c   : > { %16405 = vmatmul.mubr.msk.bf16.gmra.mrb[16].mxu1 %vm957_vm4, %v21071_v28  ;;  %v4570_v28 = vpack.c.bf16 %v4531_v27, %v4530_v42  ;;  %v4914_v42 = vld [vmem:[#allocation2 + $0x3e] sm:$0xff] }
 0x53d   : > { %16408 = vmatprep.mubr.msk.bf16.mxu1 %vm19785_vm2, %v20884_v62 }
 0x544   : > { %16409 = vmatmul.mubr.msk.bf16.gmra.mrb[20].mxu1 %vm957_vm4, %v21079_v32  ;;  %v4535_v32 = vld [vmem:[#allocation2 + $0x5d] sm:$0xff] }
 0x545   : > { %16412 = vmatprep.mubr.msk.bf16.mxu1 %vm19785_vm2, %v20884_v62  ;;  %v4572_v51 = vpack.c.bf16 %v4535_v32, %v4534_v29  ;;  %v4918_v29 = vld [vmem:[#allocation2 + $0x5e] sm:$0xff] }
 0x54c   : > { %16413 = vmatmul.mubr.msk.bf16.gmra.mrb[24].mxu1 %vm957_vm4, %v21085_v15  ;;  %v4537_v15 = vld [vmem:[#allocation2 + $0x6d] sm:$0xff] }
 0x54d   : > { %16416 = vmatprep.mubr.msk.bf16.mxu1 %vm19785_vm2, %v20884_v62  ;;  %v4573_v4 = vpack.c.bf16 %v4537_v15, %v4536_v34  ;;  %v4920_v34 = vld [vmem:[#allocation2 + $0x6e] sm:$0xff] }
 0x554   : > { %16417 = vmatmul.mubr.msk.bf16.gmra.mrb[28].mxu1 %vm957_vm4, %v21091_v37  ;;  %v19267_v37 = vld [vmem:[%s19815_s21 + $0x88] sm:$0xff]  }
 0x555   : > { %16420 = vmatprep.mubr.msk.bf16.mxu1 %vm19785_vm2, %v20884_v62 }
 0x55c   : > { %16421 = vmatmul.mubr.msk.bf16.gmra.mrb[32].mxu1 %vm957_vm4, %v21097_v47  ;;  %v4574_v47 = vpack.c.bf16 %v4539_v39, %v4538_v20  ;;  %v4922_v39 = vld [vmem:[#allocation2 + $0x7e] sm:$0xff]  ;;  %v4921_v20 = vld [vmem:[#allocation2 + $0x76] sm:$0xff] }
 0x55d   : > { %16424 = vmatprep.mubr.msk.bf16.mxu1 %vm19785_vm2, %v20884_v62 }
 0x564   : > { %16425 = vmatmul.mubr.msk.bf16.gmra.mrb[36].mxu1 %vm957_vm4, %v21103_v44  ;;  %v4575_v44 = vpack.c.bf16 %v4541_v41, %v4540_v59  ;;  %v4924_v41 = vld [vmem:[#allocation2 + $0x8e] sm:$0xff]  ;;  %v4923_v59 = vld [vmem:[#allocation2 + $0x86] sm:$0xff] }
 0x565   : > { %16428 = vmatprep.mubr.msk.bf16.mxu1 %vm19785_vm2, %v20884_v62 }
 0x56c   : > { %16429 = vmatmul.mubr.msk.bf16.gmra.mrb[40].mxu1 %vm957_vm4, %v21109_v9  ;;  %v4576_v9 = vpack.c.bf16 %v4543_v50, %v4542_v54  ;;  %v4926_v50 = vld [vmem:[#allocation2 + $0x9e] sm:$0xff]  ;;  %v4925_v54 = vld [vmem:[#allocation2 + $0x96] sm:$0xff] }
 0x56d   : > { %16432 = vmatprep.mubr.msk.bf16.mxu1 %vm19785_vm2, %v20884_v62 }
 0x574   : > { %16433 = vmatmul.mubr.msk.bf16.gmra.mrb[44].mxu1 %vm957_vm4, %v21115_v56  ;;  %v4577_v56 = vpack.c.bf16 %v4545_v52, %v4544_v12  ;;  %v4928_v52 = vld [vmem:[#allocation2 + $0xae] sm:$0xff]  ;;  %v4927_v12 = vld [vmem:[#allocation2 + $0xa6] sm:$0xff] }
 0x575   : > { %16436 = vmatprep.mubr.msk.bf16.mxu1 %vm19785_vm2, %v20884_v62 }
 0x57c   : > { %16437 = vmatmul.mubr.msk.bf16.gmra.mrb[48].mxu1 %vm957_vm4, %v21121_v58  ;;  %v4578_v58 = vpack.c.bf16 %v4547_v57, %v4546_v33  ;;  %v4930_v57 = vld [vmem:[#allocation2 + $0xbe] sm:$0xff]  ;;  %v4929_v33 = vld [vmem:[#allocation2 + $0xb6] sm:$0xff] }
 0x57d   : > { %16440 = vmatprep.mubr.msk.bf16.mxu1 %vm19785_vm2, %v20884_v62 }
 0x584   : > { %16441 = vmatmul.mubr.msk.bf16.gmra.mrb[52].mxu1 %vm957_vm4, %v21127_v1  ;;  %v4579_v1 = vpack.c.bf16 %v4549_v43, %v4548_v16  ;;  %v4932_v43 = vld [vmem:[#allocation2 + $0xce] sm:$0xff]  ;;  %v4931_v16 = vld [vmem:[#allocation2 + $0xc6] sm:$0xff] }
 0x585   : > { %16444 = vmatprep.mubr.msk.bf16.mxu1 %vm19785_vm2, %v20884_v62 }
 0x58c   : > { %16445 = vmatmul.mubr.msk.bf16.gmra.mrb[56].mxu1 %vm957_vm4, %v21133_v23  ;;  %v4580_v23 = vpack.c.bf16 %v4551_v60, %v4550_v45  ;;  %v19680_v60 = vld [vmem:[#allocation4] sm:$0xff]  ;;  %v4934_v45 = vld [vmem:[#allocation2 + $0xde] sm:$0xff] }
 0x58d   : > { %16448 = vmatprep.mubr.msk.bf16.mxu1 %vm19785_vm2, %v20884_v62 }
 0x594   : > { %16449 = vmatmul.mubr.msk.bf16.gmra.mrb[60].mxu1 %vm957_vm4, %v3818_v63  ;;  %v4581_v63 = vpack.c.bf16 %v4553_v61, %v4552_v0  ;;  %v4936_v0 = vld [vmem:[#allocation2 + $0xee] sm:$0xff] }
 0x595   : > { %16452 = vmatprep.mubr.msk.bf16.mxu1 %vm19785_vm2, %v20884_v62 }
 0x59c   : > { %16453 = vmatmul.mubr.msk.bf16.gmra.mrb[64].mxu1 %vm957_vm4, %v3819_v6  ;;  %v4582_v6 = vpack.c.bf16 %v4555_v10, %v4554_v46  ;;  %v4937_v46 = vld [vmem:[#allocation2 + $0xf6] sm:$0xff] }
 0x59d   : > { %16456 = vmatprep.mubr.msk.bf16.mxu1 %vm19785_vm2, %v20884_v62 }
 0x5a4   : > { %16457 = vmatmul.mubr.msk.bf16.gmra.mrb[68].mxu1 %vm957_vm4, %v3820_v7  ;;  %v4583_v7 = vpack.c.bf16 %v4557_v5, %v4556_v49  ;;  %v4940_v5 = vld [vmem:[#allocation2 + $0x10e] sm:$0xff]  ;;  %v4939_v49 = vld [vmem:[#allocation2 + $0x106] sm:$0xff] }
 0x5a5   : > { %16460 = vmatprep.mubr.msk.bf16.mxu1 %vm19785_vm2, %v20884_v62 }
 0x5ac   : > { %16461 = vmatmul.mubr.msk.bf16.gmra.mrb[72].mxu1 %vm957_vm4, %v3821_v14  ;;  %v4584_v14 = vpack.c.bf16 %v4559_v3, %v4558_v11  ;;  %v4942_v3 = vld [vmem:[#allocation2 + $0x11e] sm:$0xff]  ;;  %v4941_v11 = vld [vmem:[#allocation2 + $0x116] sm:$0xff] }
 0x5ad   : > { %16464 = vmatprep.mubr.msk.bf16.mxu1 %vm19785_vm2, %v20884_v62 }
 0x5b4   : > { %16465 = vmatmul.mubr.msk.bf16.gmra.mrb[76].mxu1 %vm957_vm4, %v3822_v55  ;;  %v4585_v55 = vpack.c.bf16 %v4561_v38, %v4560_v8  ;;  %v4944_v38 = vld [vmem:[#allocation2 + $0x12e] sm:$0xff]  ;;  %v4943_v8 = vld [vmem:[#allocation2 + $0x126] sm:$0xff] }
 0x5b5   : > { %16468 = vmatprep.mubr.msk.bf16.mxu1 %vm19785_vm2, %v20884_v62 }
 0x5bc   : > { %16469 = vmatmul.mubr.msk.bf16.gmra.mrb[80].mxu1 %vm957_vm4, %v4205_v22  ;;  %v4566_v22 = vld [vmem:[#allocation2 + $0x155] sm:$0xff] }
 0x5bd   : > { %16472 = vmatprep.mubr.msk.bf16.mxu1 %vm19785_vm2, %v20884_v62 }
 0x5c4   : > { %16473 = vmatmul.mubr.msk.bf16.gmra.mrb[84].mxu1 %vm957_vm4, %v4206_v18  ;;  %v4588_v18 = vpack.c.bf16 %v4567_v36, %v4566_v22  ;;  %v4949_v22 = vld [vmem:[#allocation2 + $0x156] sm:$0xff]  ;;  %v4950_v36 = vld [vmem:[#allocation2 + $0x15e] sm:$0xff] }
 0x5c5   : > { %16480 = vmatprep.mubr.msk.bf16.mxu1 %vm19785_vm2, %v20884_v62 }
 0x5cc   : > { %16481 = vmatmul.mubr.msk.bf16.vlgmr.msra.gmra.mrb[4].mxu1 %vm957_vm4, %v4569_v25  ;;  %v4911_v25 = vld [vmem:[#allocation2 + $0x26] sm:$0xff] }
 0x5cd   : > { %16484 = vmatprep.mubr.msk.bf16.mxu1 %vm19785_vm2, %v20884_v62  ;;  %16565 = vmatpush3.bf16.msra.mxu1 %v19266_v53  ;;  %v4912_v53 = vld [vmem:[#allocation2 + $0x2e] sm:$0xff] }
 0x5ce   : > { %16566 = vmatprep.subr.bf16.mxu1 %v20884_v62  ;;  %v4952_v27 = vpack.c.bf16 %v4912_v53, %v4911_v25  ;;  %v21358_v53 = vpop.permute.xlu1 %5554 }
 0x5d1   : > { %16567 = vmatpush3.bf16.msra.mxu1 %v19267_v37 }
 0x5d2   : > { %17508 = vmatprep.subr.bf16.mxu1 %v20884_v62  ;;  %v21360_v25 = vpop.permute.xlu1 %5564 }
 0x5d4   : > { %16485 = vmatmul.mubr.msk.bf16.gmra.mrb[8].mxu1 %vm957_vm4, %v4570_v28  ;;  %v4913_v28 = vld [vmem:[#allocation2 + $0x36] sm:$0xff] }
 0x5d5   : > { %16488 = vmatprep.mubr.msk.bf16.mxu1 %vm19785_vm2, %v20884_v62  ;;  %v4953_v40 = vpack.c.bf16 %v4914_v42, %v4913_v28 }
 0x5d6   : > { %v21364_v42 = vpop.permute.xlu1 %5574 }
 0x5dc   : > { %16489 = vmatmul.mubr.msk.bf16.gmra.mrb[12].mxu1 %vm957_vm4, %v4571_v31  ;;  %v4915_v31 = vld [vmem:[#allocation2 + $0x46] sm:$0xff] }
 0x5dd   : > { %16492 = vmatprep.mubr.msk.bf16.mxu1 %vm19785_vm2, %v20884_v62  ;;  %v4954_v32 = vpack.c.bf16 %v4916_v30, %v4915_v31 }
 0x5e4   : > { %16493 = vmatmul.mubr.msk.bf16.gmra.mrb[16].mxu1 %vm957_vm4, %v4572_v51  ;;  %v4917_v51 = vld [vmem:[#allocation2 + $0x56] sm:$0xff] }
 0x5e5   : > { %16496 = vmatprep.mubr.msk.bf16.mxu1 %vm19785_vm2, %v20884_v62  ;;  %v4955_v15 = vpack.c.bf16 %v4918_v29, %v4917_v51  ;;  %v21371_v51 = vld [vmem:[%s19820_s25] ss:$0 sm:$0xff] }
 0x5ec   : > { %16497 = vmatmul.mubr.msk.bf16.gmra.mrb[20].mxu1 %vm957_vm4, %v4573_v4  ;;  %v4919_v4 = vld [vmem:[#allocation2 + $0x66] sm:$0xff] }
 0x5ed   : > { %16500 = vmatprep.mubr.msk.bf16.mxu1 %vm19785_vm2, %v20884_v62  ;;  %v4956_v37 = vpack.c.bf16 %v4920_v34, %v4919_v4  ;;  %v21374_v34 = vld [vmem:[%s19825_s29] ss:$0 sm:$0xff] }
 0x5f4   : > { %16501 = vmatmul.mubr.msk.bf16.gmra.mrb[24].mxu1 %vm957_vm4, %v4574_v47  ;;  %v4957_v47 = vpack.c.bf16 %v4922_v39, %v4921_v20 }
 0x5f5   : > { %16504 = vmatprep.mubr.msk.bf16.mxu1 %vm19785_vm2, %v20884_v62 }
 0x5fc   : > { %16505 = vmatmul.mubr.msk.bf16.gmra.mrb[28].mxu1 %vm957_vm4, %v4575_v44  ;;  %v4958_v44 = vpack.c.bf16 %v4924_v41, %v4923_v59 }
 0x5fd   : > { %16508 = vmatprep.mubr.msk.bf16.mxu1 %vm19785_vm2, %v20884_v62 }
 0x604   : > { %16509 = vmatmul.mubr.msk.bf16.gmra.mrb[32].mxu1 %vm957_vm4, %v4576_v9  ;;  %v4959_v9 = vpack.c.bf16 %v4926_v50, %v4925_v54 }
 0x605   : > { %16512 = vmatprep.mubr.msk.bf16.mxu1 %vm19785_vm2, %v20884_v62 }
 0x60c   : > { %16513 = vmatmul.mubr.msk.bf16.gmra.mrb[36].mxu1 %vm957_vm4, %v4577_v56  ;;  %v4960_v56 = vpack.c.bf16 %v4928_v52, %v4927_v12 }
 0x60d   : > { %16516 = vmatprep.mubr.msk.bf16.mxu1 %vm19785_vm2, %v20884_v62 }
 0x614   : > { %16517 = vmatmul.mubr.msk.bf16.gmra.mrb[40].mxu1 %vm957_vm4, %v4578_v58  ;;  %v4961_v58 = vpack.c.bf16 %v4930_v57, %v4929_v33 }
 0x615   : > { %16520 = vmatprep.mubr.msk.bf16.mxu1 %vm19785_vm2, %v20884_v62 }
 0x61c   : > { %16521 = vmatmul.mubr.msk.bf16.gmra.mrb[44].mxu1 %vm957_vm4, %v4579_v1  ;;  %v4962_v1 = vpack.c.bf16 %v4932_v43, %v4931_v16 }
 0x61d   : > { %16524 = vmatprep.mubr.msk.bf16.mxu1 %vm19785_vm2, %v20884_v62 }
 0x624   : > { %16525 = vmatmul.mubr.msk.bf16.gmra.mrb[48].mxu1 %vm957_vm4, %v4580_v23  ;;  %v4933_v23 = vld [vmem:[#allocation2 + $0xd6] sm:$0xff] }
 0x625   : > { %16528 = vmatprep.mubr.msk.bf16.mxu1 %vm19785_vm2, %v20884_v62  ;;  %v4963_v61 = vpack.c.bf16 %v4934_v45, %v4933_v23 }
 0x62c   : > { %16529 = vmatmul.mubr.msk.bf16.gmra.mrb[52].mxu1 %vm957_vm4, %v4581_v63  ;;  %v4935_v63 = vld [vmem:[#allocation2 + $0xe6] sm:$0xff] }
 0x62d   : > { %16532 = vmatprep.mubr.msk.bf16.mxu1 %vm19785_vm2, %v20884_v62  ;;  %v4964_v10 = vpack.c.bf16 %v4936_v0, %v4935_v63 }
 0x634   : > { %16533 = vmatmul.mubr.msk.bf16.gmra.mrb[56].mxu1 %vm957_vm4, %v4582_v6 }
 0x635   : > { %16536 = vmatprep.mubr.msk.bf16.mxu1 %vm19785_vm2, %v20884_v62 }
 0x63c   : > { %16537 = vmatmul.mubr.msk.bf16.gmra.mrb[60].mxu1 %vm957_vm4, %v4583_v7  ;;  %v4966_v7 = vpack.c.bf16 %v4940_v5, %v4939_v49 }
 0x63d   : > { %16540 = vmatprep.mubr.msk.bf16.mxu1 %vm19785_vm2, %v20884_v62 }
 0x644   : > { %16541 = vmatmul.mubr.msk.bf16.gmra.mrb[64].mxu1 %vm957_vm4, %v4584_v14  ;;  %v4967_v14 = vpack.c.bf16 %v4942_v3, %v4941_v11 }
 0x645   : > { %16544 = vmatprep.mubr.msk.bf16.mxu1 %vm19785_vm2, %v20884_v62 }
 0x64c   : > { %16545 = vmatmul.mubr.msk.bf16.gmra.mrb[68].mxu1 %vm957_vm4, %v4585_v55  ;;  %v4968_v55 = vpack.c.bf16 %v4944_v38, %v4943_v8 }
 0x64d   : > { %16548 = vmatprep.mubr.msk.bf16.mxu1 %vm19785_vm2, %v20884_v62 }
 0x654   : > { %16549 = vmatmul.mubr.msk.bf16.gmra.mrb[72].mxu1 %vm957_vm4, %v4586_v19  ;;  %v4969_v19 = vpack.c.bf16 %v4946_v13, %v4945_v17 }
 0x655   : > { %16552 = vmatprep.mubr.msk.bf16.mxu1 %vm19785_vm2, %v20884_v62 }
 0x65c   : > { %16553 = vmatmul.mubr.msk.bf16.gmra.mrb[76].mxu1 %vm957_vm4, %v4587_v48  ;;  %v4970_v48 = vpack.c.bf16 %v4948_v21, %v4947_v26 }
 0x65d   : > { %16556 = vmatprep.mubr.msk.bf16.mxu1 %vm19785_vm2, %v20884_v62 }
 0x664   : > { %16557 = vmatmul.mubr.msk.bf16.gmra.mrb[80].mxu1 %vm957_vm4, %v4588_v18  ;;  %v4971_v18 = vpack.c.bf16 %v4950_v36, %v4949_v22 }
 0x665   : > { %16560 = vmatprep.mubr.msk.bf16.mxu1 %vm19785_vm2, %v20884_v62 }
 0x66c   : > { %16561 = vmatmul.mubr.msk.bf16.gmra.mrb[84].mxu1 %vm957_vm4, %v4589_v35  ;;  %v4972_v35 = vpack.c.bf16 %v4951_v24, %v4951_v24 }
 0x66d   : > { %16568 = vmatprep.mubr.msk.bf16.mxu1 %vm19785_vm2, %v20884_v62 }
 0x674   : > { %16569 = vmatmul.mubr.msk.bf16.vlgmr.msra.gmra.mrb[4].mxu1 %vm957_vm4, %v4952_v27  ;;  %v21362_v27 = vpop.permute.xlu0 %5559 }
 0x675   : > { %16572 = vmatprep.mubr.msk.bf16.mxu1 %vm19785_vm2, %v20884_v62 }
 0x678   : > { %v21366_v28 = vpop.permute.xlu0 %5569 }
 0x67c   : > { %16573 = vmatmul.mubr.msk.bf16.gmra.mrb[8].mxu1 %vm957_vm4, %v4953_v40  ;;  %v5480_v40 = vpop.permute.xlu1 %5479  ;;  %v5475_v30 = vpop.permute.xlu0 %5474 }
 0x67d   : > { %16576 = vmatprep.mubr.msk.bf16.mxu1 %vm19785_vm2, %v20884_v62 }
 0x680   : > { %v5490_v31 = vpop.permute.xlu1 %5489 }
 0x684   : > { %16577 = vmatmul.mubr.msk.bf16.gmra.mrb[12].mxu1 %vm957_vm4, %v4954_v32  ;;  %v5485_v32 = vpop.permute.xlu0 %5484  ;;  %v21368_v29 = vpop.permute.xlu1 %5579 }
 0x685   : > { %16580 = vmatprep.mubr.msk.bf16.mxu1 %vm19785_vm2, %v20884_v62 }
 0x688   : > { %v5495_v39 = vpop.permute.xlu0 %5494 }
 0x68c   : > { %16581 = vmatmul.mubr.msk.bf16.gmra.mrb[16].mxu1 %vm957_vm4, %v4955_v15  ;;  %v21380_v12 = vpop.permute.xlu0 %5584 }
 0x68d   : > { %16584 = vmatprep.mubr.msk.bf16.mxu1 %vm19785_vm2, %v20884_v62 }
 0x690   : > { %v5505_v0 = vpop.permute.xlu0 %5504 }
 0x694   : > { %16585 = vmatmul.mubr.msk.bf16.gmra.mrb[20].mxu1 %vm957_vm4, %v4956_v37  ;;  %v21395_v38 = vpop.permute.xlu0 %5594 }
 0x695   : > { %16588 = vmatprep.mubr.msk.bf16.mxu1 %vm19785_vm2, %v20884_v62 }
 0x698   : > { %v5515_v36 = vpop.permute.xlu0 %5514 }
 0x69c   : > { %16589 = vmatmul.mubr.msk.bf16.gmra.mrb[24].mxu1 %vm957_vm4, %v4957_v47 }
 0x69d   : > { %16592 = vmatprep.mubr.msk.bf16.mxu1 %vm19785_vm2, %v20884_v62 }
 0x6a4   : > { %16593 = vmatmul.mubr.msk.bf16.gmra.mrb[28].mxu1 %vm957_vm4, %v4958_v44  ;;  %v5500_v44 = vpop.permute.xlu1 %5499 }
 0x6a5   : > { %16596 = vmatprep.mubr.msk.bf16.mxu1 %vm19785_vm2, %v20884_v62 }
 0x6a8   : > { %v21384_v43 = vpop.permute.xlu1 %5589 }
 0x6ac   : > { %16597 = vmatmul.mubr.msk.bf16.gmra.mrb[32].mxu1 %vm957_vm4, %v4959_v9 }
 0x6ad   : > { %16600 = vmatprep.mubr.msk.bf16.mxu1 %vm19785_vm2, %v20884_v62 }
 0x6b4   : > { %16601 = vmatmul.mubr.msk.bf16.gmra.mrb[36].mxu1 %vm957_vm4, %v4960_v56 }
 0x6b5   : > { %16604 = vmatprep.mubr.msk.bf16.mxu1 %vm19785_vm2, %v20884_v62 }
 0x6bc   : > { %16605 = vmatmul.mubr.msk.bf16.gmra.mrb[40].mxu1 %vm957_vm4, %v4961_v58 }
 0x6bd   : > { %16608 = vmatprep.mubr.msk.bf16.mxu1 %vm19785_vm2, %v20884_v62  ;;  %v4938_v62 = vld [vmem:[#allocation2 + $0xfe] sm:$0xff] }
 0x6be   : > { %v4965_v6 = vpack.c.bf16 %v4938_v62, %v4937_v46  ;;  %v5510_v62 = vpop.permute.xlu1 %5509 }
 0x6c2   : > { %v21398_v13 = vpop.permute.xlu1 %5599 }
 0x6c4   : > { %16609 = vmatmul.mubr.msk.bf16.gmra.mrb[44].mxu1 %vm957_vm4, %v4962_v1 }
 0x6c5   : > { %16612 = vmatprep.mubr.msk.bf16.mxu1 %vm19785_vm2, %v19680_v60 }
 0x6cc   : > { %16613 = vmatmul.mubr.msk.bf16.gmra.mrb[48].mxu1 %vm957_vm4, %v4963_v61 }
 0x6cd   : > { %16616 = vmatprep.mubr.msk.bf16.mxu1 %vm19785_vm2, %v19680_v60 }
 0x6d4   : > { %16617 = vmatmul.mubr.msk.bf16.gmra.mrb[52].mxu1 %vm957_vm4, %v4964_v10 }
 0x6d5   : > { %16620 = vmatprep.mubr.msk.bf16.mxu1 %vm19785_vm2, %v19680_v60 }
 0x6dc   : > { %16621 = vmatmul.mubr.msk.bf16.gmra.mrb[56].mxu1 %vm957_vm4, %v4965_v6 }
 0x6dd   : > { %16624 = vmatprep.mubr.msk.bf16.mxu1 %vm19785_vm2, %v19680_v60 }
 0x6e4   : > { %16625 = vmatmul.mubr.msk.bf16.gmra.mrb[60].mxu1 %vm957_vm4, %v4966_v7 }
 0x6e5   : > { %16628 = vmatprep.mubr.msk.bf16.mxu1 %vm19785_vm2, %v19680_v60 }
 0x6ec   : > { %16629 = vmatmul.mubr.msk.bf16.gmra.mrb[64].mxu1 %vm957_vm4, %v4967_v14 }
 0x6ed   : > { %16632 = vmatprep.mubr.msk.bf16.mxu1 %vm19785_vm2, %v19680_v60 }
 0x6f4   : > { %16633 = vmatmul.mubr.msk.bf16.gmra.mrb[68].mxu1 %vm957_vm4, %v4968_v55 }
 0x6f5   : > { %16636 = vmatprep.mubr.msk.bf16.mxu1 %vm19785_vm2, %v19680_v60 }
 0x6fc   : > { %16637 = vmatmul.mubr.msk.bf16.gmra.mrb[72].mxu1 %vm957_vm4, %v4969_v19 }
 0x6fd   : > { %16640 = vmatprep.mubr.msk.bf16.mxu1 %vm19785_vm2, %v19680_v60 }
 0x704   : > { %16641 = vmatmul.mubr.msk.bf16.gmra.mrb[76].mxu1 %vm957_vm4, %v4970_v48 }
 0x705   : > { %16644 = vmatprep.mubr.msk.bf16.mxu1 %vm19785_vm2, %v19680_v60 }
 0x70c   : > { %16645 = vmatmul.mubr.msk.bf16.gmra.mrb[80].mxu1 %vm957_vm4, %v4971_v18 }
 0x70d   : > { %16648 = vmatprep.mubr.msk.bf16.mxu1 %vm19785_vm2, %v19680_v60 }
 0x714   : > { %16649 = vmatmul.mubr.msk.bf16.gmra.mrb[84].mxu1 %vm957_vm4, %v4972_v35 }
 0x715   : > { %17524 = vmatprep.mubr.msk.bf16.mxu1 %vm19785_vm2, %v19680_v60 }
 0x747   : > { %v5087_v15 = vpop.f32.mrb[4].mxu1 }
 0x748   : > { %v5301_v4 = vmul.f32 %v21371_v51, %v5087_v15  ;;  %v16570_v37 = vpop.f32.mrb[5].mxu1 }
 0x749   : > { %v5090_v20 = vpop.f32.mrb[6].mxu1  ;;  %v21406_v37 = vpop.permute.xlu0 %5604 }
 0x74a   : > { %v5349_v47 = vadd.f32 %v21374_v34, %v5301_v4  ;;  %v5302_v41 = vmul.f32 %v21371_v51, %v5090_v20  ;;  %v16571_v59 = vpop.f32.mrb[7].mxu1 }
 0x74c   : > { %v5390_v50 = vmax.f32 %v5349_v47, 0.0  ;;  %v5350_v54 = vadd.f32 %v21374_v34, %v5302_v41 }
 0x74e   : > { %v5677_v9 = vmul.f32 %v5475_v30, %v5390_v50  ;;  %v5391_v52 = vmax.f32 %v5350_v54, 0.0  ;;  %v5520_v30 = vpop.permute.xlu1 %5519 }
 0x74f   : > { %v5095_v56 = vpop.f32.mrb[8].mxu1 }
 0x750   : > { %5718 = vst.msk [vmem:[#allocation2 + $0x13] sm:$0xff] %vm957_vm4, %v5677_v9  ;;  %v5678_v57 = vmul.f32 %v5480_v40, %v5391_v52  ;;  %v5303_v33 = vmul.f32 %v21371_v51, %v5095_v56  ;;  %v16574_v58 = vpop.f32.mrb[9].mxu1  ;;  %v19270_v52 = vld [vmem:[%s22969_s6 + $0x4] ss:$12 sps:$4 sm:$0xff]  }
 0x751   : > { %v5098_v16 = vpop.f32.mrb[10].mxu1  ;;  %6251 = vmatprep.mubr.bf16.mxu0 %v19270_v52 }
 0x752   : > { %5719 = vst.msk [vmem:[#allocation2 + $0x1b] sm:$0xff] %vm957_vm4, %v5678_v57  ;;  %v5351_v1 = vadd.f32 %v21374_v34, %v5303_v33  ;;  %v5304_v60 = vmul.f32 %v21371_v51, %v5098_v16  ;;  %v16575_v45 = vpop.f32.mrb[11].mxu1  ;;  %v21410_v59 = vpop.permute.xlu1 %5609 }
 0x753   : > { %v5525_v33 = vpop.permute.xlu0 %5524 }
 0x754   : > { %v5392_v23 = vmax.f32 %v5351_v1, 0.0  ;;  %v5352_v61 = vadd.f32 %v21374_v34, %v5304_v60 }
 0x756   : > { %v5679_v63 = vmul.f32 %v5485_v32, %v5392_v23  ;;  %v5393_v10 = vmax.f32 %v5352_v61, 0.0  ;;  %v5530_v1 = vpop.permute.xlu1 %5529 }
 0x757   : > { %v5103_v46 = vpop.f32.mrb[12].mxu1 }
 0x758   : > { %5720 = vst.msk [vmem:[#allocation2 + $0x23] sm:$0xff] %vm957_vm4, %v5679_v63  ;;  %v5680_v6 = vmul.f32 %v5490_v31, %v5393_v10  ;;  %v5305_v5 = vmul.f32 %v21371_v51, %v5103_v46  ;;  %v16578_v49 = vpop.f32.mrb[13].mxu1  ;;  %v21422_v46 = vpop.permute.xlu0 %5614 }
 0x759   : > { %v5106_v7 = vpop.f32.mrb[14].mxu1 }
 0x75a   : > { %5721 = vst.msk [vmem:[#allocation2 + $0x2b] sm:$0xff] %vm957_vm4, %v5680_v6  ;;  %v5353_v3 = vadd.f32 %v21374_v34, %v5305_v5  ;;  %v5306_v11 = vmul.f32 %v21371_v51, %v5106_v7  ;;  %v16579_v14 = vpop.f32.mrb[15].mxu1  ;;  %v21425_v49 = vpop.permute.xlu1 %5619 }
 0x75c   : > { %v5394_v8 = vmax.f32 %v5353_v3, 0.0  ;;  %v5354_v55 = vadd.f32 %v21374_v34, %v5306_v11 }
 0x75e   : > { %v5681_v17 = vmul.f32 %v5495_v39, %v5394_v8  ;;  %v5395_v19 = vmax.f32 %v5354_v55, 0.0 }
 0x75f   : > { %v5111_v26 = vpop.f32.mrb[16].mxu1 }
 0x760   : > { %5722 = vst.msk [vmem:[#allocation2 + $0x33] sm:$0xff] %vm957_vm4, %v5681_v17  ;;  %v5682_v21 = vmul.f32 %v5500_v44, %v5395_v19  ;;  %v5307_v48 = vmul.f32 %v21371_v51, %v5111_v26  ;;  %v16582_v22 = vpop.f32.mrb[17].mxu1  ;;  %v5535_v17 = vpop.permute.xlu0 %5534 }
 0x761   : > { %v5114_v18 = vpop.f32.mrb[18].mxu1  ;;  %v5540_v22 = vpop.permute.xlu1 %5539 }
 0x762   : > { %5723 = vst.msk [vmem:[#allocation2 + $0x3b] sm:$0xff] %vm957_vm4, %v5682_v21  ;;  %v5355_v24 = vadd.f32 %v21374_v34, %v5307_v48  ;;  %v5308_v35 = vmul.f32 %v21371_v51, %v5114_v18  ;;  %v16583_v40 = vpop.f32.mrb[19].mxu1 }
 0x764   : > { %v5396_v31 = vmax.f32 %v5355_v24, 0.0  ;;  %v5356_v32 = vadd.f32 %v21374_v34, %v5308_v35  ;;  %v21433_v40 = vpop.permute.xlu0 %5624 }
 0x766   : > { %v5683_v15 = vmul.f32 %v5505_v0, %v5396_v31  ;;  %v5397_v4 = vmax.f32 %v5356_v32, 0.0 }
 0x767   : > { %v5119_v39 = vpop.f32.mrb[20].mxu1 }
 0x768   : > { %5724 = vst.msk [vmem:[#allocation2 + $0x43] sm:$0xff] %vm957_vm4, %v5683_v15  ;;  %v5684_v20 = vmul.f32 %v5510_v62, %v5397_v4  ;;  %v5309_v47 = vmul.f32 %v21371_v51, %v5119_v39  ;;  %v16586_v41 = vpop.f32.mrb[21].mxu1  ;;  %v21437_v4 = vpop.permute.xlu1 %5629 }
 0x769   : > { %v5122_v44 = vpop.f32.mrb[22].mxu1 }
 0x76a   : > { %5725 = vst.msk [vmem:[#allocation2 + $0x4b] sm:$0xff] %vm957_vm4, %v5684_v20  ;;  %v5357_v50 = vadd.f32 %v21374_v34, %v5309_v47  ;;  %v5310_v54 = vmul.f32 %v21371_v51, %v5122_v44  ;;  %v16587_v9 = vpop.f32.mrb[23].mxu1 }
 0x76c   : > { %v5398_v56 = vmax.f32 %v5357_v50, 0.0  ;;  %v5358_v57 = vadd.f32 %v21374_v34, %v5310_v54  ;;  %v5545_v54 = vpop.permute.xlu0 %5544 }
 0x76e   : > { %v5685_v58 = vmul.f32 %v5515_v36, %v5398_v56  ;;  %v5399_v16 = vmax.f32 %v5358_v57, 0.0  ;;  %v5550_v56 = vpop.permute.xlu1 %5549 }
 0x76f   : > { %v5127_v60 = vpop.f32.mrb[24].mxu1 }
 0x770   : > { %5726 = vst.msk [vmem:[#allocation2 + $0x53] sm:$0xff] %vm957_vm4, %v5685_v58  ;;  %v5686_v45 = vmul.f32 %v5520_v30, %v5399_v16  ;;  %v5311_v23 = vmul.f32 %v21371_v51, %v5127_v60  ;;  %v16590_v61 = vpop.f32.mrb[25].mxu1 }
 0x771   : > { %v5130_v0 = vpop.f32.mrb[26].mxu1 }
 0x772   : > { %5727 = vst.msk [vmem:[#allocation2 + $0x5b] sm:$0xff] %vm957_vm4, %v5686_v45  ;;  %v5359_v63 = vadd.f32 %v21374_v34, %v5311_v23  ;;  %v5312_v10 = vmul.f32 %v21371_v51, %v5130_v0  ;;  %v16591_v62 = vpop.f32.mrb[27].mxu1 }
 0x774   : > { %v5400_v6 = vmax.f32 %v5359_v63, 0.0  ;;  %v5360_v5 = vadd.f32 %v21374_v34, %v5312_v10 }
 0x776   : > { %v5687_v7 = vmul.f32 %v5525_v33, %v5400_v6  ;;  %v5401_v3 = vmax.f32 %v5360_v5, 0.0 }
 0x777   : > { %v5135_v11 = vpop.f32.mrb[28].mxu1 }
 0x778   : > { %5728 = vst.msk [vmem:[#allocation2 + $0x63] sm:$0xff] %vm957_vm4, %v5687_v7  ;;  %v5688_v14 = vmul.f32 %v5530_v1, %v5401_v3  ;;  %v5313_v8 = vmul.f32 %v21371_v51, %v5135_v11  ;;  %v16594_v55 = vpop.f32.mrb[29].mxu1 }
 0x779   : > { %v5138_v19 = vpop.f32.mrb[30].mxu1 }
 0x77a   : > { %5729 = vst.msk [vmem:[#allocation2 + $0x6b] sm:$0xff] %vm957_vm4, %v5688_v14  ;;  %v5361_v26 = vadd.f32 %v21374_v34, %v5313_v8  ;;  %v5314_v21 = vmul.f32 %v21371_v51, %v5138_v19  ;;  %v16595_v48 = vpop.f32.mrb[31].mxu1 }
 0x77c   : > { %v5402_v36 = vmax.f32 %v5361_v26, 0.0  ;;  %v5362_v18 = vadd.f32 %v21374_v34, %v5314_v21 }
 0x77e   : > { %v5689_v24 = vmul.f32 %v5535_v17, %v5402_v36  ;;  %v5403_v35 = vmax.f32 %v5362_v18, 0.0 }
 0x77f   : > { %v5143_v30 = vpop.f32.mrb[32].mxu1 }
 0x780   : > { %5730 = vst.msk [vmem:[#allocation2 + $0x73] sm:$0xff] %vm957_vm4, %v5689_v24  ;;  %v5690_v31 = vmul.f32 %v5540_v22, %v5403_v35  ;;  %v5315_v32 = vmul.f32 %v21371_v51, %v5143_v30  ;;  %v16598_v15 = vpop.f32.mrb[33].mxu1 }
 0x781   : > { %v5146_v39 = vpop.f32.mrb[34].mxu1 }
 0x782   : > { %5731 = vst.msk [vmem:[#allocation2 + $0x7b] sm:$0xff] %vm957_vm4, %v5690_v31  ;;  %v5363_v20 = vadd.f32 %v21374_v34, %v5315_v32  ;;  %v5316_v47 = vmul.f32 %v21371_v51, %v5146_v39  ;;  %v16599_v41 = vpop.f32.mrb[35].mxu1 }
 0x784   : > { %v5404_v44 = vmax.f32 %v5363_v20, 0.0  ;;  %v5364_v50 = vadd.f32 %v21374_v34, %v5316_v47 }
 0x786   : > { %v5691_v9 = vmul.f32 %v5545_v54, %v5404_v44  ;;  %v5405_v52 = vmax.f32 %v5364_v50, 0.0  ;;  %v5883_v50 = vld [vmem:[#allocation2 + $0x2d] sm:$0xff] }
 0x787   : > { %v5151_v57 = vpop.f32.mrb[36].mxu1  ;;  %v5924_v54 = vld [vmem:[#allocation2 + $0x2e] sm:$0xff] }
 0x788   : > { %5732 = vst.msk [vmem:[#allocation2 + $0x83] sm:$0xff] %vm957_vm4, %v5691_v9  ;;  %v5692_v33 = vmul.f32 %v5550_v56, %v5405_v52  ;;  %v5317_v58 = vmul.f32 %v21371_v51, %v5151_v57  ;;  %v16602_v16 = vpop.f32.mrb[37].mxu1  ;;  %v5801_v52 = vld [vmem:[#allocation2 + $0x1c] sm:$0xff] }
 0x789   : > { %v5154_v1 = vpop.f32.mrb[38].mxu1 }
 0x78a   : > { %5733 = vst.msk [vmem:[#allocation2 + $0x8b] sm:$0xff] %vm957_vm4, %v5692_v33  ;;  %v5365_v60 = vadd.f32 %v21374_v34, %v5317_v58  ;;  %v5318_v45 = vmul.f32 %v21371_v51, %v5154_v1  ;;  %v16603_v23 = vpop.f32.mrb[39].mxu1  ;;  %v5882_v33 = vld [vmem:[#allocation2 + $0x25] sm:$0xff]  ;;  %v5965_v1 = vmax.f32 %v5883_v50, %v5924_v54 }
 0x78b   : > { %v5923_v58 = vld [vmem:[#allocation2 + $0x26] sm:$0xff] }
 0x78c   : > { %v5406_v61 = vmax.f32 %v5365_v60, 0.0  ;;  %v5366_v0 = vadd.f32 %v21374_v34, %v5318_v45 }
 0x78e   : > { %v5693_v63 = vmul.f32 %v21358_v53, %v5406_v61  ;;  %v5407_v10 = vmax.f32 %v5366_v0, 0.0  ;;  %v5760_v0 = vld [vmem:[#allocation2 + $0x1b] sm:$0xff] }
 0x78f   : > { %v5159_v62 = vpop.f32.mrb[40].mxu1 }
 0x790   : > { %5734 = vst.msk [vmem:[#allocation2 + $0x93] sm:$0xff] %vm957_vm4, %v5693_v63  ;;  %v5694_v6 = vmul.f32 %v21362_v27, %v5407_v10  ;;  %v5319_v5 = vmul.f32 %v21371_v51, %v5159_v62  ;;  %v16606_v7 = vpop.f32.mrb[41].mxu1  ;;  %v5800_v63 = vld [vmem:[#allocation2 + $0x14] sm:$0xff] }
 0x791   : > { %v5162_v3 = vpop.f32.mrb[42].mxu1 }
 0x792   : > { %5735 = vst.msk [vmem:[#allocation2 + $0x9b] sm:$0xff] %vm957_vm4, %v5694_v6  ;;  %v5367_v11 = vadd.f32 %v21374_v34, %v5319_v5  ;;  %v5320_v14 = vmul.f32 %v21371_v51, %v5162_v3  ;;  %v16607_v8 = vpop.f32.mrb[43].mxu1  ;;  %v5842_v3 = vmax.f32 %v5760_v0, %v5801_v52 }
 0x794   : > { %v5408_v55 = vmax.f32 %v5367_v11, 0.0  ;;  %v5368_v53 = vadd.f32 %v21374_v34, %v5320_v14  ;;  %v5964_v11 = vmax.f32 %v5882_v33, %v5923_v58 }
 0x796   : > { %v5695_v17 = vmul.f32 %v21360_v25, %v5408_v55  ;;  %v5409_v19 = vmax.f32 %v5368_v53, 0.0 }
 0x797   : > { %v5167_v26 = vpop.f32.mrb[44].mxu1  ;;  %v5775_v23 = vld [vmem:[#allocation2 + $0x93] sm:$0xff] }
 0x798   : > { %5736 = vst.msk [vmem:[#allocation2 + $0xa3] sm:$0xff] %vm957_vm4, %v5695_v17  ;;  %v5696_v27 = vmul.f32 %v21366_v28, %v5409_v19  ;;  %v5321_v21 = vmul.f32 %v21371_v51, %v5167_v26  ;;  %v16610_v48 = vpop.f32.mrb[45].mxu1  ;;  %v5759_v17 = vld [vmem:[#allocation2 + $0x13] sm:$0xff] }
 0x799   : > { %v5170_v22 = vpop.f32.mrb[46].mxu1  ;;  %v5776_v62 = vld [vmem:[#allocation2 + $0x9b] sm:$0xff]  ;;  %v5841_v26 = vmax.f32 %v5759_v17, %v5800_v63 }
 0x79a   : > { %5737 = vst.msk [vmem:[#allocation2 + $0xab] sm:$0xff] %vm957_vm4, %v5696_v27  ;;  %v5369_v36 = vadd.f32 %v21374_v34, %v5321_v21  ;;  %v5322_v18 = vmul.f32 %v21371_v51, %v5170_v22  ;;  %v16611_v24 = vpop.f32.mrb[47].mxu1  ;;  %v6006_v27 = vmax.f32 %v5842_v3, %v5965_v1 }
 0x79b   : > { %v5885_v24 = vld [vmem:[#allocation2 + $0x3d] sm:$0xff] }
 0x79c   : > { %v5410_v35 = vmax.f32 %v5369_v36, 0.0  ;;  %v5370_v25 = vadd.f32 %v21374_v34, %v5322_v18 }
 0x79e   : > { %v5697_v30 = vmul.f32 %v21364_v42, %v5410_v35  ;;  %v5411_v31 = vmax.f32 %v5370_v25, 0.0  ;;  %v6005_v35 = vmax.f32 %v5841_v26, %v5964_v11 }
 0x79f   : > { %v5175_v32 = vpop.f32.mrb[48].mxu1  ;;  %v5817_v16 = vld [vmem:[#allocation2 + $0x9c] sm:$0xff] }
 0x7a0   : > { %5738 = vst.msk [vmem:[#allocation2 + $0xb3] sm:$0xff] %vm957_vm4, %v5697_v30  ;;  %v5698_v28 = vmul.f32 %v21368_v29, %v5411_v31  ;;  %v5323_v15 = vmul.f32 %v21371_v51, %v5175_v32  ;;  %v16614_v39 = vpop.f32.mrb[49].mxu1  ;;  %v5816_v29 = vld [vmem:[#allocation2 + $0x94] sm:$0xff]  ;;  %v5803_v31 = vld [vmem:[#allocation2 + $0x2c] sm:$0xff] }
 0x7a1   : > { %v5178_v20 = vpop.f32.mrb[50].mxu1  ;;  %v5898_v42 = vld [vmem:[#allocation2 + $0xa5] sm:$0xff]  ;;  %v5857_v6 = vmax.f32 %v5775_v23, %v5816_v29 }
 0x7a2   : > { %5739 = vst.msk [vmem:[#allocation2 + $0xbb] sm:$0xff] %vm957_vm4, %v5698_v28  ;;  %v5371_v47 = vadd.f32 %v21374_v34, %v5323_v15  ;;  %v5324_v41 = vmul.f32 %v21371_v51, %v5178_v20  ;;  %v16615_v44 = vpop.f32.mrb[51].mxu1  ;;  %v5939_v9 = vld [vmem:[#allocation2 + $0xa6] sm:$0xff]  ;;  %v5884_v20 = vld [vmem:[#allocation2 + $0x35] sm:$0xff] }
 0x7a3   : > { %v5980_v61 = vmax.f32 %v5898_v42, %v5939_v9  ;;  %v5818_v39 = vld [vmem:[#allocation2 + $0xa4] sm:$0xff] }
 0x7a4   : > { %v5412_v56 = vmax.f32 %v5371_v47, 0.0  ;;  %v5372_v57 = vadd.f32 %v21374_v34, %v5324_v41  ;;  %v5925_v47 = vld [vmem:[#allocation2 + $0x36] sm:$0xff]  ;;  %v6046_v41 = vpack.c.bf16 %v6006_v27, %v6005_v35  ;;  %v5777_v9 = vld [vmem:[#allocation2 + $0xa3] sm:$0xff]  ;;  %v5778_v33 = vld [vmem:[#allocation2 + $0xab] sm:$0xff] }
 0x7a5   : > { %v6021_v36 = vmax.f32 %v5857_v6, %v5980_v61  ;;  %v5859_v58 = vmax.f32 %v5777_v9, %v5818_v39 }
 0x7a6   : > { %v5699_v60 = vmul.f32 %v21380_v12, %v5412_v56  ;;  %v5413_v45 = vmax.f32 %v5372_v57, 0.0  ;;  %v5858_v12 = vmax.f32 %v5776_v62, %v5817_v16  ;;  %v5762_v56 = vld [vmem:[#allocation2 + $0x2b] sm:$0xff] }
 0x7a7   : > { %v5183_v10 = vpop.f32.mrb[52].mxu1  ;;  %v5899_v5 = vld [vmem:[#allocation2 + $0xad] sm:$0xff]  ;;  %v5802_v57 = vld [vmem:[#allocation2 + $0x24] sm:$0xff] }
 0x7a8   : > { %v5940_v7 = vld [vmem:[#allocation2 + $0xae] sm:$0xff]  ;;  %5740 = vst.msk [vmem:[#allocation2 + $0xc3] sm:$0xff] %vm957_vm4, %v5699_v60  ;;  %v5700_v14 = vmul.f32 %v21384_v43, %v5413_v45  ;;  %v5325_v8 = vmul.f32 %v21371_v51, %v5183_v10  ;;  %v16618_v55 = vpop.f32.mrb[53].mxu1  ;;  %v5926_v43 = vld [vmem:[#allocation2 + $0x3e] sm:$0xff]  ;;  %v5844_v60 = vmax.f32 %v5762_v56, %v5803_v31  ;;  %v5966_v45 = vmax.f32 %v5884_v20, %v5925_v47 }
 0x7a9   : > { %v5981_v53 = vmax.f32 %v5899_v5, %v5940_v7  ;;  %v5186_v19 = vpop.f32.mrb[54].mxu1  ;;  %v5900_v25 = vld [vmem:[#allocation2 + $0xb5] sm:$0xff]  ;;  %v5819_v44 = vld [vmem:[#allocation2 + $0xac] sm:$0xff]  ;;  %v5967_v50 = vmax.f32 %v5885_v24, %v5926_v43  ;;  %v5761_v10 = vld [vmem:[#allocation2 + $0x23] sm:$0xff] }
 0x7aa   : > { %5741 = vst.msk [vmem:[#allocation2 + $0xcb] sm:$0xff] %vm957_vm4, %v5700_v14  ;;  %v5373_v21 = vadd.f32 %v21374_v34, %v5325_v8  ;;  %v5326_v48 = vmul.f32 %v21371_v51, %v5186_v19  ;;  %v16619_v22 = vpop.f32.mrb[55].mxu1  ;;  %v5941_v30 = vld [vmem:[#allocation2 + $0xb6] sm:$0xff]  ;;  %v5860_v0 = vmax.f32 %v5778_v33, %v5819_v44  ;;  %v5843_v6 = vmax.f32 %v5761_v10, %v5802_v57  ;;  %v5887_v55 = vld [vmem:[#allocation2 + $0x4d] sm:$0xff] }
 0x7ab   : > { %v6022_v18 = vmax.f32 %v5858_v12, %v5981_v53  ;;  %v5982_v52 = vmax.f32 %v5900_v25, %v5941_v30  ;;  %v6008_v5 = vmax.f32 %v5844_v60, %v5967_v50  ;;  %v5805_v19 = vld [vmem:[#allocation2 + $0x3c] sm:$0xff]  ;;  %v5886_v22 = vld [vmem:[#allocation2 + $0x45] sm:$0xff]  ;;  %v5779_v30 = vld [vmem:[#allocation2 + $0xb3] sm:$0xff] }
 0x7ac   : > { %v5414_v32 = vmax.f32 %v5373_v21, 0.0  ;;  %v5374_v28 = vadd.f32 %v21374_v34, %v5326_v48  ;;  %v6007_v12 = vmax.f32 %v5843_v6, %v5966_v45  ;;  %v5820_v48 = vld [vmem:[#allocation2 + $0xb4] sm:$0xff] }
 0x7ad   : > { %v6054_v15 = vpack.c.bf16 %v6022_v18, %v6021_v36  ;;  %v6023_v14 = vmax.f32 %v5859_v58, %v5982_v52  ;;  %v5927_v36 = vld [vmem:[#allocation2 + $0x46] sm:$0xff]  ;;  %v5780_v39 = vld [vmem:[#allocation2 + $0xbb] sm:$0xff]  ;;  %v5861_v20 = vmax.f32 %v5779_v30, %v5820_v48  ;;  %v5763_v56 = vld [vmem:[#allocation2 + $0x33] sm:$0xff] }
 0x7ae   : > { %v5701_v54 = vmul.f32 %v21395_v38, %v5414_v32  ;;  %v5415_v42 = vmax.f32 %v5374_v28, 0.0  ;;  %v6047_v18 = vpack.c.bf16 %v6008_v5, %v6007_v12  ;;  %v5764_v32 = vld [vmem:[#allocation2 + $0x3b] sm:$0xff]  ;;  %v5968_v50 = vmax.f32 %v5886_v22, %v5927_v36  ;;  %v5765_v30 = vld [vmem:[#allocation2 + $0x43] sm:$0xff] }
 0x7af   : > { %15311 = vmatprep.subr.bf16.mxu0 %v6054_v15  ;;  %v5191_v29 = vpop.f32.mrb[56].mxu1  ;;  %v5901_v16 = vld [vmem:[#allocation2 + $0xbd] sm:$0xff]  ;;  %v5804_v28 = vld [vmem:[#allocation2 + $0x34] sm:$0xff]  ;;  %v5846_v44 = vmax.f32 %v5764_v32, %v5805_v19 }
 0x7b0   : > { %15312 = vmatpush3.bf16.msra.mxu0 %v6046_v41  ;;  %v5942_v1 = vld [vmem:[#allocation2 + $0xbe] sm:$0xff]  ;;  %5742 = vst.msk [vmem:[#allocation2 + $0xd3] sm:$0xff] %vm957_vm4, %v5701_v54  ;;  %v5702_v23 = vmul.f32 %v21398_v13, %v5415_v42  ;;  %v5327_v38 = vmul.f32 %v21371_v51, %v5191_v29  ;;  %v16622_v61 = vpop.f32.mrb[57].mxu1  ;;  %v5928_v13 = vld [vmem:[#allocation2 + $0x4e] sm:$0xff]  ;;  %v5845_v29 = vmax.f32 %v5763_v56, %v5804_v28 }
 0x7b1   : > { %v5983_v63 = vmax.f32 %v5901_v16, %v5942_v1  ;;  %v5194_v62 = vpop.f32.mrb[58].mxu1  ;;  %v5902_v53 = vld [vmem:[#allocation2 + $0xc5] sm:$0xff]  ;;  %v5821_v24 = vld [vmem:[#allocation2 + $0xbc] sm:$0xff]  ;;  %v5969_v43 = vmax.f32 %v5887_v55, %v5928_v13 }
 0x7b2   : > { %5743 = vst.msk [vmem:[#allocation2 + $0xdb] sm:$0xff] %vm957_vm4, %v5702_v23  ;;  %v5375_v7 = vadd.f32 %v21374_v34, %v5327_v38  ;;  %v5328_v3 = vmul.f32 %v21371_v51, %v5194_v62  ;;  %v16623_v11 = vpop.f32.mrb[59].mxu1  ;;  %v5943_v17 = vld [vmem:[#allocation2 + $0xc6] sm:$0xff]  ;;  %v5862_v9 = vmax.f32 %v5780_v39, %v5821_v24  ;;  %v5889_v23 = vld [vmem:[#allocation2 + $0x5d] sm:$0xff]  ;;  %v6009_v38 = vmax.f32 %v5845_v29, %v5968_v50 }
 0x7b3   : > { %v6024_v8 = vmax.f32 %v5860_v0, %v5983_v63  ;;  %v5984_v31 = vmax.f32 %v5902_v53, %v5943_v17  ;;  %v6010_v33 = vmax.f32 %v5846_v44, %v5969_v43  ;;  %v5807_v63 = vld [vmem:[#allocation2 + $0x4c] sm:$0xff]  ;;  %v5822_v5 = vld [vmem:[#allocation2 + $0xc4] sm:$0xff] }
 0x7b4   : > { %v5416_v26 = vmax.f32 %v5375_v7, 0.0  ;;  %v5376_v27 = vadd.f32 %v21374_v34, %v5328_v3  ;;  %v5888_v7 = vld [vmem:[#allocation2 + $0x55] sm:$0xff]  ;;  %v5781_v12 = vld [vmem:[#allocation2 + $0xc3] sm:$0xff]  ;;  %v5766_v17 = vld [vmem:[#allocation2 + $0x4b] sm:$0xff] }
 0x7b5   : > { %v6055_v21 = vpack.c.bf16 %v6024_v8, %v6023_v14  ;;  %v6025_v60 = vmax.f32 %v5861_v20, %v5984_v31  ;;  %v5929_v3 = vld [vmem:[#allocation2 + $0x56] sm:$0xff]  ;;  %v6048_v11 = vpack.c.bf16 %v6010_v33, %v6009_v38  ;;  %v5806_v19 = vld [vmem:[#allocation2 + $0x44] sm:$0xff]  ;;  %v5848_v36 = vmax.f32 %v5766_v17, %v5807_v63  ;;  %v5891_v44 = vld [vmem:[#allocation2 + $0x6d] sm:$0xff] }
 0x7b6   : > { %v5703_v35 = vmul.f32 %v21406_v37, %v5416_v26  ;;  %v5417_v25 = vmax.f32 %v5376_v27, 0.0  ;;  %v5782_v27 = vld [vmem:[#allocation2 + $0xcb] sm:$0xff]  ;;  %v5847_v32 = vmax.f32 %v5765_v30, %v5806_v19  ;;  %v5768_v38 = vld [vmem:[#allocation2 + $0x5b] sm:$0xff] }
 0x7b7   : > { %15313 = vmatprep.subr.bf16.mxu0 %v6055_v21  ;;  %v5199_v15 = vpop.f32.mrb[60].mxu1  ;;  %v5903_v47 = vld [vmem:[#allocation2 + $0xcd] sm:$0xff]  ;;  %v5863_v21 = vmax.f32 %v5781_v12, %v5822_v5  ;;  %v5890_v29 = vld [vmem:[#allocation2 + $0x65] sm:$0xff] }
 0x7b8   : > { %15314 = vmatpush3.bf16.msra.mxu0 %v6047_v18  ;;  %v5944_v41 = vld [vmem:[#allocation2 + $0xce] sm:$0xff]  ;;  %5744 = vst.msk [vmem:[#allocation2 + $0xe3] sm:$0xff] %vm957_vm4, %v5703_v35  ;;  %v5704_v54 = vmul.f32 %v21410_v59, %v5417_v25  ;;  %v5329_v37 = vmul.f32 %v21371_v51, %v5199_v15  ;;  %v16626_v42 = vpop.f32.mrb[61].mxu1  ;;  %v5930_v59 = vld [vmem:[#allocation2 + $0x5e] sm:$0xff]  ;;  %v5970_v18 = vmax.f32 %v5888_v7, %v5929_v3  ;;  %v5931_v33 = vld [vmem:[#allocation2 + $0x66] sm:$0xff] }
 0x7b9   : > { %v5985_v52 = vmax.f32 %v5903_v47, %v5944_v41  ;;  %v5202_v57 = vpop.f32.mrb[62].mxu1  ;;  %v5904_v61 = vld [vmem:[#allocation2 + $0xd5] sm:$0xff]  ;;  %v5823_v14 = vld [vmem:[#allocation2 + $0xcc] sm:$0xff]  ;;  %v5971_v8 = vmax.f32 %v5889_v23, %v5930_v59  ;;  %v5972_v7 = vmax.f32 %v5890_v29, %v5931_v33 }
 0x7ba   : > { %5745 = vst.msk [vmem:[#allocation2 + $0xeb] sm:$0xff] %vm957_vm4, %v5704_v54  ;;  %v5377_v58 = vadd.f32 %v21374_v34, %v5329_v37  ;;  %v5330_v16 = vmul.f32 %v21371_v51, %v5202_v57  ;;  %v16627_v1 = vpop.f32.mrb[63].mxu1  ;;  %v5945_v0 = vld [vmem:[#allocation2 + $0xd6] sm:$0xff]  ;;  %v5864_v35 = vmax.f32 %v5782_v27, %v5823_v14  ;;  %v6011_v50 = vmax.f32 %v5847_v32, %v5970_v18 }
 0x7bb   : > { %v6026_v45 = vmax.f32 %v5862_v9, %v5985_v52  ;;  %v5986_v53 = vmax.f32 %v5904_v61, %v5945_v0  ;;  %v6012_v28 = vmax.f32 %v5848_v36, %v5971_v8  ;;  %v5809_v42 = vld [vmem:[#allocation2 + $0x5c] sm:$0xff]  ;;  %v5824_v57 = vld [vmem:[#allocation2 + $0xd4] sm:$0xff] }
 0x7bc   : > { %v5418_v10 = vmax.f32 %v5377_v58, 0.0  ;;  %v5378_v62 = vadd.f32 %v21374_v34, %v5330_v16  ;;  %v5783_v23 = vld [vmem:[#allocation2 + $0xd3] sm:$0xff]  ;;  %v5784_v63 = vld [vmem:[#allocation2 + $0xdb] sm:$0xff]  ;;  %v5850_v5 = vmax.f32 %v5768_v38, %v5809_v42 }
 0x7bd   : > { %v6056_v6 = vpack.c.bf16 %v6026_v45, %v6025_v60  ;;  %v6027_v47 = vmax.f32 %v5863_v21, %v5986_v53  ;;  %v6049_v58 = vpack.c.bf16 %v6012_v28, %v6011_v50  ;;  %v5808_v61 = vld [vmem:[#allocation2 + $0x54] sm:$0xff]  ;;  %v5810_v50 = vld [vmem:[#allocation2 + $0x64] sm:$0xff] }
 0x7be   : > { %v5705_v55 = vmul.f32 %v21422_v46, %v5418_v10  ;;  %v5419_v13 = vmax.f32 %v5378_v62, 0.0  ;;  %v5865_v10 = vmax.f32 %v5783_v23, %v5824_v57  ;;  %v5933_v32 = vld [vmem:[#allocation2 + $0x76] sm:$0xff] }
 0x7bf   : > { %15315 = vmatprep.subr.bf16.mxu0 %v6056_v6  ;;  %v5207_v26 = vpop.f32.mrb[64].mxu1  ;;  %v5905_v48 = vld [vmem:[#allocation2 + $0xdd] sm:$0xff] }
 0x7c0   : > { %15316 = vmatpush3.bf16.msra.mxu0 %v6048_v11  ;;  %v5946_v22 = vld [vmem:[#allocation2 + $0xde] sm:$0xff]  ;;  %5746 = vst.msk [vmem:[#allocation2 + $0xf3] sm:$0xff] %vm957_vm4, %v5705_v55  ;;  %v5706_v24 = vmul.f32 %v21425_v49, %v5419_v13  ;;  %v5331_v46 = vmul.f32 %v21371_v51, %v5207_v26  ;;  %v16630_v43 = vpop.f32.mrb[65].mxu1  ;;  %v5932_v49 = vld [vmem:[#allocation2 + $0x6e] sm:$0xff]  ;;  %v5635_v13 = vpop.permute.xlu0 %5634 }
 0x7c1   : > { %v5987_v25 = vmax.f32 %v5905_v48, %v5946_v22  ;;  %v5210_v31 = vpop.f32.mrb[66].mxu1  ;;  %v5906_v54 = vld [vmem:[#allocation2 + $0xe5] sm:$0xff]  ;;  %v5825_v16 = vld [vmem:[#allocation2 + $0xdc] sm:$0xff]  ;;  %v5973_v1 = vmax.f32 %v5891_v44, %v5932_v49  ;;  %v5767_v55 = vld [vmem:[#allocation2 + $0x53] sm:$0xff] }
 0x7c2   : > { %5747 = vst.msk [vmem:[#allocation2 + $0xfb] sm:$0xff] %vm957_vm4, %v5706_v24  ;;  %v5379_v15 = vadd.f32 %v21374_v34, %v5331_v46  ;;  %v5332_v39 = vmul.f32 %v21371_v51, %v5210_v31  ;;  %v16631_v20 = vpop.f32.mrb[67].mxu1  ;;  %v5947_v37 = vld [vmem:[#allocation2 + $0xe6] sm:$0xff]  ;;  %v5866_v14 = vmax.f32 %v5784_v63, %v5825_v16  ;;  %v5849_v53 = vmax.f32 %v5767_v55, %v5808_v61  ;;  %v5934_v22 = vld [vmem:[#allocation2 + $0x7e] sm:$0xff]  ;;  %v5892_v31 = vld [vmem:[#allocation2 + $0x75] sm:$0xff] }
 0x7c3   : > { %v6028_v41 = vmax.f32 %v5864_v35, %v5987_v25  ;;  %v5988_v59 = vmax.f32 %v5906_v54, %v5947_v37  ;;  %v6014_v17 = vmax.f32 %v5850_v5, %v5973_v1  ;;  %v5811_v46 = vld [vmem:[#allocation2 + $0x6c] sm:$0xff]  ;;  %v5826_v30 = vld [vmem:[#allocation2 + $0xe4] sm:$0xff]  ;;  %v5974_v29 = vmax.f32 %v5892_v31, %v5933_v32 }
 0x7c4   : > { %v5420_v9 = vmax.f32 %v5379_v15, 0.0  ;;  %v5380_v52 = vadd.f32 %v21374_v34, %v5332_v39  ;;  %v6013_v36 = vmax.f32 %v5849_v53, %v5972_v7  ;;  %v5770_v49 = vld [vmem:[#allocation2 + $0x6b] sm:$0xff]  ;;  %v5640_v54 = vpop.permute.xlu0 %5639 }
 0x7c5   : > { %v6057_v56 = vpack.c.bf16 %v6028_v41, %v6027_v47  ;;  %v6029_v21 = vmax.f32 %v5865_v10, %v5988_v59  ;;  %v5785_v41 = vld [vmem:[#allocation2 + $0xe3] sm:$0xff]  ;;  %v5786_v42 = vld [vmem:[#allocation2 + $0xeb] sm:$0xff]  ;;  %v5852_v57 = vmax.f32 %v5770_v49, %v5811_v46 }
 0x7c6   : > { %v5707_v60 = vmul.f32 %v21433_v40, %v5420_v9  ;;  %v5421_v45 = vmax.f32 %v5380_v52, 0.0  ;;  %v6050_v28 = vpack.c.bf16 %v6014_v17, %v6013_v36  ;;  %v5867_v9 = vmax.f32 %v5785_v41, %v5826_v30  ;;  %v5936_v5 = vld [vmem:[#allocation2 + $0x8e] sm:$0xff]  ;;  %v5935_v53 = vld [vmem:[#allocation2 + $0x86] sm:$0xff]  ;;  %v5645_v17 = vpop.permute.xlu1 %5644  ;;  %v5772_v36 = vld [vmem:[#allocation2 + $0x7b] sm:$0xff] }
 0x7c7   : > { %15317 = vmatprep.subr.bf16.mxu0 %v6057_v56  ;;  %v5215_v0 = vpop.f32.mrb[68].mxu1  ;;  %v5907_v62 = vld [vmem:[#allocation2 + $0xed] sm:$0xff] }
 0x7c8   : > { %15318 = vmatpush3.bf16.msra.mxu0 %v6049_v58  ;;  %v5948_v6 = vld [vmem:[#allocation2 + $0xee] sm:$0xff]  ;;  %5748 = vst.msk [vmem:[#allocation2 + $0x103] sm:$0xff] %vm957_vm4, %v5707_v60  ;;  %v5708_v3 = vmul.f32 %v21437_v4, %v5421_v45  ;;  %v5333_v40 = vmul.f32 %v21371_v51, %v5215_v0  ;;  %v16634_v11 = vpop.f32.mrb[69].mxu1  ;;  %v5893_v4 = vld [vmem:[#allocation2 + $0x7d] sm:$0xff] }
 0x7c9   : > { %v5989_v8 = vmax.f32 %v5907_v62, %v5948_v6  ;;  %v5218_v12 = vpop.f32.mrb[70].mxu1  ;;  %v5908_v18 = vld [vmem:[#allocation2 + $0xf5] sm:$0xff]  ;;  %v5827_v15 = vld [vmem:[#allocation2 + $0xec] sm:$0xff]  ;;  %v5975_v39 = vmax.f32 %v5893_v4, %v5934_v22  ;;  %v5769_v45 = vld [vmem:[#allocation2 + $0x63] sm:$0xff] }
 0x7ca   : > { %5749 = vst.msk [vmem:[#allocation2 + $0x10b] sm:$0xff] %vm957_vm4, %v5708_v3  ;;  %v5381_v19 = vadd.f32 %v21374_v34, %v5333_v40  ;;  %v5334_v26 = vmul.f32 %v21371_v51, %v5218_v12  ;;  %v16635_v27 = vpop.f32.mrb[71].mxu1  ;;  %v5949_v24 = vld [vmem:[#allocation2 + $0xf6] sm:$0xff]  ;;  %v5868_v1 = vmax.f32 %v5786_v42, %v5827_v15  ;;  %v5851_v59 = vmax.f32 %v5769_v45, %v5810_v50  ;;  %v5895_v6 = vld [vmem:[#allocation2 + $0x8d] sm:$0xff]  ;;  %v5894_v12 = vld [vmem:[#allocation2 + $0x85] sm:$0xff] }
 0x7cb   : > { %v6030_v48 = vmax.f32 %v5866_v14, %v5989_v8  ;;  %v5990_v44 = vmax.f32 %v5908_v18, %v5949_v24  ;;  %v6016_v38 = vmax.f32 %v5852_v57, %v5975_v39  ;;  %v5813_v11 = vld [vmem:[#allocation2 + $0x7c] sm:$0xff]  ;;  %v5977_v27 = vmax.f32 %v5895_v6, %v5936_v5  ;;  %v5787_v4 = vld [vmem:[#allocation2 + $0xf3] sm:$0xff]  ;;  %v5650_v24 = vpop.permute.xlu0 %5649 }
 0x7cc   : > { %v5422_v43 = vmax.f32 %v5381_v19, 0.0  ;;  %v5382_v35 = vadd.f32 %v21374_v34, %v5334_v26  ;;  %v6015_v7 = vmax.f32 %v5851_v59, %v5974_v29  ;;  %v5812_v18 = vld [vmem:[#allocation2 + $0x74] sm:$0xff]  ;;  %v5854_v31 = vmax.f32 %v5772_v36, %v5813_v11  ;;  %v5938_v57 = vld [vmem:[#allocation2 + $0x9e] sm:$0xff] }
 0x7cd   : > { %v6058_v25 = vpack.c.bf16 %v6030_v48, %v6029_v21  ;;  %v6031_v10 = vmax.f32 %v5867_v9, %v5990_v44  ;;  %v5976_v32 = vmax.f32 %v5894_v12, %v5935_v53  ;;  %v5771_v41 = vld [vmem:[#allocation2 + $0x73] sm:$0xff] }
 0x7ce   : > { %v5709_v20 = vmul.f32 %v5635_v13, %v5422_v43  ;;  %v5423_v47 = vmax.f32 %v5382_v35, 0.0  ;;  %v5828_v13 = vld [vmem:[#allocation2 + $0xf4] sm:$0xff]  ;;  %v6051_v19 = vpack.c.bf16 %v6016_v38, %v6015_v7  ;;  %v5853_v49 = vmax.f32 %v5771_v41, %v5812_v18  ;;  %v5774_v7 = vld [vmem:[#allocation2 + $0x8b] sm:$0xff] }
 0x7cf   : > { %15319 = vmatprep.subr.bf16.mxu0 %v6058_v25  ;;  %v5223_v37 = vpop.f32.mrb[72].mxu1  ;;  %v5909_v52 = vld [vmem:[#allocation2 + $0xfd] sm:$0xff]  ;;  %v5869_v35 = vmax.f32 %v5787_v4, %v5828_v13  ;;  %v6018_v50 = vmax.f32 %v5854_v31, %v5977_v27  ;;  %v5896_v38 = vld [vmem:[#allocation2 + $0x95] sm:$0xff] }
 0x7d0   : > { %15320 = vmatpush3.bf16.msra.mxu0 %v6050_v28  ;;  %v5950_v56 = vld [vmem:[#allocation2 + $0xfe] sm:$0xff]  ;;  %5750 = vst.msk [vmem:[#allocation2 + $0x113] sm:$0xff] %vm957_vm4, %v5709_v20  ;;  %v5710_v33 = vmul.f32 %v5640_v54, %v5423_v47  ;;  %v5335_v58 = vmul.f32 %v21371_v51, %v5223_v37  ;;  %v16638_v16 = vpop.f32.mrb[73].mxu1  ;;  %v6017_v29 = vmax.f32 %v5853_v49, %v5976_v32 }
 0x7d1   : > { %v5991_v60 = vmax.f32 %v5909_v52, %v5950_v56  ;;  %v5226_v23 = vpop.f32.mrb[74].mxu1  ;;  %v5910_v3 = vld [vmem:[#allocation2 + $0x105] sm:$0xff]  ;;  %v5829_v26 = vld [vmem:[#allocation2 + $0xfc] sm:$0xff] }
 0x7d2   : > { %5751 = vst.msk [vmem:[#allocation2 + $0x11b] sm:$0xff] %vm957_vm4, %v5710_v33  ;;  %v5383_v61 = vadd.f32 %v21374_v34, %v5335_v58  ;;  %v5336_v0 = vmul.f32 %v21371_v51, %v5226_v23  ;;  %v16639_v63 = vpop.f32.mrb[75].mxu1  ;;  %v5951_v40 = vld [vmem:[#allocation2 + $0x106] sm:$0xff]  ;;  %v5788_v43 = vld [vmem:[#allocation2 + $0xfb] sm:$0xff] }
 0x7d3   : > { %v6032_v62 = vmax.f32 %v5868_v1, %v5991_v60  ;;  %v5992_v22 = vmax.f32 %v5910_v3, %v5951_v40  ;;  %v5870_v20 = vmax.f32 %v5788_v43, %v5829_v26  ;;  %v5897_v56 = vld [vmem:[#allocation2 + $0x9d] sm:$0xff]  ;;  %v5815_v16 = vld [vmem:[#allocation2 + $0x8c] sm:$0xff]  ;;  %v5660_v40 = vpop.permute.xlu0 %5659 }
 0x7d4   : > { %v5424_v14 = vmax.f32 %v5383_v61, 0.0  ;;  %v5384_v8 = vadd.f32 %v21374_v34, %v5336_v0  ;;  %v21525_v60 = vld [vmem:[%s19825_s29] ss:$0 sm:$0xff]  ;;  %v5830_v59 = vld [vmem:[#allocation2 + $0x104] sm:$0xff]  ;;  %v5655_v61 = vpop.permute.xlu1 %5654  ;;  %v5979_v63 = vmax.f32 %v5897_v56, %v5938_v57  ;;  %v5856_v12 = vmax.f32 %v5774_v7, %v5815_v16 }
 0x7d5   : > { %v6059_v55 = vpack.c.bf16 %v6032_v62, %v6031_v10  ;;  %v6033_v9 = vmax.f32 %v5869_v35, %v5992_v22  ;;  %v5789_v6 = vld [vmem:[#allocation2 + $0x103] sm:$0xff] }
 0x7d6   : > { %v5711_v21 = vmul.f32 %v5645_v17, %v5424_v14  ;;  %v5425_v48 = vmax.f32 %v5384_v8, 0.0  ;;  %v5814_v3 = vld [vmem:[#allocation2 + $0x84] sm:$0xff]  ;;  %v5871_v8 = vmax.f32 %v5789_v6, %v5830_v59  ;;  %v6020_v18 = vmax.f32 %v5856_v12, %v5979_v63 }
 0x7d7   : > { %15321 = vmatprep.subr.bf16.mxu0 %v6059_v55  ;;  %v5231_v46 = vpop.f32.mrb[76].mxu1  ;;  %v5911_v25 = vld [vmem:[#allocation2 + $0x10d] sm:$0xff]  ;;  %v5773_v4 = vld [vmem:[#allocation2 + $0x83] sm:$0xff] }
 0x7d8   : > { %15322 = vmatpush3.bf16.msra.mxu0 %v6051_v19  ;;  %v5952_v30 = vld [vmem:[#allocation2 + $0x10e] sm:$0xff]  ;;  %5752 = vst.msk [vmem:[#allocation2 + $0x123] sm:$0xff] %vm957_vm4, %v5711_v21  ;;  %v5712_v28 = vmul.f32 %v5650_v24, %v5425_v48  ;;  %v5337_v15 = vmul.f32 %v21371_v51, %v5231_v46  ;;  %v16642_v39 = vpop.f32.mrb[77].mxu1  ;;  %v19682_v19 = vld [vmem:[%s19820_s25] ss:$0 sm:$0xff]  ;;  %v5855_v36 = vmax.f32 %v5773_v4, %v5814_v3 }
 0x7d9   : > { %v5993_v47 = vmax.f32 %v5911_v25, %v5952_v30  ;;  %v5234_v44 = vpop.f32.mrb[78].mxu1  ;;  %v5912_v33 = vld [vmem:[#allocation2 + $0x115] sm:$0xff]  ;;  %v5831_v0 = vld [vmem:[#allocation2 + $0x10c] sm:$0xff] }
 0x7da   : > { %5753 = vst.msk [vmem:[#allocation2 + $0x12b] sm:$0xff] %vm957_vm4, %v5712_v28  ;;  %v5385_v54 = vadd.f32 %v21374_v34, %v5337_v15  ;;  %v5338_v37 = vmul.f32 %v21371_v51, %v5234_v44  ;;  %v16643_v42 = vpop.f32.mrb[79].mxu1  ;;  %v5953_v58 = vld [vmem:[#allocation2 + $0x116] sm:$0xff]  ;;  %v6052_v51 = vpack.c.bf16 %v6018_v50, %v6017_v29  ;;  %v5790_v14 = vld [vmem:[#allocation2 + $0x10b] sm:$0xff] }
 0x7db   : > { %v6034_v52 = vmax.f32 %v5870_v20, %v5993_v47  ;;  %v5937_v34 = vld [vmem:[#allocation2 + $0x96] sm:$0xff]  ;;  %v5994_v5 = vmax.f32 %v5912_v33, %v5953_v58  ;;  %v5872_v21 = vmax.f32 %v5790_v14, %v5831_v0  ;;  %v5665_v47 = vpop.permute.xlu1 %5664 }
 0x7dc   : > { %v5426_v1 = vmax.f32 %v5385_v54, 0.0  ;;  %v5386_v45 = vadd.f32 %v21525_v60, %v5338_v37  ;;  %v5978_v53 = vmax.f32 %v5896_v38, %v5937_v34  ;;  %v5832_v20 = vld [vmem:[#allocation2 + $0x114] sm:$0xff]  ;;  %v19268_v54 = vld [vmem:[%s22969_s6] ss:$12 sps:$4 sm:$0xff]  }
 0x7dd   : > { %v6060_v23 = vpack.c.bf16 %v6034_v52, %v6033_v9  ;;  %v6035_v35 = vmax.f32 %v5871_v8, %v5994_v5  ;;  %v5791_v37 = vld [vmem:[#allocation2 + $0x113] sm:$0xff]  ;;  %v19271_v9 = vld [vmem:[%s22969_s6 + $0x1c] ss:$12 sps:$4 sm:$0xff]   ;;  %v5670_v52 = vpop.permute.xlu0 %5669 }
 0x7de   : > { %v5713_v10 = vmul.f32 %v5655_v61, %v5426_v1  ;;  %v5427_v62 = vmax.f32 %v5386_v45, 0.0  ;;  %v6019_v30 = vmax.f32 %v5855_v36, %v5978_v53  ;;  %v5792_v57 = vld [vmem:[#allocation2 + $0x11b] sm:$0xff]  ;;  %v5873_v29 = vmax.f32 %v5791_v37, %v5832_v20 }
 0x7df   : > { %15323 = vmatprep.subr.bf16.mxu0 %v6060_v23  ;;  %v5239_v11 = vpop.f32.mrb[80].mxu1  ;;  %v5913_v55 = vld [vmem:[#allocation2 + $0x11d] sm:$0xff]  ;;  %v21536_v23 = vld [vmem:[#allocation4] sm:$0xff]  ;;  %v5675_v7 = vpop.permute.xlu1 %5674 }
 0x7e0   : > { %15324 = vmatpush3.bf16.msra.mxu0 %v6052_v51  ;;  %v5954_v13 = vld [vmem:[#allocation2 + $0x11e] sm:$0xff]  ;;  %5754 = vst.msk [vmem:[#allocation2 + $0x133] sm:$0xff] %vm957_vm4, %v5713_v10  ;;  %v5714_v17 = vmul.f32 %v5660_v40, %v5427_v62  ;;  %v5339_v26 = vmul.f32 %v19682_v19, %v5239_v11  ;;  %v16646_v27 = vpop.f32.mrb[81].mxu1  ;;  %v6053_v41 = vpack.c.bf16 %v6020_v18, %v6019_v30 }
 0x7e1   : > { %v5995_v48 = vmax.f32 %v5913_v55, %v5954_v13  ;;  %v5242_v22 = vpop.f32.mrb[82].mxu1  ;;  %v5914_v31 = vld [vmem:[#allocation2 + $0x125] sm:$0xff]  ;;  %v5833_v44 = vld [vmem:[#allocation2 + $0x11c] sm:$0xff]  ;;  %1007 = vst.msk [vmem:[#allocation3 + $0x8] sm:$0xff] %vm1005_vm9, %v21536_v23  ;;  %1008 = vst.msk [vmem:[#allocation3 + $0x10] sm:$0xff] %vm1005_vm9, %v21536_v23 }
 0x7e2   : > { %5755 = vst.msk [vmem:[#allocation2 + $0x13b] sm:$0xff] %vm957_vm4, %v5714_v17  ;;  %v5387_v24 = vadd.f32 %v21525_v60, %v5339_v26  ;;  %v5340_v46 = vmul.f32 %v19682_v19, %v5242_v22  ;;  %v16647_v43 = vpop.f32.mrb[83].mxu1  ;;  %v5955_v32 = vld [vmem:[#allocation2 + $0x126] sm:$0xff]  ;;  %v5874_v59 = vmax.f32 %v5792_v57, %v5833_v44  ;;  %v19274_v13 = vld [vmem:[%s22969_s6 + $0x34] ss:$12 sps:$4 sm:$0xff]  }
 0x7e3   : > { %v6036_v25 = vmax.f32 %v5872_v21, %v5995_v48  ;;  %v5996_v42 = vmax.f32 %v5914_v31, %v5955_v32  ;;  %v5834_v3 = vld [vmem:[#allocation2 + $0x124] sm:$0xff]  ;;  %v19276_v36 = vld [vmem:[%s22969_s6 + $0x30] ss:$12 sps:$4 sm:$0xff]   ;;  %1006 = vst.msk [vmem:[#allocation3] sm:$0xff] %vm1005_vm9, %v21536_v23  ;;  %1009 = vst.msk [vmem:[#allocation3 + $0x18] sm:$0xff] %vm1005_vm9, %v21536_v23 }
 0x7e4   : > { %v5428_v28 = vmax.f32 %v5387_v24, 0.0  ;;  %v5388_v15 = vadd.f32 %v21525_v60, %v5340_v46  ;;  %v19273_v14 = vld [vmem:[%s22969_s6 + $0x18] ss:$12 sps:$4 sm:$0xff]   ;;  %1010 = vst.msk [vmem:[#allocation3 + $0x20] sm:$0xff] %vm1005_vm9, %v21536_v23  ;;  %1011 = vst.msk [vmem:[#allocation3 + $0x28] sm:$0xff] %vm1005_vm9, %v21536_v23 }
 0x7e5   : > { %v6061_v39 = vpack.c.bf16 %v6036_v25, %v6035_v35  ;;  %v6037_v0 = vmax.f32 %v5873_v29, %v5996_v42  ;;  %v5793_v8 = vld [vmem:[#allocation2 + $0x123] sm:$0xff]  ;;  %v19277_v25 = vld [vmem:[%s22969_s6 + $0x4c] ss:$12 sps:$4 sm:$0xff]   ;;  %1012 = vst.msk [vmem:[#allocation3 + $0x30] sm:$0xff] %vm1005_vm9, %v21536_v23  ;;  %1013 = vst.msk [vmem:[#allocation3 + $0x38] sm:$0xff] %vm1005_vm9, %v21536_v23 }
 0x7e6   : > { %v5715_v49 = vmul.f32 %v5665_v47, %v5428_v28  ;;  %v5429_v50 = vmax.f32 %v5388_v15, 0.0  ;;  %v5875_v17 = vmax.f32 %v5793_v8, %v5834_v3  ;;  %v5921_v18 = vld [vmem:[#allocation2 + $0x15d] sm:$0xff]  ;;  %v5922_v30 = vld [vmem:[#allocation2 + $0x165] sm:$0xf]  ;;  %1014 = vst.msk [vmem:[#allocation3 + $0x40] sm:$0xff] %vm1005_vm9, %v21536_v23  ;;  %1015 = vst.msk [vmem:[#allocation3 + $0x48] sm:$0xff] %vm1005_vm9, %v21536_v23 }
 0x7e7   : > { %15325 = vmatprep.subr.bf16.mxu0 %v6061_v39  ;;  %v5247_v56 = vpop.f32.mrb[84].mxu1  ;;  %v5915_v33 = vld [vmem:[#allocation2 + $0x12d] sm:$0xff]  ;;  %v5962_v24 = vld [vmem:[#allocation2 + $0x15e] sm:$0xff]  ;;  %v5963_v31 = vld [vmem:[#allocation2 + $0x166] sm:$0xf]  ;;  %1016 = vst.msk [vmem:[#allocation3 + $0x50] sm:$0xff] %vm1005_vm9, %v21536_v23 }
 0x7e8   : > { %15326 = vmatpush3.bf16.msra.mxu0 %v6053_v41  ;;  %v5956_v58 = vld [vmem:[#allocation2 + $0x12e] sm:$0xff]  ;;  %5756 = vst.msk [vmem:[#allocation2 + $0x143] sm:$0xff] %vm957_vm4, %v5715_v49  ;;  %v5716_v16 = vmul.f32 %v5670_v52, %v5429_v50  ;;  %v5341_v1 = vmul.f32 %v19682_v19, %v5247_v56  ;;  %v16650_v45 = vpop.f32.mrb[85].mxu1  ;;  %v6003_v56 = vmax.f32 %v5921_v18, %v5962_v24  ;;  %v19285_v3 = vld [vmem:[%s22969_s6 + $0x78] ss:$12 sps:$4 sm:$0xff]  }
 0x7e9   : > { %16652 = vmatprep.subr.bf16.mxu0 %v21536_v23  ;;  %v5997_v38 = vmax.f32 %v5915_v33, %v5956_v58  ;;  %v5250_v34 = vpop.f32.mrb[86].mxu1  ;;  %v5916_v10 = vld [vmem:[#allocation2 + $0x135] sm:$0xff]  ;;  %v5835_v40 = vld [vmem:[#allocation2 + $0x12c] sm:$0xff]  ;;  %1017 = vst.msk [vmem:[#allocation3 + $0x58] sm:$0xff] %vm1005_vm9, %v21536_v23  ;;  %1018 = vst.msk [vmem:[#allocation3 + $0x60] sm:$0xff] %vm1005_vm9, %v21536_v23 }
 0x7ea   : > { %5757 = vst.msk [vmem:[#allocation2 + $0x14b] sm:$0xff] %vm957_vm4, %v5716_v16  ;;  %v5389_v61 = vadd.f32 %v21525_v60, %v5341_v1  ;;  %v16651_v51 = vpop.f32.mrb[87].mxu1  ;;  %v5957_v62 = vld [vmem:[#allocation2 + $0x136] sm:$0xff]  ;;  %v5794_v60 = vld [vmem:[#allocation2 + $0x12b] sm:$0xff]  ;;  %v6004_v1 = vmax.f32 %v5922_v30, %v5963_v31 }
 0x7eb   : > { %6252 = vmatmul.mubr.bf16.vlgmr.msra.gmra.mrb[80].mxu0 %v19268_v54  ;;  %v6038_v63 = vmax.f32 %v5874_v59, %v5997_v38  ;;  %v5998_v55 = vmax.f32 %v5916_v10, %v5957_v62  ;;  %v5876_v19 = vmax.f32 %v5794_v60, %v5835_v40  ;;  %v5795_v46 = vld [vmem:[#allocation2 + $0x133] sm:$0xff]  ;;  %v5796_v32 = vld [vmem:[#allocation2 + $0x13b] sm:$0xff]  ;;  %1019 = vst.msk [vmem:[#allocation3 + $0x68] sm:$0xff] %vm1005_vm9, %v21536_v23  ;;  %1020 = vst.msk [vmem:[#allocation3 + $0x70] sm:$0xff] %vm1005_vm9, %v21536_v23 }
 0x7ec   : > { %6259 = vmatprep.mubr.bf16.mxu0 %v19271_v9  ;;  %v5430_v6 = vmax.f32 %v5389_v61, 0.0  ;;  %v5836_v43 = vld [vmem:[#allocation2 + $0x134] sm:$0xff]  ;;  %v19289_v8 = vld [vmem:[%s22969_s6 + $0x20] ss:$12 sps:$4 sm:$0xff]   ;;  %1022 = vst.msk [vmem:[#allocation3 + $0x78] sm:$0x3] %vm1021_vm10, %v21536_v23 }
 0x7ed   : > { %v6062_v5 = vpack.c.bf16 %v6038_v63, %v6037_v0  ;;  %v6039_v27 = vmax.f32 %v5875_v17, %v5998_v55  ;;  %v5877_v44 = vmax.f32 %v5795_v46, %v5836_v43  ;;  %v19279_v61 = vld [vmem:[%s22969_s6 + $0x48] ss:$12 sps:$4 sm:$0xff]   ;;  %v19280_v0 = vld [vmem:[%s22969_s6 + $0x64] ss:$12 sps:$4 sm:$0xff]  }
 0x7ee   : > { %v5717_v11 = vmul.f32 %v5675_v7, %v5430_v6  ;;  %v19282_v6 = vld [vmem:[%s22969_s6 + $0x60] ss:$12 sps:$4 sm:$0xff]   ;;  %v6091_v7 = vld [vmem:[%s22969_s6 + $0x90] sm:$0x33]  ;;  %v19290_v55 = vld [vmem:[%s22969_s6 + $0x38] ss:$12 sps:$4 sm:$0xff]  }
 0x7ef   : > { %16653 = vmatpush3.bf16.msra.mxu0 %v6062_v5  ;;  %v5917_v12 = vld [vmem:[#allocation2 + $0x13d] sm:$0xff]  ;;  %v14178_v40 = vcombine.high %v6091_v7, %v6091_v7  ;;  %v19292_v60 = vld [vmem:[%s22969_s6 + $0x68] ss:$12 sps:$4 sm:$0xff]  }
 0x7f0   : > { %16654 = vmatprep.subr.bf16.mxu0 %v21536_v23  ;;  %v5958_v53 = vld [vmem:[#allocation2 + $0x13e] sm:$0xff]  ;;  %5758 = vst.msk [vmem:[#allocation2 + $0x153] sm:$0xf] %vm1928_vm5, %v5717_v11  ;;  %v14177_v11 = vcombine.low %v6091_v7, %v6091_v7  ;;  %v19295_v17 = vld [vmem:[%s22971_s3 + $0x10] sm:$0xff]  }
 0x7f1   : > { %v5999_v26 = vmax.f32 %v5917_v12, %v5958_v53  ;;  %v5918_v48 = vld [vmem:[#allocation2 + $0x145] sm:$0xff]  ;;  %v5837_v35 = vld [vmem:[#allocation2 + $0x13c] sm:$0xff]  ;;  %v19294_v53 = vld [vmem:[%s22969_s6 + $0x98] ss:$0 sps:$4 sm:$0x33]  }
 0x7f2   : > { %v5959_v4 = vld [vmem:[#allocation2 + $0x146] sm:$0xff]  ;;  %v5878_v49 = vmax.f32 %v5796_v32, %v5837_v35 }
 0x7f3   : > { %6260 = vmatmul.mubr.bf16.gmra.mrb[84].mxu0 %v19273_v14  ;;  %v6040_v21 = vmax.f32 %v5876_v19, %v5999_v26  ;;  %v6000_v28 = vmax.f32 %v5918_v48, %v5959_v4  ;;  %v5798_v15 = vld [vmem:[#allocation2 + $0x14b] sm:$0xff]  ;;  %v5797_v58 = vld [vmem:[#allocation2 + $0x143] sm:$0xff]  ;;  %v19296_v19 = vld [vmem:[%s22971_s3 + $0x18] sm:$0xff]  }
 0x7f4   : > { %6267 = vmatprep.mubr.bf16.mxu0 %v19274_v13  ;;  %v5838_v39 = vld [vmem:[#allocation2 + $0x144] sm:$0xff]  ;;  %v19291_v13 = vld [vmem:[%s22969_s6 + $0x50] ss:$12 sps:$4 sm:$0xff]   ;;  %v19293_v12 = vld [vmem:[%s22969_s6 + $0x80] ss:$12 sps:$4 sm:$0xff]  }
 0x7f5   : > { %v6063_v22 = vpack.c.bf16 %v6040_v21, %v6039_v27  ;;  %v6041_v29 = vmax.f32 %v5877_v44, %v6000_v28  ;;  %v5879_v45 = vmax.f32 %v5797_v58, %v5838_v39  ;;  %v19283_v5 = vld [vmem:[%s22969_s6 + $0x7c] ss:$12 sps:$4 sm:$0xff]  }
 0x7f6   : > { %v19288_v14 = vld [vmem:[%s22969_s6 + $0x8] ss:$12 sps:$4 sm:$0xff]  }
 0x7f7   : > { %16655 = vmatpush3.bf16.msra.mxu0 %v6063_v22  ;;  %v5919_v20 = vld [vmem:[#allocation2 + $0x14d] sm:$0xff]  ;;  %v5920_v54 = vld [vmem:[#allocation2 + $0x155] sm:$0xff] }
 0x7f8   : > { %16656 = vmatprep.subr.bf16.mxu0 %v21536_v23  ;;  %v5960_v47 = vld [vmem:[#allocation2 + $0x14e] sm:$0xff]  ;;  %v5961_v37 = vld [vmem:[#allocation2 + $0x156] sm:$0xff] }
 0x7f9   : > { %v5839_v41 = vld [vmem:[#allocation2 + $0x14c] sm:$0xff]  ;;  %v6001_v50 = vmax.f32 %v5919_v20, %v5960_v47  ;;  %v6002_v52 = vmax.f32 %v5920_v54, %v5961_v37  ;;  %v5840_v57 = vld [vmem:[#allocation2 + $0x154] sm:$0xf] }
 0x7fa   : > { %v5799_v42 = vld [vmem:[#allocation2 + $0x153] sm:$0xf]  ;;  %v5880_v9 = vmax.f32 %v5798_v15, %v5839_v41 }
 0x7fb   : > { %6268 = vmatmul.mubr.bf16.gmra.mrb[88].mxu0 %v19276_v36  ;;  %v6042_v33 = vmax.f32 %v5878_v49, %v6001_v50  ;;  %v5881_v16 = vmax.f32 %v5799_v42, %v5840_v57  ;;  %v6043_v38 = vmax.f32 %v5879_v45, %v6002_v52 }
 0x7fc   : > { %6275 = vmatprep.mubr.bf16.mxu0 %v19277_v25  ;;  %v6044_v34 = vmax.f32 %v5880_v9, %v6003_v56 }
 0x7fd   : > { %v6064_v59 = vpack.c.bf16 %v6042_v33, %v6041_v29  ;;  %v6045_v51 = vmax.f32 %v5881_v16, %v6004_v1 }
 0x7fe   : > { %v6065_v63 = vpack.c.bf16 %v6044_v34, %v6043_v38 }
 0x7ff   : > { %16657 = vmatpush3.bf16.msra.mxu0 %v6064_v59  ;;  %v6066_v10 = vpack.c.bf16 %v6045_v51, %v6045_v51 }
 0x800   : > { %16658 = vmatprep.subr.bf16.mxu0 %v21536_v23 }
 0x801   : > { %v6217_v62 = vsel %vm6215_vm7, %v6066_v10, 0 }
 0x803   : > { %6276 = vmatmul.mubr.bf16.gmra.mrb[92].mxu0 %v19279_v61 }
 0x804   : > { %16659 = vmatpush3.bf16.msra.mxu0 %v6065_v63  ;;  %6283 = vmatprep.mubr.bf16.mxu0 %v19280_v0 }
 0x805   : > { %16660 = vmatprep.subr.bf16.mxu0 %v21536_v23 }
 0x808   : > { %16661 = vmatpush3.bf16.msra.mxu0 %v6217_v62 }
 0x809   : > { %16690 = vmatprep.subr.bf16.mxu0 %v21536_v23 }
 0x80b   : > { %6284 = vmatmul.mubr.bf16.gmra.mrb[96].mxu0 %v19282_v6 }
 0x80c   : > { %6291 = vmatprep.mubr.bf16.mxu0 %v19283_v5  ;;  %v21636_v5 = vld [vmem:[#allocation3 + $0x1] sm:$0xff] }
 0x813   : > { %6292 = vmatmul.mubr.bf16.gmra.mrb[100].mxu0 %v19285_v3 }
 0x814   : > { %6299 = vmatprep.mubr.bf16.mxu0 %v14178_v40 }
 0x81b   : > { %6300 = vmatmul.mubr.bf16.gmra.mrb[104].mxu0 %v14177_v11 }
 0x81c   : > { %16662 = vmatprep.mubr.msk.bf16.mxu0 %vm19785_vm2, %v21536_v23 }
 0x823   : > { %16663 = vmatmul.mubr.msk.bf16.vlgmr.msra.gmra.mrb[108].mxu0 %vm6193_vm8, %v19288_v14  ;;  %v19297_v14 = vld [vmem:[%s22971_s3] sm:$0xff]  }
 0x824   : > { %16666 = vmatprep.mubr.msk.bf16.mxu0 %vm19785_vm2, %v21536_v23  ;;  %16691 = vmatpush3.bf16.msra.mxu0 %v19295_v17 }
 0x825   : > { %16692 = vmatprep.subr.bf16.mxu0 %v21536_v23 }
 0x828   : > { %16693 = vmatpush3.bf16.msra.mxu0 %v19296_v19 }
 0x829   : > { %16722 = vmatprep.subr.bf16.mxu0 %v21536_v23 }
 0x82b   : > { %16667 = vmatmul.mubr.msk.bf16.gmra.mrb[112].mxu0 %vm6193_vm8, %v19289_v8 }
 0x82c   : > { %16670 = vmatprep.mubr.msk.bf16.mxu0 %vm19785_vm2, %v21536_v23 }
 0x833   : > { %16671 = vmatmul.mubr.msk.bf16.gmra.mrb[116].mxu0 %vm6193_vm8, %v19290_v55 }
 0x834   : > { %16674 = vmatprep.mubr.msk.bf16.mxu0 %vm19785_vm2, %v21536_v23 }
 0x83b   : > { %16675 = vmatmul.mubr.msk.bf16.gmra.mrb[120].mxu0 %vm6193_vm8, %v19291_v13 }
 0x83c   : > { %16678 = vmatprep.mubr.msk.bf16.mxu0 %vm19785_vm2, %v21536_v23 }
 0x843   : > { %16679 = vmatmul.mubr.msk.bf16.gmra.mrb[124].mxu0 %vm6193_vm8, %v19292_v60  ;;  %v19298_v60 = vld [vmem:[%s22971_s3 + $0x8] sm:$0xff]  }
 0x844   : > { %16682 = vmatprep.mubr.msk.bf16.mxu0 %vm19785_vm2, %v21536_v23 }
 0x84b   : > { %16683 = vmatmul.mubr.msk.bf16.gmra.mrb[128].mxu0 %vm6193_vm8, %v19293_v12 }
 0x84c   : > { %16686 = vmatprep.mubr.msk.bf16.mxu0 %vm19785_vm2, %v21536_v23 }
 0x853   : > { %16687 = vmatmul.mubr.msk.bf16.gmra.mrb[132].mxu0 %vm6193_vm8, %v19294_v53 }
 0x854   : > { %16694 = vmatprep.mubr.msk.bf16.mxu0 %vm19785_vm2, %v21536_v23 }
 0x8be   : > { %v15327_v26 = vpop.f32.mrb[80].mxu0 }
 0x8bf   : > { %v15328_v27 = vpop.f32.mrb[81].mxu0 }
 0x8c0   : > { %v15329_v21 = vadd.f32 %v15328_v27, %v15327_v26  ;;  %v15330_v48 = vpop.f32.mrb[82].mxu0 }
 0x8c1   : > { %v15331_v4 = vpop.f32.mrb[83].mxu0 }
 0x8c2   : > { %v15332_v22 = vadd.f32 %v15331_v4, %v15330_v48 }
 0x8c6   : > { %v15333_v36 = vpop.f32.mrb[84].mxu0 }
 0x8c7   : > { %v15334_v18 = vpop.f32.mrb[85].mxu0 }
 0x8c8   : > { %v15335_v24 = vadd.f32 %v15334_v18, %v15333_v36  ;;  %v15336_v46 = vpop.f32.mrb[86].mxu0 }
 0x8c9   : > { %v15337_v43 = vpop.f32.mrb[87].mxu0 }
 0x8ca   : > { %v15338_v35 = vadd.f32 %v15337_v43, %v15336_v46 }
 0x8ce   : > { %v15339_v25 = vpop.f32.mrb[88].mxu0 }
 0x8cf   : > { %v15340_v30 = vpop.f32.mrb[89].mxu0 }
 0x8d0   : > { %v15341_v31 = vadd.f32 %v15340_v30, %v15339_v25  ;;  %v15342_v32 = vpop.f32.mrb[90].mxu0 }
 0x8d1   : > { %v15343_v28 = vpop.f32.mrb[91].mxu0 }
 0x8d2   : > { %v15344_v15 = vadd.f32 %v15343_v28, %v15342_v32 }
 0x8d6   : > { %v15345_v39 = vpop.f32.mrb[92].mxu0 }
 0x8d7   : > { %v15346_v20 = vpop.f32.mrb[93].mxu0 }
 0x8d8   : > { %v15347_v47 = vadd.f32 %v15346_v20, %v15345_v39  ;;  %v15348_v41 = vpop.f32.mrb[94].mxu0 }
 0x8d9   : > { %v15349_v44 = vpop.f32.mrb[95].mxu0 }
 0x8da   : > { %v21622_v49 = vadd.f32 %v15349_v44, %v15348_v41 }
 0x8de   : > { %v15351_v50 = vpop.f32.mrb[96].mxu0 }
 0x8df   : > { %v15352_v54 = vpop.f32.mrb[97].mxu0 }
 0x8e0   : > { %v21624_v37 = vadd.f32 %v15352_v54, %v15351_v50  ;;  %v15354_v42 = vpop.f32.mrb[98].mxu0 }
 0x8e1   : > { %v15355_v9 = vpop.f32.mrb[99].mxu0 }
 0x8e2   : > { %v21626_v52 = vadd.f32 %v15355_v9, %v15354_v42 }
 0x8e6   : > { %v15357_v56 = vpop.f32.mrb[100].mxu0 }
 0x8e7   : > { %v15358_v57 = vpop.f32.mrb[101].mxu0 }
 0x8e8   : > { %v21628_v29 = vadd.f32 %v15358_v57, %v15357_v56  ;;  %v15360_v33 = vpop.f32.mrb[102].mxu0 }
 0x8e9   : > { %v15361_v58 = vpop.f32.mrb[103].mxu0 }
 0x8ea   : > { %v21630_v16 = vadd.f32 %v15361_v58, %v15360_v33 }
 0x8ee   : > { %v15363_v1 = vpop.f32.mrb[104].mxu0 }
 0x8ef   : > { %v15364_v45 = vpop.f32.mrb[105].mxu0 }
 0x8f0   : > { %v21632_v59 = vadd.f32 %v15364_v45, %v15363_v1  ;;  %v15366_v38 = vpop.f32.mrb[106].mxu0 }
 0x8f1   : > { %v15367_v34 = vpop.f32.mrb[107].mxu0 }
 0x8f6   : > { %v6341_v61 = vpop.f32.mrb[108].mxu0 }
 0x8f7   : > { %v6342_v51 = vadd.f32 %v15329_v21, %v6341_v61  ;;  %v16664_v0 = vpop.f32.mrb[109].mxu0 }
 0x8f8   : > { %v6344_v63 = vpop.f32.mrb[110].mxu0 }
 0x8f9   : > { %6395 = vst.msk [vmem:[#allocation3 + $0xb] sm:$0xff] %vm957_vm4, %v6342_v51  ;;  %v6345_v10 = vadd.f32 %v15332_v22, %v6344_v63  ;;  %v16665_v62 = vpop.f32.mrb[111].mxu0  ;;  %v19299_v63 = vld [vmem:[%s22971_s3 + $0x20] sm:$0xff]  }
 0x8fa   : > { %v19300_v62 = vld [vmem:[%s22971_s3 + $0x28] sm:$0xff]  }
 0x8fb   : > { %6396 = vst.msk [vmem:[#allocation3 + $0x13] sm:$0xff] %vm957_vm4, %v6345_v10 }
 0x8fe   : > { %v6349_v6 = vpop.f32.mrb[112].mxu0 }
 0x8ff   : > { %v6350_v7 = vadd.f32 %v15335_v24, %v6349_v6  ;;  %v16668_v3 = vpop.f32.mrb[113].mxu0 }
 0x900   : > { %v6433_v40 = vld [vmem:[#allocation3 + $0x9] sm:$0xff]  ;;  %v6352_v11 = vpop.f32.mrb[114].mxu0 }
 0x901   : > { %6397 = vst.msk [vmem:[#allocation3 + $0x1b] sm:$0xff] %vm957_vm4, %v6350_v7  ;;  %v6445_v8 = vpack.c.bf16 %v6433_v40, %v21636_v5  ;;  %v6353_v55 = vadd.f32 %v15338_v35, %v6352_v11  ;;  %v16669_v13 = vpop.f32.mrb[115].mxu0  ;;  %v6409_v0 = vld [vmem:[#allocation3 + $0x8] sm:$0xff] }
 0x902   : > { %v6434_v19 = vld [vmem:[#allocation3 + $0x11] sm:$0xff] }
 0x903   : > { %16695 = vmatmul.mubr.msk.bf16.vlgmr.msra.gmra.mrb[136].mxu0 %vm957_vm4, %v6445_v8  ;;  %6398 = vst.msk [vmem:[#allocation3 + $0x23] sm:$0xff] %vm957_vm4, %v6353_v55  ;;  %v6410_v7 = vld [vmem:[#allocation3 + $0x10] sm:$0xff] }
 0x904   : > { %16698 = vmatprep.mubr.msk.bf16.mxu0 %vm19785_vm2, %v21536_v23  ;;  %16723 = vmatpush3.bf16.msra.mxu0 %v19297_v14 }
 0x905   : > { %16724 = vmatprep.subr.bf16.mxu0 %v21536_v23 }
 0x906   : > { %v6357_v12 = vpop.f32.mrb[116].mxu0 }
 0x907   : > { %v6358_v53 = vadd.f32 %v15341_v31, %v6357_v12  ;;  %v16672_v17 = vpop.f32.mrb[117].mxu0 }
 0x908   : > { %v6435_v26 = vld [vmem:[#allocation3 + $0x19] sm:$0xff]  ;;  %v6360_v27 = vpop.f32.mrb[118].mxu0  ;;  %16725 = vmatpush3.bf16.msra.mxu0 %v19298_v60 }
 0x909   : > { %6399 = vst.msk [vmem:[#allocation3 + $0x2b] sm:$0xff] %vm957_vm4, %v6358_v53  ;;  %v6446_v21 = vpack.c.bf16 %v6435_v26, %v6434_v19  ;;  %v6361_v48 = vadd.f32 %v15344_v15, %v6360_v27  ;;  %v16673_v4 = vpop.f32.mrb[119].mxu0  ;;  %16754 = vmatprep.subr.bf16.mxu0 %v21536_v23  ;;  %v6411_v6 = vld [vmem:[#allocation3 + $0x18] sm:$0xff] }
 0x90a   : > { %v6436_v24 = vld [vmem:[#allocation3 + $0x21] sm:$0xff]  ;;  %v6422_v3 = vpack.c.bf16 %v6411_v6, %v6410_v7  ;;  %v6700_v4 = vld [vmem:[#allocation3 + $0xa] sm:$0xff] }
 0x90b   : > { %16699 = vmatmul.mubr.msk.bf16.gmra.mrb[140].mxu0 %vm957_vm4, %v6446_v21  ;;  %6400 = vst.msk [vmem:[#allocation3 + $0x33] sm:$0xff] %vm957_vm4, %v6361_v48  ;;  %v6412_v11 = vld [vmem:[#allocation3 + $0x20] sm:$0xff] }
 0x90c   : > { %16702 = vmatprep.mubr.msk.bf16.mxu0 %vm19785_vm2, %v21536_v23  ;;  %v6699_v48 = vld [vmem:[#allocation3 + $0x2] sm:$0xff] }
 0x90e   : > { %v6365_v22 = vpop.f32.mrb[120].mxu0 }
 0x90f   : > { %v6366_v36 = vadd.f32 %v15347_v47, %v6365_v22  ;;  %v16676_v18 = vpop.f32.mrb[121].mxu0  ;;  %v19301_v22 = vld [vmem:[%s22971_s3 + $0x30] sm:$0xff]  }
 0x910   : > { %v6437_v46 = vld [vmem:[#allocation3 + $0x29] sm:$0xff]  ;;  %v6368_v43 = vpop.f32.mrb[122].mxu0 }
 0x911   : > { %6401 = vst.msk [vmem:[#allocation3 + $0x3b] sm:$0xff] %vm957_vm4, %v6366_v36  ;;  %v6447_v35 = vpack.c.bf16 %v6437_v46, %v6436_v24  ;;  %v6369_v25 = vadd.f32 %v21622_v49, %v6368_v43  ;;  %v16677_v30 = vpop.f32.mrb[123].mxu0  ;;  %v6413_v40 = vld [vmem:[#allocation3 + $0x28] sm:$0xff]  ;;  %v6712_v36 = vpack.c.bf16 %v6700_v4, %v6699_v48  ;;  %v6702_v24 = vld [vmem:[#allocation3 + $0x1a] sm:$0xff]  ;;  %v6701_v46 = vld [vmem:[#allocation3 + $0x12] sm:$0xff] }
 0x912   : > { %v6438_v15 = vld [vmem:[#allocation3 + $0x31] sm:$0xff]  ;;  %v6423_v14 = vpack.c.bf16 %v6413_v40, %v6412_v11  ;;  %v19302_v18 = vld [vmem:[%s22971_s3 + $0x38] sm:$0xff]   ;;  %v6713_v43 = vpack.c.bf16 %v6702_v24, %v6701_v46  ;;  %v7178_v48 = vld [vmem:[#allocation3 + $0x1c] sm:$0xff] }
 0x913   : > { %16703 = vmatmul.mubr.msk.bf16.gmra.mrb[144].mxu0 %vm957_vm4, %v6447_v35  ;;  %6402 = vst.msk [vmem:[#allocation3 + $0x43] sm:$0xff] %vm957_vm4, %v6369_v25  ;;  %v6414_v55 = vld [vmem:[#allocation3 + $0x30] sm:$0xff]  ;;  %v6703_v25 = vld [vmem:[#allocation3 + $0x22] sm:$0xff] }
 0x914   : > { %16706 = vmatprep.mubr.msk.bf16.mxu0 %vm19785_vm2, %v21536_v23  ;;  %v6704_v35 = vld [vmem:[#allocation3 + $0x2a] sm:$0xff] }
 0x915   : > { %v6714_v30 = vpack.c.bf16 %v6704_v35, %v6703_v25 }
 0x916   : > { %v6373_v31 = vpop.f32.mrb[124].mxu0 }
 0x917   : > { %v6374_v32 = vadd.f32 %v21624_v37, %v6373_v31  ;;  %v16680_v28 = vpop.f32.mrb[125].mxu0 }
 0x918   : > { %v6439_v39 = vld [vmem:[#allocation3 + $0x39] sm:$0xff]  ;;  %v6376_v20 = vpop.f32.mrb[126].mxu0 }
 0x919   : > { %6403 = vst.msk [vmem:[#allocation3 + $0x4b] sm:$0xff] %vm957_vm4, %v6374_v32  ;;  %v6448_v47 = vpack.c.bf16 %v6439_v39, %v6438_v15  ;;  %v6377_v41 = vadd.f32 %v21626_v52, %v6376_v20  ;;  %v16681_v44 = vpop.f32.mrb[127].mxu0  ;;  %v6415_v8 = vld [vmem:[#allocation3 + $0x38] sm:$0xff] }
 0x91a   : > { %v6440_v37 = vld [vmem:[#allocation3 + $0x41] sm:$0xff]  ;;  %v6424_v13 = vpack.c.bf16 %v6415_v8, %v6414_v55  ;;  %v6705_v32 = vld [vmem:[#allocation3 + $0x32] sm:$0xff] }
 0x91b   : > { %16707 = vmatmul.mubr.msk.bf16.gmra.mrb[148].mxu0 %vm957_vm4, %v6448_v47  ;;  %6404 = vst.msk [vmem:[#allocation3 + $0x53] sm:$0xff] %vm957_vm4, %v6377_v41  ;;  %v6416_v12 = vld [vmem:[#allocation3 + $0x40] sm:$0xff] }
 0x91c   : > { %16710 = vmatprep.mubr.msk.bf16.mxu0 %vm19785_vm2, %v21536_v23  ;;  %v6706_v31 = vld [vmem:[#allocation3 + $0x3a] sm:$0xff]  ;;  %v6707_v39 = vld [vmem:[#allocation3 + $0x42] sm:$0xff] }
 0x91d   : > { %v6715_v28 = vpack.c.bf16 %v6706_v31, %v6705_v32  ;;  %v7024_v6 = vld [vmem:[#allocation3 + $0x43] sm:$0xff]  ;;  %v7023_v7 = vld [vmem:[#allocation3 + $0x3b] sm:$0xff] }
 0x91e   : > { %v6381_v49 = vpop.f32.mrb[128].mxu0 }
 0x91f   : > { %v6382_v50 = vadd.f32 %v21628_v29, %v6381_v49  ;;  %v16684_v54 = vpop.f32.mrb[129].mxu0 }
 0x920   : > { %v6441_v42 = vld [vmem:[#allocation3 + $0x49] sm:$0xff]  ;;  %v6384_v9 = vpop.f32.mrb[130].mxu0 }
 0x921   : > { %6405 = vst.msk [vmem:[#allocation3 + $0x5b] sm:$0xff] %vm957_vm4, %v6382_v50  ;;  %v6449_v56 = vpack.c.bf16 %v6441_v42, %v6440_v37  ;;  %v6385_v52 = vadd.f32 %v21630_v16, %v6384_v9  ;;  %v16685_v57 = vpop.f32.mrb[131].mxu0  ;;  %v6417_v60 = vld [vmem:[#allocation3 + $0x48] sm:$0xff]  ;;  %v19303_v54 = vld [vmem:[%s22971_s3 + $0x40] sm:$0xff]   ;;  %v6871_v37 = vpack.c.bf16 %v6701_v46, %v6700_v4  ;;  %v19304_v42 = vld [vmem:[%s22971_s3 + $0x48] sm:$0xff]   ;;  %v6872_v9 = vpack.c.bf16 %v6703_v25, %v6702_v24 }
 0x922   : > { %v6442_v1 = vld [vmem:[#allocation3 + $0x51] sm:$0xff]  ;;  %v6425_v53 = vpack.c.bf16 %v6417_v60, %v6416_v12  ;;  %v7183_v24 = vld [vmem:[#allocation3 + $0x44] sm:$0xff]  ;;  %v7182_v46 = vld [vmem:[#allocation3 + $0x3c] sm:$0xff] }
 0x923   : > { %16711 = vmatmul.mubr.msk.bf16.gmra.mrb[152].mxu0 %vm957_vm4, %v6449_v56  ;;  %6406 = vst.msk [vmem:[#allocation3 + $0x63] sm:$0xff] %vm957_vm4, %v6385_v52  ;;  %v6418_v19 = vld [vmem:[#allocation3 + $0x50] sm:$0xff]  ;;  %v6873_v56 = vpack.c.bf16 %v6705_v32, %v6704_v35  ;;  %v6874_v52 = vpack.c.bf16 %v6707_v39, %v6706_v31 }
 0x924   : > { %16714 = vmatprep.mubr.msk.bf16.mxu0 %vm19785_vm2, %v21536_v23  ;;  %v6708_v15 = vld [vmem:[#allocation3 + $0x4a] sm:$0xff]  ;;  %v6709_v41 = vld [vmem:[#allocation3 + $0x52] sm:$0xff] }
 0x925   : > { %v6716_v20 = vpack.c.bf16 %v6708_v15, %v6707_v39  ;;  %v6875_v57 = vpack.c.bf16 %v6709_v41, %v6708_v15  ;;  %v7026_v40 = vld [vmem:[#allocation3 + $0x53] sm:$0xff]  ;;  %v7025_v11 = vld [vmem:[#allocation3 + $0x4b] sm:$0xff] }
 0x926   : > { %v6389_v33 = vpop.f32.mrb[132].mxu0  ;;  %v7184_v25 = vld [vmem:[#allocation3 + $0x4c] sm:$0xff] }
 0x927   : > { %v6390_v29 = vadd.f32 %v21632_v59, %v6389_v33  ;;  %v16688_v58 = vpop.f32.mrb[133].mxu0  ;;  %v6408_v59 = vld [vmem:[#allocation3] sm:$0xff] }
 0x928   : > { %v6443_v45 = vld [vmem:[#allocation3 + $0x59] sm:$0xff]  ;;  %v6392_v38 = vpop.f32.mrb[134].mxu0  ;;  %v6421_v10 = vpack.c.bf16 %v6409_v0, %v6408_v59 }
 0x929   : > { %v6450_v34 = vpack.c.bf16 %v6443_v45, %v6442_v1  ;;  %6407 = vst.msk [vmem:[#allocation3 + $0x6b] sm:$0xf] %vm1928_vm5, %v6390_v29  ;;  %v16689_v16 = vpop.f32.mrb[135].mxu0  ;;  %v6419_v17 = vld [vmem:[#allocation3 + $0x58] sm:$0xff]  ;;  %v7017_v38 = vld [vmem:[#allocation3 + $0xb] sm:$0xff] }
 0x92a   : > { %v6444_v61 = vld [vmem:[#allocation3 + $0x61] sm:$0xf]  ;;  %v6426_v26 = vpack.c.bf16 %v6419_v17, %v6418_v19  ;;  %v7018_v45 = vld [vmem:[#allocation3 + $0x13] sm:$0xff] }
 0x92b   : > { %16715 = vmatmul.mubr.msk.bf16.gmra.mrb[156].mxu0 %vm957_vm4, %v6450_v34  ;;  %v6451_v51 = vpack.c.bf16 %v6444_v61, %v6444_v61  ;;  %v6420_v27 = vld [vmem:[#allocation3 + $0x60] sm:$0xf]  ;;  %v7030_v16 = vpack.c.bf16 %v7018_v45, %v7017_v38  ;;  %v19306_v61 = vld [vmem:[%s22971_s3 + $0x58] sm:$0xff]   ;;  %v19307_v19 = vld [vmem:[%s22971_s3 + $0x60] sm:$0xff]  }
 0x92c   : > { %16718 = vmatprep.mubr.msk.bf16.mxu0 %vm19785_vm2, %v21536_v23  ;;  %v6427_v21 = vpack.c.bf16 %v6420_v27, %v6420_v27  ;;  %v6710_v47 = vld [vmem:[#allocation3 + $0x5a] sm:$0xff]  ;;  %v6711_v49 = vld [vmem:[#allocation3 + $0x62] sm:$0xf]  ;;  %v7176_v17 = vld [vmem:[#allocation3 + $0xc] sm:$0xff] }
 0x92d   : > { %v6717_v44 = vpack.c.bf16 %v6710_v47, %v6709_v41  ;;  %v6718_v50 = vpack.c.bf16 %v6711_v49, %v6711_v49  ;;  %v6869_v33 = vld [vmem:[#allocation3 + $0x62] sm:$0xff]  ;;  %v19308_v27 = vld [vmem:[%s22971_s3 + $0x68] sm:$0xff]   ;;  %v7497_v45 = vld [vmem:[#allocation3 + $0x2d] sm:$0xff] }
 0x92e   : > { %v6876_v29 = vpack.c.bf16 %v6869_v33, %v6710_v47  ;;  %v19305_v34 = vld [vmem:[%s22971_s3 + $0x50] sm:$0xff]   ;;  %v7185_v35 = vld [vmem:[#allocation3 + $0x54] sm:$0xff]  ;;  %v19310_v41 = vld [vmem:[%s22971_s3 + $0x78] sm:$0xff]  }
 0x92f   : > { %v7019_v59 = vld [vmem:[#allocation3 + $0x1b] sm:$0xff]  ;;  %v7028_v8 = vld [vmem:[#allocation3 + $0x63] sm:$0xff]  ;;  %v19311_v33 = vld [vmem:[%s22971_s3 + $0x80] sm:$0xff]  }
 0x930   : > { %v6870_v58 = vld [vmem:[#allocation3 + $0x6a] sm:$0xf]  ;;  %v7027_v55 = vld [vmem:[#allocation3 + $0x5b] sm:$0xff] }
 0x931   : > { %v6877_v1 = vpack.c.bf16 %v6870_v58, %v6870_v58  ;;  %v7029_v60 = vld [vmem:[#allocation3 + $0x6b] sm:$0xf]  ;;  %v7186_v32 = vld [vmem:[#allocation3 + $0x5c] sm:$0xff] }
 0x932   : > { %v7036_v12 = vpack.c.bf16 %v7029_v60, %v7029_v60  ;;  %v7187_v31 = vld [vmem:[#allocation3 + $0x64] sm:$0xff]  ;;  %v7188_v15 = vld [vmem:[#allocation3 + $0x6c] sm:$0xf]  ;;  %v19312_v58 = vld [vmem:[%s22971_s3 + $0x88] sm:$0xff]  }
 0x933   : > { %16719 = vmatmul.mubr.msk.bf16.gmra.mrb[160].mxu0 %vm957_vm4, %v6451_v51  ;;  %v7020_v51 = vld [vmem:[#allocation3 + $0x23] sm:$0xff]  ;;  %v7195_v39 = vpack.c.bf16 %v7188_v15, %v7188_v15  ;;  %v21892_v15 = vld [vmem:[%s22976_s10] ss:$0 sm:$0xff]  ;;  %s22980_s10 = sld [smem:[#allocation19_spill]] }
 0x934   : > { %16726 = vmatprep.mubr.msk.bf16.mxu0 %vm19785_vm2, %v21536_v23  ;;  %v7031_v0 = vpack.c.bf16 %v7020_v51, %v7019_v59  ;;  %v7496_v38 = vld [vmem:[#allocation3 + $0x25] sm:$0xff]  ;;  %v7501_v51 = vld [vmem:[#allocation3 + $0x4d] sm:$0xff] }
 0x935   : > { %v7500_v59 = vld [vmem:[#allocation3 + $0x45] sm:$0xff] }
 0x936   : > { %v7655_v60 = vld [vmem:[#allocation3 + $0x26] sm:$0xff] }
 0x93b   : > { %16727 = vmatmul.mubr.msk.bf16.vlgmr.msra.gmra.mrb[136].mxu0 %vm957_vm4, %v6421_v10  ;;  %v7021_v10 = vld [vmem:[#allocation3 + $0x2b] sm:$0xff] }
 0x93c   : > { %16730 = vmatprep.mubr.msk.bf16.mxu0 %vm19785_vm2, %v21536_v23  ;;  %16755 = vmatpush3.bf16.msra.mxu0 %v19299_v63  ;;  %v7022_v63 = vld [vmem:[#allocation3 + $0x33] sm:$0xff] }
 0x93d   : > { %16756 = vmatprep.subr.bf16.mxu0 %v21536_v23 }
 0x940   : > { %16757 = vmatpush3.bf16.msra.mxu0 %v19300_v62  ;;  %v7032_v62 = vpack.c.bf16 %v7022_v63, %v7021_v10  ;;  %v7503_v63 = vld [vmem:[#allocation3 + $0x5d] sm:$0xff]  ;;  %v7502_v10 = vld [vmem:[#allocation3 + $0x55] sm:$0xff] }
 0x941   : > { %16786 = vmatprep.subr.bf16.mxu0 %v21536_v23 }
 0x943   : > { %16731 = vmatmul.mubr.msk.bf16.gmra.mrb[140].mxu0 %vm957_vm4, %v6422_v3  ;;  %v7033_v3 = vpack.c.bf16 %v7024_v6, %v7023_v7  ;;  %v7504_v6 = vld [vmem:[#allocation3 + $0x65] sm:$0xff]  ;;  %v7505_v7 = vld [vmem:[#allocation3 + $0x6d] sm:$0xff] }
 0x944   : > { %16734 = vmatprep.mubr.msk.bf16.mxu0 %vm19785_vm2, %v21536_v23 }
 0x94b   : > { %16735 = vmatmul.mubr.msk.bf16.gmra.mrb[144].mxu0 %vm957_vm4, %v6423_v14  ;;  %v7034_v14 = vpack.c.bf16 %v7026_v40, %v7025_v11  ;;  %v7506_v40 = vld [vmem:[#allocation3 + $0x75] sm:$0xf] }
 0x94c   : > { %16738 = vmatprep.mubr.msk.bf16.mxu0 %vm19785_vm2, %v21536_v23  ;;  %v7513_v11 = vpack.c.bf16 %v7506_v40, %v7506_v40 }
 0x953   : > { %16739 = vmatmul.mubr.msk.bf16.gmra.mrb[148].mxu0 %vm957_vm4, %v6424_v13  ;;  %v7035_v13 = vpack.c.bf16 %v7028_v8, %v7027_v55  ;;  %v7653_v8 = vld [vmem:[#allocation3 + $0x16] sm:$0xff] }
 0x954   : > { %16742 = vmatprep.mubr.msk.bf16.mxu0 %vm19785_vm2, %v21536_v23 }
 0x95b   : > { %16743 = vmatmul.mubr.msk.bf16.gmra.mrb[152].mxu0 %vm957_vm4, %v6425_v53  ;;  %v7177_v53 = vld [vmem:[#allocation3 + $0x14] sm:$0xff] }
 0x95c   : > { %16746 = vmatprep.mubr.msk.bf16.mxu0 %vm19785_vm2, %v21536_v23  ;;  %v7348_v47 = vpack.c.bf16 %v7178_v48, %v7177_v53 }
 0x963   : > { %16747 = vmatmul.mubr.msk.bf16.gmra.mrb[156].mxu0 %vm957_vm4, %v6426_v26  ;;  %v7189_v26 = vpack.c.bf16 %v7177_v53, %v7176_v17  ;;  %v7658_v53 = vld [vmem:[#allocation3 + $0x3e] sm:$0xff]  ;;  %v7657_v17 = vld [vmem:[#allocation3 + $0x36] sm:$0xff] }
 0x964   : > { %16750 = vmatprep.mubr.msk.bf16.mxu0 %vm19785_vm2, %v21536_v23 }
 0x96b   : > { %16751 = vmatmul.mubr.msk.bf16.gmra.mrb[160].mxu0 %vm957_vm4, %v6427_v21  ;;  %v7179_v21 = vld [vmem:[#allocation3 + $0x24] sm:$0xff] }
 0x96c   : > { %16758 = vmatprep.mubr.msk.bf16.mxu0 %vm19785_vm2, %v21536_v23  ;;  %v7190_v4 = vpack.c.bf16 %v7179_v21, %v7178_v48  ;;  %v7662_v48 = vld [vmem:[#allocation3 + $0x5e] sm:$0xff] }
 0x973   : > { %16759 = vmatmul.mubr.msk.bf16.vlgmr.msra.gmra.mrb[136].mxu0 %vm957_vm4, %v6712_v36  ;;  %v7180_v36 = vld [vmem:[#allocation3 + $0x2c] sm:$0xff] }
 0x974   : > { %16762 = vmatprep.mubr.msk.bf16.mxu0 %vm19785_vm2, %v21536_v23  ;;  %16787 = vmatpush3.bf16.msra.mxu0 %v19301_v22  ;;  %v7181_v22 = vld [vmem:[#allocation3 + $0x34] sm:$0xff] }
 0x975   : > { %16788 = vmatprep.subr.bf16.mxu0 %v21536_v23  ;;  %v7350_v49 = vpack.c.bf16 %v7182_v46, %v7181_v22 }
 0x978   : > { %16789 = vmatpush3.bf16.msra.mxu0 %v19302_v18  ;;  %v7191_v18 = vpack.c.bf16 %v7181_v22, %v7180_v36 }
 0x979   : > { %16818 = vmatprep.subr.bf16.mxu0 %v21536_v23 }
 0x97b   : > { %16763 = vmatmul.mubr.msk.bf16.gmra.mrb[140].mxu0 %vm957_vm4, %v6713_v43  ;;  %v7192_v43 = vpack.c.bf16 %v7183_v24, %v7182_v46  ;;  %v7665_v46 = vld [vmem:[#allocation3 + $0x76] sm:$0xf] }
 0x97c   : > { %16766 = vmatprep.mubr.msk.bf16.mxu0 %vm19785_vm2, %v21536_v23 }
 0x983   : > { %16767 = vmatmul.mubr.msk.bf16.gmra.mrb[144].mxu0 %vm957_vm4, %v6714_v30  ;;  %v7193_v30 = vpack.c.bf16 %v7185_v35, %v7184_v25 }
 0x984   : > { %16770 = vmatprep.mubr.msk.bf16.mxu0 %vm19785_vm2, %v21536_v23 }
 0x98b   : > { %16771 = vmatmul.mubr.msk.bf16.gmra.mrb[148].mxu0 %vm957_vm4, %v6715_v28  ;;  %v7194_v28 = vpack.c.bf16 %v7187_v31, %v7186_v32 }
 0x98c   : > { %16774 = vmatprep.mubr.msk.bf16.mxu0 %vm19785_vm2, %v21536_v23 }
 0x993   : > { %16775 = vmatmul.mubr.msk.bf16.gmra.mrb[152].mxu0 %vm957_vm4, %v6716_v20  ;;  %v19309_v20 = vld [vmem:[%s22971_s3 + $0x70] sm:$0xff]   ;;  %s22987_s3 = sld [smem:[#allocation23_spill]] }
 0x994   : > { %16778 = vmatprep.mubr.msk.bf16.mxu0 %vm19785_vm2, %v21536_v23 }
 0x99b   : > { %16779 = vmatmul.mubr.msk.bf16.gmra.mrb[156].mxu0 %vm957_vm4, %v6717_v44  ;;  %v7349_v44 = vpack.c.bf16 %v7180_v36, %v7179_v21  ;;  %v7663_v36 = vld [vmem:[#allocation3 + $0x66] sm:$0xff] }
 0x99c   : > { %16782 = vmatprep.mubr.msk.bf16.mxu0 %vm19785_vm2, %v21536_v23 }
 0x9a3   : > { %16783 = vmatmul.mubr.msk.bf16.gmra.mrb[160].mxu0 %vm957_vm4, %v6718_v50  ;;  %v7351_v50 = vpack.c.bf16 %v7184_v25, %v7183_v24  ;;  %v19314_v25 = vld [vmem:[%s19845_s19 + $0x28] sm:$0xff]  }
 0x9a4   : > { %16790 = vmatprep.mubr.msk.bf16.mxu0 %vm19785_vm2, %v21536_v23 }
 0x9ab   : > { %16791 = vmatmul.mubr.msk.bf16.vlgmr.msra.gmra.mrb[136].mxu0 %vm957_vm4, %v6871_v37  ;;  %v7346_v37 = vld [vmem:[#allocation3 + $0x6c] sm:$0xff] }
 0x9ac   : > { %16794 = vmatprep.mubr.msk.bf16.mxu0 %vm19785_vm2, %v21536_v23  ;;  %16819 = vmatpush3.bf16.msra.mxu0 %v19303_v54  ;;  %v7352_v54 = vpack.c.bf16 %v7186_v32, %v7185_v35  ;;  %v19313_v35 = vld [vmem:[%s19845_s19 + $0x20] sm:$0xff]  }
 0x9ad   : > { %16820 = vmatprep.subr.bf16.mxu0 %v21536_v23  ;;  %v21889_v32 = vld [vmem:[%s22975_s8] ss:$0 sm:$0xff] }
 0x9b0   : > { %16821 = vmatpush3.bf16.msra.mxu0 %v19304_v42  ;;  %v7353_v42 = vpack.c.bf16 %v7346_v37, %v7187_v31  ;;  %v19316_v31 = vld [vmem:[%s19845_s19 + $0x38] sm:$0xff]   ;;  %v7881_v37 = vpop.permute.xlu0 %7880 }
 0x9b1   : > { %16850 = vmatprep.subr.bf16.mxu0 %v21536_v23 }
 0x9b3   : > { %16795 = vmatmul.mubr.msk.bf16.gmra.mrb[140].mxu0 %vm957_vm4, %v6872_v9  ;;  %v7347_v9 = vld [vmem:[#allocation3 + $0x74] sm:$0xf] }
 0x9b4   : > { %16798 = vmatprep.mubr.msk.bf16.mxu0 %vm19785_vm2, %v21536_v23 }
 0x9bb   : > { %16799 = vmatmul.mubr.msk.bf16.gmra.mrb[144].mxu0 %vm957_vm4, %v6873_v56  ;;  %v7354_v56 = vpack.c.bf16 %v7347_v9, %v7347_v9 }
 0x9bc   : > { %16802 = vmatprep.mubr.msk.bf16.mxu0 %vm19785_vm2, %v21536_v23 }
 0x9c3   : > { %16803 = vmatmul.mubr.msk.bf16.gmra.mrb[148].mxu0 %vm957_vm4, %v6874_v52  ;;  %v7495_v52 = vld [vmem:[#allocation3 + $0x1d] sm:$0xff] }
 0x9c4   : > { %16806 = vmatprep.mubr.msk.bf16.mxu0 %vm19785_vm2, %v21536_v23 }
 0x9cb   : > { %16807 = vmatmul.mubr.msk.bf16.gmra.mrb[152].mxu0 %vm957_vm4, %v6875_v57  ;;  %v7494_v57 = vld [vmem:[#allocation3 + $0x15] sm:$0xff] }
 0x9cc   : > { %16810 = vmatprep.mubr.msk.bf16.mxu0 %vm19785_vm2, %v21536_v23 }
 0x9d3   : > { %16811 = vmatmul.mubr.msk.bf16.gmra.mrb[156].mxu0 %vm957_vm4, %v6876_v29  ;;  %v7507_v29 = vpack.c.bf16 %v7495_v52, %v7494_v57 }
 0x9d4   : > { %16814 = vmatprep.mubr.msk.bf16.mxu0 %vm19785_vm2, %v21536_v23 }
 0x9db   : > { %16815 = vmatmul.mubr.msk.bf16.gmra.mrb[160].mxu0 %vm957_vm4, %v6877_v1  ;;  %v21837_v1 = vld [vmem:[#allocation4] sm:$0xff] }
 0x9dc   : > { %16822 = vmatprep.mubr.msk.bf16.mxu0 %vm19785_vm2, %v21536_v23 }
 0x9e3   : > { %16823 = vmatmul.mubr.msk.bf16.vlgmr.msra.gmra.mrb[136].mxu0 %vm957_vm4, %v7030_v16  ;;  %v7499_v16 = vld [vmem:[#allocation3 + $0x3d] sm:$0xff] }
 0x9e4   : > { %16826 = vmatprep.mubr.msk.bf16.mxu0 %vm19785_vm2, %v21536_v23  ;;  %16851 = vmatpush3.bf16.msra.mxu0 %v19305_v34  ;;  %v7508_v34 = vpack.c.bf16 %v7497_v45, %v7496_v38 }
 0x9e5   : > { %16852 = vmatprep.subr.bf16.mxu0 %v21536_v23 }
 0x9e8   : > { %16853 = vmatpush3.bf16.msra.mxu0 %v19306_v61  ;;  %v7498_v61 = vld [vmem:[#allocation3 + $0x35] sm:$0xff] }
 0x9e9   : > { %16882 = vmatprep.subr.bf16.mxu0 %v21536_v23 }
 0x9eb   : > { %16827 = vmatmul.mubr.msk.bf16.gmra.mrb[140].mxu0 %vm957_vm4, %v7031_v0  ;;  %v7510_v0 = vpack.c.bf16 %v7501_v51, %v7500_v59 }
 0x9ec   : > { %16830 = vmatprep.mubr.msk.bf16.mxu0 %vm19785_vm2, %v21536_v23 }
 0x9f3   : > { %16831 = vmatmul.mubr.msk.bf16.gmra.mrb[144].mxu0 %vm957_vm4, %v7032_v62  ;;  %v7511_v62 = vpack.c.bf16 %v7503_v63, %v7502_v10 }
 0x9f4   : > { %16834 = vmatprep.mubr.msk.bf16.mxu0 %vm19785_vm2, %v21536_v23 }
 0x9fb   : > { %16835 = vmatmul.mubr.msk.bf16.gmra.mrb[148].mxu0 %vm957_vm4, %v7033_v3  ;;  %v7512_v3 = vpack.c.bf16 %v7505_v7, %v7504_v6 }
 0x9fc   : > { %16838 = vmatprep.mubr.msk.bf16.mxu0 %vm19785_vm2, %v21536_v23 }
 0xa03   : > { %16839 = vmatmul.mubr.msk.bf16.gmra.mrb[152].mxu0 %vm957_vm4, %v7034_v14  ;;  %v7654_v14 = vld [vmem:[#allocation3 + $0x1e] sm:$0xff] }
 0xa04   : > { %16842 = vmatprep.mubr.msk.bf16.mxu0 %vm19785_vm2, %v21536_v23  ;;  %v7666_v55 = vpack.c.bf16 %v7654_v14, %v7653_v8 }
 0xa0b   : > { %16843 = vmatmul.mubr.msk.bf16.gmra.mrb[156].mxu0 %vm957_vm4, %v7035_v13  ;;  %v7656_v13 = vld [vmem:[#allocation3 + $0x2e] sm:$0xff] }
 0xa0c   : > { %16846 = vmatprep.mubr.msk.bf16.mxu0 %vm19785_vm2, %v21536_v23 }
 0xa13   : > { %16847 = vmatmul.mubr.msk.bf16.gmra.mrb[160].mxu0 %vm957_vm4, %v7036_v12  ;;  %v7667_v12 = vpack.c.bf16 %v7656_v13, %v7655_v60  ;;  %v19318_v13 = vld [vmem:[%s19845_s19 + $0x8] sm:$0xff]  }
 0xa14   : > { %16854 = vmatprep.mubr.msk.bf16.mxu0 %vm19785_vm2, %v21536_v23 }
 0xa1b   : > { %16855 = vmatmul.mubr.msk.bf16.vlgmr.msra.gmra.mrb[136].mxu0 %vm957_vm4, %v7189_v26  ;;  %v7660_v26 = vld [vmem:[#allocation3 + $0x4e] sm:$0xff] }
 0xa1c   : > { %16858 = vmatprep.mubr.msk.bf16.mxu0 %vm19785_vm2, %v21536_v23  ;;  %16883 = vmatpush3.bf16.msra.mxu0 %v19307_v19  ;;  %v7668_v19 = vpack.c.bf16 %v7658_v53, %v7657_v17 }
 0xa1d   : > { %16884 = vmatprep.subr.bf16.mxu0 %v21536_v23 }
 0xa20   : > { %16885 = vmatpush3.bf16.msra.mxu0 %v19308_v27  ;;  %v7659_v27 = vld [vmem:[#allocation3 + $0x46] sm:$0xff] }
 0xa21   : > { %16914 = vmatprep.subr.bf16.mxu0 %v21536_v23  ;;  %v7669_v21 = vpack.c.bf16 %v7660_v26, %v7659_v27 }
 0xa23   : > { %16859 = vmatmul.mubr.msk.bf16.gmra.mrb[140].mxu0 %vm957_vm4, %v7190_v4  ;;  %v7661_v4 = vld [vmem:[#allocation3 + $0x56] sm:$0xff] }
 0xa24   : > { %16862 = vmatprep.mubr.msk.bf16.mxu0 %vm19785_vm2, %v21536_v23  ;;  %v7670_v22 = vpack.c.bf16 %v7662_v48, %v7661_v4  ;;  %v19319_v48 = vld [vmem:[%s19845_s19 + $0x10] sm:$0xff]  }
 0xa2b   : > { %16863 = vmatmul.mubr.msk.bf16.gmra.mrb[144].mxu0 %vm957_vm4, %v7191_v18  ;;  %v7664_v18 = vld [vmem:[#allocation3 + $0x6e] sm:$0xff] }
 0xa2c   : > { %16866 = vmatprep.mubr.msk.bf16.mxu0 %vm19785_vm2, %v21536_v23  ;;  %v7671_v24 = vpack.c.bf16 %v7664_v18, %v7663_v36 }
 0xa33   : > { %16867 = vmatmul.mubr.msk.bf16.gmra.mrb[148].mxu0 %vm957_vm4, %v7192_v43  ;;  %v7672_v43 = vpack.c.bf16 %v7665_v46, %v7665_v46 }
 0xa34   : > { %16870 = vmatprep.mubr.msk.bf16.mxu0 %vm19785_vm2, %v21536_v23 }
 0xa3b   : > { %16871 = vmatmul.mubr.msk.bf16.gmra.mrb[152].mxu0 %vm957_vm4, %v7193_v30  ;;  %v19315_v30 = vld [vmem:[%s19845_s19 + $0x30] sm:$0xff]  }
 0xa3c   : > { %16874 = vmatprep.mubr.msk.bf16.mxu0 %vm19785_vm2, %v21536_v23 }
 0xa43   : > { %16875 = vmatmul.mubr.msk.bf16.gmra.mrb[156].mxu0 %vm957_vm4, %v7194_v28 }
 0xa44   : > { %16878 = vmatprep.mubr.msk.bf16.mxu0 %vm19785_vm2, %v21536_v23 }
 0xa4b   : > { %16879 = vmatmul.mubr.msk.bf16.gmra.mrb[160].mxu0 %vm957_vm4, %v7195_v39 }
 0xa4c   : > { %16886 = vmatprep.mubr.msk.bf16.mxu0 %vm19785_vm2, %v21536_v23 }
 0xa53   : > { %16887 = vmatmul.mubr.msk.bf16.vlgmr.msra.gmra.mrb[136].mxu0 %vm957_vm4, %v7348_v47 }
 0xa54   : > { %16890 = vmatprep.mubr.msk.bf16.mxu0 %vm19785_vm2, %v21536_v23  ;;  %16915 = vmatpush3.bf16.msra.mxu0 %v19309_v20 }
 0xa55   : > { %16916 = vmatprep.subr.bf16.mxu0 %v21536_v23 }
 0xa58   : > { %16917 = vmatpush3.bf16.msra.mxu0 %v19310_v41 }
 0xa59   : > { %16946 = vmatprep.subr.bf16.mxu0 %v21536_v23 }
 0xa5b   : > { %16891 = vmatmul.mubr.msk.bf16.gmra.mrb[140].mxu0 %vm957_vm4, %v7349_v44 }
 0xa5c   : > { %16894 = vmatprep.mubr.msk.bf16.mxu0 %vm19785_vm2, %v21536_v23 }
 0xa63   : > { %16895 = vmatmul.mubr.msk.bf16.gmra.mrb[144].mxu0 %vm957_vm4, %v7350_v49 }
 0xa64   : > { %16898 = vmatprep.mubr.msk.bf16.mxu0 %vm19785_vm2, %v21536_v23 }
 0xa6b   : > { %16899 = vmatmul.mubr.msk.bf16.gmra.mrb[148].mxu0 %vm957_vm4, %v7351_v50 }
 0xa6c   : > { %16902 = vmatprep.mubr.msk.bf16.mxu0 %vm19785_vm2, %v21536_v23 }
 0xa73   : > { %16903 = vmatmul.mubr.msk.bf16.gmra.mrb[152].mxu0 %vm957_vm4, %v7352_v54 }
 0xa74   : > { %16906 = vmatprep.mubr.msk.bf16.mxu0 %vm19785_vm2, %v21536_v23 }
 0xa7b   : > { %16907 = vmatmul.mubr.msk.bf16.gmra.mrb[156].mxu0 %vm957_vm4, %v7353_v42 }
 0xa7c   : > { %16910 = vmatprep.mubr.msk.bf16.mxu0 %vm19785_vm2, %v21536_v23 }
 0xa83   : > { %16911 = vmatmul.mubr.msk.bf16.gmra.mrb[160].mxu0 %vm957_vm4, %v7354_v56  ;;  %v7886_v56 = vpop.permute.xlu1 %7885 }
 0xa84   : > { %16918 = vmatprep.mubr.msk.bf16.mxu0 %vm19785_vm2, %v21536_v23 }
 0xa8b   : > { %16919 = vmatmul.mubr.msk.bf16.vlgmr.msra.gmra.mrb[136].mxu0 %vm957_vm4, %v7507_v29 }
 0xa8c   : > { %16922 = vmatprep.mubr.msk.bf16.mxu0 %vm19785_vm2, %v21536_v23  ;;  %16947 = vmatpush3.bf16.msra.mxu0 %v19311_v33  ;;  %v7509_v23 = vpack.c.bf16 %v7499_v16, %v7498_v61 }
 0xa8d   : > { %16948 = vmatprep.subr.bf16.mxu0 %v21837_v1 }
 0xa90   : > { %16949 = vmatpush3.bf16.msra.mxu0 %v19312_v58 }
 0xa91   : > { %16978 = vmatprep.subr.bf16.mxu0 %v21837_v1 }
 0xa93   : > { %16923 = vmatmul.mubr.msk.bf16.gmra.mrb[140].mxu0 %vm957_vm4, %v7508_v34 }
 0xa94   : > { %16926 = vmatprep.mubr.msk.bf16.mxu0 %vm19785_vm2, %v21837_v1 }
 0xa9b   : > { %16927 = vmatmul.mubr.msk.bf16.gmra.mrb[144].mxu0 %vm957_vm4, %v7509_v23  ;;  %v7891_v23 = vpop.permute.xlu0 %7890 }
 0xa9c   : > { %16930 = vmatprep.mubr.msk.bf16.mxu0 %vm19785_vm2, %v21837_v1 }
 0xaa3   : > { %16931 = vmatmul.mubr.msk.bf16.gmra.mrb[148].mxu0 %vm957_vm4, %v7510_v0  ;;  %v7896_v0 = vpop.permute.xlu1 %7895 }
 0xaa4   : > { %16934 = vmatprep.mubr.msk.bf16.mxu0 %vm19785_vm2, %v21837_v1 }
 0xaab   : > { %16935 = vmatmul.mubr.msk.bf16.gmra.mrb[152].mxu0 %vm957_vm4, %v7511_v62  ;;  %v19317_v62 = vld [vmem:[%s19845_s19] sm:$0xff]  }
 0xaac   : > { %16938 = vmatprep.mubr.msk.bf16.mxu0 %vm19785_vm2, %v21837_v1 }
 0xab3   : > { %16939 = vmatmul.mubr.msk.bf16.gmra.mrb[156].mxu0 %vm957_vm4, %v7512_v3 }
 0xab4   : > { %16942 = vmatprep.mubr.msk.bf16.mxu0 %vm19785_vm2, %v21837_v1 }
 0xabb   : > { %16943 = vmatmul.mubr.msk.bf16.gmra.mrb[160].mxu0 %vm957_vm4, %v7513_v11 }
 0xabc   : > { %16950 = vmatprep.mubr.msk.bf16.mxu0 %vm19785_vm2, %v21837_v1 }
 0xac3   : > { %16951 = vmatmul.mubr.msk.bf16.vlgmr.msra.gmra.mrb[136].mxu0 %vm957_vm4, %v7666_v55 }
 0xac4   : > { %16954 = vmatprep.mubr.msk.bf16.mxu0 %vm19785_vm2, %v21837_v1  ;;  %16979 = vmatpush3.bf16.msra.mxu0 %v19313_v35 }
 0xac5   : > { %16980 = vmatprep.subr.bf16.mxu0 %v21837_v1 }
 0xac8   : > { %16981 = vmatpush3.bf16.msra.mxu0 %v19314_v25  ;;  %v19320_v25 = vld [vmem:[%s19845_s19 + $0x18] sm:$0xff]  }
 0xac9   : > { %16982 = vmatprep.subr.bf16.mxu0 %v21837_v1 }
 0xacb   : > { %16955 = vmatmul.mubr.msk.bf16.gmra.mrb[140].mxu0 %vm957_vm4, %v7667_v12 }
 0xacc   : > { %16958 = vmatprep.mubr.msk.bf16.mxu0 %vm19785_vm2, %v21837_v1  ;;  %16983 = vmatpush3.bf16.msra.mxu0 %v19315_v30 }
 0xacd   : > { %16984 = vmatprep.subr.bf16.mxu0 %v21837_v1 }
 0xad0   : > { %16985 = vmatpush3.bf16.msra.mxu0 %v19316_v31 }
 0xad1   : > { %17014 = vmatprep.subr.bf16.mxu0 %v21837_v1 }
 0xad3   : > { %16959 = vmatmul.mubr.msk.bf16.gmra.mrb[144].mxu0 %vm957_vm4, %v7668_v19  ;;  %v7906_v19 = vpop.permute.xlu1 %7905 }
 0xad4   : > { %16962 = vmatprep.mubr.msk.bf16.mxu0 %vm19785_vm2, %v21837_v1 }
 0xadb   : > { %16963 = vmatmul.mubr.msk.bf16.gmra.mrb[148].mxu0 %vm957_vm4, %v7669_v21 }
 0xadc   : > { %16966 = vmatprep.mubr.msk.bf16.mxu0 %vm19785_vm2, %v21837_v1 }
 0xae3   : > { %16967 = vmatmul.mubr.msk.bf16.gmra.mrb[152].mxu0 %vm957_vm4, %v7670_v22 }
 0xae4   : > { %16970 = vmatprep.mubr.msk.bf16.mxu0 %vm19785_vm2, %v21837_v1 }
 0xaeb   : > { %16971 = vmatmul.mubr.msk.bf16.gmra.mrb[156].mxu0 %vm957_vm4, %v7671_v24 }
 0xaec   : > { %16974 = vmatprep.mubr.msk.bf16.mxu0 %vm19785_vm2, %v21837_v1 }
 0xaf3   : > { %16975 = vmatmul.mubr.msk.bf16.gmra.mrb[160].mxu0 %vm957_vm4, %v7672_v43 }
 0xaf4   : > { %16986 = vmatprep.mubr.msk.bf16.mxu0 %vm19785_vm2, %v21837_v1 }
 0xb96   : > { %v7745_v28 = vpop.f32.mrb[136].mxu0 }
 0xb97   : > { %v7819_v39 = vmul.f32 %v21889_v32, %v7745_v28  ;;  %v16952_v20 = vpop.f32.mrb[137].mxu0 }
 0xb98   : > { %v7748_v47 = vpop.f32.mrb[138].mxu0 }
 0xb99   : > { %v7839_v41 = vadd.f32 %v21892_v15, %v7819_v39  ;;  %v7820_v44 = vmul.f32 %v21889_v32, %v7748_v47  ;;  %v16953_v49 = vpop.f32.mrb[139].mxu0  ;;  %v7916_v47 = vpop.permute.xlu1 %7915 }
 0xb9b   : > { %v7852_v50 = vmax.f32 %v7839_v41, 0.0  ;;  %v7840_v54 = vadd.f32 %v21892_v15, %v7820_v44 }
 0xb9d   : > { %v7943_v42 = vmul.f32 %v7881_v37, %v7852_v50  ;;  %v7853_v9 = vmax.f32 %v7840_v54, 0.0 }
 0xb9e   : > { %v7753_v52 = vpop.f32.mrb[140].mxu0 }
 0xb9f   : > { %7956 = vst.msk [vmem:[#allocation3 + $0xb] sm:$0xff] %vm1005_vm9, %v7943_v42  ;;  %v7944_v57 = vmul.f32 %v7886_v56, %v7853_v9  ;;  %v7821_v33 = vmul.f32 %v21889_v32, %v7753_v52  ;;  %v16956_v29 = vpop.f32.mrb[141].mxu0 }
 0xba0   : > { %v7756_v58 = vpop.f32.mrb[142].mxu0 }
 0xba1   : > { %7957 = vst.msk [vmem:[#allocation3 + $0x13] sm:$0xff] %vm1005_vm9, %v7944_v57  ;;  %v7841_v45 = vadd.f32 %v21892_v15, %v7821_v33  ;;  %v7822_v38 = vmul.f32 %v21889_v32, %v7756_v58  ;;  %v16957_v34 = vpop.f32.mrb[143].mxu0 }
 0xba2   : > { %v7926_v34 = vpop.permute.xlu1 %7925 }
 0xba3   : > { %v7854_v16 = vmax.f32 %v7841_v45, 0.0  ;;  %v7842_v61 = vadd.f32 %v21892_v15, %v7822_v38 }
 0xba5   : > { %v7945_v51 = vmul.f32 %v7891_v23, %v7854_v16  ;;  %v7855_v59 = vmax.f32 %v7842_v61, 0.0 }
 0xba6   : > { %v7761_v63 = vpop.f32.mrb[144].mxu0  ;;  %v7999_v10 = vld [vmem:[#allocation3 + $0x9] sm:$0xff] }
 0xba7   : > { %7958 = vst.msk [vmem:[#allocation3 + $0x1b] sm:$0xff] %vm1005_vm9, %v7945_v51  ;;  %v7946_v6 = vmul.f32 %v7896_v0, %v7855_v59  ;;  %v7823_v7 = vmul.f32 %v21889_v32, %v7761_v63  ;;  %v16960_v3 = vpop.f32.mrb[145].mxu0  ;;  %v8011_v40 = vpack.c.bf16 %v7999_v10, %v21636_v5  ;;  %v7901_v5 = vpop.permute.xlu0 %7900 }
 0xba8   : > { %v7764_v11 = vpop.f32.mrb[146].mxu0  ;;  %v8000_v27 = vld [vmem:[#allocation3 + $0x11] sm:$0xff] }
 0xba9   : > { %7959 = vst.msk [vmem:[#allocation3 + $0x23] sm:$0xff] %vm1005_vm9, %v7946_v6  ;;  %v7843_v14 = vadd.f32 %v21892_v15, %v7823_v7  ;;  %v7824_v8 = vmul.f32 %v21889_v32, %v7764_v11  ;;  %v16961_v55 = vpop.f32.mrb[147].mxu0  ;;  %16987 = vmatmul.mubr.msk.bf16.vlgmr.msra.gmra.mrb[164].mxu0 %vm1005_vm9, %v8011_v40 }
 0xbaa   : > { %16990 = vmatprep.mubr.msk.bf16.mxu0 %vm19785_vm2, %v21837_v1  ;;  %17015 = vmatpush3.bf16.msra.mxu0 %v19317_v62  ;;  %v7936_v55 = vpop.permute.xlu1 %7935 }
 0xbab   : > { %v7856_v60 = vmax.f32 %v7843_v14, 0.0  ;;  %v7844_v12 = vadd.f32 %v21892_v15, %v7824_v8  ;;  %17016 = vmatprep.subr.bf16.mxu0 %v21837_v1  ;;  %v7911_v28 = vpop.permute.xlu0 %7910 }
 0xbad   : > { %v7947_v53 = vmul.f32 %v7901_v5, %v7856_v60  ;;  %v7857_v17 = vmax.f32 %v7844_v12, 0.0 }
 0xbae   : > { %v7769_v26 = vpop.f32.mrb[148].mxu0  ;;  %v8001_v21 = vld [vmem:[#allocation3 + $0x19] sm:$0xff]  ;;  %17017 = vmatpush3.bf16.msra.mxu0 %v19318_v13 }
 0xbaf   : > { %7960 = vst.msk [vmem:[#allocation3 + $0x2b] sm:$0xff] %vm1005_vm9, %v7947_v53  ;;  %v7948_v4 = vmul.f32 %v7906_v19, %v7857_v17  ;;  %v7825_v22 = vmul.f32 %v21889_v32, %v7769_v26  ;;  %v16964_v36 = vpop.f32.mrb[149].mxu0  ;;  %v8012_v18 = vpack.c.bf16 %v8001_v21, %v8000_v27  ;;  %17018 = vmatprep.subr.bf16.mxu0 %v21837_v1  ;;  %v7921_v58 = vpop.permute.xlu0 %7920 }
 0xbb0   : > { %v7772_v24 = vpop.f32.mrb[150].mxu0  ;;  %v8002_v44 = vld [vmem:[#allocation3 + $0x21] sm:$0xff] }
 0xbb1   : > { %7961 = vst.msk [vmem:[#allocation3 + $0x33] sm:$0xff] %vm1005_vm9, %v7948_v4  ;;  %v7845_v46 = vadd.f32 %v21892_v15, %v7825_v22  ;;  %v7826_v43 = vmul.f32 %v21889_v32, %v7772_v24  ;;  %v16965_v35 = vpop.f32.mrb[151].mxu0  ;;  %16991 = vmatmul.mubr.msk.bf16.gmra.mrb[168].mxu0 %vm1005_vm9, %v8012_v18 }
 0xbb2   : > { %16994 = vmatprep.mubr.msk.bf16.mxu0 %vm19785_vm2, %v21837_v1  ;;  %17019 = vmatpush3.bf16.msra.mxu0 %v19319_v48  ;;  %v19321_v35 = vld [vmem:[%s19845_s19 + $0x40] sm:$0xff]  }
 0xbb3   : > { %v7858_v30 = vmax.f32 %v7845_v46, 0.0  ;;  %v7846_v31 = vadd.f32 %v21892_v15, %v7826_v43  ;;  %17020 = vmatprep.subr.bf16.mxu0 %v21837_v1  ;;  %v7931_v11 = vpop.permute.xlu0 %7930  ;;  %v7970_v46 = vld [vmem:[#allocation3] sm:$0xff]  ;;  %v7971_v43 = vld [vmem:[#allocation3 + $0x8] sm:$0xff] }
 0xbb5   : > { %v7949_v39 = vmul.f32 %v7911_v28, %v7858_v30  ;;  %v7859_v20 = vmax.f32 %v7846_v31, 0.0  ;;  %v19322_v30 = vld [vmem:[%s19845_s19 + $0x48] sm:$0xff]   ;;  %v7972_v28 = vld [vmem:[#allocation3 + $0x10] sm:$0xff] }
 0xbb6   : > { %v7777_v41 = vpop.f32.mrb[152].mxu0  ;;  %v8003_v49 = vld [vmem:[#allocation3 + $0x29] sm:$0xff]  ;;  %17021 = vmatpush3.bf16.msra.mxu0 %v19320_v25  ;;  %v7983_v25 = vpack.c.bf16 %v7971_v43, %v7970_v46  ;;  %v7973_v31 = vld [vmem:[#allocation3 + $0x18] sm:$0xff] }
 0xbb7   : > { %7962 = vst.msk [vmem:[#allocation3 + $0x3b] sm:$0xff] %vm1005_vm9, %v7949_v39  ;;  %v7950_v50 = vmul.f32 %v7916_v47, %v7859_v20  ;;  %v7827_v54 = vmul.f32 %v21889_v32, %v7777_v41  ;;  %v16968_v37 = vpop.f32.mrb[153].mxu0  ;;  %v8013_v42 = vpack.c.bf16 %v8003_v49, %v8002_v44  ;;  %17050 = vmatprep.subr.bf16.mxu0 %v21837_v1  ;;  %v7941_v4 = vpop.permute.xlu0 %7940  ;;  %v19323_v39 = vld [vmem:[%s19845_s19 + $0x50] sm:$0xff]   ;;  %v19324_v47 = vld [vmem:[%s19845_s19 + $0x58] sm:$0xff]   ;;  %v19333_v43 = vld [vmem:[%s19845_s19 + $0xa0] sm:$0xff]  }
 0xbb8   : > { %v7780_v9 = vpop.f32.mrb[154].mxu0  ;;  %v8004_v61 = vld [vmem:[#allocation3 + $0x31] sm:$0xff]  ;;  %v7984_v20 = vpack.c.bf16 %v7973_v31, %v7972_v28  ;;  %v7975_v41 = vld [vmem:[#allocation3 + $0x28] sm:$0xff]  ;;  %v7974_v44 = vld [vmem:[#allocation3 + $0x20] sm:$0xff] }
 0xbb9   : > { %7963 = vst.msk [vmem:[#allocation3 + $0x43] sm:$0xff] %vm1005_vm9, %v7950_v50  ;;  %v7847_v56 = vadd.f32 %v21892_v15, %v7827_v54  ;;  %v7828_v52 = vmul.f32 %v21889_v32, %v7780_v9  ;;  %v16969_v57 = vpop.f32.mrb[155].mxu0  ;;  %16995 = vmatmul.mubr.msk.bf16.gmra.mrb[172].mxu0 %vm1005_vm9, %v8013_v42  ;;  %v7985_v49 = vpack.c.bf16 %v7975_v41, %v7974_v44  ;;  %v7976_v54 = vld [vmem:[#allocation3 + $0x30] sm:$0xff]  ;;  %v8645_v31 = vld [vmem:[#allocation3 + $0x1b] sm:$0xff] }
 0xbba   : > { %16998 = vmatprep.mubr.msk.bf16.mxu0 %vm19785_vm2, %v21837_v1  ;;  %v8643_v46 = vld [vmem:[#allocation3 + $0xb] sm:$0xff]  ;;  %v19335_v28 = vld [vmem:[%s19845_s19 + $0xb0] sm:$0xff]  }
 0xbbb   : > { %v7860_v33 = vmax.f32 %v7847_v56, 0.0  ;;  %v7848_v29 = vadd.f32 %v21892_v15, %v7828_v52  ;;  %v8647_v41 = vld [vmem:[#allocation3 + $0x2b] sm:$0xff] }
 0xbbd   : > { %v7951_v45 = vmul.f32 %v7921_v58, %v7860_v33  ;;  %v7861_v38 = vmax.f32 %v7848_v29, 0.0 }
 0xbbe   : > { %v7785_v16 = vpop.f32.mrb[156].mxu0  ;;  %v8005_v23 = vld [vmem:[#allocation3 + $0x39] sm:$0xff] }
 0xbbf   : > { %7964 = vst.msk [vmem:[#allocation3 + $0x4b] sm:$0xff] %vm1005_vm9, %v7951_v45  ;;  %v7952_v51 = vmul.f32 %v7926_v34, %v7861_v38  ;;  %v7829_v59 = vmul.f32 %v21889_v32, %v7785_v16  ;;  %v16972_v0 = vpop.f32.mrb[157].mxu0  ;;  %v8014_v63 = vpack.c.bf16 %v8005_v23, %v8004_v61  ;;  %v7977_v50 = vld [vmem:[#allocation3 + $0x38] sm:$0xff]  ;;  %v8293_v45 = vld [vmem:[#allocation3 + $0x2] sm:$0xff]  ;;  %v8294_v38 = vld [vmem:[#allocation3 + $0xa] sm:$0xff] }
 0xbc0   : > { %v7788_v10 = vpop.f32.mrb[158].mxu0  ;;  %v8006_v60 = vld [vmem:[#allocation3 + $0x41] sm:$0xff]  ;;  %v7986_v37 = vpack.c.bf16 %v7977_v50, %v7976_v54  ;;  %v19325_v34 = vld [vmem:[%s19845_s19 + $0x60] sm:$0xff]   ;;  %v8306_v16 = vpack.c.bf16 %v8294_v38, %v8293_v45  ;;  %v19326_v61 = vld [vmem:[%s19845_s19 + $0x68] sm:$0xff]  }
 0xbc1   : > { %7965 = vst.msk [vmem:[#allocation3 + $0x53] sm:$0xff] %vm1005_vm9, %v7952_v51  ;;  %v7849_v62 = vadd.f32 %v21892_v15, %v7829_v59  ;;  %v7830_v6 = vmul.f32 %v21889_v32, %v7788_v10  ;;  %v16973_v7 = vpop.f32.mrb[159].mxu0  ;;  %16999 = vmatmul.mubr.msk.bf16.gmra.mrb[176].mxu0 %vm1005_vm9, %v8014_v63  ;;  %v7978_v9 = vld [vmem:[#allocation3 + $0x40] sm:$0xff]  ;;  %v8295_v51 = vld [vmem:[#allocation3 + $0x12] sm:$0xff]  ;;  %v19328_v63 = vld [vmem:[%s19845_s19 + $0x78] sm:$0xff]  }
 0xbc2   : > { %17002 = vmatprep.mubr.msk.bf16.mxu0 %vm19785_vm2, %v21837_v1  ;;  %v8296_v23 = vld [vmem:[#allocation3 + $0x1a] sm:$0xff]  ;;  %v8298_v10 = vld [vmem:[#allocation3 + $0x2a] sm:$0xff] }
 0xbc3   : > { %v7862_v3 = vmax.f32 %v7849_v62, 0.0  ;;  %v7850_v40 = vadd.f32 %v21892_v15, %v7830_v6  ;;  %v19327_v59 = vld [vmem:[%s19845_s19 + $0x70] sm:$0xff]   ;;  %v8307_v0 = vpack.c.bf16 %v8296_v23, %v8295_v51  ;;  %v8818_v45 = vld [vmem:[#allocation3 + $0xc] sm:$0xff] }
 0xbc4   : > { %v8297_v62 = vld [vmem:[#allocation3 + $0x22] sm:$0xff]  ;;  %v8300_v7 = vld [vmem:[#allocation3 + $0x3a] sm:$0xff] }
 0xbc5   : > { %v7953_v14 = vmul.f32 %v7931_v11, %v7862_v3  ;;  %v7863_v8 = vmax.f32 %v7850_v40, 0.0  ;;  %v8308_v6 = vpack.c.bf16 %v8298_v10, %v8297_v62  ;;  %v8299_v3 = vld [vmem:[#allocation3 + $0x32] sm:$0xff]  ;;  %v8649_v50 = vld [vmem:[#allocation3 + $0x3b] sm:$0xff] }
 0xbc6   : > { %v7793_v13 = vpop.f32.mrb[160].mxu0  ;;  %v8007_v12 = vld [vmem:[#allocation3 + $0x49] sm:$0xff]  ;;  %v8309_v40 = vpack.c.bf16 %v8300_v7, %v8299_v3 }
 0xbc7   : > { %7966 = vst.msk [vmem:[#allocation3 + $0x5b] sm:$0xff] %vm1005_vm9, %v7953_v14  ;;  %v7954_v5 = vmul.f32 %v7936_v55, %v7863_v8  ;;  %v7831_v53 = vmul.f32 %v21889_v32, %v7793_v13  ;;  %v16976_v17 = vpop.f32.mrb[161].mxu0  ;;  %v8015_v19 = vpack.c.bf16 %v8007_v12, %v8006_v60  ;;  %v7979_v42 = vld [vmem:[#allocation3 + $0x48] sm:$0xff] }
 0xbc8   : > { %v7796_v26 = vpop.f32.mrb[162].mxu0  ;;  %v8008_v36 = vld [vmem:[#allocation3 + $0x51] sm:$0xff]  ;;  %v7987_v56 = vpack.c.bf16 %v7979_v42, %v7978_v9  ;;  %v8301_v14 = vld [vmem:[#allocation3 + $0x42] sm:$0xff]  ;;  %v8481_v17 = vpack.c.bf16 %v8295_v51, %v8294_v38 }
 0xbc9   : > { %7967 = vst.msk [vmem:[#allocation3 + $0x63] sm:$0xff] %vm1005_vm9, %v7954_v5  ;;  %v7851_v27 = vadd.f32 %v21892_v15, %v7831_v53  ;;  %v16977_v21 = vpop.f32.mrb[163].mxu0  ;;  %17003 = vmatmul.mubr.msk.bf16.gmra.mrb[180].mxu0 %vm1005_vm9, %v8015_v19  ;;  %v7980_v57 = vld [vmem:[#allocation3 + $0x50] sm:$0xff]  ;;  %v19330_v19 = vld [vmem:[%s19845_s19 + $0x88] sm:$0xff]   ;;  %v19331_v26 = vld [vmem:[%s19845_s19 + $0x90] sm:$0xff]  }
 0xbca   : > { %17006 = vmatprep.mubr.msk.bf16.mxu0 %vm19785_vm2, %v21837_v1  ;;  %v8302_v11 = vld [vmem:[#allocation3 + $0x4a] sm:$0xff]  ;;  %v8303_v13 = vld [vmem:[#allocation3 + $0x52] sm:$0xff]  ;;  %v19339_v51 = vld [vmem:[%s19845_s19 + $0xd0] sm:$0xff]  }
 0xbcb   : > { %v7864_v48 = vmax.f32 %v7851_v27, 0.0  ;;  %v8310_v8 = vpack.c.bf16 %v8302_v11, %v8301_v14  ;;  %v19329_v53 = vld [vmem:[%s19845_s19 + $0x80] sm:$0xff]   ;;  %v8482_v27 = vpack.c.bf16 %v8297_v62, %v8296_v23  ;;  %v19332_v21 = vld [vmem:[%s19845_s19 + $0x98] sm:$0xff]   ;;  %v8820_v23 = vld [vmem:[#allocation3 + $0x1c] sm:$0xff] }
 0xbcc   : > { %v8651_v42 = vld [vmem:[#allocation3 + $0x4b] sm:$0xff] }
 0xbcd   : > { %v7955_v22 = vmul.f32 %v7941_v4, %v7864_v48  ;;  %v8483_v48 = vpack.c.bf16 %v8299_v3, %v8298_v10  ;;  %v8484_v4 = vpack.c.bf16 %v8301_v14, %v8300_v7  ;;  %v19337_v38 = vld [vmem:[%s19845_s19 + $0xc0] sm:$0xff]   ;;  %v8824_v7 = vld [vmem:[#allocation3 + $0x3c] sm:$0xff] }
 0xbce   : > { %v8009_v32 = vld [vmem:[#allocation3 + $0x59] sm:$0xff]  ;;  %v8822_v10 = vld [vmem:[#allocation3 + $0x2c] sm:$0xff] }
 0xbcf   : > { %v8016_v18 = vpack.c.bf16 %v8009_v32, %v8008_v36  ;;  %7969 = vst.msk [vmem:[#allocation3 + $0x6b] sm:$0xf] %vm7968_vm11, %v7955_v22  ;;  %v7981_v52 = vld [vmem:[#allocation3 + $0x58] sm:$0xff]  ;;  %v8485_v22 = vpack.c.bf16 %v8303_v13, %v8302_v11  ;;  %v8826_v11 = vld [vmem:[#allocation3 + $0x4c] sm:$0xff] }
 0xbd0   : > { %v8010_v15 = vld [vmem:[#allocation3 + $0x61] sm:$0xf]  ;;  %v7988_v33 = vpack.c.bf16 %v7981_v52, %v7980_v57 }
 0xbd1   : > { %17007 = vmatmul.mubr.msk.bf16.gmra.mrb[184].mxu0 %vm1005_vm9, %v8016_v18  ;;  %v8017_v24 = vpack.c.bf16 %v8010_v15, %v8010_v15  ;;  %v7982_v29 = vld [vmem:[#allocation3 + $0x60] sm:$0xf] }
 0xbd2   : > { %17010 = vmatprep.mubr.msk.bf16.mxu0 %vm19785_vm2, %v21837_v1  ;;  %v7989_v58 = vpack.c.bf16 %v7982_v29, %v7982_v29  ;;  %v8304_v55 = vld [vmem:[#allocation3 + $0x5a] sm:$0xff]  ;;  %v8305_v12 = vld [vmem:[#allocation3 + $0x62] sm:$0xf] }
 0xbd3   : > { %v8311_v60 = vpack.c.bf16 %v8304_v55, %v8303_v13  ;;  %v8312_v5 = vpack.c.bf16 %v8305_v12, %v8305_v12  ;;  %v8479_v36 = vld [vmem:[#allocation3 + $0x62] sm:$0xff] }
 0xbd4   : > { %v8486_v32 = vpack.c.bf16 %v8479_v36, %v8304_v55  ;;  %v8653_v52 = vld [vmem:[#allocation3 + $0x5b] sm:$0xff] }
 0xbd5   : > { %v8828_v55 = vld [vmem:[#allocation3 + $0x5c] sm:$0xff] }
 0xbd6   : > { %v8480_v18 = vld [vmem:[#allocation3 + $0x6a] sm:$0xf] }
 0xbd7   : > { %v8487_v15 = vpack.c.bf16 %v8480_v18, %v8480_v18 }
 0xbd9   : > { %17011 = vmatmul.mubr.msk.bf16.gmra.mrb[188].mxu0 %vm1005_vm9, %v8017_v24  ;;  %v8644_v24 = vld [vmem:[#allocation3 + $0x13] sm:$0xff] }
 0xbda   : > { %17022 = vmatprep.mubr.msk.bf16.mxu0 %vm19785_vm2, %v21837_v1 }
 0xbe1   : > { %17023 = vmatmul.mubr.msk.bf16.vlgmr.msra.gmra.mrb[164].mxu0 %vm1005_vm9, %v7983_v25  ;;  %v19334_v25 = vld [vmem:[%s19845_s19 + $0xa8] sm:$0xff]  }
 0xbe2   : > { %17026 = vmatprep.mubr.msk.bf16.mxu0 %vm19785_vm2, %v21837_v1  ;;  %17051 = vmatpush3.bf16.msra.mxu0 %v19321_v35  ;;  %v8656_v35 = vpack.c.bf16 %v8644_v24, %v8643_v46  ;;  %v9168_v24 = vld [vmem:[#allocation3 + $0x15] sm:$0xff] }
 0xbe3   : > { %17052 = vmatprep.subr.bf16.mxu0 %v21837_v1  ;;  %v19345_v46 = vld [vmem:[%s19845_s19 + $0x100] sm:$0xff]  }
 0xbe6   : > { %17053 = vmatpush3.bf16.msra.mxu0 %v19322_v30  ;;  %v8646_v30 = vld [vmem:[#allocation3 + $0x23] sm:$0xff] }
 0xbe7   : > { %17054 = vmatprep.subr.bf16.mxu0 %v21837_v1 }
 0xbe9   : > { %17027 = vmatmul.mubr.msk.bf16.gmra.mrb[168].mxu0 %vm1005_vm9, %v7984_v20  ;;  %v19336_v20 = vld [vmem:[%s19845_s19 + $0xb8] sm:$0xff]  }
 0xbea   : > { %17030 = vmatprep.mubr.msk.bf16.mxu0 %vm19785_vm2, %v21837_v1  ;;  %17055 = vmatpush3.bf16.msra.mxu0 %v19323_v39  ;;  %v8657_v39 = vpack.c.bf16 %v8646_v30, %v8645_v31  ;;  %v9170_v30 = vld [vmem:[#allocation3 + $0x25] sm:$0xff] }
 0xbeb   : > { %17056 = vmatprep.subr.bf16.mxu0 %v21837_v1  ;;  %v19347_v31 = vld [vmem:[%s19845_s19 + $0x110] sm:$0xff]  }
 0xbee   : > { %17057 = vmatpush3.bf16.msra.mxu0 %v19324_v47  ;;  %v8648_v47 = vld [vmem:[#allocation3 + $0x33] sm:$0xff] }
 0xbef   : > { %17086 = vmatprep.subr.bf16.mxu0 %v21837_v1  ;;  %v8658_v44 = vpack.c.bf16 %v8648_v47, %v8647_v41  ;;  %v9172_v47 = vld [vmem:[#allocation3 + $0x35] sm:$0xff] }
 0xbf1   : > { %17031 = vmatmul.mubr.msk.bf16.gmra.mrb[172].mxu0 %vm1005_vm9, %v7985_v49  ;;  %v8650_v49 = vld [vmem:[#allocation3 + $0x43] sm:$0xff] }
 0xbf2   : > { %17034 = vmatprep.mubr.msk.bf16.mxu0 %vm19785_vm2, %v21837_v1  ;;  %v8659_v54 = vpack.c.bf16 %v8650_v49, %v8649_v50  ;;  %v9175_v49 = vld [vmem:[#allocation3 + $0x4d] sm:$0xff]  ;;  %v9174_v50 = vld [vmem:[#allocation3 + $0x45] sm:$0xff] }
 0xbf9   : > { %17035 = vmatmul.mubr.msk.bf16.gmra.mrb[176].mxu0 %vm1005_vm9, %v7986_v37  ;;  %v8652_v37 = vld [vmem:[#allocation3 + $0x53] sm:$0xff] }
 0xbfa   : > { %17038 = vmatprep.mubr.msk.bf16.mxu0 %vm19785_vm2, %v21837_v1  ;;  %v8660_v9 = vpack.c.bf16 %v8652_v37, %v8651_v42  ;;  %v9177_v37 = vld [vmem:[#allocation3 + $0x5d] sm:$0xff]  ;;  %v9176_v42 = vld [vmem:[#allocation3 + $0x55] sm:$0xff] }
 0xc01   : > { %17039 = vmatmul.mubr.msk.bf16.gmra.mrb[180].mxu0 %vm1005_vm9, %v7987_v56  ;;  %v8654_v56 = vld [vmem:[#allocation3 + $0x63] sm:$0xff] }
 0xc02   : > { %17042 = vmatprep.mubr.msk.bf16.mxu0 %vm19785_vm2, %v21837_v1  ;;  %v8661_v57 = vpack.c.bf16 %v8654_v56, %v8653_v52  ;;  %v9179_v56 = vld [vmem:[#allocation3 + $0x6d] sm:$0xff] }
 0xc09   : > { %17043 = vmatmul.mubr.msk.bf16.gmra.mrb[184].mxu0 %vm1005_vm9, %v7988_v33  ;;  %v8655_v33 = vld [vmem:[#allocation3 + $0x6b] sm:$0xf] }
 0xc0a   : > { %17046 = vmatprep.mubr.msk.bf16.mxu0 %vm19785_vm2, %v21837_v1  ;;  %v8662_v29 = vpack.c.bf16 %v8655_v33, %v8655_v33 }
 0xc11   : > { %17047 = vmatmul.mubr.msk.bf16.gmra.mrb[188].mxu0 %vm1005_vm9, %v7989_v58  ;;  %v8819_v58 = vld [vmem:[#allocation3 + $0x14] sm:$0xff] }
 0xc12   : > { %17058 = vmatprep.mubr.msk.bf16.mxu0 %vm19785_vm2, %v21837_v1 }
 0xc19   : > { %17059 = vmatmul.mubr.msk.bf16.vlgmr.msra.gmra.mrb[164].mxu0 %vm1005_vm9, %v8306_v16  ;;  %v19338_v16 = vld [vmem:[%s19845_s19 + $0xc8] sm:$0xff]  }
 0xc1a   : > { %17062 = vmatprep.mubr.msk.bf16.mxu0 %vm19785_vm2, %v21837_v1  ;;  %17087 = vmatpush3.bf16.msra.mxu0 %v19325_v34  ;;  %v8831_v34 = vpack.c.bf16 %v8819_v58, %v8818_v45 }
 0xc1b   : > { %17088 = vmatprep.subr.bf16.mxu0 %v21837_v1 }
 0xc1e   : > { %17089 = vmatpush3.bf16.msra.mxu0 %v19326_v61  ;;  %v8821_v61 = vld [vmem:[#allocation3 + $0x24] sm:$0xff] }
 0xc1f   : > { %17090 = vmatprep.subr.bf16.mxu0 %v21837_v1 }
 0xc21   : > { %17063 = vmatmul.mubr.msk.bf16.gmra.mrb[168].mxu0 %vm1005_vm9, %v8307_v0  ;;  %v19340_v0 = vld [vmem:[%s19845_s19 + $0xd8] sm:$0xff]  }
 0xc22   : > { %17066 = vmatprep.mubr.msk.bf16.mxu0 %vm19785_vm2, %v21837_v1  ;;  %17091 = vmatpush3.bf16.msra.mxu0 %v19327_v59  ;;  %v8832_v59 = vpack.c.bf16 %v8821_v61, %v8820_v23 }
 0xc23   : > { %17092 = vmatprep.subr.bf16.mxu0 %v21837_v1 }
 0xc26   : > { %17093 = vmatpush3.bf16.msra.mxu0 %v19328_v63  ;;  %v8823_v63 = vld [vmem:[#allocation3 + $0x34] sm:$0xff] }
 0xc27   : > { %17122 = vmatprep.subr.bf16.mxu0 %v21837_v1  ;;  %v8833_v62 = vpack.c.bf16 %v8823_v63, %v8822_v10 }
 0xc29   : > { %17067 = vmatmul.mubr.msk.bf16.gmra.mrb[172].mxu0 %vm1005_vm9, %v8308_v6  ;;  %v8825_v6 = vld [vmem:[#allocation3 + $0x44] sm:$0xff] }
 0xc2a   : > { %17070 = vmatprep.mubr.msk.bf16.mxu0 %vm19785_vm2, %v21837_v1  ;;  %v8834_v3 = vpack.c.bf16 %v8825_v6, %v8824_v7 }
 0xc31   : > { %17071 = vmatmul.mubr.msk.bf16.gmra.mrb[176].mxu0 %vm1005_vm9, %v8309_v40  ;;  %v8827_v40 = vld [vmem:[#allocation3 + $0x54] sm:$0xff] }
 0xc32   : > { %17074 = vmatprep.mubr.msk.bf16.mxu0 %vm19785_vm2, %v21837_v1  ;;  %v8835_v14 = vpack.c.bf16 %v8827_v40, %v8826_v11 }
 0xc39   : > { %17075 = vmatmul.mubr.msk.bf16.gmra.mrb[180].mxu0 %vm1005_vm9, %v8310_v8  ;;  %v8829_v8 = vld [vmem:[#allocation3 + $0x64] sm:$0xff] }
 0xc3a   : > { %17078 = vmatprep.mubr.msk.bf16.mxu0 %vm19785_vm2, %v21837_v1  ;;  %v8836_v13 = vpack.c.bf16 %v8829_v8, %v8828_v55 }
 0xc41   : > { %17079 = vmatmul.mubr.msk.bf16.gmra.mrb[184].mxu0 %vm1005_vm9, %v8311_v60  ;;  %v8830_v60 = vld [vmem:[#allocation3 + $0x6c] sm:$0xf] }
 0xc42   : > { %17082 = vmatprep.mubr.msk.bf16.mxu0 %vm19785_vm2, %v21837_v1  ;;  %v8837_v12 = vpack.c.bf16 %v8830_v60, %v8830_v60 }
 0xc49   : > { %17083 = vmatmul.mubr.msk.bf16.gmra.mrb[188].mxu0 %vm1005_vm9, %v8312_v5  ;;  %v19341_v5 = vld [vmem:[%s19845_s19 + $0xe0] sm:$0xff]  }
 0xc4a   : > { %17094 = vmatprep.mubr.msk.bf16.mxu0 %vm19785_vm2, %v21837_v1 }
 0xc51   : > { %17095 = vmatmul.mubr.msk.bf16.vlgmr.msra.gmra.mrb[164].mxu0 %vm1005_vm9, %v8481_v17  ;;  %v19342_v17 = vld [vmem:[%s19845_s19 + $0xe8] sm:$0xff]  }
 0xc52   : > { %17098 = vmatprep.mubr.msk.bf16.mxu0 %vm19785_vm2, %v21837_v1  ;;  %17123 = vmatpush3.bf16.msra.mxu0 %v19329_v53  ;;  %v9006_v53 = vpack.c.bf16 %v8820_v23, %v8819_v58  ;;  %v9343_v58 = vld [vmem:[#allocation3 + $0x16] sm:$0xff] }
 0xc53   : > { %17124 = vmatprep.subr.bf16.mxu0 %v21837_v1  ;;  %v9347_v23 = vld [vmem:[#allocation3 + $0x36] sm:$0xff] }
 0xc56   : > { %17125 = vmatpush3.bf16.msra.mxu0 %v19330_v19  ;;  %v19343_v19 = vld [vmem:[%s19845_s19 + $0xf0] sm:$0xff]  }
 0xc57   : > { %17126 = vmatprep.subr.bf16.mxu0 %v21837_v1 }
 0xc59   : > { %17099 = vmatmul.mubr.msk.bf16.gmra.mrb[168].mxu0 %vm1005_vm9, %v8482_v27  ;;  %v19344_v27 = vld [vmem:[%s19845_s19 + $0xf8] sm:$0xff]  }
 0xc5a   : > { %17102 = vmatprep.mubr.msk.bf16.mxu0 %vm19785_vm2, %v21837_v1  ;;  %17127 = vmatpush3.bf16.msra.mxu0 %v19331_v26  ;;  %v9007_v26 = vpack.c.bf16 %v8822_v10, %v8821_v61  ;;  %v9348_v61 = vld [vmem:[#allocation3 + $0x3e] sm:$0xff] }
 0xc5b   : > { %17128 = vmatprep.subr.bf16.mxu0 %v21837_v1  ;;  %v9352_v10 = vld [vmem:[#allocation3 + $0x5e] sm:$0xff] }
 0xc5e   : > { %17129 = vmatpush3.bf16.msra.mxu0 %v19332_v21  ;;  %v9008_v21 = vpack.c.bf16 %v8824_v7, %v8823_v63  ;;  %v9353_v7 = vld [vmem:[#allocation3 + $0x66] sm:$0xff] }
 0xc5f   : > { %17158 = vmatprep.subr.bf16.mxu0 %v21837_v1 }
 0xc61   : > { %17103 = vmatmul.mubr.msk.bf16.gmra.mrb[172].mxu0 %vm1005_vm9, %v8483_v48  ;;  %v9009_v48 = vpack.c.bf16 %v8826_v11, %v8825_v6  ;;  %v9355_v11 = vld [vmem:[#allocation3 + $0x76] sm:$0xf] }
 0xc62   : > { %17106 = vmatprep.mubr.msk.bf16.mxu0 %vm19785_vm2, %v21837_v1 }
 0xc69   : > { %17107 = vmatmul.mubr.msk.bf16.gmra.mrb[176].mxu0 %vm1005_vm9, %v8484_v4  ;;  %v9010_v4 = vpack.c.bf16 %v8828_v55, %v8827_v40 }
 0xc6a   : > { %17110 = vmatprep.mubr.msk.bf16.mxu0 %vm19785_vm2, %v21837_v1 }
 0xc71   : > { %17111 = vmatmul.mubr.msk.bf16.gmra.mrb[180].mxu0 %vm1005_vm9, %v8485_v22  ;;  %v9004_v22 = vld [vmem:[#allocation3 + $0x6c] sm:$0xff] }
 0xc72   : > { %17114 = vmatprep.mubr.msk.bf16.mxu0 %vm19785_vm2, %v21837_v1  ;;  %v9011_v36 = vpack.c.bf16 %v9004_v22, %v8829_v8  ;;  %v22190_v8 = vld [vmem:[%s22977_s18] ss:$0 sm:$0xff]  ;;  %v9592_v22 = vpop.permute.xlu0 %9591  ;;  %s22981_s18 = sld [smem:[#allocation17_spill]] }
 0xc79   : > { %17115 = vmatmul.mubr.msk.bf16.gmra.mrb[184].mxu0 %vm1005_vm9, %v8486_v32  ;;  %v9005_v32 = vld [vmem:[#allocation3 + $0x74] sm:$0xf] }
 0xc7a   : > { %17118 = vmatprep.mubr.msk.bf16.mxu0 %vm19785_vm2, %v21837_v1  ;;  %v9012_v18 = vpack.c.bf16 %v9005_v32, %v9005_v32 }
 0xc81   : > { %17119 = vmatmul.mubr.msk.bf16.gmra.mrb[188].mxu0 %vm1005_vm9, %v8487_v15  ;;  %v9169_v15 = vld [vmem:[#allocation3 + $0x1d] sm:$0xff] }
 0xc82   : > { %17130 = vmatprep.mubr.msk.bf16.mxu0 %vm19785_vm2, %v21837_v1 }
 0xc89   : > { %17131 = vmatmul.mubr.msk.bf16.vlgmr.msra.gmra.mrb[164].mxu0 %vm1005_vm9, %v8656_v35  ;;  %v19346_v35 = vld [vmem:[%s19845_s19 + $0x108] sm:$0xff]  }
 0xc8a   : > { %17134 = vmatprep.mubr.msk.bf16.mxu0 %vm19785_vm2, %v21837_v1  ;;  %17159 = vmatpush3.bf16.msra.mxu0 %v19333_v43  ;;  %v9181_v43 = vpack.c.bf16 %v9169_v15, %v9168_v24 }
 0xc8b   : > { %17160 = vmatprep.subr.bf16.mxu0 %v21837_v1 }
 0xc8e   : > { %17161 = vmatpush3.bf16.msra.mxu0 %v19334_v25  ;;  %v9171_v25 = vld [vmem:[#allocation3 + $0x2d] sm:$0xff] }
 0xc8f   : > { %17162 = vmatprep.subr.bf16.mxu0 %v21837_v1 }
 0xc91   : > { %17135 = vmatmul.mubr.msk.bf16.gmra.mrb[168].mxu0 %vm1005_vm9, %v8657_v39  ;;  %v19348_v39 = vld [vmem:[%s19845_s19 + $0x118] sm:$0xff]  }
 0xc92   : > { %17138 = vmatprep.mubr.msk.bf16.mxu0 %vm19785_vm2, %v21837_v1  ;;  %17163 = vmatpush3.bf16.msra.mxu0 %v19335_v28  ;;  %v9182_v28 = vpack.c.bf16 %v9171_v25, %v9170_v30 }
 0xc93   : > { %17164 = vmatprep.subr.bf16.mxu0 %v21837_v1 }
 0xc96   : > { %17165 = vmatpush3.bf16.msra.mxu0 %v19336_v20  ;;  %v9173_v20 = vld [vmem:[#allocation3 + $0x3d] sm:$0xff] }
 0xc97   : > { %17194 = vmatprep.subr.bf16.mxu0 %v21837_v1  ;;  %v9183_v41 = vpack.c.bf16 %v9173_v20, %v9172_v47  ;;  %v9602_v20 = vpop.permute.xlu0 %9601 }
 0xc99   : > { %17139 = vmatmul.mubr.msk.bf16.gmra.mrb[172].mxu0 %vm1005_vm9, %v8658_v44  ;;  %v22152_v44 = vld [vmem:[#allocation4] sm:$0xff] }
 0xc9a   : > { %17142 = vmatprep.mubr.msk.bf16.mxu0 %vm19785_vm2, %v21837_v1 }
 0xca1   : > { %17143 = vmatmul.mubr.msk.bf16.gmra.mrb[176].mxu0 %vm1005_vm9, %v8659_v54  ;;  %v9184_v54 = vpack.c.bf16 %v9175_v49, %v9174_v50 }
 0xca2   : > { %17146 = vmatprep.mubr.msk.bf16.mxu0 %vm19785_vm2, %v21837_v1 }
 0xca9   : > { %17147 = vmatmul.mubr.msk.bf16.gmra.mrb[180].mxu0 %vm1005_vm9, %v8660_v9  ;;  %v9185_v9 = vpack.c.bf16 %v9177_v37, %v9176_v42 }
 0xcaa   : > { %17150 = vmatprep.mubr.msk.bf16.mxu0 %vm19785_vm2, %v21837_v1 }
 0xcb1   : > { %17151 = vmatmul.mubr.msk.bf16.gmra.mrb[184].mxu0 %vm1005_vm9, %v8661_v57  ;;  %v9180_v57 = vld [vmem:[#allocation3 + $0x75] sm:$0xf] }
 0xcb2   : > { %17154 = vmatprep.mubr.msk.bf16.mxu0 %vm19785_vm2, %v21837_v1  ;;  %v9187_v33 = vpack.c.bf16 %v9180_v57, %v9180_v57 }
 0xcb9   : > { %17155 = vmatmul.mubr.msk.bf16.gmra.mrb[188].mxu0 %vm1005_vm9, %v8662_v29  ;;  %v9344_v29 = vld [vmem:[#allocation3 + $0x1e] sm:$0xff] }
 0xcba   : > { %17166 = vmatprep.mubr.msk.bf16.mxu0 %vm19785_vm2, %v21837_v1  ;;  %v9356_v45 = vpack.c.bf16 %v9344_v29, %v9343_v58  ;;  %v9612_v58 = vpop.permute.xlu0 %9611 }
 0xcc1   : > { %17167 = vmatmul.mubr.msk.bf16.vlgmr.msra.gmra.mrb[164].mxu0 %vm1005_vm9, %v8831_v34  ;;  %v9345_v34 = vld [vmem:[#allocation3 + $0x26] sm:$0xff] }
 0xcc2   : > { %17170 = vmatprep.mubr.msk.bf16.mxu0 %vm19785_vm2, %v21837_v1  ;;  %17195 = vmatpush3.bf16.msra.mxu0 %v19337_v38  ;;  %v9346_v38 = vld [vmem:[#allocation3 + $0x2e] sm:$0xff] }
 0xcc3   : > { %17196 = vmatprep.subr.bf16.mxu0 %v21837_v1 }
 0xcc6   : > { %17197 = vmatpush3.bf16.msra.mxu0 %v19338_v16  ;;  %v9357_v16 = vpack.c.bf16 %v9346_v38, %v9345_v34 }
 0xcc7   : > { %17198 = vmatprep.subr.bf16.mxu0 %v21837_v1 }
 0xcc9   : > { %17171 = vmatmul.mubr.msk.bf16.gmra.mrb[168].mxu0 %vm1005_vm9, %v8832_v59  ;;  %v9350_v59 = vld [vmem:[#allocation3 + $0x4e] sm:$0xff] }
 0xcca   : > { %17174 = vmatprep.mubr.msk.bf16.mxu0 %vm19785_vm2, %v21837_v1  ;;  %17199 = vmatpush3.bf16.msra.mxu0 %v19339_v51  ;;  %v9358_v51 = vpack.c.bf16 %v9348_v61, %v9347_v23 }
 0xccb   : > { %17200 = vmatprep.subr.bf16.mxu0 %v21837_v1 }
 0xcce   : > { %17201 = vmatpush3.bf16.msra.mxu0 %v19340_v0  ;;  %v9349_v0 = vld [vmem:[#allocation3 + $0x46] sm:$0xff] }
 0xccf   : > { %17230 = vmatprep.subr.bf16.mxu0 %v21837_v1  ;;  %v9359_v63 = vpack.c.bf16 %v9350_v59, %v9349_v0 }
 0xcd1   : > { %17175 = vmatmul.mubr.msk.bf16.gmra.mrb[172].mxu0 %vm1005_vm9, %v8833_v62  ;;  %v9351_v62 = vld [vmem:[#allocation3 + $0x56] sm:$0xff] }
 0xcd2   : > { %17178 = vmatprep.mubr.msk.bf16.mxu0 %vm19785_vm2, %v21837_v1  ;;  %v9360_v6 = vpack.c.bf16 %v9352_v10, %v9351_v62 }
 0xcd9   : > { %17179 = vmatmul.mubr.msk.bf16.gmra.mrb[176].mxu0 %vm1005_vm9, %v8834_v3  ;;  %v9354_v3 = vld [vmem:[#allocation3 + $0x6e] sm:$0xff] }
 0xcda   : > { %17182 = vmatprep.mubr.msk.bf16.mxu0 %vm19785_vm2, %v21837_v1  ;;  %v9361_v40 = vpack.c.bf16 %v9354_v3, %v9353_v7 }
 0xce1   : > { %17183 = vmatmul.mubr.msk.bf16.gmra.mrb[180].mxu0 %vm1005_vm9, %v8835_v14  ;;  %v9362_v14 = vpack.c.bf16 %v9355_v11, %v9355_v11 }
 0xce2   : > { %17186 = vmatprep.mubr.msk.bf16.mxu0 %vm19785_vm2, %v21837_v1 }
 0xce9   : > { %17187 = vmatmul.mubr.msk.bf16.gmra.mrb[184].mxu0 %vm1005_vm9, %v8836_v13  ;;  %v22193_v13 = vld [vmem:[%s22978_s1] ss:$0 sm:$0xff]  ;;  %s22982_s1 = sld [smem:[#allocation18_spill]] }
 0xcea   : > { %17190 = vmatprep.mubr.msk.bf16.mxu0 %vm19785_vm2, %v21837_v1 }
 0xcf1   : > { %17191 = vmatmul.mubr.msk.bf16.gmra.mrb[188].mxu0 %vm1005_vm9, %v8837_v12 }
 0xcf2   : > { %17202 = vmatprep.mubr.msk.bf16.mxu0 %vm19785_vm2, %v21837_v1 }
 0xcf9   : > { %17203 = vmatmul.mubr.msk.bf16.vlgmr.msra.gmra.mrb[164].mxu0 %vm1005_vm9, %v9006_v53 }
 0xcfa   : > { %17206 = vmatprep.mubr.msk.bf16.mxu0 %vm19785_vm2, %v21837_v1  ;;  %17231 = vmatpush3.bf16.msra.mxu0 %v19341_v5 }
 0xcfb   : > { %17232 = vmatprep.subr.bf16.mxu0 %v21837_v1 }
 0xcfe   : > { %17233 = vmatpush3.bf16.msra.mxu0 %v19342_v17 }
 0xcff   : > { %17234 = vmatprep.subr.bf16.mxu0 %v21837_v1 }
 0xd01   : > { %17207 = vmatmul.mubr.msk.bf16.gmra.mrb[168].mxu0 %vm1005_vm9, %v9007_v26 }
 0xd02   : > { %17210 = vmatprep.mubr.msk.bf16.mxu0 %vm19785_vm2, %v21837_v1  ;;  %17235 = vmatpush3.bf16.msra.mxu0 %v19343_v19 }
 0xd03   : > { %17236 = vmatprep.subr.bf16.mxu0 %v21837_v1 }
 0xd06   : > { %17237 = vmatpush3.bf16.msra.mxu0 %v19344_v27 }
 0xd07   : > { %17266 = vmatprep.subr.bf16.mxu0 %v21837_v1 }
 0xd09   : > { %17211 = vmatmul.mubr.msk.bf16.gmra.mrb[172].mxu0 %vm1005_vm9, %v9008_v21  ;;  %v9587_v21 = vpop.permute.xlu1 %9586 }
 0xd0a   : > { %17214 = vmatprep.mubr.msk.bf16.mxu0 %vm19785_vm2, %v21837_v1 }
 0xd11   : > { %17215 = vmatmul.mubr.msk.bf16.gmra.mrb[176].mxu0 %vm1005_vm9, %v9009_v48 }
 0xd12   : > { %17218 = vmatprep.mubr.msk.bf16.mxu0 %vm19785_vm2, %v21837_v1 }
 0xd19   : > { %17219 = vmatmul.mubr.msk.bf16.gmra.mrb[180].mxu0 %vm1005_vm9, %v9010_v4 }
 0xd1a   : > { %17222 = vmatprep.mubr.msk.bf16.mxu0 %vm19785_vm2, %v21837_v1 }
 0xd21   : > { %17223 = vmatmul.mubr.msk.bf16.gmra.mrb[184].mxu0 %vm1005_vm9, %v9011_v36 }
 0xd22   : > { %17226 = vmatprep.mubr.msk.bf16.mxu0 %vm19785_vm2, %v21837_v1 }
 0xd29   : > { %17227 = vmatmul.mubr.msk.bf16.gmra.mrb[188].mxu0 %vm1005_vm9, %v9012_v18 }
 0xd2a   : > { %17238 = vmatprep.mubr.msk.bf16.mxu0 %vm19785_vm2, %v21837_v1 }
 0xd31   : > { %17239 = vmatmul.mubr.msk.bf16.vlgmr.msra.gmra.mrb[164].mxu0 %vm1005_vm9, %v9181_v43 }
 0xd32   : > { %17242 = vmatprep.mubr.msk.bf16.mxu0 %vm19785_vm2, %v21837_v1  ;;  %17267 = vmatpush3.bf16.msra.mxu0 %v19345_v46 }
 0xd33   : > { %17268 = vmatprep.subr.bf16.mxu0 %v21837_v1 }
 0xd36   : > { %17269 = vmatpush3.bf16.msra.mxu0 %v19346_v35 }
 0xd37   : > { %17270 = vmatprep.subr.bf16.mxu0 %v21837_v1 }
 0xd39   : > { %17243 = vmatmul.mubr.msk.bf16.gmra.mrb[168].mxu0 %vm1005_vm9, %v9182_v28 }
 0xd3a   : > { %17246 = vmatprep.mubr.msk.bf16.mxu0 %vm19785_vm2, %v21837_v1  ;;  %17271 = vmatpush3.bf16.msra.mxu0 %v19347_v31  ;;  %v9597_v31 = vpop.permute.xlu1 %9596 }
 0xd3b   : > { %17272 = vmatprep.subr.bf16.mxu0 %v21837_v1 }
 0xd3e   : > { %17273 = vmatpush3.bf16.msra.mxu0 %v19348_v39 }
 0xd3f   : > { %17302 = vmatprep.subr.bf16.mxu0 %v21837_v1  ;;  %v9178_v1 = vld [vmem:[#allocation3 + $0x65] sm:$0xff] }
 0xd40   : > { %v9186_v52 = vpack.c.bf16 %v9179_v56, %v9178_v1 }
 0xd41   : > { %17247 = vmatmul.mubr.msk.bf16.gmra.mrb[172].mxu0 %vm1005_vm9, %v9183_v41 }
 0xd42   : > { %17250 = vmatprep.mubr.msk.bf16.mxu0 %vm19785_vm2, %v22152_v44 }
 0xd49   : > { %17251 = vmatmul.mubr.msk.bf16.gmra.mrb[176].mxu0 %vm1005_vm9, %v9184_v54 }
 0xd4a   : > { %17254 = vmatprep.mubr.msk.bf16.mxu0 %vm19785_vm2, %v22152_v44 }
 0xd51   : > { %17255 = vmatmul.mubr.msk.bf16.gmra.mrb[180].mxu0 %vm1005_vm9, %v9185_v9 }
 0xd52   : > { %17258 = vmatprep.mubr.msk.bf16.mxu0 %vm19785_vm2, %v22152_v44 }
 0xd59   : > { %17259 = vmatmul.mubr.msk.bf16.gmra.mrb[184].mxu0 %vm1005_vm9, %v9186_v52  ;;  %v9607_v52 = vpop.permute.xlu1 %9606 }
 0xd5a   : > { %17262 = vmatprep.mubr.msk.bf16.mxu0 %vm19785_vm2, %v22152_v44 }
 0xd61   : > { %17263 = vmatmul.mubr.msk.bf16.gmra.mrb[188].mxu0 %vm1005_vm9, %v9187_v33 }
 0xd62   : > { %17274 = vmatprep.mubr.msk.bf16.mxu0 %vm19785_vm2, %v22152_v44 }
 0xd69   : > { %17275 = vmatmul.mubr.msk.bf16.vlgmr.msra.gmra.mrb[164].mxu0 %vm1005_vm9, %v9356_v45 }
 0xd6a   : > { %17278 = vmatprep.mubr.msk.bf16.mxu0 %vm19785_vm2, %v22152_v44 }
 0xd71   : > { %17279 = vmatmul.mubr.msk.bf16.gmra.mrb[168].mxu0 %vm1005_vm9, %v9357_v16 }
 0xd72   : > { %17282 = vmatprep.mubr.msk.bf16.mxu0 %vm19785_vm2, %v22152_v44 }
 0xd79   : > { %17283 = vmatmul.mubr.msk.bf16.gmra.mrb[172].mxu0 %vm1005_vm9, %v9358_v51 }
 0xd7a   : > { %17286 = vmatprep.mubr.msk.bf16.mxu0 %vm19785_vm2, %v22152_v44 }
 0xd81   : > { %17287 = vmatmul.mubr.msk.bf16.gmra.mrb[176].mxu0 %vm1005_vm9, %v9359_v63 }
 0xd82   : > { %17290 = vmatprep.mubr.msk.bf16.mxu0 %vm19785_vm2, %v22152_v44 }
 0xd89   : > { %17291 = vmatmul.mubr.msk.bf16.gmra.mrb[180].mxu0 %vm1005_vm9, %v9360_v6 }
 0xd8a   : > { %17294 = vmatprep.mubr.msk.bf16.mxu0 %vm19785_vm2, %v22152_v44 }
 0xd91   : > { %17295 = vmatmul.mubr.msk.bf16.gmra.mrb[184].mxu0 %vm1005_vm9, %v9361_v40 }
 0xd92   : > { %17298 = vmatprep.mubr.msk.bf16.mxu0 %vm19785_vm2, %v22152_v44 }
 0xd99   : > { %17299 = vmatmul.mubr.msk.bf16.gmra.mrb[188].mxu0 %vm1005_vm9, %v9362_v14 }
 0xd9a   : > { %17316 = vmatprep.mubr.msk.bf16.mxu0 %vm19785_vm2, %v22152_v44 }
 0xe3c   : > { %v9451_v55 = vpop.f32.mrb[164].mxu0 }
 0xe3d   : > { %v9525_v60 = vmul.f32 %v22190_v8, %v9451_v55  ;;  %v17276_v12 = vpop.f32.mrb[165].mxu0 }
 0xe3e   : > { %v9454_v5 = vpop.f32.mrb[166].mxu0 }
 0xe3f   : > { %v9545_v53 = vadd.f32 %v22193_v13, %v9525_v60  ;;  %v9526_v17 = vmul.f32 %v22190_v8, %v9454_v5  ;;  %v17277_v19 = vpop.f32.mrb[167].mxu0 }
 0xe41   : > { %v9558_v26 = vmax.f32 %v9545_v53, 0.0  ;;  %v9546_v27 = vadd.f32 %v22193_v13, %v9526_v17  ;;  %v9617_v17 = vpop.permute.xlu1 %9616 }
 0xe43   : > { %v9649_v48 = vmul.f32 %v9587_v21, %v9558_v26  ;;  %v9559_v4 = vmax.f32 %v9546_v27, 0.0 }
 0xe44   : > { %v9459_v36 = vpop.f32.mrb[168].mxu0 }
 0xe45   : > { %9662 = vst.msk [vmem:[#allocation3 + $0xb] sm:$0xff] %vm1005_vm9, %v9649_v48  ;;  %v9650_v32 = vmul.f32 %v9592_v22, %v9559_v4  ;;  %v9527_v18 = vmul.f32 %v22190_v8, %v9459_v36  ;;  %v17280_v15 = vpop.f32.mrb[169].mxu0  ;;  %v9622_v48 = vpop.permute.xlu0 %9621 }
 0xe46   : > { %v9462_v24 = vpop.f32.mrb[170].mxu0 }
 0xe47   : > { %9663 = vst.msk [vmem:[#allocation3 + $0x13] sm:$0xff] %vm1005_vm9, %v9650_v32  ;;  %v9547_v46 = vadd.f32 %v22193_v13, %v9527_v18  ;;  %v9528_v43 = vmul.f32 %v22190_v8, %v9462_v24  ;;  %v17281_v35 = vpop.f32.mrb[171].mxu0 }
 0xe49   : > { %v9560_v25 = vmax.f32 %v9547_v46, 0.0  ;;  %v9548_v30 = vadd.f32 %v22193_v13, %v9528_v43 }
 0xe4b   : > { %v9651_v28 = vmul.f32 %v9597_v31, %v9560_v25  ;;  %v9561_v39 = vmax.f32 %v9548_v30, 0.0 }
 0xe4c   : > { %v9467_v47 = vpop.f32.mrb[172].mxu0  ;;  %v9675_v59 = vld [vmem:[#allocation3 + $0xb] sm:$0xff] }
 0xe4d   : > { %9664 = vst.msk [vmem:[#allocation3 + $0x1b] sm:$0xff] %vm1005_vm9, %v9651_v28  ;;  %v9652_v41 = vmul.f32 %v9602_v20, %v9561_v39  ;;  %v9529_v49 = vmul.f32 %v22190_v8, %v9467_v47  ;;  %v17284_v50 = vpop.f32.mrb[173].mxu0 }
 0xe4e   : > { %v9470_v54 = vpop.f32.mrb[174].mxu0  ;;  %v9688_v29 = vld [vmem:[#allocation3 + $0xc] sm:$0xff] }
 0xe4f   : > { %9665 = vst.msk [vmem:[#allocation3 + $0x23] sm:$0xff] %vm1005_vm9, %v9652_v41  ;;  %v9549_v37 = vadd.f32 %v22193_v13, %v9529_v49  ;;  %v9530_v42 = vmul.f32 %v22190_v8, %v9470_v54  ;;  %v17285_v9 = vpop.f32.mrb[175].mxu0  ;;  %v9676_v10 = vld [vmem:[#allocation3 + $0x13] sm:$0xff]  ;;  %v9701_v62 = vmax.f32 %v9675_v59, %v9688_v29 }
 0xe50   : > { %v9627_v9 = vpop.permute.xlu1 %9626 }
 0xe51   : > { %v9562_v1 = vmax.f32 %v9549_v37, 0.0  ;;  %v9550_v56 = vadd.f32 %v22193_v13, %v9530_v42 }
 0xe53   : > { %v9653_v57 = vmul.f32 %v9607_v52, %v9562_v1  ;;  %v9563_v33 = vmax.f32 %v9550_v56, 0.0 }
 0xe54   : > { %v9475_v45 = vpop.f32.mrb[176].mxu0  ;;  %v9689_v38 = vld [vmem:[#allocation3 + $0x14] sm:$0xff] }
 0xe55   : > { %v9714_v34 = vld [vmem:[#allocation3 + $0x15] sm:$0xff]  ;;  %9666 = vst.msk [vmem:[#allocation3 + $0x2b] sm:$0xff] %vm1005_vm9, %v9653_v57  ;;  %v9654_v61 = vmul.f32 %v9612_v58, %v9563_v33  ;;  %v9531_v23 = vmul.f32 %v22190_v8, %v9475_v45  ;;  %v17288_v51 = vpop.f32.mrb[177].mxu0  ;;  %v9702_v14 = vmax.f32 %v9676_v10, %v9689_v38  ;;  %v9632_v33 = vpop.permute.xlu0 %9631 }
 0xe56   : > { %v9727_v16 = vld [vmem:[#allocation3 + $0x16] sm:$0xff]  ;;  %v9478_v63 = vpop.f32.mrb[178].mxu0  ;;  %v9728_v7 = vld [vmem:[#allocation3 + $0x1e] sm:$0xff] }
 0xe57   : > { %v9740_v0 = vmax.f32 %v9714_v34, %v9727_v16  ;;  %v9715_v6 = vld [vmem:[#allocation3 + $0x1d] sm:$0xff]  ;;  %9667 = vst.msk [vmem:[#allocation3 + $0x33] sm:$0xff] %vm1005_vm9, %v9654_v61  ;;  %v9551_v3 = vadd.f32 %v22193_v13, %v9531_v23  ;;  %v9532_v40 = vmul.f32 %v22190_v8, %v9478_v63  ;;  %v17289_v11 = vpop.f32.mrb[179].mxu0 }
 0xe58   : > { %v9741_v55 = vmax.f32 %v9715_v6, %v9728_v7  ;;  %v9690_v21 = vld [vmem:[#allocation3 + $0x1c] sm:$0xff] }
 0xe59   : > { %v9564_v60 = vmax.f32 %v9551_v3, 0.0  ;;  %v9552_v12 = vadd.f32 %v22193_v13, %v9532_v40  ;;  %v9753_v5 = vmax.f32 %v9701_v62, %v9740_v0  ;;  %v9677_v46 = vld [vmem:[#allocation3 + $0x1b] sm:$0xff]  ;;  %v9678_v25 = vld [vmem:[#allocation3 + $0x23] sm:$0xff] }
 0xe5a   : > { %v9754_v53 = vmax.f32 %v9702_v14, %v9741_v55  ;;  %v9703_v30 = vmax.f32 %v9677_v46, %v9690_v21 }
 0xe5b   : > { %v9655_v19 = vmul.f32 %v9617_v17, %v9564_v60  ;;  %v9565_v26 = vmax.f32 %v9552_v12, 0.0 }
 0xe5c   : > { %v9766_v27 = vpack.c.bf16 %v9754_v53, %v9753_v5  ;;  %v9483_v4 = vpop.f32.mrb[180].mxu0  ;;  %v9691_v22 = vld [vmem:[#allocation3 + $0x24] sm:$0xff]  ;;  %v9637_v5 = vpop.permute.xlu1 %9636 }
 0xe5d   : > { %v9716_v36 = vld [vmem:[#allocation3 + $0x25] sm:$0xff]  ;;  %9668 = vst.msk [vmem:[#allocation3 + $0x3b] sm:$0xff] %vm1005_vm9, %v9655_v19  ;;  %v9656_v18 = vmul.f32 %v9622_v48, %v9565_v26  ;;  %v9533_v15 = vmul.f32 %v22190_v8, %v9483_v4  ;;  %v17292_v24 = vpop.f32.mrb[181].mxu0  ;;  %v9704_v41 = vmax.f32 %v9678_v25, %v9691_v22 }
 0xe5e   : > { %v9729_v32 = vld [vmem:[#allocation3 + $0x26] sm:$0xff]  ;;  %17303 = vmatpush3.bf16.msra.mxu0 %v9766_v27  ;;  %v9486_v35 = vpop.f32.mrb[182].mxu0  ;;  %v9730_v28 = vld [vmem:[#allocation3 + $0x2e] sm:$0xff]  ;;  %v9642_v27 = vpop.permute.xlu0 %9641 }
 0xe5f   : > { %v9742_v43 = vmax.f32 %v9716_v36, %v9729_v32  ;;  %17304 = vmatprep.subr.bf16.mxu0 %v22152_v44  ;;  %v9717_v31 = vld [vmem:[#allocation3 + $0x2d] sm:$0xff]  ;;  %9669 = vst.msk [vmem:[#allocation3 + $0x43] sm:$0xff] %vm1005_vm9, %v9656_v18  ;;  %v9553_v39 = vadd.f32 %v22193_v13, %v9533_v15  ;;  %v9534_v20 = vmul.f32 %v22190_v8, %v9486_v35  ;;  %v17293_v47 = vpop.f32.mrb[183].mxu0 }
 0xe60   : > { %v9743_v49 = vmax.f32 %v9717_v31, %v9730_v28  ;;  %v9692_v57 = vld [vmem:[#allocation3 + $0x2c] sm:$0xff] }
 0xe61   : > { %v9566_v50 = vmax.f32 %v9553_v39, 0.0  ;;  %v9554_v54 = vadd.f32 %v22193_v13, %v9534_v20  ;;  %v9755_v37 = vmax.f32 %v9703_v30, %v9742_v43  ;;  %v9679_v23 = vld [vmem:[#allocation3 + $0x2b] sm:$0xff]  ;;  %v9680_v0 = vld [vmem:[#allocation3 + $0x33] sm:$0xff] }
 0xe62   : > { %v9756_v42 = vmax.f32 %v9704_v41, %v9743_v49  ;;  %v9705_v63 = vmax.f32 %v9679_v23, %v9692_v57  ;;  %v9647_v49 = vpop.permute.xlu1 %9646 }
 0xe63   : > { %v9657_v1 = vmul.f32 %v9627_v9, %v9566_v50  ;;  %v9567_v56 = vmax.f32 %v9554_v54, 0.0 }
 0xe64   : > { %v9767_v52 = vpack.c.bf16 %v9756_v42, %v9755_v37  ;;  %v9491_v29 = vpop.f32.mrb[184].mxu0  ;;  %v9693_v58 = vld [vmem:[#allocation3 + $0x34] sm:$0xff] }
 0xe65   : > { %v9718_v45 = vld [vmem:[#allocation3 + $0x35] sm:$0xff]  ;;  %9670 = vst.msk [vmem:[#allocation3 + $0x4b] sm:$0xff] %vm1005_vm9, %v9657_v1  ;;  %v9658_v34 = vmul.f32 %v9632_v33, %v9567_v56  ;;  %v9535_v16 = vmul.f32 %v22190_v8, %v9491_v29  ;;  %v17296_v61 = vpop.f32.mrb[185].mxu0  ;;  %v9706_v40 = vmax.f32 %v9680_v0, %v9693_v58 }
 0xe66   : > { %v9731_v38 = vld [vmem:[#allocation3 + $0x36] sm:$0xff]  ;;  %17305 = vmatpush3.bf16.msra.mxu0 %v9767_v52  ;;  %v9494_v59 = vpop.f32.mrb[186].mxu0  ;;  %v9732_v62 = vld [vmem:[#allocation3 + $0x3e] sm:$0xff] }
 0xe67   : > { %v9744_v51 = vmax.f32 %v9718_v45, %v9731_v38  ;;  %17306 = vmatprep.subr.bf16.mxu0 %v22152_v44  ;;  %v9719_v10 = vld [vmem:[#allocation3 + $0x3d] sm:$0xff]  ;;  %9671 = vst.msk [vmem:[#allocation3 + $0x53] sm:$0xff] %vm1005_vm9, %v9658_v34  ;;  %v9555_v6 = vadd.f32 %v22193_v13, %v9535_v16  ;;  %v9536_v7 = vmul.f32 %v22190_v8, %v9494_v59  ;;  %v17297_v3 = vpop.f32.mrb[187].mxu0  ;;  %v9726_v16 = vld [vmem:[#allocation3 + $0x75] sm:$0xf] }
 0xe68   : > { %v9745_v11 = vmax.f32 %v9719_v10, %v9732_v62  ;;  %v9694_v26 = vld [vmem:[#allocation3 + $0x3c] sm:$0xff]  ;;  %v9739_v61 = vld [vmem:[#allocation3 + $0x76] sm:$0xf] }
 0xe69   : > { %v9568_v14 = vmax.f32 %v9555_v6, 0.0  ;;  %v9556_v55 = vadd.f32 %v22193_v13, %v9536_v7  ;;  %v9757_v60 = vmax.f32 %v9705_v63, %v9744_v51  ;;  %v9681_v15 = vld [vmem:[#allocation3 + $0x3b] sm:$0xff]  ;;  %v9682_v43 = vld [vmem:[#allocation3 + $0x43] sm:$0xff] }
 0xe6a   : > { %v9758_v12 = vmax.f32 %v9706_v40, %v9745_v11  ;;  %v9707_v28 = vmax.f32 %v9681_v15, %v9694_v26  ;;  %v9752_v11 = vmax.f32 %v9726_v16, %v9739_v61  ;;  %v19355_v15 = vld [vmem:[%s22979_s7 + $0x38] sm:$0xff]   ;;  %v19362_v61 = vld [vmem:[%s22979_s7 + $0x50] sm:$0xff]  }
 0xe6b   : > { %v9659_v53 = vmul.f32 %v9637_v5, %v9568_v14  ;;  %v9569_v17 = vmax.f32 %v9556_v55, 0.0 }
 0xe6c   : > { %v9768_v19 = vpack.c.bf16 %v9758_v12, %v9757_v60  ;;  %v9499_v21 = vpop.f32.mrb[188].mxu0  ;;  %v9695_v48 = vld [vmem:[#allocation3 + $0x44] sm:$0xff] }
 0xe6d   : > { %v9720_v4 = vld [vmem:[#allocation3 + $0x45] sm:$0xff]  ;;  %9672 = vst.msk [vmem:[#allocation3 + $0x5b] sm:$0xff] %vm1005_vm9, %v9659_v53  ;;  %v9660_v36 = vmul.f32 %v9642_v27, %v9569_v17  ;;  %v9537_v32 = vmul.f32 %v22190_v8, %v9499_v21  ;;  %v17300_v18 = vpop.f32.mrb[189].mxu0  ;;  %v9708_v39 = vmax.f32 %v9682_v43, %v9695_v48  ;;  %v19349_v48 = vld [vmem:[%s19940_s30] sm:$0xff]  }
 0xe6e   : > { %v9733_v22 = vld [vmem:[#allocation3 + $0x46] sm:$0xff]  ;;  %17307 = vmatpush3.bf16.msra.mxu0 %v9768_v19  ;;  %v9502_v46 = vpop.f32.mrb[190].mxu0  ;;  %v9734_v25 = vld [vmem:[#allocation3 + $0x4e] sm:$0xff] }
 0xe6f   : > { %v9746_v24 = vmax.f32 %v9720_v4, %v9733_v22  ;;  %17308 = vmatprep.subr.bf16.mxu0 %v22152_v44  ;;  %v9721_v35 = vld [vmem:[#allocation3 + $0x4d] sm:$0xff]  ;;  %9673 = vst.msk [vmem:[#allocation3 + $0x63] sm:$0xff] %vm1005_vm9, %v9660_v36  ;;  %v9557_v30 = vadd.f32 %v22193_v13, %v9537_v32  ;;  %v17301_v31 = vpop.f32.mrb[191].mxu0  ;;  %v19350_v22 = vld [vmem:[%s19940_s30 + $0x8] sm:$0xff]   ;;  %v19354_v18 = vld [vmem:[%s22979_s7 + $0x30] sm:$0xff]  }
 0xe70   : > { %v9747_v20 = vmax.f32 %v9721_v35, %v9734_v25  ;;  %v9696_v37 = vld [vmem:[#allocation3 + $0x4c] sm:$0xff]  ;;  %v19351_v36 = vld [vmem:[%s19940_s30 + $0x10] ss:$0 sps:$4 sm:$0x33]   ;;  %v19353_v32 = vld [vmem:[%s22979_s7 + $0x28] sm:$0xff]  }
 0xe71   : > { %v9570_v47 = vmax.f32 %v9557_v30, 0.0  ;;  %v9759_v8 = vmax.f32 %v9707_v28, %v9746_v24  ;;  %v9683_v56 = vld [vmem:[#allocation3 + $0x4b] sm:$0xff]  ;;  %v9684_v13 = vld [vmem:[#allocation3 + $0x53] sm:$0xff] }
 0xe72   : > { %v9760_v41 = vmax.f32 %v9708_v39, %v9747_v20  ;;  %v9709_v29 = vmax.f32 %v9683_v56, %v9696_v37  ;;  %v19352_v4 = vld [vmem:[%s22979_s7 + $0x20] sm:$0xff]  }
 0xe73   : > { %v9661_v50 = vmul.f32 %v9647_v49, %v9570_v47  ;;  %v19356_v20 = vld [vmem:[%s22979_s7] sm:$0xff]  }
 0xe74   : > { %v9769_v54 = vpack.c.bf16 %v9760_v41, %v9759_v8  ;;  %v9697_v42 = vld [vmem:[#allocation3 + $0x54] sm:$0xff] }
 0xe75   : > { %v9722_v9 = vld [vmem:[#allocation3 + $0x55] sm:$0xff]  ;;  %9674 = vst.msk [vmem:[#allocation3 + $0x6b] sm:$0xf] %vm7968_vm11, %v9661_v50  ;;  %v9710_v58 = vmax.f32 %v9684_v13, %v9697_v42  ;;  %v19358_v42 = vld [vmem:[%s22979_s7 + $0x10] sm:$0xff]  }
 0xe76   : > { %v9735_v1 = vld [vmem:[#allocation3 + $0x56] sm:$0xff]  ;;  %17309 = vmatpush3.bf16.msra.mxu0 %v9769_v54  ;;  %v9736_v33 = vld [vmem:[#allocation3 + $0x5e] sm:$0xff] }
 0xe77   : > { %v9748_v52 = vmax.f32 %v9722_v9, %v9735_v1  ;;  %17310 = vmatprep.subr.bf16.mxu0 %v22152_v44  ;;  %v9723_v57 = vld [vmem:[#allocation3 + $0x5d] sm:$0xff] }
 0xe78   : > { %v9749_v45 = vmax.f32 %v9723_v57, %v9736_v33  ;;  %v9685_v51 = vld [vmem:[#allocation3 + $0x5b] sm:$0xff]  ;;  %v9686_v59 = vld [vmem:[#allocation3 + $0x63] sm:$0xff] }
 0xe79   : > { %v9761_v38 = vmax.f32 %v9709_v29, %v9748_v52  ;;  %v9698_v0 = vld [vmem:[#allocation3 + $0x5c] sm:$0xff]  ;;  %v19359_v52 = vld [vmem:[%s22979_s7 + $0x18] sm:$0xff]  }
 0xe7a   : > { %v9762_v34 = vmax.f32 %v9710_v58, %v9749_v45  ;;  %v9711_v14 = vmax.f32 %v9685_v51, %v9698_v0  ;;  %v19357_v41 = vld [vmem:[%s22979_s7 + $0x8] sm:$0xff]   ;;  %v19360_v58 = vld [vmem:[%s22979_s7 + $0x40] sm:$0xff]   ;;  %v19363_v51 = vld [vmem:[%s22979_s7 + $0x58] sm:$0xff]  }
 0xe7c   : > { %v9770_v23 = vpack.c.bf16 %v9762_v34, %v9761_v38  ;;  %v9699_v63 = vld [vmem:[#allocation3 + $0x64] sm:$0xff]  ;;  %v9725_v62 = vld [vmem:[#allocation3 + $0x6d] sm:$0xff]  ;;  %v19361_v38 = vld [vmem:[%s22979_s7 + $0x48] sm:$0xff]  }
 0xe7d   : > { %v9724_v10 = vld [vmem:[#allocation3 + $0x65] sm:$0xff]  ;;  %v9712_v6 = vmax.f32 %v9686_v59, %v9699_v63  ;;  %v9738_v3 = vld [vmem:[#allocation3 + $0x6e] sm:$0xff] }
 0xe7e   : > { %17311 = vmatpush3.bf16.msra.mxu0 %v9770_v23  ;;  %v9737_v7 = vld [vmem:[#allocation3 + $0x66] sm:$0xff]  ;;  %v9751_v60 = vmax.f32 %v9725_v62, %v9738_v3  ;;  %v19364_v62 = vld [vmem:[%s22979_s7 + $0x60] sm:$0xff]  }
 0xe7f   : > { %v9687_v40 = vld [vmem:[#allocation3 + $0x6b] sm:$0xf]  ;;  %17312 = vmatprep.subr.bf16.mxu0 %v22152_v44  ;;  %v9750_v55 = vmax.f32 %v9724_v10, %v9737_v7  ;;  %v19365_v7 = vld [vmem:[%s22979_s7 + $0x68] sm:$0xff]  }
 0xe80   : > { %v9700_v12 = vld [vmem:[#allocation3 + $0x6c] sm:$0xf]  ;;  %v9764_v17 = vmax.f32 %v9712_v6, %v9751_v60 }
 0xe81   : > { %v9713_v5 = vmax.f32 %v9687_v40, %v9700_v12  ;;  %v9763_v53 = vmax.f32 %v9711_v14, %v9750_v55  ;;  %v19367_v55 = vld [vmem:[%s22979_s7 + $0x78] sm:$0xff]  }
 0xe83   : > { %v9765_v19 = vmax.f32 %v9713_v5, %v9752_v11  ;;  %v9771_v26 = vpack.c.bf16 %v9764_v17, %v9763_v53  ;;  %v19366_v11 = vld [vmem:[%s22979_s7 + $0x70] sm:$0xff]   ;;  %v19368_v17 = vld [vmem:[%s22979_s7 + $0x80] sm:$0xff]  }
 0xe85   : > { %v9772_v27 = vpack.c.bf16 %v9765_v19, %v9765_v19  ;;  %17313 = vmatpush3.bf16.msra.mxu0 %v9771_v26  ;;  %v19369_v26 = vld [vmem:[%s22979_s7 + $0x88] sm:$0xff]  }
 0xe86   : > { %17314 = vmatprep.subr.bf16.mxu0 %v22152_v44 }
 0xe87   : > { %v9802_v21 = vsel %vm6215_vm7, %v9772_v27, 0 }
 0xe89   : > { %17315 = vmatpush3.bf16.msra.mxu0 %v9802_v21 }
 0xe8a   : > { %17328 = vmatprep.subr.bf16.mxu0 %v22152_v44 }
 0xe8c   : > { %17317 = vmatmul.mubr.msk.bf16.vlgmr.msra.gmra.mrb[192].mxu0 %vm9791_vm12, %v19349_v48  ;;  %v19370_v48 = vld [vmem:[%s22979_s7 + $0x90] sm:$0xff]  }
 0xe8d   : > { %17320 = vmatprep.mubr.msk.bf16.mxu0 %vm19785_vm2, %v22152_v44  ;;  %17329 = vmatpush3.bf16.msra.mxu0 %v19352_v4 }
 0xe8e   : > { %17330 = vmatprep.subr.bf16.mxu0 %v22152_v44 }
 0xe91   : > { %17331 = vmatpush3.bf16.msra.mxu0 %v19353_v32  ;;  %v19389_v32 = vld [vmem:[%s22980_s10 + $0x48] sm:$0xff]  }
 0xe92   : > { %17332 = vmatprep.subr.bf16.mxu0 %v22152_v44 }
 0xe94   : > { %17321 = vmatmul.mubr.msk.bf16.gmra.mrb[196].mxu0 %vm9791_vm12, %v19350_v22  ;;  %v19388_v22 = vld [vmem:[%s22980_s10 + $0x40] sm:$0xff]  }
 0xe95   : > { %17324 = vmatprep.mubr.msk.bf16.mxu0 %vm19785_vm2, %v22152_v44  ;;  %17333 = vmatpush3.bf16.msra.mxu0 %v19354_v18 }
 0xe96   : > { %17334 = vmatprep.subr.bf16.mxu0 %v22152_v44  ;;  %17509 = vmatpush3.bf16.msra.mxu1 %v19388_v22 }
 0xe97   : > { %17510 = vmatprep.subr.bf16.mxu1 %v22152_v44 }
 0xe99   : > { %17335 = vmatpush3.bf16.msra.mxu0 %v19355_v15 }
 0xe9a   : > { %17348 = vmatprep.subr.bf16.mxu0 %v22152_v44  ;;  %17511 = vmatpush3.bf16.msra.mxu1 %v19389_v32 }
 0xe9b   : > { %17512 = vmatprep.subr.bf16.mxu1 %v22152_v44 }
 0xe9c   : > { %17325 = vmatmul.mubr.msk.bf16.gmra.mrb[200].mxu0 %vm9791_vm12, %v19351_v36  ;;  %v19371_v36 = vld [vmem:[%s22979_s7 + $0x98] sm:$0xff]  }
 0xe9d   : > { %17336 = vmatprep.mubr.msk.bf16.mxu0 %vm19785_vm2, %v22152_v44 }
 0xf5f   : > { %v9838_v24 = vpop.f32.mrb[192].mxu0 }
 0xf60   : > { %9860 = vst.msk [vmem:[#allocation4 + $0x7] sm:$0xff] %vm1005_vm9, %v9838_v24  ;;  %v17318_v46 = vpop.f32.mrb[193].mxu0  ;;  %v19390_v24 = vld [vmem:[%s22980_s10 + $0x50] sm:$0xff]  }
 0xf61   : > { %v9841_v43 = vpop.f32.mrb[194].mxu0  ;;  %17513 = vmatpush3.bf16.msra.mxu1 %v19390_v24 }
 0xf62   : > { %9861 = vst.msk [vmem:[#allocation4 + $0xf] sm:$0xff] %vm1005_vm9, %v9841_v43  ;;  %v17319_v35 = vpop.f32.mrb[195].mxu0  ;;  %17514 = vmatprep.subr.bf16.mxu1 %v22152_v44 }
 0xf63   : > { %v19372_v35 = vld [vmem:[%s22979_s7 + $0xa0] sm:$0xff]  }
 0xf67   : > { %v9846_v25 = vpop.f32.mrb[196].mxu0  ;;  %v9881_v28 = vld [vmem:[#allocation4 + $0x1] sm:$0xff] }
 0xf68   : > { %9862 = vst.msk [vmem:[#allocation4 + $0x17] sm:$0xff] %vm1005_vm9, %v9846_v25  ;;  %v17322_v30 = vpop.f32.mrb[197].mxu0  ;;  %v9865_v29 = vld [vmem:[#allocation4] sm:$0xff] }
 0xf69   : > { %v9849_v31 = vpop.f32.mrb[198].mxu0  ;;  %v9882_v39 = vld [vmem:[#allocation4 + $0x9] sm:$0xff]  ;;  %v19373_v30 = vld [vmem:[%s22979_s7 + $0xa8] sm:$0xff]  }
 0xf6a   : > { %9863 = vst.msk [vmem:[#allocation4 + $0x1f] sm:$0xff] %vm1005_vm9, %v9849_v31  ;;  %v9886_v47 = vpack.c.bf16 %v9882_v39, %v9881_v28  ;;  %v17323_v8 = vpop.f32.mrb[199].mxu0  ;;  %v22281_v33 = vld [vmem:[#allocation4 + $0x8] sm:$0xff]  ;;  %v19374_v39 = vld [vmem:[%s22979_s7 + $0xb0] sm:$0xff]  }
 0xf6b   : > { %v9870_v45 = vpack.c.bf16 %v22281_v33, %v9865_v29  ;;  %v10077_v63 = vld [vmem:[#allocation4 + $0xa] sm:$0xff]  ;;  %v10076_v10 = vld [vmem:[#allocation4 + $0x2] sm:$0xff] }
 0xf6c   : > { %17337 = vmatmul.mubr.msk.bf16.vlgmr.msra.gmra.mrb[204].mxu0 %vm1005_vm9, %v9886_v47  ;;  %v10081_v6 = vpack.c.bf16 %v10077_v63, %v10076_v10  ;;  %v22324_v5 = vld [vmem:[#allocation4 + $0xe] sm:$0xff]  ;;  %v10187_v53 = vld [vmem:[#allocation4 + $0x6] sm:$0xff] }
 0xf6d   : > { %17340 = vmatprep.mubr.msk.bf16.mxu0 %vm19785_vm2, %v22152_v44  ;;  %17349 = vmatpush3.bf16.msra.mxu0 %v19356_v20  ;;  %v10192_v19 = vpack.c.bf16 %v22324_v5, %v10187_v53  ;;  %v10299_v46 = vld [vmem:[#allocation4 + $0xf] sm:$0xff]  ;;  %v10298_v43 = vld [vmem:[#allocation4 + $0x7] sm:$0xff] }
 0xf6e   : > { %17350 = vmatprep.subr.bf16.mxu0 %v22152_v44  ;;  %v10303_v25 = vpack.c.bf16 %v10299_v46, %v10298_v43  ;;  %v19375_v47 = vld [vmem:[%s22979_s7 + $0xb8] sm:$0xff]   ;;  %v19384_v63 = vld [vmem:[%s22979_s7 + $0x100] sm:$0xff]  }
 0xf6f   : > { %v9854_v49 = vpop.f32.mrb[200].mxu0  ;;  %v9883_v54 = vld [vmem:[#allocation4 + $0x11] sm:$0xff] }
 0xf70   : > { %9864 = vst.msk [vmem:[#allocation4 + $0x27] sm:$0xf] %vm7968_vm11, %v9854_v49  ;;  %v17326_v50 = vpop.f32.mrb[201].mxu0  ;;  %v22292_v16 = vld [vmem:[#allocation4 + $0x10] sm:$0xff] }
 0xf71   : > { %v9884_v37 = vld [vmem:[#allocation4 + $0x19] sm:$0xff]  ;;  %17351 = vmatpush3.bf16.msra.mxu0 %v19357_v41  ;;  %v9857_v9 = vpop.f32.mrb[202].mxu0  ;;  %v9885_v13 = vld [vmem:[#allocation4 + $0x21] sm:$0xf]  ;;  %v19376_v49 = vld [vmem:[%s22979_s7 + $0xc0] sm:$0xff]   ;;  %v10414_v50 = vpack.c.bf16 %v22292_v16, %v22281_v33 }
 0xf72   : > { %v9887_v1 = vpack.c.bf16 %v9884_v37, %v9883_v54  ;;  %17352 = vmatprep.subr.bf16.mxu0 %v22152_v44  ;;  %v17327_v56 = vpop.f32.mrb[203].mxu0  ;;  %v9888_v57 = vpack.c.bf16 %v9885_v13, %v9885_v13  ;;  %v22290_v34 = vld [vmem:[#allocation4 + $0x18] sm:$0xff]  ;;  %v9869_v59 = vld [vmem:[#allocation4 + $0x20] sm:$0xf]  ;;  %v19380_v33 = vld [vmem:[%s22979_s7 + $0xe0] sm:$0xff]  }
 0xf73   : > { %v9871_v23 = vpack.c.bf16 %v22290_v34, %v22292_v16  ;;  %v9872_v0 = vpack.c.bf16 %v9869_v59, %v9869_v59  ;;  %v10079_v3 = vld [vmem:[#allocation4 + $0x1a] sm:$0xff]  ;;  %v10078_v40 = vld [vmem:[#allocation4 + $0x12] sm:$0xff]  ;;  %v10080_v60 = vld [vmem:[#allocation4 + $0x22] sm:$0xf] }
 0xf74   : > { %17341 = vmatmul.mubr.msk.bf16.gmra.mrb[208].mxu0 %vm1005_vm9, %v9887_v1  ;;  %v10082_v14 = vpack.c.bf16 %v10079_v3, %v10078_v40  ;;  %v10083_v12 = vpack.c.bf16 %v10080_v60, %v10080_v60  ;;  %v22333_v27 = vld [vmem:[#allocation4 + $0x1e] sm:$0xff]  ;;  %v22335_v21 = vld [vmem:[#allocation4 + $0x16] sm:$0xff]  ;;  %v19379_v1 = vld [vmem:[%s22979_s7 + $0xd8] sm:$0xff]  }
 0xf75   : > { %17344 = vmatprep.mubr.msk.bf16.mxu0 %vm19785_vm2, %v22152_v44  ;;  %17353 = vmatpush3.bf16.msra.mxu0 %v19358_v42  ;;  %v10193_v4 = vpack.c.bf16 %v22333_v27, %v22335_v21  ;;  %v10301_v31 = vld [vmem:[#allocation4 + $0x1f] sm:$0xff]  ;;  %v10300_v28 = vld [vmem:[#allocation4 + $0x17] sm:$0xff]  ;;  %v10747_v60 = vpack.c.bf16 %v22335_v21, %v22324_v5  ;;  %v19391_v5 = vld [vmem:[%s22980_s10 + $0x58] sm:$0xff]  }
 0xf76   : > { %17354 = vmatprep.subr.bf16.mxu0 %v22152_v44  ;;  %v10304_v20 = vpack.c.bf16 %v10301_v31, %v10300_v28  ;;  %v19377_v54 = vld [vmem:[%s22979_s7 + $0xc8] sm:$0xff]   ;;  %v19378_v42 = vld [vmem:[%s22979_s7 + $0xd0] sm:$0xff]   ;;  %17515 = vmatpush3.bf16.msra.mxu1 %v19391_v5 }
 0xf77   : > { %v10191_v18 = vld [vmem:[#allocation4 + $0x26] sm:$0xf]  ;;  %v10521_v13 = vld [vmem:[#allocation4 + $0x14] sm:$0xff] }
 0xf78   : > { %v10194_v15 = vpack.c.bf16 %v10191_v18, %v10191_v18  ;;  %v10302_v8 = vld [vmem:[#allocation4 + $0x27] sm:$0xf]  ;;  %v10632_v59 = vld [vmem:[#allocation4 + $0x15] sm:$0xff] }
 0xf79   : > { %17355 = vmatpush3.bf16.msra.mxu0 %v19359_v52  ;;  %v10305_v41 = vpack.c.bf16 %v10302_v8, %v10302_v8  ;;  %v10412_v37 = vld [vmem:[#allocation4 + $0x20] sm:$0xff]  ;;  %v10413_v56 = vld [vmem:[#allocation4 + $0x28] sm:$0xf] }
 0xf7a   : > { %17368 = vmatprep.subr.bf16.mxu0 %v22152_v44  ;;  %v10415_v9 = vpack.c.bf16 %v10412_v37, %v22290_v34  ;;  %v10416_v52 = vpack.c.bf16 %v10413_v56, %v10413_v56  ;;  %v19382_v34 = vld [vmem:[%s22979_s7 + $0xf0] sm:$0xff]  }
 0xf7b   : > { %v19386_v3 = vld [vmem:[%s22979_s7 + $0x110] sm:$0xff]  }
 0xf7c   : > { %17345 = vmatmul.mubr.msk.bf16.gmra.mrb[212].mxu0 %vm1005_vm9, %v9888_v57  ;;  %v10520_v57 = vld [vmem:[#allocation4 + $0xc] sm:$0xff]  ;;  %v19394_v21 = vld [vmem:[%s22980_s10 + $0x70] sm:$0xff]  }
 0xf7d   : > { %17356 = vmatprep.mubr.msk.bf16.mxu0 %vm19785_vm2, %v22152_v44  ;;  %v10525_v29 = vpack.c.bf16 %v10521_v13, %v10520_v57 }
 0xf84   : > { %17357 = vmatmul.mubr.msk.bf16.vlgmr.msra.gmra.mrb[204].mxu0 %vm1005_vm9, %v9870_v45  ;;  %v10523_v45 = vld [vmem:[#allocation4 + $0x24] sm:$0xff] }
 0xf85   : > { %17360 = vmatprep.mubr.msk.bf16.mxu0 %vm19785_vm2, %v22152_v44  ;;  %17369 = vmatpush3.bf16.msra.mxu0 %v19360_v58  ;;  %v19381_v58 = vld [vmem:[%s22979_s7 + $0xe8] sm:$0xff]  }
 0xf86   : > { %17370 = vmatprep.subr.bf16.mxu0 %v22152_v44 }
 0xf89   : > { %17371 = vmatpush3.bf16.msra.mxu0 %v19361_v38  ;;  %v10522_v38 = vld [vmem:[#allocation4 + $0x1c] sm:$0xff] }
 0xf8a   : > { %17372 = vmatprep.subr.bf16.mxu0 %v22152_v44  ;;  %v10526_v16 = vpack.c.bf16 %v10523_v45, %v10522_v38 }
 0xf8c   : > { %17361 = vmatmul.mubr.msk.bf16.gmra.mrb[208].mxu0 %vm1005_vm9, %v9871_v23  ;;  %v19383_v23 = vld [vmem:[%s22979_s7 + $0xf8] sm:$0xff]  }
 0xf8d   : > { %17364 = vmatprep.mubr.msk.bf16.mxu0 %vm19785_vm2, %v22152_v44  ;;  %17373 = vmatpush3.bf16.msra.mxu0 %v19362_v61  ;;  %v10524_v61 = vld [vmem:[#allocation4 + $0x2c] sm:$0xf] }
 0xf8e   : > { %17374 = vmatprep.subr.bf16.mxu0 %v22152_v44 }
 0xf91   : > { %17375 = vmatpush3.bf16.msra.mxu0 %v19363_v51  ;;  %v10527_v51 = vpack.c.bf16 %v10524_v61, %v10524_v61  ;;  %v19396_v61 = vld [vmem:[%s22980_s10] sm:$0xff]  }
 0xf92   : > { %17388 = vmatprep.subr.bf16.mxu0 %v22152_v44 }
 0xf94   : > { %17365 = vmatmul.mubr.msk.bf16.gmra.mrb[212].mxu0 %vm1005_vm9, %v9872_v0  ;;  %v10631_v0 = vld [vmem:[#allocation4 + $0xd] sm:$0xff] }
 0xf95   : > { %17376 = vmatprep.mubr.msk.bf16.mxu0 %vm19785_vm2, %v22152_v44  ;;  %v10636_v10 = vpack.c.bf16 %v10632_v59, %v10631_v0 }
 0xf9c   : > { %17377 = vmatmul.mubr.msk.bf16.vlgmr.msra.gmra.mrb[204].mxu0 %vm1005_vm9, %v10081_v6  ;;  %v10634_v6 = vld [vmem:[#allocation4 + $0x25] sm:$0xff] }
 0xf9d   : > { %17380 = vmatprep.mubr.msk.bf16.mxu0 %vm19785_vm2, %v22152_v44  ;;  %17389 = vmatpush3.bf16.msra.mxu0 %v19364_v62  ;;  %v19385_v62 = vld [vmem:[%s22979_s7 + $0x108] sm:$0xff]  }
 0xf9e   : > { %17390 = vmatprep.subr.bf16.mxu0 %v22152_v44 }
 0xfa1   : > { %17391 = vmatpush3.bf16.msra.mxu0 %v19365_v7  ;;  %v10633_v7 = vld [vmem:[#allocation4 + $0x1d] sm:$0xff] }
 0xfa2   : > { %17392 = vmatprep.subr.bf16.mxu0 %v22152_v44  ;;  %v10637_v40 = vpack.c.bf16 %v10634_v6, %v10633_v7 }
 0xfa4   : > { %17381 = vmatmul.mubr.msk.bf16.gmra.mrb[208].mxu0 %vm1005_vm9, %v10082_v14  ;;  %v10635_v14 = vld [vmem:[#allocation4 + $0x2d] sm:$0xf] }
 0xfa5   : > { %17384 = vmatprep.mubr.msk.bf16.mxu0 %vm19785_vm2, %v22152_v44  ;;  %17393 = vmatpush3.bf16.msra.mxu0 %v19366_v11  ;;  %v22417_v11 = vld [vmem:[#allocation5] sm:$0xff] }
 0xfa6   : > { %17394 = vmatprep.subr.bf16.mxu0 %v22152_v44  ;;  %17516 = vmatprep.subr.bf16.mxu1 %v22417_v11 }
 0xfa9   : > { %17395 = vmatpush3.bf16.msra.mxu0 %v19367_v55  ;;  %v19387_v55 = vld [vmem:[%s22979_s7 + $0x118] sm:$0xff]  }
 0xfaa   : > { %17408 = vmatprep.subr.bf16.mxu0 %v22152_v44 }
 0xfac   : > { %17385 = vmatmul.mubr.msk.bf16.gmra.mrb[212].mxu0 %vm1005_vm9, %v10083_v12  ;;  %v10745_v12 = vld [vmem:[#allocation4 + $0x26] sm:$0xff] }
 0xfad   : > { %17396 = vmatprep.mubr.msk.bf16.mxu0 %vm19785_vm2, %v22152_v44  ;;  %v10748_v53 = vpack.c.bf16 %v10745_v12, %v22333_v27  ;;  %v19393_v27 = vld [vmem:[%s22980_s10 + $0x68] sm:$0xff]  }
 0xfb4   : > { %17397 = vmatmul.mubr.msk.bf16.vlgmr.msra.gmra.mrb[204].mxu0 %vm1005_vm9, %v10192_v19 }
 0xfb5   : > { %17400 = vmatprep.mubr.msk.bf16.mxu0 %vm19785_vm2, %v22152_v44  ;;  %17409 = vmatpush3.bf16.msra.mxu0 %v19368_v17  ;;  %v10746_v17 = vld [vmem:[#allocation4 + $0x2e] sm:$0xf] }
 0xfb6   : > { %17410 = vmatprep.subr.bf16.mxu0 %v22152_v44  ;;  %v10749_v19 = vpack.c.bf16 %v10746_v17, %v10746_v17  ;;  %v19402_v17 = vld [vmem:[%s22980_s10 + $0x30] sm:$0xff]  }
 0xfb9   : > { %17411 = vmatpush3.bf16.msra.mxu0 %v19369_v26  ;;  %v19392_v26 = vld [vmem:[%s22980_s10 + $0x60] sm:$0xff]  }
 0xfba   : > { %17412 = vmatprep.subr.bf16.mxu0 %v22152_v44  ;;  %17517 = vmatpush3.bf16.msra.mxu1 %v19392_v26 }
 0xfbb   : > { %17518 = vmatprep.subr.bf16.mxu1 %v22417_v11 }
 0xfbc   : > { %17401 = vmatmul.mubr.msk.bf16.gmra.mrb[208].mxu0 %vm1005_vm9, %v10193_v4  ;;  %v14600_v4 = vld [vmem:[%s22981_s18] ss:$0 sm:$0xff]  ;;  %s22983_s18 = sld [smem:[#allocation20_spill]] }
 0xfbd   : > { %17404 = vmatprep.mubr.msk.bf16.mxu0 %vm19785_vm2, %v22152_v44  ;;  %17413 = vmatpush3.bf16.msra.mxu0 %v19370_v48  ;;  %v19395_v48 = vld [vmem:[%s22980_s10 + $0x78] sm:$0xff]  }
 0xfbe   : > { %17414 = vmatprep.subr.bf16.mxu0 %v22152_v44  ;;  %17519 = vmatpush3.bf16.msra.mxu1 %v19393_v27  ;;  %v19404_v27 = vld [vmem:[%s22980_s10 + $0x80] sm:$0xff]  }
 0xfbf   : > { %17520 = vmatprep.subr.bf16.mxu1 %v22417_v11 }
 0xfc1   : > { %17415 = vmatpush3.bf16.msra.mxu0 %v19371_v36  ;;  %v14601_v36 = vld [vmem:[%s22982_s1] ss:$0 sm:$0xff]  ;;  %s22984_s1 = sld [smem:[#allocation21_spill]] }
 0xfc2   : > { %17428 = vmatprep.subr.bf16.mxu0 %v22152_v44  ;;  %17521 = vmatpush3.bf16.msra.mxu1 %v19394_v21 }
 0xfc3   : > { %17522 = vmatprep.subr.bf16.mxu1 %v22417_v11 }
 0xfc4   : > { %17405 = vmatmul.mubr.msk.bf16.gmra.mrb[212].mxu0 %vm1005_vm9, %v10194_v15 }
 0xfc5   : > { %17416 = vmatprep.mubr.msk.bf16.mxu0 %vm19785_vm2, %v22152_v44 }
 0xfc6   : > { %17523 = vmatpush3.bf16.msra.mxu1 %v19395_v48  ;;  %v19405_v48 = vld [vmem:[%s22980_s10 + $0x88] sm:$0xff]  }
 0xfc7   : > { %17536 = vmatprep.subr.bf16.mxu1 %v22417_v11 }
 0xfcc   : > { %17417 = vmatmul.mubr.msk.bf16.vlgmr.msra.gmra.mrb[204].mxu0 %vm1005_vm9, %v10303_v25 }
 0xfcd   : > { %17420 = vmatprep.mubr.msk.bf16.mxu0 %vm19785_vm2, %v22152_v44  ;;  %17429 = vmatpush3.bf16.msra.mxu0 %v19372_v35 }
 0xfce   : > { %17430 = vmatprep.subr.bf16.mxu0 %v22152_v44 }
 0xfd1   : > { %17431 = vmatpush3.bf16.msra.mxu0 %v19373_v30  ;;  %v10890_v30 = vpop.permute.xlu0 %10889 }
 0xfd2   : > { %17432 = vmatprep.subr.bf16.mxu0 %v22152_v44 }
 0xfd4   : > { %17421 = vmatmul.mubr.msk.bf16.gmra.mrb[208].mxu0 %vm1005_vm9, %v10304_v20 }
 0xfd5   : > { %17424 = vmatprep.mubr.msk.bf16.mxu0 %vm19785_vm2, %v22152_v44  ;;  %17433 = vmatpush3.bf16.msra.mxu0 %v19374_v39  ;;  %v10895_v39 = vpop.permute.xlu1 %10894  ;;  %v10900_v56 = vpop.permute.xlu0 %10899 }
 0xfd6   : > { %17434 = vmatprep.subr.bf16.mxu0 %v22152_v44 }
 0xfd9   : > { %17435 = vmatpush3.bf16.msra.mxu0 %v19375_v47  ;;  %v10905_v57 = vpop.permute.xlu1 %10904 }
 0xfda   : > { %17448 = vmatprep.subr.bf16.mxu0 %v22152_v44 }
 0xfdc   : > { %17425 = vmatmul.mubr.msk.bf16.gmra.mrb[212].mxu0 %vm1005_vm9, %v10305_v41 }
 0xfdd   : > { %17436 = vmatprep.mubr.msk.bf16.mxu0 %vm19785_vm2, %v22152_v44 }
 0xfe4   : > { %17437 = vmatmul.mubr.msk.bf16.vlgmr.msra.gmra.mrb[204].mxu0 %vm1005_vm9, %v10414_v50 }
 0xfe5   : > { %17440 = vmatprep.mubr.msk.bf16.mxu0 %vm19785_vm2, %v22152_v44  ;;  %17449 = vmatpush3.bf16.msra.mxu0 %v19376_v49 }
 0xfe6   : > { %17450 = vmatprep.subr.bf16.mxu0 %v22152_v44 }
 0xfe9   : > { %17451 = vmatpush3.bf16.msra.mxu0 %v19377_v54 }
 0xfea   : > { %17452 = vmatprep.subr.bf16.mxu0 %v22152_v44 }
 0xfec   : > { %17441 = vmatmul.mubr.msk.bf16.gmra.mrb[208].mxu0 %vm1005_vm9, %v10415_v9 }
 0xfed   : > { %17444 = vmatprep.mubr.msk.bf16.mxu0 %vm19785_vm2, %v22152_v44  ;;  %17453 = vmatpush3.bf16.msra.mxu0 %v19378_v42 }
 0xfee   : > { %17454 = vmatprep.subr.bf16.mxu0 %v22152_v44 }
 0xff1   : > { %17455 = vmatpush3.bf16.msra.mxu0 %v19379_v1 }
 0xff2   : > { %17468 = vmatprep.subr.bf16.mxu0 %v22152_v44 }
 0xff4   : > { %17445 = vmatmul.mubr.msk.bf16.gmra.mrb[212].mxu0 %vm1005_vm9, %v10416_v52 }
 0xff5   : > { %17456 = vmatprep.mubr.msk.bf16.mxu0 %vm19785_vm2, %v22152_v44 }
 0xffc   : > { %17457 = vmatmul.mubr.msk.bf16.vlgmr.msra.gmra.mrb[204].mxu0 %vm1005_vm9, %v10525_v29 }
 0xffd   : > { %17460 = vmatprep.mubr.msk.bf16.mxu0 %vm19785_vm2, %v22152_v44  ;;  %17469 = vmatpush3.bf16.msra.mxu0 %v19380_v33 }
 0xffe   : > { %17470 = vmatprep.subr.bf16.mxu0 %v22152_v44 }
0x1001   : > { %17471 = vmatpush3.bf16.msra.mxu0 %v19381_v58 }
0x1002   : > { %17472 = vmatprep.subr.bf16.mxu0 %v22152_v44 }
0x1004   : > { %17461 = vmatmul.mubr.msk.bf16.gmra.mrb[208].mxu0 %vm1005_vm9, %v10526_v16 }
0x1005   : > { %17464 = vmatprep.mubr.msk.bf16.mxu0 %vm19785_vm2, %v22152_v44  ;;  %17473 = vmatpush3.bf16.msra.mxu0 %v19382_v34 }
0x1006   : > { %17474 = vmatprep.subr.bf16.mxu0 %v22152_v44 }
0x1009   : > { %17475 = vmatpush3.bf16.msra.mxu0 %v19383_v23 }
0x100a   : > { %17488 = vmatprep.subr.bf16.mxu0 %v22152_v44 }
0x100c   : > { %17465 = vmatmul.mubr.msk.bf16.gmra.mrb[212].mxu0 %vm1005_vm9, %v10527_v51 }
0x100d   : > { %17476 = vmatprep.mubr.msk.bf16.mxu0 %vm19785_vm2, %v22152_v44 }
0x1014   : > { %17477 = vmatmul.mubr.msk.bf16.vlgmr.msra.gmra.mrb[204].mxu0 %vm1005_vm9, %v10636_v10  ;;  %v10910_v10 = vpop.permute.xlu0 %10909 }
0x1015   : > { %17480 = vmatprep.mubr.msk.bf16.mxu0 %vm19785_vm2, %v22152_v44  ;;  %17489 = vmatpush3.bf16.msra.mxu0 %v19384_v63 }
0x1016   : > { %17490 = vmatprep.subr.bf16.mxu0 %v22152_v44  ;;  %v10638_v44 = vpack.c.bf16 %v10635_v14, %v10635_v14 }
0x1019   : > { %17491 = vmatpush3.bf16.msra.mxu0 %v19385_v62  ;;  %v19397_v62 = vld [vmem:[%s22980_s10 + $0x8] sm:$0xff]  }
0x101a   : > { %17492 = vmatprep.subr.bf16.mxu0 %v22417_v11 }
0x101c   : > { %17481 = vmatmul.mubr.msk.bf16.gmra.mrb[208].mxu0 %vm1005_vm9, %v10637_v40  ;;  %v19398_v40 = vld [vmem:[%s22980_s10 + $0x10] sm:$0xff]  }
0x101d   : > { %17484 = vmatprep.mubr.msk.bf16.mxu0 %vm19785_vm2, %v22417_v11  ;;  %17493 = vmatpush3.bf16.msra.mxu0 %v19386_v3 }
0x101e   : > { %17494 = vmatprep.subr.bf16.mxu0 %v22417_v11 }
0x1021   : > { %17495 = vmatpush3.bf16.msra.mxu0 %v19387_v55  ;;  %v19399_v55 = vld [vmem:[%s22980_s10 + $0x18] sm:$0xff]  }
0x1022   : > { %17760 = vmatprep.subr.bf16.mxu0 %v22417_v11 }
0x1024   : > { %17485 = vmatmul.mubr.msk.bf16.gmra.mrb[212].mxu0 %vm1005_vm9, %v10638_v44 }
0x1025   : > { %17496 = vmatprep.mubr.msk.bf16.mxu0 %vm19785_vm2, %v22417_v11 }
0x102c   : > { %17497 = vmatmul.mubr.msk.bf16.vlgmr.msra.gmra.mrb[204].mxu0 %vm1005_vm9, %v10747_v60  ;;  %v19400_v60 = vld [vmem:[%s22980_s10 + $0x20] sm:$0xff]  }
0x102d   : > { %17500 = vmatprep.mubr.msk.bf16.mxu0 %vm19785_vm2, %v22417_v11 }
0x1034   : > { %17501 = vmatmul.mubr.msk.bf16.gmra.mrb[208].mxu0 %vm1005_vm9, %v10748_v53  ;;  %v19401_v53 = vld [vmem:[%s22980_s10 + $0x28] sm:$0xff]  }
0x1035   : > { %17504 = vmatprep.mubr.msk.bf16.mxu0 %vm19785_vm2, %v22417_v11 }
0x103c   : > { %17505 = vmatmul.mubr.msk.bf16.gmra.mrb[212].mxu0 %vm1005_vm9, %v10749_v19  ;;  %v19403_v19 = vld [vmem:[%s22980_s10 + $0x38] sm:$0xff]  }
0x103d   : > { %17766 = vmatprep.mubr.msk.bf16.mxu0 %vm19785_vm2, %v22417_v11 }
0x10ff   : > { %v10826_v22 = vpop.f32.mrb[204].mxu0 }
0x1100   : > { %v10860_v32 = vmul.f32 %v14600_v4, %v10826_v22  ;;  %v17498_v18 = vpop.f32.mrb[205].mxu0 }
0x1101   : > { %v10829_v15 = vpop.f32.mrb[206].mxu0  ;;  %v19407_v18 = vld [vmem:[%s22980_s10 + $0x98] sm:$0xff]  }
0x1102   : > { %v10872_v24 = vadd.f32 %v14601_v36, %v10860_v32  ;;  %v10861_v46 = vmul.f32 %v14600_v4, %v10829_v15  ;;  %v17499_v43 = vpop.f32.mrb[207].mxu0 }
0x1103   : > { %v19409_v43 = vld [vmem:[%s22980_s10 + $0xa8] sm:$0xff]  }
0x1104   : > { %v10877_v35 = vmax.f32 %v10872_v24, 0.0  ;;  %v10873_v25 = vadd.f32 %v14601_v36, %v10861_v46  ;;  %v19408_v24 = vld [vmem:[%s22980_s10 + $0xa0] sm:$0xff]  }
0x1106   : > { %v22453_v31 = vmul.f32 %v10890_v30, %v10877_v35  ;;  %v10878_v28 = vmax.f32 %v10873_v25, 0.0  ;;  %v19410_v35 = vld [vmem:[%s22980_s10 + $0xb0] sm:$0xff]   ;;  %v19411_v25 = vld [vmem:[%s22980_s10 + $0xb8] sm:$0xff]  }
0x1107   : > { %v10834_v20 = vpop.f32.mrb[208].mxu0 }
0x1108   : > { %10917 = vst [vmem:[#allocation4 + $0x7] sm:$0xff] %v22453_v31  ;;  %v22456_v47 = vmul.f32 %v10895_v39, %v10878_v28  ;;  %v10862_v8 = vmul.f32 %v14600_v4, %v10834_v20  ;;  %v17502_v41 = vpop.f32.mrb[209].mxu0  ;;  %v19412_v39 = vld [vmem:[%s22980_s10 + $0xc0] sm:$0xff]  }
0x1109   : > { %v10837_v49 = vpop.f32.mrb[210].mxu0 }
0x110a   : > { %10918 = vst [vmem:[#allocation4 + $0xf] sm:$0xff] %v22456_v47  ;;  %v10874_v50 = vadd.f32 %v14601_v36, %v10862_v8  ;;  %v10863_v54 = vmul.f32 %v14600_v4, %v10837_v49  ;;  %v17503_v37 = vpop.f32.mrb[211].mxu0  ;;  %v11452_v42 = vpack.c.bf16 %v22456_v47, %v22453_v31  ;;  %v19413_v8 = vld [vmem:[%s22980_s10 + $0xc8] sm:$0xff]   ;;  %v19431_v31 = vld [vmem:[%s22980_s10 + $0x158] sm:$0xff]  }
0x110b   : > { %v19415_v37 = vld [vmem:[%s22980_s10 + $0xd8] sm:$0xff]  }
0x110c   : > { %v10879_v9 = vmax.f32 %v10874_v50, 0.0  ;;  %v10875_v1 = vadd.f32 %v14601_v36, %v10863_v54  ;;  %v19414_v50 = vld [vmem:[%s22980_s10 + $0xd0] sm:$0xff]  }
0x110e   : > { %v22461_v52 = vmul.f32 %v10900_v56, %v10879_v9  ;;  %v10880_v13 = vmax.f32 %v10875_v1, 0.0  ;;  %v19416_v1 = vld [vmem:[%s22980_s10 + $0xe0] sm:$0xff]  }
0x110f   : > { %v10842_v33 = vpop.f32.mrb[212].mxu0  ;;  %v10946_v34 = vld [vmem:[#allocation4 + $0x1] sm:$0xff] }
0x1110   : > { %10919 = vst [vmem:[#allocation4 + $0x17] sm:$0xff] %v22461_v52  ;;  %v22464_v29 = vmul.f32 %v10905_v57, %v10880_v13  ;;  %v10864_v58 = vmul.f32 %v14600_v4, %v10842_v33  ;;  %v17506_v45 = vpop.f32.mrb[213].mxu0  ;;  %v10922_v26 = vld [vmem:[#allocation4] sm:$0xff]  ;;  %v19417_v13 = vld [vmem:[%s22980_s10 + $0xe8] sm:$0xff]   ;;  %v19419_v33 = vld [vmem:[%s22980_s10 + $0xf8] sm:$0xff]  }
0x1111   : > { %v10845_v38 = vpop.f32.mrb[214].mxu0  ;;  %v10947_v16 = vld [vmem:[#allocation4 + $0x9] sm:$0xff]  ;;  %v19418_v57 = vld [vmem:[%s22980_s10 + $0xf0] sm:$0xff]  }
0x1112   : > { %10920 = vst [vmem:[#allocation4 + $0x1f] sm:$0xff] %v22464_v29  ;;  %v10876_v23 = vadd.f32 %v14601_v36, %v10864_v58  ;;  %v17507_v51 = vpop.f32.mrb[215].mxu0  ;;  %v10951_v59 = vpack.c.bf16 %v10947_v16, %v10946_v34  ;;  %v11453_v0 = vpack.c.bf16 %v22464_v29, %v22461_v52  ;;  %v22490_v5 = vld [vmem:[#allocation4 + $0x8] sm:$0xff]  ;;  %v19406_v36 = vld [vmem:[%s22980_s10 + $0x90] sm:$0xff]   ;;  %v19420_v38 = vld [vmem:[%s22980_s10 + $0x100] sm:$0xff]  }
0x1113   : > { %v10927_v21 = vpack.c.bf16 %v22490_v5, %v10922_v26  ;;  %v11180_v30 = vld [vmem:[#allocation4 + $0xa] sm:$0xff]  ;;  %v11179_v28 = vld [vmem:[#allocation4 + $0x2] sm:$0xff]  ;;  %v19421_v16 = vld [vmem:[%s22980_s10 + $0x108] sm:$0xff]  }
0x1114   : > { %v10881_v63 = vmax.f32 %v10876_v23, 0.0  ;;  %17525 = vmatmul.mubr.bf16.vlgmr.msra.gmra.mrb[88].mxu1 %v10951_v59  ;;  %v11184_v20 = vpack.c.bf16 %v11180_v30, %v11179_v28  ;;  %v22543_v58 = vld [vmem:[#allocation4 + $0xe] sm:$0xff]  ;;  %v11313_v45 = vld [vmem:[#allocation4 + $0x6] sm:$0xff]  ;;  %v19433_v52 = vld [vmem:[%s22980_s10 + $0x168] sm:$0xff]  }
0x1115   : > { %17537 = vmatpush3.bf16.msra.mxu1 %v19396_v61  ;;  %17528 = vmatprep.mubr.msk.bf16.mxu1 %vm19785_vm2, %v22417_v11  ;;  %v11318_v34 = vpack.c.bf16 %v22543_v58, %v11313_v45  ;;  %v19422_v51 = vld [vmem:[%s22980_s10 + $0x110] sm:$0xff]  }
0x1116   : > { %v10916_v6 = vmul.f32 %v10910_v10, %v10881_v63  ;;  %17538 = vmatprep.subr.bf16.mxu1 %v22417_v11  ;;  %v19423_v63 = vld [vmem:[%s22980_s10 + $0x118] sm:$0xff]   ;;  %v19434_v29 = vld [vmem:[%s22980_s10 + $0x170] sm:$0xff]  }
0x1117   : > { %v10948_v7 = vld [vmem:[#allocation4 + $0x11] sm:$0xff]  ;;  %v19438_v26 = vld [vmem:[%s22980_s10 + $0x190] sm:$0xff]  }
0x1118   : > { %10921 = vst [vmem:[#allocation4 + $0x27] sm:$0xf] %v10916_v6  ;;  %v22501_v22 = vld [vmem:[#allocation4 + $0x10] sm:$0xff]  ;;  %v19446_v30 = vld [vmem:[%s22980_s10 + $0x1d0] sm:$0xff]  }
0x1119   : > { %17539 = vmatpush3.bf16.msra.mxu1 %v19397_v62  ;;  %v10949_v3 = vld [vmem:[#allocation4 + $0x19] sm:$0xff]  ;;  %v10950_v44 = vld [vmem:[#allocation4 + $0x21] sm:$0xf]  ;;  %v19424_v62 = vld [vmem:[%s22980_s10 + $0x120] sm:$0xff]  }
0x111a   : > { %17540 = vmatprep.subr.bf16.mxu1 %v22417_v11  ;;  %v10952_v14 = vpack.c.bf16 %v10949_v3, %v10948_v7  ;;  %v10953_v12 = vpack.c.bf16 %v10950_v44, %v10950_v44  ;;  %v22499_v4 = vld [vmem:[#allocation4 + $0x18] sm:$0xff]  ;;  %v10926_v15 = vld [vmem:[#allocation4 + $0x20] sm:$0xf] }
0x111b   : > { %v10928_v32 = vpack.c.bf16 %v22499_v4, %v22501_v22  ;;  %v10929_v46 = vpack.c.bf16 %v10926_v15, %v10926_v15  ;;  %v11182_v41 = vld [vmem:[#allocation4 + $0x1a] sm:$0xff]  ;;  %v11181_v49 = vld [vmem:[#allocation4 + $0x12] sm:$0xff]  ;;  %v11183_v9 = vld [vmem:[#allocation4 + $0x22] sm:$0xf] }
0x111c   : > { %17529 = vmatmul.mubr.bf16.gmra.mrb[92].mxu1 %v10952_v14  ;;  %v11185_v54 = vpack.c.bf16 %v11182_v41, %v11181_v49  ;;  %v11186_v56 = vpack.c.bf16 %v11183_v9, %v11183_v9  ;;  %v22552_v61 = vld [vmem:[#allocation4 + $0x1e] sm:$0xff]  ;;  %v22554_v23 = vld [vmem:[#allocation4 + $0x16] sm:$0xff]  ;;  %v11715_v15 = vld [vmem:[#allocation4 + $0xc] sm:$0xff] }
0x111d   : > { %17541 = vmatpush3.bf16.msra.mxu1 %v19398_v40  ;;  %17532 = vmatprep.mubr.msk.bf16.mxu1 %vm19785_vm2, %v22417_v11  ;;  %v11319_v59 = vpack.c.bf16 %v22552_v61, %v22554_v23  ;;  %v19425_v7 = vld [vmem:[%s22980_s10 + $0x128] sm:$0xff]   ;;  %v19426_v3 = vld [vmem:[%s22980_s10 + $0x130] sm:$0xff]   ;;  %v19427_v40 = vld [vmem:[%s22980_s10 + $0x138] sm:$0xff]  }
0x111e   : > { %17542 = vmatprep.subr.bf16.mxu1 %v22417_v11  ;;  %v19428_v14 = vld [vmem:[%s22980_s10 + $0x140] sm:$0xff]   ;;  %v19430_v44 = vld [vmem:[%s22980_s10 + $0x150] sm:$0xff]   ;;  %v19449_v49 = vld [vmem:[%s22980_s10 + $0x1e8] sm:$0xff]  }
0x111f   : > { %v11317_v10 = vld [vmem:[#allocation4 + $0x26] sm:$0xf]  ;;  %v19448_v41 = vld [vmem:[%s22980_s10 + $0x1e0] sm:$0xff]  }
0x1120   : > { %v11320_v6 = vpack.c.bf16 %v11317_v10, %v11317_v10  ;;  %v11451_v47 = vld [vmem:[#allocation4 + $0x27] sm:$0xf]  ;;  %v11849_v9 = vld [vmem:[#allocation4 + $0xd] sm:$0xff] }
0x1121   : > { %17543 = vmatpush3.bf16.msra.mxu1 %v19399_v55  ;;  %v19429_v55 = vld [vmem:[%s22980_s10 + $0x148] sm:$0xff]   ;;  %v19454_v45 = vld [vmem:[%s22980_s10 + $0x210] sm:$0xff]  }
0x1122   : > { %17544 = vmatprep.subr.bf16.mxu1 %v22417_v11  ;;  %v19458_v10 = vld [vmem:[%s22980_s10 + $0x230] sm:$0xff]  }
0x1124   : > { %17533 = vmatmul.mubr.bf16.gmra.mrb[96].mxu1 %v10953_v12  ;;  %v19436_v12 = vld [vmem:[%s22980_s10 + $0x180] sm:$0xff]  }
0x1125   : > { %17545 = vmatpush3.bf16.msra.mxu1 %v19400_v60  ;;  %17552 = vmatprep.mubr.msk.bf16.mxu1 %vm19785_vm2, %v22417_v11  ;;  %v11454_v60 = vpack.c.bf16 %v11451_v47, %v11451_v47 }
0x1126   : > { %17546 = vmatprep.subr.bf16.mxu1 %v22417_v11 }
0x1129   : > { %17547 = vmatpush3.bf16.msra.mxu1 %v19401_v53  ;;  %v11586_v53 = vpack.c.bf16 %v22501_v22, %v22490_v5  ;;  %v19439_v5 = vld [vmem:[%s22980_s10 + $0x198] sm:$0xff]  }
0x112a   : > { %17548 = vmatprep.subr.bf16.mxu1 %v22417_v11 }
0x112d   : > { %17549 = vmatpush3.bf16.msra.mxu1 %v19402_v17  ;;  %v19437_v17 = vld [vmem:[%s22980_s10 + $0x188] sm:$0xff]  }
0x112e   : > { %17550 = vmatprep.subr.bf16.mxu1 %v22417_v11 }
0x1131   : > { %17551 = vmatpush3.bf16.msra.mxu1 %v19403_v19  ;;  %v11584_v19 = vld [vmem:[#allocation4 + $0x20] sm:$0xff] }
0x1132   : > { %17564 = vmatprep.subr.bf16.mxu1 %v22417_v11 }
0x1134   : > { %17553 = vmatmul.mubr.bf16.vlgmr.msra.gmra.mrb[88].mxu1 %v10927_v21  ;;  %v11585_v21 = vld [vmem:[#allocation4 + $0x28] sm:$0xf] }
0x1135   : > { %17565 = vmatpush3.bf16.msra.mxu1 %v19404_v27  ;;  %17556 = vmatprep.mubr.msk.bf16.mxu1 %vm19785_vm2, %v22417_v11  ;;  %v11587_v27 = vpack.c.bf16 %v11584_v19, %v22499_v4  ;;  %v11588_v22 = vpack.c.bf16 %v11585_v21, %v11585_v21  ;;  %v19441_v4 = vld [vmem:[%s22980_s10 + $0x1a8] sm:$0xff]  }
0x1136   : > { %17566 = vmatprep.subr.bf16.mxu1 %v22417_v11 }
0x1139   : > { %17567 = vmatpush3.bf16.msra.mxu1 %v19405_v48  ;;  %v19440_v48 = vld [vmem:[%s22980_s10 + $0x1a0] sm:$0xff]  }
0x113a   : > { %17568 = vmatprep.subr.bf16.mxu1 %v22417_v11 }
0x113c   : > { %17557 = vmatmul.mubr.bf16.gmra.mrb[92].mxu1 %v10928_v32  ;;  %v19443_v32 = vld [vmem:[%s22980_s10 + $0x1b8] sm:$0xff]  }
0x113d   : > { %17569 = vmatpush3.bf16.msra.mxu1 %v19406_v36  ;;  %17560 = vmatprep.mubr.msk.bf16.mxu1 %vm19785_vm2, %v22417_v11  ;;  %v19442_v36 = vld [vmem:[%s22980_s10 + $0x1b0] sm:$0xff]  }
0x113e   : > { %17570 = vmatprep.subr.bf16.mxu1 %v22417_v11 }
0x1141   : > { %17571 = vmatpush3.bf16.msra.mxu1 %v19407_v18  ;;  %v11716_v18 = vld [vmem:[#allocation4 + $0x14] sm:$0xff] }
0x1142   : > { %17572 = vmatprep.subr.bf16.mxu1 %v22417_v11 }
0x1144   : > { %17561 = vmatmul.mubr.bf16.gmra.mrb[96].mxu1 %v10929_v46  ;;  %v11720_v46 = vpack.c.bf16 %v11716_v18, %v11715_v15 }
0x1145   : > { %17573 = vmatpush3.bf16.msra.mxu1 %v19408_v24  ;;  %17580 = vmatprep.mubr.msk.bf16.mxu1 %vm19785_vm2, %v22417_v11  ;;  %v19444_v24 = vld [vmem:[%s22980_s10 + $0x1c0] sm:$0xff]  }
0x1146   : > { %17574 = vmatprep.subr.bf16.mxu1 %v22417_v11 }
0x1149   : > { %17575 = vmatpush3.bf16.msra.mxu1 %v19409_v43  ;;  %v19445_v43 = vld [vmem:[%s22980_s10 + $0x1c8] sm:$0xff]  }
0x114a   : > { %17576 = vmatprep.subr.bf16.mxu1 %v22417_v11 }
0x114d   : > { %17577 = vmatpush3.bf16.msra.mxu1 %v19410_v35  ;;  %v11718_v35 = vld [vmem:[#allocation4 + $0x24] sm:$0xff] }
0x114e   : > { %17578 = vmatprep.subr.bf16.mxu1 %v22417_v11 }
0x1151   : > { %17579 = vmatpush3.bf16.msra.mxu1 %v19411_v25  ;;  %v11717_v25 = vld [vmem:[#allocation4 + $0x1c] sm:$0xff] }
0x1152   : > { %17592 = vmatprep.subr.bf16.mxu1 %v22417_v11  ;;  %v11721_v28 = vpack.c.bf16 %v11718_v35, %v11717_v25 }
0x1154   : > { %17581 = vmatmul.mubr.bf16.vlgmr.msra.gmra.mrb[88].mxu1 %v11184_v20  ;;  %v11719_v20 = vld [vmem:[#allocation4 + $0x2c] sm:$0xf] }
0x1155   : > { %17593 = vmatpush3.bf16.msra.mxu1 %v19412_v39  ;;  %17584 = vmatprep.mubr.msk.bf16.mxu1 %vm19785_vm2, %v22417_v11  ;;  %v19447_v39 = vld [vmem:[%s22980_s10 + $0x1d8] sm:$0xff]  }
0x1156   : > { %17594 = vmatprep.subr.bf16.mxu1 %v22417_v11 }
0x1159   : > { %17595 = vmatpush3.bf16.msra.mxu1 %v19413_v8  ;;  %v11722_v8 = vpack.c.bf16 %v11719_v20, %v11719_v20 }
0x115a   : > { %17596 = vmatprep.subr.bf16.mxu1 %v22417_v11 }
0x115c   : > { %17585 = vmatmul.mubr.bf16.gmra.mrb[92].mxu1 %v11185_v54  ;;  %v19451_v54 = vld [vmem:[%s22980_s10 + $0x1f8] sm:$0xff]  }
0x115d   : > { %17597 = vmatpush3.bf16.msra.mxu1 %v19414_v50  ;;  %17588 = vmatprep.mubr.msk.bf16.mxu1 %vm19785_vm2, %v22417_v11  ;;  %v19450_v50 = vld [vmem:[%s22980_s10 + $0x1f0] sm:$0xff]  }
0x115e   : > { %17598 = vmatprep.subr.bf16.mxu1 %v22417_v11 }
0x1161   : > { %17599 = vmatpush3.bf16.msra.mxu1 %v19415_v37  ;;  %v11850_v37 = vld [vmem:[#allocation4 + $0x15] sm:$0xff] }
0x1162   : > { %17600 = vmatprep.subr.bf16.mxu1 %v22417_v11 }
0x1164   : > { %17589 = vmatmul.mubr.bf16.gmra.mrb[96].mxu1 %v11186_v56  ;;  %v11854_v56 = vpack.c.bf16 %v11850_v37, %v11849_v9 }
0x1165   : > { %17601 = vmatpush3.bf16.msra.mxu1 %v19416_v1  ;;  %17608 = vmatprep.mubr.msk.bf16.mxu1 %vm19785_vm2, %v22417_v11  ;;  %v19452_v1 = vld [vmem:[%s22980_s10 + $0x200] sm:$0xff]  }
0x1166   : > { %17602 = vmatprep.subr.bf16.mxu1 %v22417_v11 }
0x1169   : > { %17603 = vmatpush3.bf16.msra.mxu1 %v19417_v13  ;;  %v19453_v13 = vld [vmem:[%s22980_s10 + $0x208] sm:$0xff]  }
0x116a   : > { %17604 = vmatprep.subr.bf16.mxu1 %v22417_v11 }
0x116d   : > { %17605 = vmatpush3.bf16.msra.mxu1 %v19418_v57  ;;  %v11852_v57 = vld [vmem:[#allocation4 + $0x25] sm:$0xff] }
0x116e   : > { %17606 = vmatprep.subr.bf16.mxu1 %v22417_v11 }
0x1171   : > { %17607 = vmatpush3.bf16.msra.mxu1 %v19419_v33  ;;  %v11851_v33 = vld [vmem:[#allocation4 + $0x1d] sm:$0xff] }
0x1172   : > { %17620 = vmatprep.subr.bf16.mxu1 %v22417_v11 }
0x1174   : > { %17609 = vmatmul.mubr.bf16.vlgmr.msra.gmra.mrb[88].mxu1 %v11318_v34  ;;  %v19455_v34 = vld [vmem:[%s22980_s10 + $0x218] sm:$0xff]  }
0x1175   : > { %17621 = vmatpush3.bf16.msra.mxu1 %v19420_v38  ;;  %17612 = vmatprep.mubr.msk.bf16.mxu1 %vm19785_vm2, %v22417_v11  ;;  %v11855_v38 = vpack.c.bf16 %v11852_v57, %v11851_v33 }
0x1176   : > { %17622 = vmatprep.subr.bf16.mxu1 %v22417_v11 }
0x1179   : > { %17623 = vmatpush3.bf16.msra.mxu1 %v19421_v16  ;;  %v11853_v16 = vld [vmem:[#allocation4 + $0x2d] sm:$0xf] }
0x117a   : > { %17624 = vmatprep.subr.bf16.mxu1 %v22417_v11 }
0x117c   : > { %17613 = vmatmul.mubr.bf16.gmra.mrb[92].mxu1 %v11319_v59  ;;  %v19456_v59 = vld [vmem:[%s22980_s10 + $0x220] sm:$0xff]  }
0x117d   : > { %17625 = vmatpush3.bf16.msra.mxu1 %v19422_v51  ;;  %17616 = vmatprep.mubr.msk.bf16.mxu1 %vm19785_vm2, %v22417_v11  ;;  %v11856_v51 = vpack.c.bf16 %v11853_v16, %v11853_v16 }
0x117e   : > { %17626 = vmatprep.subr.bf16.mxu1 %v22417_v11 }
0x1181   : > { %17627 = vmatpush3.bf16.msra.mxu1 %v19423_v63  ;;  %v19457_v63 = vld [vmem:[%s22980_s10 + $0x228] sm:$0xff]  }
0x1182   : > { %17628 = vmatprep.subr.bf16.mxu1 %v22417_v11 }
0x1184   : > { %17617 = vmatmul.mubr.bf16.gmra.mrb[96].mxu1 %v11320_v6  ;;  %v11988_v6 = vpack.c.bf16 %v22554_v23, %v22543_v58 }
0x1185   : > { %17629 = vmatpush3.bf16.msra.mxu1 %v19424_v62  ;;  %17636 = vmatprep.mubr.msk.bf16.mxu1 %vm19785_vm2, %v22417_v11  ;;  %v19459_v62 = vld [vmem:[%s22980_s10 + $0x238] sm:$0xff]  }
0x1186   : > { %17630 = vmatprep.subr.bf16.mxu1 %v22417_v11 }
0x1189   : > { %17631 = vmatpush3.bf16.msra.mxu1 %v19425_v7  ;;  %v11986_v7 = vld [vmem:[#allocation4 + $0x26] sm:$0xff] }
0x118a   : > { %17632 = vmatprep.subr.bf16.mxu1 %v22417_v11 }
0x118d   : > { %17633 = vmatpush3.bf16.msra.mxu1 %v19426_v3  ;;  %v11989_v3 = vpack.c.bf16 %v11986_v7, %v22552_v61 }
0x118e   : > { %17634 = vmatprep.subr.bf16.mxu1 %v22417_v11 }
0x1191   : > { %17635 = vmatpush3.bf16.msra.mxu1 %v19427_v40  ;;  %v11987_v40 = vld [vmem:[#allocation4 + $0x2e] sm:$0xf] }
0x1192   : > { %17648 = vmatprep.subr.bf16.mxu1 %v22417_v11 }
0x1194   : > { %17637 = vmatmul.mubr.bf16.vlgmr.msra.gmra.mrb[88].mxu1 %v11452_v42  ;;  %v19432_v42 = vld [vmem:[%s22980_s10 + $0x160] sm:$0xff]  }
0x1195   : > { %17649 = vmatpush3.bf16.msra.mxu1 %v19428_v14  ;;  %17640 = vmatprep.mubr.msk.bf16.mxu1 %vm19785_vm2, %v22417_v11  ;;  %v11990_v14 = vpack.c.bf16 %v11987_v40, %v11987_v40 }
0x1196   : > { %17650 = vmatprep.subr.bf16.mxu1 %v22417_v11 }
0x1199   : > { %17651 = vmatpush3.bf16.msra.mxu1 %v19429_v55  ;;  %v14802_v55 = vld [vmem:[%s22983_s18] ss:$0 sm:$0xff]  ;;  %s22985_s18 = sld [smem:[#allocation22_spill]] }
0x119a   : > { %17652 = vmatprep.subr.bf16.mxu1 %v22417_v11 }
0x119c   : > { %17641 = vmatmul.mubr.bf16.gmra.mrb[92].mxu1 %v11453_v0  ;;  %v19435_v0 = vld [vmem:[%s22980_s10 + $0x178] sm:$0xff]  }
0x119d   : > { %17653 = vmatpush3.bf16.msra.mxu1 %v19430_v44  ;;  %17644 = vmatprep.mubr.msk.bf16.mxu1 %vm19785_vm2, %v22417_v11 }
0x119e   : > { %17654 = vmatprep.subr.bf16.mxu1 %v22417_v11 }
0x11a1   : > { %17655 = vmatpush3.bf16.msra.mxu1 %v19431_v31  ;;  %v14803_v31 = vld [vmem:[%s22984_s1] ss:$0 sm:$0xff]  ;;  %s22986_s1 = sld [smem:[#allocation25_spill]] }
0x11a2   : > { %17656 = vmatprep.subr.bf16.mxu1 %v22417_v11 }
0x11a4   : > { %17645 = vmatmul.mubr.bf16.gmra.mrb[96].mxu1 %v11454_v60 }
0x11a5   : > { %17657 = vmatpush3.bf16.msra.mxu1 %v19432_v42  ;;  %17664 = vmatprep.mubr.msk.bf16.mxu1 %vm19785_vm2, %v22417_v11 }
0x11a6   : > { %17658 = vmatprep.subr.bf16.mxu1 %v22417_v11 }
0x11a9   : > { %17659 = vmatpush3.bf16.msra.mxu1 %v19433_v52 }
0x11aa   : > { %17660 = vmatprep.subr.bf16.mxu1 %v22417_v11 }
0x11ad   : > { %17661 = vmatpush3.bf16.msra.mxu1 %v19434_v29 }
0x11ae   : > { %17662 = vmatprep.subr.bf16.mxu1 %v22417_v11 }
0x11b1   : > { %17663 = vmatpush3.bf16.msra.mxu1 %v19435_v0 }
0x11b2   : > { %17676 = vmatprep.subr.bf16.mxu1 %v22417_v11 }
0x11b4   : > { %17665 = vmatmul.mubr.bf16.vlgmr.msra.gmra.mrb[88].mxu1 %v11586_v53 }
0x11b5   : > { %17677 = vmatpush3.bf16.msra.mxu1 %v19436_v12  ;;  %17668 = vmatprep.mubr.msk.bf16.mxu1 %vm19785_vm2, %v22417_v11  ;;  %v12154_v12 = vpop.permute.xlu1 %12153 }
0x11b6   : > { %17678 = vmatprep.subr.bf16.mxu1 %v22417_v11 }
0x11b9   : > { %17679 = vmatpush3.bf16.msra.mxu1 %v19437_v17  ;;  %v12159_v17 = vpop.permute.xlu0 %12158  ;;  %v12164_v18 = vpop.permute.xlu1 %12163 }
0x11ba   : > { %17680 = vmatprep.subr.bf16.mxu1 %v22417_v11 }
0x11bc   : > { %17669 = vmatmul.mubr.bf16.gmra.mrb[92].mxu1 %v11587_v27 }
0x11bd   : > { %17681 = vmatpush3.bf16.msra.mxu1 %v19438_v26  ;;  %17672 = vmatprep.mubr.msk.bf16.mxu1 %vm19785_vm2, %v22417_v11 }
0x11be   : > { %17682 = vmatprep.subr.bf16.mxu1 %v22417_v11 }
0x11c1   : > { %17683 = vmatpush3.bf16.msra.mxu1 %v19439_v5 }
0x11c2   : > { %17684 = vmatprep.subr.bf16.mxu1 %v22417_v11 }
0x11c4   : > { %17673 = vmatmul.mubr.bf16.gmra.mrb[96].mxu1 %v11588_v22 }
0x11c5   : > { %17685 = vmatpush3.bf16.msra.mxu1 %v19440_v48  ;;  %17692 = vmatprep.mubr.msk.bf16.mxu1 %vm19785_vm2, %v22417_v11 }
0x11c6   : > { %17686 = vmatprep.subr.bf16.mxu1 %v22417_v11 }
0x11c9   : > { %17687 = vmatpush3.bf16.msra.mxu1 %v19441_v4 }
0x11ca   : > { %17688 = vmatprep.subr.bf16.mxu1 %v22417_v11 }
0x11cd   : > { %17689 = vmatpush3.bf16.msra.mxu1 %v19442_v36 }
0x11ce   : > { %17690 = vmatprep.subr.bf16.mxu1 %v22417_v11 }
0x11d1   : > { %17691 = vmatpush3.bf16.msra.mxu1 %v19443_v32 }
0x11d2   : > { %17704 = vmatprep.subr.bf16.mxu1 %v22417_v11 }
0x11d4   : > { %17693 = vmatmul.mubr.bf16.vlgmr.msra.gmra.mrb[88].mxu1 %v11720_v46  ;;  %v12169_v46 = vpop.permute.xlu0 %12168 }
0x11d5   : > { %17705 = vmatpush3.bf16.msra.mxu1 %v19444_v24  ;;  %17696 = vmatprep.mubr.msk.bf16.mxu1 %vm19785_vm2, %v22417_v11 }
0x11d6   : > { %17706 = vmatprep.subr.bf16.mxu1 %v22417_v11 }
0x11d9   : > { %17707 = vmatpush3.bf16.msra.mxu1 %v19445_v43 }
0x11da   : > { %17708 = vmatprep.subr.bf16.mxu1 %v22417_v11 }
0x11dc   : > { %17697 = vmatmul.mubr.bf16.gmra.mrb[92].mxu1 %v11721_v28 }
0x11dd   : > { %17709 = vmatpush3.bf16.msra.mxu1 %v19446_v30  ;;  %17700 = vmatprep.mubr.msk.bf16.mxu1 %vm19785_vm2, %v22417_v11 }
0x11de   : > { %17710 = vmatprep.subr.bf16.mxu1 %v22417_v11 }
0x11e1   : > { %17711 = vmatpush3.bf16.msra.mxu1 %v19447_v39 }
0x11e2   : > { %17712 = vmatprep.subr.bf16.mxu1 %v22417_v11 }
0x11e4   : > { %17701 = vmatmul.mubr.bf16.gmra.mrb[96].mxu1 %v11722_v8 }
0x11e5   : > { %17713 = vmatpush3.bf16.msra.mxu1 %v19448_v41  ;;  %17720 = vmatprep.mubr.msk.bf16.mxu1 %vm19785_vm2, %v22417_v11 }
0x11e6   : > { %17714 = vmatprep.subr.bf16.mxu1 %v22417_v11 }
0x11e9   : > { %17715 = vmatpush3.bf16.msra.mxu1 %v19449_v49 }
0x11ea   : > { %17716 = vmatprep.subr.bf16.mxu1 %v22417_v11 }
0x11ed   : > { %17717 = vmatpush3.bf16.msra.mxu1 %v19450_v50 }
0x11ee   : > { %17718 = vmatprep.subr.bf16.mxu1 %v22417_v11 }
0x11f1   : > { %17719 = vmatpush3.bf16.msra.mxu1 %v19451_v54  ;;  %v12174_v54 = vpop.permute.xlu1 %12173 }
0x11f2   : > { %17732 = vmatprep.subr.bf16.mxu1 %v22417_v11 }
0x11f4   : > { %17721 = vmatmul.mubr.bf16.vlgmr.msra.gmra.mrb[88].mxu1 %v11854_v56 }
0x11f5   : > { %17733 = vmatpush3.bf16.msra.mxu1 %v19452_v1  ;;  %17724 = vmatprep.mubr.msk.bf16.mxu1 %vm19785_vm2, %v22417_v11 }
0x11f6   : > { %17734 = vmatprep.subr.bf16.mxu1 %v22417_v11 }
0x11f9   : > { %17735 = vmatpush3.bf16.msra.mxu1 %v19453_v13 }
0x11fa   : > { %17736 = vmatprep.subr.bf16.mxu1 %v22417_v11 }
0x11fc   : > { %17725 = vmatmul.mubr.bf16.gmra.mrb[92].mxu1 %v11855_v38 }
0x11fd   : > { %17737 = vmatpush3.bf16.msra.mxu1 %v19454_v45  ;;  %17728 = vmatprep.mubr.msk.bf16.mxu1 %vm19785_vm2, %v22417_v11 }
0x11fe   : > { %17738 = vmatprep.subr.bf16.mxu1 %v22417_v11 }
0x1201   : > { %17739 = vmatpush3.bf16.msra.mxu1 %v19455_v34 }
0x1202   : > { %17740 = vmatprep.subr.bf16.mxu1 %v22417_v11 }
0x1204   : > { %17729 = vmatmul.mubr.bf16.gmra.mrb[96].mxu1 %v11856_v51 }
0x1205   : > { %17741 = vmatpush3.bf16.msra.mxu1 %v19456_v59  ;;  %17748 = vmatprep.mubr.msk.bf16.mxu1 %vm19785_vm2, %v22417_v11 }
0x1206   : > { %17742 = vmatprep.subr.bf16.mxu1 %v22417_v11 }
0x1209   : > { %17743 = vmatpush3.bf16.msra.mxu1 %v19457_v63 }
0x120a   : > { %17744 = vmatprep.subr.bf16.mxu1 %v22417_v11 }
0x120d   : > { %17745 = vmatpush3.bf16.msra.mxu1 %v19458_v10  ;;  %v12205_v10 = vld [vmem:[#allocation4 + $0x2d] sm:$0xf] }
0x120e   : > { %17746 = vmatprep.subr.bf16.mxu1 %v22417_v11 }
0x1211   : > { %17747 = vmatpush3.bf16.msra.mxu1 %v19459_v62  ;;  %v12210_v62 = vld [vmem:[#allocation4 + $0x2e] sm:$0xf] }
0x1214   : > { %17749 = vmatmul.mubr.bf16.vlgmr.msra.gmra.mrb[88].mxu1 %v11988_v6 }
0x1215   : > { %17752 = vmatprep.mubr.msk.bf16.mxu1 %vm19785_vm2, %v22417_v11 }
0x121c   : > { %17753 = vmatmul.mubr.bf16.gmra.mrb[92].mxu1 %v11989_v3 }
0x121d   : > { %17756 = vmatprep.mubr.msk.bf16.mxu1 %vm19785_vm2, %v22417_v11 }
0x1224   : > { %17757 = vmatmul.mubr.bf16.gmra.mrb[96].mxu1 %v11990_v14 }
0x12e7   : > { %v12090_v44 = vpop.f32.mrb[88].mxu1 }
0x12e8   : > { %v12124_v47 = vmul.f32 %v14802_v55, %v12090_v44  ;;  %v17750_v42 = vpop.f32.mrb[89].mxu1 }
0x12e9   : > { %v12093_v58 = vpop.f32.mrb[90].mxu1 }
0x12ea   : > { %v12136_v23 = vadd.f32 %v14803_v31, %v12124_v47  ;;  %v12125_v60 = vmul.f32 %v14802_v55, %v12093_v58  ;;  %v17751_v52 = vpop.f32.mrb[91].mxu1 }
0x12ec   : > { %v12141_v29 = vmax.f32 %v12136_v23, 0.0  ;;  %v12137_v0 = vadd.f32 %v14803_v31, %v12125_v60 }
0x12ee   : > { %v12176_v61 = vmul.f32 %v12154_v12, %v12141_v29  ;;  %v12142_v53 = vmax.f32 %v12137_v0, 0.0  ;;  %v19463_v12 = vld [vmem:[%s22985_s18 + $0x84] ss:$8 sps:$4 sm:$0xff]  }
0x12ef   : > { %v12098_v19 = vpop.f32.mrb[92].mxu1 }
0x12f0   : > { %12181 = vst [vmem:[#allocation4 + $0x7] sm:$0xff] %v12176_v61  ;;  %v12177_v26 = vmul.f32 %v12159_v17, %v12142_v53  ;;  %v12126_v27 = vmul.f32 %v14802_v55, %v12098_v19  ;;  %v17754_v5 = vpop.f32.mrb[93].mxu1  ;;  %v19460_v53 = vld [vmem:[%s19945_s24] sm:$0xff]   ;;  %v19466_v19 = vld [vmem:[%s22985_s18 + $0x94] ss:$8 sps:$4 sm:$0xff]  }
0x12f1   : > { %v12101_v21 = vpop.f32.mrb[94].mxu1  ;;  %v19461_v17 = vld [vmem:[%s22985_s18 + $0x80] ss:$8 sps:$4 sm:$0xff]   ;;  %v19472_v5 = vld [vmem:[%s22985_s18 + $0xb4] ss:$8 sps:$4 sm:$0xff]  }
0x12f2   : > { %12182 = vst [vmem:[#allocation4 + $0xf] sm:$0xff] %v12177_v26  ;;  %v12138_v48 = vadd.f32 %v14803_v31, %v12126_v27  ;;  %v12127_v22 = vmul.f32 %v14802_v55, %v12101_v21  ;;  %v17755_v4 = vpop.f32.mrb[95].mxu1  ;;  %v19467_v27 = vld [vmem:[%s22985_s18 + $0xa0] ss:$8 sps:$4 sm:$0xff]   ;;  %v19470_v21 = vld [vmem:[%s22985_s18 + $0xb0] ss:$8 sps:$4 sm:$0xff]  }
0x12f3   : > { %v19476_v4 = vld [vmem:[%s22985_s18 + $0xd0] ss:$8 sps:$4 sm:$0xff]  }
0x12f4   : > { %v12143_v36 = vmax.f32 %v12138_v48, 0.0  ;;  %v12139_v32 = vadd.f32 %v14803_v31, %v12127_v22  ;;  %v19475_v48 = vld [vmem:[%s22985_s18 + $0xc4] ss:$8 sps:$4 sm:$0xff]   ;;  %v19473_v22 = vld [vmem:[%s22985_s18 + $0xc0] ss:$8 sps:$4 sm:$0xff]  }
0x12f6   : > { %v12178_v15 = vmul.f32 %v12164_v18, %v12143_v36  ;;  %v12144_v24 = vmax.f32 %v12139_v32, 0.0  ;;  %v19478_v36 = vld [vmem:[%s22985_s18 + $0xd4] ss:$8 sps:$4 sm:$0xff]   ;;  %v19481_v32 = vld [vmem:[%s22985_s18 + $0xe4] ss:$8 sps:$4 sm:$0xff]  }
0x12f7   : > { %v12106_v43 = vpop.f32.mrb[96].mxu1  ;;  %v19479_v18 = vld [vmem:[%s22985_s18 + $0xe0] ss:$8 sps:$4 sm:$0xff]  }
0x12f8   : > { %12183 = vst [vmem:[#allocation4 + $0x17] sm:$0xff] %v12178_v15  ;;  %v12179_v35 = vmul.f32 %v12169_v46, %v12144_v24  ;;  %v12128_v25 = vmul.f32 %v14802_v55, %v12106_v43  ;;  %v17758_v30 = vpop.f32.mrb[97].mxu1  ;;  %v12215_v55 = vmax.f32 %v12205_v10, %v12210_v62  ;;  %v19482_v24 = vld [vmem:[%s22985_s18 + $0xf0] ss:$8 sps:$4 sm:$0xff]   ;;  %v19487_v46 = vld [vmem:[%s22985_s18 + $0x4] ss:$8 sps:$4 sm:$0xff]  }
0x12f9   : > { %v12109_v28 = vpop.f32.mrb[98].mxu1  ;;  %v12191_v8 = vld [vmem:[#allocation4 + $0x8] sm:$0xff] }
0x12fa   : > { %12184 = vst [vmem:[#allocation4 + $0x1f] sm:$0xff] %v12179_v35  ;;  %v12140_v39 = vadd.f32 %v14803_v31, %v12128_v25  ;;  %v17759_v20 = vpop.f32.mrb[99].mxu1  ;;  %v12201_v41 = vld [vmem:[#allocation4 + $0xd] sm:$0xff]  ;;  %v12196_v9 = vmax.f32 %v12176_v61, %v12191_v8 }
0x12fb   : > { %v12206_v49 = vld [vmem:[#allocation4 + $0xe] sm:$0xff] }
0x12fc   : > { %v12145_v50 = vmax.f32 %v12140_v39, 0.0  ;;  %v12211_v1 = vmax.f32 %v12201_v41, %v12206_v49  ;;  %v19485_v39 = vld [vmem:[%s22985_s18] ss:$8 sps:$4 sm:$0xff]   ;;  %v19490_v49 = vld [vmem:[%s22985_s18 + $0x14] ss:$8 sps:$4 sm:$0xff]  }
0x12fe   : > { %v12180_v37 = vmul.f32 %v12174_v54, %v12145_v50  ;;  %v12216_v38 = vmax.f32 %v12196_v9, %v12211_v1  ;;  %v19488_v50 = vld [vmem:[%s22985_s18 + $0x10] ss:$8 sps:$4 sm:$0xff]   ;;  %v19493_v54 = vld [vmem:[%s22985_s18 + $0x24] ss:$8 sps:$4 sm:$0xff]   ;;  %v19496_v9 = vld [vmem:[%s22985_s18 + $0x34] ss:$8 sps:$4 sm:$0xff]  }
0x12ff   : > { %v12192_v56 = vld [vmem:[#allocation4 + $0x10] sm:$0xff]  ;;  %v19494_v1 = vld [vmem:[%s22985_s18 + $0x30] ss:$8 sps:$4 sm:$0xff]  }
0x1300   : > { %v12202_v13 = vld [vmem:[#allocation4 + $0x15] sm:$0xff]  ;;  %12185 = vst [vmem:[#allocation4 + $0x27] sm:$0xf] %v12180_v37  ;;  %v12197_v33 = vmax.f32 %v12177_v26, %v12192_v56  ;;  %v19464_v26 = vld [vmem:[%s22985_s18 + $0x90] ss:$8 sps:$4 sm:$0xff]  }
0x1301   : > { %v12207_v57 = vld [vmem:[#allocation4 + $0x16] sm:$0xff]  ;;  %v12208_v59 = vld [vmem:[#allocation4 + $0x1e] sm:$0xff] }
0x1302   : > { %v12212_v45 = vmax.f32 %v12202_v13, %v12207_v57  ;;  %v12193_v16 = vld [vmem:[#allocation4 + $0x18] sm:$0xff]  ;;  %v19502_v57 = vld [vmem:[%s22985_s18 + $0x54] ss:$8 sps:$4 sm:$0xff]  }
0x1303   : > { %v12203_v51 = vld [vmem:[#allocation4 + $0x1d] sm:$0xff]  ;;  %v12198_v6 = vmax.f32 %v12178_v15, %v12193_v16  ;;  %v19491_v37 = vld [vmem:[%s22985_s18 + $0x20] ss:$8 sps:$4 sm:$0xff]  }
0x1304   : > { %v12217_v34 = vmax.f32 %v12197_v33, %v12212_v45  ;;  %v12213_v7 = vmax.f32 %v12203_v51, %v12208_v59  ;;  %v19484_v15 = vld [vmem:[%s22985_s18 + $0xf4] ss:$8 sps:$4 sm:$0xff]   ;;  %v19499_v56 = vld [vmem:[%s22985_s18 + $0x44] ss:$8 sps:$4 sm:$0xff]   ;;  %v19497_v13 = vld [vmem:[%s22985_s18 + $0x40] ss:$8 sps:$4 sm:$0xff]  }
0x1305   : > { %v19500_v33 = vld [vmem:[%s22985_s18 + $0x50] ss:$8 sps:$4 sm:$0xff]   ;;  %v19505_v45 = vld [vmem:[%s22985_s18 + $0x64] ss:$8 sps:$4 sm:$0xff]  }
0x1306   : > { %v12221_v63 = vpack.c.bf16 %v12217_v34, %v12216_v38  ;;  %v12218_v23 = vmax.f32 %v12198_v6, %v12213_v7  ;;  %v19503_v38 = vld [vmem:[%s22985_s18 + $0x60] ss:$8 sps:$4 sm:$0xff]   ;;  %v19508_v34 = vld [vmem:[%s22985_s18 + $0x74] ss:$8 sps:$4 sm:$0xff]   ;;  %v19506_v16 = vld [vmem:[%s22985_s18 + $0x70] ss:$8 sps:$4 sm:$0xff]  }
0x1307   : > { %v12194_v3 = vld [vmem:[#allocation4 + $0x20] sm:$0xff]  ;;  %v12195_v42 = vld [vmem:[#allocation4 + $0x28] sm:$0xf]  ;;  %v19511_v51 = vld [vmem:[%s22985_s18 + $0x104] ss:$8 sps:$4 sm:$0xff]  }
0x1308   : > { %17761 = vmatpush3.bf16.msra.mxu0 %v12221_v63  ;;  %v12204_v40 = vld [vmem:[#allocation4 + $0x25] sm:$0xff]  ;;  %v12199_v44 = vmax.f32 %v12179_v35, %v12194_v3  ;;  %v19509_v63 = vld [vmem:[%s22985_s18 + $0x100] ss:$8 sps:$4 sm:$0xff]   ;;  %v19517_v3 = vld [vmem:[%s22985_s18 + $0x124] ss:$8 sps:$4 sm:$0xff]  }
0x1309   : > { %17762 = vmatprep.subr.bf16.mxu0 %v22417_v11  ;;  %v12209_v14 = vld [vmem:[#allocation4 + $0x26] sm:$0xff] }
0x130a   : > { %v12214_v31 = vmax.f32 %v12204_v40, %v12209_v14  ;;  %v12190_v47 = vld [vmem:[#allocation4 + $0x27] sm:$0xf]  ;;  %v19515_v40 = vld [vmem:[%s22985_s18 + $0x120] ss:$8 sps:$4 sm:$0xff]  }
0x130b   : > { %v12200_v58 = vmax.f32 %v12190_v47, %v12195_v42  ;;  %v19514_v6 = vld [vmem:[%s22985_s18 + $0x114] ss:$8 sps:$4 sm:$0xff]   ;;  %v19512_v7 = vld [vmem:[%s22985_s18 + $0x110] ss:$8 sps:$4 sm:$0xff]  }
0x130c   : > { %v12219_v60 = vmax.f32 %v12199_v44, %v12214_v31  ;;  %v19520_v14 = vld [vmem:[%s22985_s18 + $0x134] ss:$8 sps:$4 sm:$0xff]   ;;  %v19523_v44 = vld [vmem:[%s22985_s18 + $0x144] ss:$8 sps:$4 sm:$0xff]   ;;  %v19521_v31 = vld [vmem:[%s22985_s18 + $0x140] ss:$8 sps:$4 sm:$0xff]  }
0x130d   : > { %v12220_v52 = vmax.f32 %v12200_v58, %v12215_v55  ;;  %v19518_v55 = vld [vmem:[%s22985_s18 + $0x130] ss:$8 sps:$4 sm:$0xff]   ;;  %v19526_v47 = vld [vmem:[%s22985_s18 + $0x154] ss:$8 sps:$4 sm:$0xff]   ;;  %v19529_v58 = vld [vmem:[%s22985_s18 + $0x164] ss:$8 sps:$4 sm:$0xff]  }
0x130e   : > { %v12222_v29 = vpack.c.bf16 %v12219_v60, %v12218_v23  ;;  %v19524_v42 = vld [vmem:[%s22985_s18 + $0x150] ss:$8 sps:$4 sm:$0xff]   ;;  %v19527_v23 = vld [vmem:[%s22985_s18 + $0x160] ss:$8 sps:$4 sm:$0xff]   ;;  %v19532_v60 = vld [vmem:[%s22985_s18 + $0x174] ss:$8 sps:$4 sm:$0xff]  }
0x130f   : > { %v12223_v0 = vpack.c.bf16 %v12220_v52, %v12220_v52  ;;  %v19530_v52 = vld [vmem:[%s22985_s18 + $0x170] ss:$8 sps:$4 sm:$0xff]  }
0x1310   : > { %17763 = vmatpush3.bf16.msra.mxu0 %v12222_v29  ;;  %v19535_v29 = vld [vmem:[%s22985_s18 + $0x184] ss:$8 sps:$4 sm:$0xff]  }
0x1311   : > { %17764 = vmatprep.subr.bf16.mxu0 %v22417_v11  ;;  %v12236_v61 = vsel %vm6215_vm7, %v12223_v0, 0  ;;  %v19469_v11 = vld [vmem:[%s22985_s18 + $0xa4] ss:$8 sps:$4 sm:$0xff]  }
0x1314   : > { %17765 = vmatpush3.bf16.msra.mxu0 %v12236_v61 }
0x1315   : > { %12400 = vmatprep.subr.bf16.mxu0 %v19463_v12  ;;  %v19533_v12 = vld [vmem:[%s22985_s18 + $0x180] ss:$8 sps:$4 sm:$0xff]  }
0x1317   : > { %17767 = vmatmul.mubr.msk.bf16.vlgmr.msra.gmra.mrb[216].mxu0 %vm12231_vm13, %v19460_v53 }
0x1318   : > { %12401 = vmatpush1.bf16.msra.mxu0 %v19461_v17  ;;  %12432 = vmatprep.mubr.bf16.mxu0 %v19782_v2  ;;  %v19538_v17 = vld [vmem:[%s22985_s18 + $0x194] ss:$8 sps:$4 sm:$0xff]  }
0x1319   : > { %12402 = vmatprep.subr.bf16.mxu0 %v19466_v19  ;;  %v19536_v19 = vld [vmem:[%s22985_s18 + $0x190] ss:$8 sps:$4 sm:$0xff]  }
0x131c   : > { %12403 = vmatpush1.bf16.msra.mxu0 %v19464_v26  ;;  %v19541_v26 = vld [vmem:[%s22985_s18 + $0x1a4] ss:$8 sps:$4 sm:$0xff]  }
0x131d   : > { %12404 = vmatprep.subr.bf16.mxu0 %v19469_v11  ;;  %v19539_v11 = vld [vmem:[%s22985_s18 + $0x1a0] ss:$8 sps:$4 sm:$0xff]  }
0x1320   : > { %12405 = vmatpush1.bf16.msra.mxu0 %v19467_v27  ;;  %v19544_v27 = vld [vmem:[%s22985_s18 + $0x1b4] ss:$8 sps:$4 sm:$0xff]  }
0x1321   : > { %12406 = vmatprep.subr.bf16.mxu0 %v19472_v5  ;;  %v19542_v5 = vld [vmem:[%s22985_s18 + $0x1b0] ss:$8 sps:$4 sm:$0xff]  }
0x1324   : > { %12407 = vmatpush1.bf16.msra.mxu0 %v19470_v21  ;;  %v19547_v21 = vld [vmem:[%s22985_s18 + $0x1c4] ss:$8 sps:$4 sm:$0xff]  }
0x1325   : > { %12408 = vmatprep.subr.bf16.mxu0 %v19475_v48  ;;  %v19545_v48 = vld [vmem:[%s22985_s18 + $0x1c0] ss:$8 sps:$4 sm:$0xff]  }
0x1328   : > { %12409 = vmatpush1.bf16.msra.mxu0 %v19473_v22  ;;  %v19550_v22 = vld [vmem:[%s22985_s18 + $0x1d4] ss:$8 sps:$4 sm:$0xff]  }
0x1329   : > { %12410 = vmatprep.subr.bf16.mxu0 %v19478_v36  ;;  %v19553_v36 = vld [vmem:[%s22985_s18 + $0x1e4] ss:$8 sps:$4 sm:$0xff]  }
0x132c   : > { %12411 = vmatpush1.bf16.msra.mxu0 %v19476_v4  ;;  %v19548_v4 = vld [vmem:[%s22985_s18 + $0x1d0] ss:$8 sps:$4 sm:$0xff]  }
0x132d   : > { %12412 = vmatprep.subr.bf16.mxu0 %v19481_v32  ;;  %v19551_v32 = vld [vmem:[%s22985_s18 + $0x1e0] ss:$8 sps:$4 sm:$0xff]  }
0x1330   : > { %12413 = vmatpush1.bf16.msra.mxu0 %v19479_v18  ;;  %v19556_v18 = vld [vmem:[%s22985_s18 + $0x1f4] ss:$8 sps:$4 sm:$0xff]  }
0x1331   : > { %12414 = vmatprep.subr.bf16.mxu0 %v19484_v15  ;;  %v19554_v15 = vld [vmem:[%s22985_s18 + $0x1f0] ss:$8 sps:$4 sm:$0xff]  }
0x1334   : > { %12415 = vmatpush1.bf16.msra.mxu0 %v19482_v24  ;;  %v19559_v24 = vld [vmem:[%s22985_s18 + $0x204] ss:$8 sps:$4 sm:$0xff]  }
0x1335   : > { %12523 = vmatprep.subr.bf16.mxu0 %v19487_v46 }
0x13ea   : > { %v22702_v43 = vpop.f32.mrb[216].mxu0 }
0x13eb   : > { %12279 = vst [vmem:[#allocation5 + $0x5] sm:$0xff] %v22702_v43  ;;  %v17768_v35 = vpop.f32.mrb[217].mxu0 }
0x13ec   : > { %v22705_v25 = vpop.f32.mrb[218].mxu0  ;;  %v19557_v35 = vld [vmem:[%s22985_s18 + $0x200] ss:$8 sps:$4 sm:$0xff]  }
0x13ed   : > { %12280 = vst [vmem:[#allocation5 + $0xd] sm:$0xff] %v22705_v25  ;;  %v17769_v30 = vpop.f32.mrb[219].mxu0  ;;  %v12862_v28 = vpack.c.bf16 %v22705_v25, %v22702_v43  ;;  %v19587_v43 = vld [vmem:[%s22985_s18 + $0x2a0] ss:$8 sps:$4 sm:$0xff]   ;;  %v19592_v25 = vld [vmem:[%s22985_s18 + $0x2b4] ss:$8 sps:$4 sm:$0xff]  }
0x13f2   : > { %v12300_v20 = vld [vmem:[#allocation5 + $0x1] sm:$0xff] }
0x13f3   : > { %v12281_v10 = vld [vmem:[#allocation5] sm:$0xff] }
0x13f4   : > { %v22711_v8 = vld [vmem:[#allocation5 + $0x9] sm:$0xff] }
0x13f5   : > { %v12302_v41 = vpack.c.bf16 %v22711_v8, %v12300_v20  ;;  %v22730_v59 = vld [vmem:[#allocation5 + $0x8] sm:$0xff] }
0x13f6   : > { %v12283_v62 = vpack.c.bf16 %v22730_v59, %v12281_v10  ;;  %v22750_v0 = vld [vmem:[#allocation5 + $0xa] sm:$0xff]  ;;  %v12566_v61 = vld [vmem:[#allocation5 + $0x2] sm:$0xff] }
0x13f7   : > { %12433 = vmatmul.mubr.bf16.vlgmr.msra.gmra.mrb[220].mxu0 %v12302_v41  ;;  %v12568_v53 = vpack.c.bf16 %v22750_v0, %v12566_v61  ;;  %v12714_v46 = vld [vmem:[#allocation5 + $0xc] sm:$0xff]  ;;  %v12713_v30 = vld [vmem:[#allocation5 + $0x4] sm:$0xff]  ;;  %v19605_v61 = vld [vmem:[%s22985_s18 + $0x300] ss:$8 sps:$4 sm:$0xff]  }
0x13f8   : > { %12524 = vmatpush1.bf16.msra.mxu0 %v19485_v39  ;;  %12555 = vmatprep.mubr.bf16.mxu0 %v19782_v2  ;;  %v12715_v39 = vpack.c.bf16 %v12714_v46, %v12713_v30  ;;  %v19562_v20 = vld [vmem:[%s22985_s18 + $0x214] ss:$8 sps:$4 sm:$0xff]   ;;  %v19560_v41 = vld [vmem:[%s22985_s18 + $0x210] ss:$8 sps:$4 sm:$0xff]   ;;  %v13680_v10 = vld [vmem:[%s22986_s1 + $0x88] sm:$0xff] }
0x13f9   : > { %12525 = vmatprep.subr.bf16.mxu0 %v19490_v49  ;;  %v19565_v49 = vld [vmem:[%s22985_s18 + $0x224] ss:$8 sps:$4 sm:$0xff]   ;;  %v13155_v46 = vld [vmem:[#allocation5 + $0x10] sm:$0xff] }
0x13fa   : > { %v13156_v30 = vpack.c.bf16 %v13155_v46, %v22730_v59  ;;  %v19638_v59 = vld [vmem:[%s22985_s18 + $0x3b0] ss:$8 sps:$4 sm:$0xff]  }
0x13fb   : > { %v13673_v46 = vld [vmem:[%s22986_s1 + $0x50] sm:$0xff] }
0x13fc   : > { %12526 = vmatpush1.bf16.msra.mxu0 %v19488_v50  ;;  %v19563_v50 = vld [vmem:[%s22985_s18 + $0x220] ss:$8 sps:$4 sm:$0xff]  }
0x13fd   : > { %12527 = vmatprep.subr.bf16.mxu0 %v19493_v54  ;;  %v19568_v54 = vld [vmem:[%s22985_s18 + $0x234] ss:$8 sps:$4 sm:$0xff]  }
0x1400   : > { %12528 = vmatpush1.bf16.msra.mxu0 %v19491_v37  ;;  %v19566_v37 = vld [vmem:[%s22985_s18 + $0x230] ss:$8 sps:$4 sm:$0xff]  }
0x1401   : > { %12529 = vmatprep.subr.bf16.mxu0 %v19496_v9  ;;  %v19571_v9 = vld [vmem:[%s22985_s18 + $0x244] ss:$8 sps:$4 sm:$0xff]  }
0x1404   : > { %12530 = vmatpush1.bf16.msra.mxu0 %v19494_v1  ;;  %v19569_v1 = vld [vmem:[%s22985_s18 + $0x240] ss:$8 sps:$4 sm:$0xff]  }
0x1405   : > { %12531 = vmatprep.subr.bf16.mxu0 %v19499_v56  ;;  %v19574_v56 = vld [vmem:[%s22985_s18 + $0x254] ss:$8 sps:$4 sm:$0xff]  }
0x1408   : > { %12532 = vmatpush1.bf16.msra.mxu0 %v19497_v13  ;;  %v19572_v13 = vld [vmem:[%s22985_s18 + $0x250] ss:$8 sps:$4 sm:$0xff]  }
0x1409   : > { %12533 = vmatprep.subr.bf16.mxu0 %v19502_v57  ;;  %v19577_v57 = vld [vmem:[%s22985_s18 + $0x264] ss:$8 sps:$4 sm:$0xff]  }
0x140c   : > { %12534 = vmatpush1.bf16.msra.mxu0 %v19500_v33  ;;  %v19575_v33 = vld [vmem:[%s22985_s18 + $0x260] ss:$8 sps:$4 sm:$0xff]  }
0x140d   : > { %12535 = vmatprep.subr.bf16.mxu0 %v19505_v45  ;;  %v19580_v45 = vld [vmem:[%s22985_s18 + $0x274] ss:$8 sps:$4 sm:$0xff]  }
0x1410   : > { %12536 = vmatpush1.bf16.msra.mxu0 %v19503_v38  ;;  %v19578_v38 = vld [vmem:[%s22985_s18 + $0x270] ss:$8 sps:$4 sm:$0xff]  }
0x1411   : > { %12537 = vmatprep.subr.bf16.mxu0 %v19508_v34  ;;  %v19583_v34 = vld [vmem:[%s22985_s18 + $0x284] ss:$8 sps:$4 sm:$0xff]  }
0x1414   : > { %12538 = vmatpush1.bf16.msra.mxu0 %v19506_v16  ;;  %v19581_v16 = vld [vmem:[%s22985_s18 + $0x280] ss:$8 sps:$4 sm:$0xff]  }
0x1415   : > { %12666 = vmatprep.subr.bf16.mxu0 %v19511_v51  ;;  %v19586_v51 = vld [vmem:[%s22985_s18 + $0x294] ss:$8 sps:$4 sm:$0xff]  }
0x1417   : > { %12556 = vmatmul.mubr.bf16.vlgmr.msra.gmra.mrb[220].mxu0 %v12283_v62  ;;  %v13663_v62 = vld [vmem:[%s22986_s1] sm:$0xff] }
0x1418   : > { %12667 = vmatpush1.bf16.msra.mxu0 %v19509_v63  ;;  %12698 = vmatprep.mubr.bf16.mxu0 %v19782_v2  ;;  %v13679_v63 = vld [vmem:[%s22986_s1 + $0x80] sm:$0xff] }
0x1419   : > { %12668 = vmatprep.subr.bf16.mxu0 %v19514_v6  ;;  %v19584_v6 = vld [vmem:[%s22985_s18 + $0x290] ss:$8 sps:$4 sm:$0xff]  }
0x141c   : > { %12669 = vmatpush1.bf16.msra.mxu0 %v19512_v7  ;;  %v17770_v7 = vpack.c.bf16 %v13680_v10, %v13679_v63  ;;  %v19656_v63 = vld [vmem:[%s22985_s18 + $0x410] ss:$8 sps:$4 sm:$0xff]   ;;  %v19661_v10 = vld [vmem:[%s22985_s18 + $0x424] ss:$8 sps:$4 sm:$0xff]  }
0x141d   : > { %12670 = vmatprep.subr.bf16.mxu0 %v19517_v3  ;;  %v13664_v3 = vld [vmem:[%s22986_s1 + $0x8] sm:$0xff] }
0x141e   : > { %17771 = vmatprep.subr.bf16.mxu1 %v17770_v7  ;;  %v19667_v7 = vld [vmem:[%s22985_s18 + $0x444] ss:$8 sps:$4 sm:$0xff]  }
0x1420   : > { %12671 = vmatpush1.bf16.msra.mxu0 %v19515_v40  ;;  %v19589_v40 = vld [vmem:[%s22985_s18 + $0x2a4] ss:$8 sps:$4 sm:$0xff]  }
0x1421   : > { %12672 = vmatprep.subr.bf16.mxu0 %v19520_v14  ;;  %v17772_v14 = vpack.c.bf16 %v13664_v3, %v13663_v62  ;;  %v19659_v62 = vld [vmem:[%s22985_s18 + $0x420] ss:$8 sps:$4 sm:$0xff]  }
0x1422   : > { %v19665_v3 = vld [vmem:[%s22985_s18 + $0x440] ss:$8 sps:$4 sm:$0xff]  }
0x1423   : > { %17773 = vmatpush3.bf16.msra.mxu1 %v17772_v14  ;;  %v19673_v14 = vld [vmem:[%s22985_s18 + $0x464] ss:$8 sps:$4 sm:$0xff]  }
0x1424   : > { %12673 = vmatpush1.bf16.msra.mxu0 %v19518_v55  ;;  %v19595_v55 = vld [vmem:[%s22985_s18 + $0x2c4] ss:$8 sps:$4 sm:$0xff]  }
0x1425   : > { %12674 = vmatprep.subr.bf16.mxu0 %v19523_v44  ;;  %v19593_v44 = vld [vmem:[%s22985_s18 + $0x2c0] ss:$8 sps:$4 sm:$0xff]  }
0x1428   : > { %12675 = vmatpush1.bf16.msra.mxu0 %v19521_v31  ;;  %v19598_v31 = vld [vmem:[%s22985_s18 + $0x2d4] ss:$8 sps:$4 sm:$0xff]  }
0x1429   : > { %12676 = vmatprep.subr.bf16.mxu0 %v19526_v47  ;;  %v19596_v47 = vld [vmem:[%s22985_s18 + $0x2d0] ss:$8 sps:$4 sm:$0xff]  }
0x142c   : > { %12677 = vmatpush1.bf16.msra.mxu0 %v19524_v42  ;;  %v19601_v42 = vld [vmem:[%s22985_s18 + $0x2e4] ss:$8 sps:$4 sm:$0xff]  }
0x142d   : > { %12678 = vmatprep.subr.bf16.mxu0 %v19529_v58  ;;  %v19599_v58 = vld [vmem:[%s22985_s18 + $0x2e0] ss:$8 sps:$4 sm:$0xff]  }
0x1430   : > { %12679 = vmatpush1.bf16.msra.mxu0 %v19527_v23  ;;  %v19604_v23 = vld [vmem:[%s22985_s18 + $0x2f4] ss:$8 sps:$4 sm:$0xff]  }
0x1431   : > { %12680 = vmatprep.subr.bf16.mxu0 %v19532_v60  ;;  %v19602_v60 = vld [vmem:[%s22985_s18 + $0x2f0] ss:$8 sps:$4 sm:$0xff]  }
0x1434   : > { %12681 = vmatpush1.bf16.msra.mxu0 %v19530_v52  ;;  %v19607_v52 = vld [vmem:[%s22985_s18 + $0x304] ss:$8 sps:$4 sm:$0xff]  }
0x1435   : > { %12813 = vmatprep.subr.bf16.mxu0 %v19535_v29  ;;  %v13007_v29 = vld [vmem:[#allocation5 + $0x6] sm:$0xff] }
0x1437   : > { %12699 = vmatmul.mubr.bf16.vlgmr.msra.gmra.mrb[220].mxu0 %v12568_v53 }
0x1438   : > { %12814 = vmatpush1.bf16.msra.mxu0 %v19533_v12  ;;  %12845 = vmatprep.mubr.bf16.mxu0 %v19782_v2  ;;  %v13008_v12 = vld [vmem:[#allocation5 + $0xe] sm:$0xff] }
0x1439   : > { %12815 = vmatprep.subr.bf16.mxu0 %v19538_v17  ;;  %v13009_v53 = vpack.c.bf16 %v13008_v12, %v13007_v29  ;;  %v19610_v17 = vld [vmem:[%s22985_s18 + $0x314] ss:$8 sps:$4 sm:$0xff]   ;;  %v13684_v29 = vld [vmem:[%s22986_s1 + $0xa8] sm:$0xff] }
0x143c   : > { %12816 = vmatpush1.bf16.msra.mxu0 %v19536_v19  ;;  %v19608_v19 = vld [vmem:[%s22985_s18 + $0x310] ss:$8 sps:$4 sm:$0xff]  }
0x143d   : > { %12817 = vmatprep.subr.bf16.mxu0 %v19541_v26  ;;  %v19613_v26 = vld [vmem:[%s22985_s18 + $0x324] ss:$8 sps:$4 sm:$0xff]  }
0x1440   : > { %12818 = vmatpush1.bf16.msra.mxu0 %v19539_v11  ;;  %v19611_v11 = vld [vmem:[%s22985_s18 + $0x320] ss:$8 sps:$4 sm:$0xff]  }
0x1441   : > { %12819 = vmatprep.subr.bf16.mxu0 %v19544_v27  ;;  %v19616_v27 = vld [vmem:[%s22985_s18 + $0x334] ss:$8 sps:$4 sm:$0xff]  }
0x1444   : > { %12820 = vmatpush1.bf16.msra.mxu0 %v19542_v5  ;;  %v19614_v5 = vld [vmem:[%s22985_s18 + $0x330] ss:$8 sps:$4 sm:$0xff]  }
0x1445   : > { %12821 = vmatprep.subr.bf16.mxu0 %v19547_v21  ;;  %v19619_v21 = vld [vmem:[%s22985_s18 + $0x344] ss:$8 sps:$4 sm:$0xff]  }
0x1448   : > { %12822 = vmatpush1.bf16.msra.mxu0 %v19545_v48  ;;  %v19617_v48 = vld [vmem:[%s22985_s18 + $0x340] ss:$8 sps:$4 sm:$0xff]  }
0x1449   : > { %12823 = vmatprep.subr.bf16.mxu0 %v19550_v22  ;;  %v19622_v22 = vld [vmem:[%s22985_s18 + $0x354] ss:$8 sps:$4 sm:$0xff]  }
0x144c   : > { %12824 = vmatpush1.bf16.msra.mxu0 %v19548_v4  ;;  %v19620_v4 = vld [vmem:[%s22985_s18 + $0x350] ss:$8 sps:$4 sm:$0xff]  }
0x144d   : > { %12825 = vmatprep.subr.bf16.mxu0 %v19553_v36  ;;  %v19625_v36 = vld [vmem:[%s22985_s18 + $0x364] ss:$8 sps:$4 sm:$0xff]  }
0x1450   : > { %12826 = vmatpush1.bf16.msra.mxu0 %v19551_v32  ;;  %v19623_v32 = vld [vmem:[%s22985_s18 + $0x360] ss:$8 sps:$4 sm:$0xff]  }
0x1451   : > { %12827 = vmatprep.subr.bf16.mxu0 %v19556_v18  ;;  %v19628_v18 = vld [vmem:[%s22985_s18 + $0x374] ss:$8 sps:$4 sm:$0xff]  }
0x1454   : > { %12828 = vmatpush1.bf16.msra.mxu0 %v19554_v15  ;;  %v19626_v15 = vld [vmem:[%s22985_s18 + $0x370] ss:$8 sps:$4 sm:$0xff]  }
0x1455   : > { %12960 = vmatprep.subr.bf16.mxu0 %v19559_v24  ;;  %v19631_v24 = vld [vmem:[%s22985_s18 + $0x384] ss:$8 sps:$4 sm:$0xff]  }
0x1457   : > { %12846 = vmatmul.mubr.bf16.vlgmr.msra.gmra.mrb[220].mxu0 %v12715_v39  ;;  %v19634_v39 = vld [vmem:[%s22985_s18 + $0x394] ss:$8 sps:$4 sm:$0xff]  }
0x1458   : > { %12961 = vmatpush1.bf16.msra.mxu0 %v19557_v35  ;;  %12992 = vmatprep.mubr.bf16.mxu0 %v19782_v2  ;;  %v19629_v35 = vld [vmem:[%s22985_s18 + $0x380] ss:$8 sps:$4 sm:$0xff]  }
0x1459   : > { %12962 = vmatprep.subr.bf16.mxu0 %v19562_v20  ;;  %v19632_v20 = vld [vmem:[%s22985_s18 + $0x390] ss:$8 sps:$4 sm:$0xff]  }
0x145c   : > { %12963 = vmatpush1.bf16.msra.mxu0 %v19560_v41  ;;  %v19637_v41 = vld [vmem:[%s22985_s18 + $0x3a4] ss:$8 sps:$4 sm:$0xff]  }
0x145d   : > { %12964 = vmatprep.subr.bf16.mxu0 %v19565_v49  ;;  %v19635_v49 = vld [vmem:[%s22985_s18 + $0x3a0] ss:$8 sps:$4 sm:$0xff]  }
0x1460   : > { %12965 = vmatpush1.bf16.msra.mxu0 %v19563_v50  ;;  %v19640_v50 = vld [vmem:[%s22985_s18 + $0x3b4] ss:$8 sps:$4 sm:$0xff]  }
0x1461   : > { %12966 = vmatprep.subr.bf16.mxu0 %v19568_v54  ;;  %v19643_v54 = vld [vmem:[%s22985_s18 + $0x3c4] ss:$8 sps:$4 sm:$0xff]  }
0x1464   : > { %12967 = vmatpush1.bf16.msra.mxu0 %v19566_v37  ;;  %v19641_v37 = vld [vmem:[%s22985_s18 + $0x3c0] ss:$8 sps:$4 sm:$0xff]  }
0x1465   : > { %12968 = vmatprep.subr.bf16.mxu0 %v19571_v9  ;;  %v19646_v9 = vld [vmem:[%s22985_s18 + $0x3d4] ss:$8 sps:$4 sm:$0xff]  }
0x1468   : > { %12969 = vmatpush1.bf16.msra.mxu0 %v19569_v1  ;;  %v19644_v1 = vld [vmem:[%s22985_s18 + $0x3d0] ss:$8 sps:$4 sm:$0xff]  }
0x1469   : > { %12970 = vmatprep.subr.bf16.mxu0 %v19574_v56  ;;  %v19649_v56 = vld [vmem:[%s22985_s18 + $0x3e4] ss:$8 sps:$4 sm:$0xff]  }
0x146c   : > { %12971 = vmatpush1.bf16.msra.mxu0 %v19572_v13  ;;  %v19647_v13 = vld [vmem:[%s22985_s18 + $0x3e0] ss:$8 sps:$4 sm:$0xff]  }
0x146d   : > { %12972 = vmatprep.subr.bf16.mxu0 %v19577_v57  ;;  %v19652_v57 = vld [vmem:[%s22985_s18 + $0x3f4] ss:$8 sps:$4 sm:$0xff]  }
0x1470   : > { %12973 = vmatpush1.bf16.msra.mxu0 %v19575_v33  ;;  %v19650_v33 = vld [vmem:[%s22985_s18 + $0x3f0] ss:$8 sps:$4 sm:$0xff]  }
0x1471   : > { %12974 = vmatprep.subr.bf16.mxu0 %v19580_v45  ;;  %v19655_v45 = vld [vmem:[%s22985_s18 + $0x404] ss:$8 sps:$4 sm:$0xff]  }
0x1474   : > { %12975 = vmatpush1.bf16.msra.mxu0 %v19578_v38  ;;  %v13302_v38 = vld [vmem:[#allocation5 + $0x11] sm:$0xff] }
0x1475   : > { %13107 = vmatprep.subr.bf16.mxu0 %v19583_v34  ;;  %v19653_v34 = vld [vmem:[%s22985_s18 + $0x400] ss:$8 sps:$4 sm:$0xff]  }
0x1477   : > { %12993 = vmatmul.mubr.bf16.vlgmr.msra.gmra.mrb[220].mxu0 %v12862_v28  ;;  %v19590_v28 = vld [vmem:[%s22985_s18 + $0x2b0] ss:$8 sps:$4 sm:$0xff]  }
0x1478   : > { %13108 = vmatpush1.bf16.msra.mxu0 %v19581_v16  ;;  %13139 = vmatprep.mubr.bf16.mxu0 %v19782_v2  ;;  %v13303_v16 = vpack.c.bf16 %v13302_v38, %v22711_v8  ;;  %v19662_v8 = vld [vmem:[%s22985_s18 + $0x430] ss:$8 sps:$4 sm:$0xff]   ;;  %v13595_v38 = vld [vmem:[%s22987_s3] sm:$0x3]  ;;  %s22989_s3 = sld [smem:[#allocation26_spill]] }
0x1479   : > { %13109 = vmatprep.subr.bf16.mxu0 %v19586_v51  ;;  %v19658_v51 = vld [vmem:[%s22985_s18 + $0x414] ss:$8 sps:$4 sm:$0xff]  }
0x147c   : > { %13110 = vmatpush1.bf16.msra.mxu0 %v19584_v6  ;;  %v19664_v6 = vld [vmem:[%s22985_s18 + $0x434] ss:$8 sps:$4 sm:$0xff]  }
0x147d   : > { %13111 = vmatprep.subr.bf16.mxu0 %v19589_v40  ;;  %v19670_v40 = vld [vmem:[%s22985_s18 + $0x454] ss:$8 sps:$4 sm:$0xff]  }
0x1480   : > { %13112 = vmatpush1.bf16.msra.mxu0 %v19587_v43  ;;  %v19671_v43 = vld [vmem:[%s22985_s18 + $0x460] ss:$8 sps:$4 sm:$0xff]  }
0x1481   : > { %13113 = vmatprep.subr.bf16.mxu0 %v19592_v25  ;;  %v19676_v25 = vld [vmem:[%s22985_s18 + $0x474] ss:$8 sps:$4 sm:$0xff]  }
0x1484   : > { %13114 = vmatpush1.bf16.msra.mxu0 %v19590_v28  ;;  %v19674_v28 = vld [vmem:[%s22985_s18 + $0x470] ss:$8 sps:$4 sm:$0xff]  }
0x1485   : > { %13115 = vmatprep.subr.bf16.mxu0 %v19595_v55  ;;  %v13449_v55 = vld [vmem:[#allocation5 + $0x12] sm:$0xff] }
0x1488   : > { %13116 = vmatpush1.bf16.msra.mxu0 %v19593_v44  ;;  %v13450_v44 = vpack.c.bf16 %v13449_v55, %v22750_v0  ;;  %v13668_v0 = vld [vmem:[%s22986_s1 + $0x28] sm:$0xff] }
0x1489   : > { %13117 = vmatprep.subr.bf16.mxu0 %v19598_v31  ;;  %v13681_v31 = vld [vmem:[%s22986_s1 + $0x90] sm:$0xff] }
0x148c   : > { %13118 = vmatpush1.bf16.msra.mxu0 %v19596_v47  ;;  %v13682_v47 = vld [vmem:[%s22986_s1 + $0x98] sm:$0xff] }
0x148d   : > { %13119 = vmatprep.subr.bf16.mxu0 %v19601_v42  ;;  %v17774_v42 = vpack.c.bf16 %v13682_v47, %v13681_v31 }
0x148f   : > { %17775 = vmatprep.subr.bf16.mxu1 %v17774_v42 }
0x1490   : > { %13120 = vmatpush1.bf16.msra.mxu0 %v19599_v58  ;;  %v13665_v58 = vld [vmem:[%s22986_s1 + $0x10] sm:$0xff] }
0x1491   : > { %13121 = vmatprep.subr.bf16.mxu0 %v19604_v23  ;;  %v13666_v23 = vld [vmem:[%s22986_s1 + $0x18] sm:$0xff] }
0x1494   : > { %13122 = vmatpush1.bf16.msra.mxu0 %v19602_v60  ;;  %v17776_v60 = vpack.c.bf16 %v13666_v23, %v13665_v58  ;;  %v13641_v58 = vpop.permute.xlu1 %13640  ;;  %v13636_v23 = vpop.permute.xlu0 %13635 }
0x1495   : > { %13254 = vmatprep.subr.bf16.mxu0 %v19607_v52  ;;  %v13683_v52 = vld [vmem:[%s22986_s1 + $0xa0] sm:$0xff] }
0x1496   : > { %17777 = vmatpush3.bf16.msra.mxu1 %v17776_v60  ;;  %v17778_v12 = vpack.c.bf16 %v13684_v29, %v13683_v52 }
0x1497   : > { %13140 = vmatmul.mubr.bf16.vlgmr.msra.gmra.mrb[220].mxu0 %v13009_v53 }
0x1498   : > { %13255 = vmatpush1.bf16.msra.mxu0 %v19605_v61  ;;  %13286 = vmatprep.mubr.bf16.mxu0 %v19782_v2  ;;  %v13667_v61 = vld [vmem:[%s22986_s1 + $0x20] sm:$0xff] }
0x1499   : > { %13256 = vmatprep.subr.bf16.mxu0 %v19610_v17  ;;  %v17780_v53 = vpack.c.bf16 %v13668_v0, %v13667_v61  ;;  %17779 = vmatprep.subr.bf16.mxu1 %v17778_v12  ;;  %v13685_v17 = vld [vmem:[%s22986_s1 + $0xb0] sm:$0xff] }
0x149b   : > { %17781 = vmatpush3.bf16.msra.mxu1 %v17780_v53 }
0x149c   : > { %13257 = vmatpush1.bf16.msra.mxu0 %v19608_v19  ;;  %v13686_v19 = vld [vmem:[%s22986_s1 + $0xb8] sm:$0xff] }
0x149d   : > { %13258 = vmatprep.subr.bf16.mxu0 %v19613_v26  ;;  %v17782_v26 = vpack.c.bf16 %v13686_v19, %v13685_v17 }
0x149f   : > { %17783 = vmatprep.subr.bf16.mxu1 %v17782_v26 }
0x14a0   : > { %13259 = vmatpush1.bf16.msra.mxu0 %v19611_v11  ;;  %v13669_v11 = vld [vmem:[%s22986_s1 + $0x30] sm:$0xff] }
0x14a1   : > { %13260 = vmatprep.subr.bf16.mxu0 %v19616_v27  ;;  %v13670_v27 = vld [vmem:[%s22986_s1 + $0x38] sm:$0xff] }
0x14a4   : > { %13261 = vmatpush1.bf16.msra.mxu0 %v19614_v5  ;;  %v17784_v5 = vpack.c.bf16 %v13670_v27, %v13669_v11 }
0x14a5   : > { %13262 = vmatprep.subr.bf16.mxu0 %v19619_v21  ;;  %v13687_v21 = vld [vmem:[%s22986_s1 + $0xc0] sm:$0xff] }
0x14a6   : > { %17785 = vmatpush3.bf16.msra.mxu1 %v17784_v5 }
0x14a8   : > { %13263 = vmatpush1.bf16.msra.mxu0 %v19617_v48  ;;  %v13688_v48 = vld [vmem:[%s22986_s1 + $0xc8] sm:$0xff] }
0x14a9   : > { %13264 = vmatprep.subr.bf16.mxu0 %v19622_v22  ;;  %v17786_v22 = vpack.c.bf16 %v13688_v48, %v13687_v21 }
0x14ab   : > { %17787 = vmatprep.subr.bf16.mxu1 %v17786_v22 }
0x14ac   : > { %13265 = vmatpush1.bf16.msra.mxu0 %v19620_v4  ;;  %v13671_v4 = vld [vmem:[%s22986_s1 + $0x40] sm:$0xff] }
0x14ad   : > { %13266 = vmatprep.subr.bf16.mxu0 %v19625_v36  ;;  %v13672_v36 = vld [vmem:[%s22986_s1 + $0x48] sm:$0xff] }
0x14b0   : > { %13267 = vmatpush1.bf16.msra.mxu0 %v19623_v32  ;;  %v17788_v32 = vpack.c.bf16 %v13672_v36, %v13671_v4 }
0x14b1   : > { %13268 = vmatprep.subr.bf16.mxu0 %v19628_v18  ;;  %v13689_v18 = vld [vmem:[%s22986_s1 + $0xd0] sm:$0xff] }
0x14b2   : > { %17789 = vmatpush3.bf16.msra.mxu1 %v17788_v32 }
0x14b4   : > { %13269 = vmatpush1.bf16.msra.mxu0 %v19626_v15  ;;  %v13690_v15 = vld [vmem:[%s22986_s1 + $0xd8] sm:$0xff] }
0x14b5   : > { %13401 = vmatprep.subr.bf16.mxu0 %v19631_v24  ;;  %v17790_v24 = vpack.c.bf16 %v13690_v15, %v13689_v18 }
0x14b7   : > { %13287 = vmatmul.mubr.bf16.vlgmr.msra.gmra.mrb[220].mxu0 %v13156_v30  ;;  %17791 = vmatprep.subr.bf16.mxu1 %v17790_v24 }
0x14b8   : > { %13402 = vmatpush1.bf16.msra.mxu0 %v19629_v35  ;;  %13433 = vmatprep.mubr.bf16.mxu0 %v19782_v2  ;;  %v13674_v35 = vld [vmem:[%s22986_s1 + $0x58] sm:$0xff] }
0x14b9   : > { %13403 = vmatprep.subr.bf16.mxu0 %v19634_v39  ;;  %v17792_v30 = vpack.c.bf16 %v13674_v35, %v13673_v46  ;;  %v13691_v39 = vld [vmem:[%s22986_s1 + $0xe0] sm:$0xff] }
0x14ba   : > { %v13695_v46 = vld [vmem:[%s22989_s3] sm:$0x1] }
0x14bb   : > { %17793 = vmatpush3.bf16.msra.mxu1 %v17792_v30 }
0x14bc   : > { %13404 = vmatpush1.bf16.msra.mxu0 %v19632_v20  ;;  %v13692_v20 = vld [vmem:[%s22986_s1 + $0xe8] sm:$0xff] }
0x14bd   : > { %13405 = vmatprep.subr.bf16.mxu0 %v19637_v41  ;;  %v13675_v41 = vld [vmem:[%s22986_s1 + $0x60] sm:$0xff] }
0x14c0   : > { %13406 = vmatpush1.bf16.msra.mxu0 %v19635_v49  ;;  %v17794_v49 = vpack.c.bf16 %v13692_v20, %v13691_v39 }
0x14c1   : > { %13407 = vmatprep.subr.bf16.mxu0 %v19640_v50  ;;  %v13676_v50 = vld [vmem:[%s22986_s1 + $0x68] sm:$0xff] }
0x14c2   : > { %17795 = vmatprep.subr.bf16.mxu1 %v17794_v49 }
0x14c4   : > { %13408 = vmatpush1.bf16.msra.mxu0 %v19638_v59  ;;  %v13693_v59 = vld [vmem:[%s22986_s1 + $0xf0] sm:$0xff] }
0x14c5   : > { %13409 = vmatprep.subr.bf16.mxu0 %v19643_v54  ;;  %v13694_v54 = vld [vmem:[%s22986_s1 + $0xf8] sm:$0xff] }
0x14c8   : > { %13410 = vmatpush1.bf16.msra.mxu0 %v19641_v37  ;;  %v17796_v37 = vpack.c.bf16 %v13676_v50, %v13675_v41 }
0x14c9   : > { %13411 = vmatprep.subr.bf16.mxu0 %v19646_v9  ;;  %v17798_v9 = vpack.c.bf16 %v13694_v54, %v13693_v59 }
0x14ca   : > { %17797 = vmatpush3.bf16.msra.mxu1 %v17796_v37 }
0x14cb   : > { %17799 = vmatprep.subr.bf16.mxu1 %v17798_v9 }
0x14cc   : > { %13412 = vmatpush1.bf16.msra.mxu0 %v19644_v1  ;;  %v13677_v1 = vld [vmem:[%s22986_s1 + $0x70] sm:$0xff] }
0x14cd   : > { %13413 = vmatprep.subr.bf16.mxu0 %v19649_v56  ;;  %v13678_v56 = vld [vmem:[%s22986_s1 + $0x78] sm:$0xff]  ;;  %s15078_s1 = sshll.u32 %s19973_s0, 4  ;;  %s19786_s0 = smov [#allocation6]  }
0x14ce   : > { %s22898_s7 = scalar_lea.hbm %s19950_s14, %s15078_s1  ;;  %s19691_s3 = sshll.u32 %s19786_s0, 4  ;;  %s19692_s3 = int_to_ptr.vmem [resolvable:$false] %s19691_s3 }
0x14cf   : > { %s19693_s10 = scalar_lea.vmem %s19692_s3, 32 }
0x14d0   : > { %13414 = vmatpush1.bf16.msra.mxu0 %v19647_v13  ;;  %v17800_v13 = vpack.c.bf16 %v13678_v56, %v13677_v1 }
0x14d1   : > { %13415 = vmatprep.subr.bf16.mxu0 %v19652_v57  ;;  %v13597_v57 = vlaneseq }
0x14d2   : > { %17801 = vmatpush3.bf16.msra.mxu1 %v17800_v13 }
0x14d4   : > { %13416 = vmatpush1.bf16.msra.mxu0 %v19650_v33  ;;  %v13598_v33 = vshrl.u32 %v13597_v57, 7 }
0x14d5   : > { %13548 = vmatprep.subr.bf16.mxu0 %v19655_v45 }
0x14d6   : > { %v13599_v45 = vsub.s32 0, %v13598_v33 }
0x14d7   : > { %13434 = vmatmul.mubr.bf16.vlgmr.msra.gmra.mrb[220].mxu0 %v13303_v16  ;;  %v13611_v16 = vld [vmem:[%s22988_s4] sm:$0x3]  ;;  %s949_s4 = sand.u32 1, %s19741_s23  }
0x14d8   : > { %13549 = vmatpush1.bf16.msra.mxu0 %v19653_v34  ;;  %13580 = vmatprep.mubr.bf16.mxu0 %v19782_v2  ;;  %v19668_v2 = vld [vmem:[%s22985_s18 + $0x450] ss:$8 sps:$4 sm:$0xff]   ;;  %v13603_v34 = vsub.s32 1, %v13598_v33  ;;  %s950_s5 = scalar_lea.vmem [#allocation6], %s949_s4  ;;  %s13769_s8 = scalar_lea.sflag [#allocation7], %s949_s4 }
0x14d9   : > { %13550 = vmatprep.subr.bf16.mxu0 %v19658_v51  ;;  %v13600_v51 = vrot.slane %v13595_v38, %v13599_v45  ;;  %s13781_s6 = sshll.u32 %s950_s5, 4  ;;  %s22900_s6 = int_to_ptr.vmem [resolvable:$true] %s13781_s6 }
0x14da   : > { %s19687_s9 = scalar_lea.vmem %s22900_s6, 16  ;;  %p19694_p0 = scmp.lt.s32.totalorder %s22900_s6, %s19692_s3 }
0x14db   : > { %p19688_p11 = scmp.ne.s32.totalorder %s22900_s6, %s19687_s9  ;;  %p19695_p1 = scmp.lt.s32.totalorder %s19693_s10, %s19687_s9 }
0x14dc   : > { %13551 = vmatpush1.bf16.msra.mxu0 %v19656_v63  ;;  %v13604_v63 = vrot.slane %v13595_v38, %v13603_v34 }
0x14dd   : > { %13552 = vmatprep.subr.bf16.mxu0 %v19661_v10  ;;  %v13616_v10 = vrot.slane %v13611_v16, %v13599_v45  ;;  %p19689_p12 = pnand %p19688_p11, %p19990_p5  ;;  %p19696_p2 = por %p19695_p1, %p19694_p0 }
0x14df   : > { %p19690_p13 = pneg %p19689_p12 }
0x14e0   : > { %13553 = vmatpush1.bf16.msra.mxu0 %v19659_v62 }
0x14e1   : > { %13554 = vmatprep.subr.bf16.mxu0 %v19664_v6  ;;  %v13620_v6 = vrot.slane %v13611_v16, %v13603_v34  ;;  %p19697_p3 = pnand %p19696_p2, %p19690_p13 }
0x14e4   : > { %13555 = vmatpush1.bf16.msra.mxu0 %v19662_v8 }
0x14e5   : > { %13556 = vmatprep.subr.bf16.mxu0 %v19667_v7 }
0x14e8   : > { %13557 = vmatpush1.bf16.msra.mxu0 %v19665_v3 }
0x14e9   : > { %13558 = vmatprep.subr.bf16.mxu0 %v19670_v40 }
0x14ec   : > { %13559 = vmatpush1.bf16.msra.mxu0 %v19668_v2 }
0x14ed   : > { %13560 = vmatprep.subr.bf16.mxu0 %v19673_v14 }
0x14f0   : > { %13561 = vmatpush1.bf16.msra.mxu0 %v19671_v43 }
0x14f1   : > { %13562 = vmatprep.subr.bf16.mxu0 %v19676_v25 }
0x14f4   : > { %13563 = vmatpush1.bf16.msra.mxu0 %v19674_v28 }
0x14f7   : > { %13581 = vmatmul.mubr.bf16.vlgmr.msra.gmra.mrb[220].mxu0 %v13450_v44 }
0x15ca   : > { %v13582_v62 = vpop.f32.mrb[220].mxu0 }
0x15cb   : > { %v13607_v8 = vmul.f32 %v13600_v51, %v13582_v62  ;;  %v13584_v7 = vpop.f32.mrb[221].mxu0 }
0x15cc   : > { %v13608_v3 = vmul.f32 %v13604_v63, %v13584_v7  ;;  %v13586_v40 = vpop.f32.mrb[222].mxu0 }
0x15cd   : > { %v13623_v2 = vadd.f32 %v13616_v10, %v13607_v8  ;;  %v13609_v14 = vmul.f32 %v13600_v51, %v13586_v40  ;;  %v13588_v43 = vpop.f32.mrb[223].mxu0 }
0x15ce   : > { %v13624_v25 = vadd.f32 %v13620_v6, %v13608_v3  ;;  %v13610_v28 = vmul.f32 %v13604_v63, %v13588_v43 }
0x15cf   : > { %v13627_v55 = vmax.f32 %v13623_v2, 0.0  ;;  %v13625_v44 = vadd.f32 %v13616_v10, %v13609_v14 }
0x15d0   : > { %v13628_v31 = vmax.f32 %v13624_v25, 0.0  ;;  %v13626_v47 = vadd.f32 %v13620_v6, %v13610_v28 }
0x15d1   : > { %v13629_v42 = vmax.f32 %v13625_v44, 0.0  ;;  %v13643_v52 = vmul.f32 %v13636_v23, %v13627_v55 }
0x15d2   : > { %v13630_v60 = vmax.f32 %v13626_v47, 0.0  ;;  %v13644_v12 = vmul.f32 %v13636_v23, %v13628_v31 }
0x15d3   : > { %v13645_v29 = vmul.f32 %v13641_v58, %v13629_v42 }
0x15d4   : > { %v13646_v61 = vmul.f32 %v13641_v58, %v13630_v60 }
0x15d5   : > { %v13647_v0 = vadd.f32 %v13645_v29, %v13643_v52 }
0x15d6   : > { %v13654_v53 = vadd.f32 %v13646_v61, %v13644_v12 }
0x15d7   : > { %v13648_v17 = vrot.slane %v13647_v0, 4 }
0x15d8   : > { %v13655_v19 = vrot.slane %v13654_v53, 4 }
0x15d9   : > { %v13649_v26 = vadd.f32 %v13648_v17, %v13647_v0 }
0x15da   : > { %v13656_v11 = vadd.f32 %v13655_v19, %v13654_v53 }
0x15db   : > { %v13650_v27 = vrot.slane %v13649_v26, 2 }
0x15dc   : > { %v13657_v5 = vrot.slane %v13656_v11, 2 }
0x15dd   : > { %v13651_v21 = vadd.f32 %v13650_v27, %v13649_v26 }
0x15de   : > { %v13658_v48 = vadd.f32 %v13657_v5, %v13656_v11 }
0x15df   : > { %v13652_v22 = vrot.slane %v13651_v21, 1 }
0x15e0   : > { %v13659_v4 = vrot.slane %v13658_v48, 1 }
0x15e1   : > { %v13653_v36 = vadd.f32 %v13652_v22, %v13651_v21 }
0x15e2   : > { %v13660_v32 = vadd.f32 %v13659_v4, %v13658_v48 }
0x15e3   : > { %v13661_v15 = vmul.f32 0.25, %v13653_v36 }
0x15e4   : > { %v13662_v18 = vmul.f32 0.25, %v13660_v32 }
0x15e6   : > { %13760 = vmatprep.mubr.f32.mxu1 %v13662_v18 }
0x15e7   : > { %13761 = vmatmul.mubr.f32.vlgmr.msra.gmra.mrb[100].mxu1 %v13661_v15 }
0x16ba   : > { %v15769_v24 = vpop.f32.mrb[100].mxu1 }
0x16bb   : > { %v15770_v35 = vpop.f32.mrb[101].mxu1 }
0x16bc   : > { %v15771_v30 = vadd.f32 %v15770_v35, %v15769_v24 }
0x16be   : > { %v13763_v39 = vadd.f32 %v15771_v30, %v13695_v46 }
0x16c0   : > { %13767 = vst.msk [vmem:[%s950_s5] sm:$0x1] %vm13766_vm14, %v13763_v39 }
0x16c1   : > { %19700 = shalt.err (!%p19697_p3)
}
0x16c2   : > { %s19701_s5 = scalar_lea.hbm %s22898_s7, 16  ;;  %s19705_s1 = scalar_lea.hbm %s19950_s14, 32 }
0x16c3   : > { %p19702_p4 = scmp.ne.s32.totalorder %s22898_s7, %s19701_s5  ;;  %p19706_p9 = scmp.lt.u32.totalorder %s22898_s7, %s19950_s14 }
0x16c4   : > { %p19707_p10 = scmp.lt.u32.totalorder %s19705_s1, %s19701_s5  ;;  %p19709_p12 = scmp.lt.u32.totalorder %s19701_s5, %s22898_s7 }
0x16c5   : > { %p19703_p7 = pnand %p19702_p4, %p19990_p5 }
0x16c6   : > { %p19708_p11 = por %p19707_p10, %p19706_p9 }
0x16c7   : > { %p19704_p8 = pneg %p19703_p7 }
0x16c8   : > { %p19710_p0 = por %p19709_p12, %p19708_p11 }
0x16ca   : > { %p19711_p13 = pnand %p19710_p0, %p19704_p8 }
0x16cc   : > { %19714 = shalt.err (!%p19711_p13)
}
0x16cd   : > { %19151 = dma.vmem_to_hbm [thread:$0]  (%p19990_p5), %s22900_s6, 16, %s22898_s7, %s13769_s8  }
0x16ce PF: > { %p19157_p1 = scmp.ge.s32.totalorder %s19749_s28, 2  ;;  %s13793_s9 = sand.u32 1, %s19737_s22  }
0x16cf   : > { %s13794_s10 = scalar_lea.sflag [#allocation7], %s13793_s9 }
0x16d0   : > { %p19154_p2 = pnand %p19157_p1, %p19994_p6 }
0x16d2   : > { %19732 = dma.done.wait (!%p19154_p2), %s13794_s10, 16  }
0x16d3   : > { %19734 = vsyncadd (!%p19154_p2), %s13794_s10, 4294967280  ;;  %p73_p3 = scmp.ge.s32.totalorder %s19977_s2, 4   ;;  %s22990_s22 = smov %s19741_s23 }
0x16d4   : > { %s22991_s23 = smov %s19745_s26  ;;  %s22992_s26 = smov %s19988_s11 }
0x16d5   : > { %s22993_s28 = smov %s19977_s2  ;;  %75 = sbr.rel (!%p73_p3) target bundleno = 58 (0x3a), region = 258 }
0x16dc   :  { %13798 = vsyncpa [#allocation7], 1 }
0x16dd   :  { %13800 = vsyncpa [#allocation7 + $0x1], 1 }

</bundles_post_ra>
